<compile_context>
chip_gen: v5e
topology: v5e:2x2
jax: 0.10.0
libtpu: 0.0.40
codegen_flags: <defaults>
</compile_context>

<pallas_src>
import functools

import jax
import jax.numpy as jnp
from jax.experimental import pallas as pl
from jax.experimental.pallas import tpu as pltpu

LANE = 128
_VMEM_LIMIT = 32 * 1024 * 1024     # above v5e's 16 MiB scoped default, safe on v6e/v7x
_ACT_DTYPE = jnp.bfloat16          # inter-layer activation dtype (accum stays f32)


def _rup(x, m):
    return ((x + m - 1) // m) * m


def _choose_tile(n, max_tile, granule):
    """Largest divisor of n that is a multiple of `granule` and <= max_tile."""
    best = granule
    t = granule
    while t <= min(n, max_tile):
        if n % t == 0:
            best = t
        t += granule
    return best


def _pad_channels(x, target):
    c = x.shape[-1]
    if c == target:
        return x
    cfg = [(0, 0)] * (x.ndim - 1) + [(0, target - c)]
    return jnp.pad(x, cfg)


# ----------------------------------------------------------------------------
# Gridded matmul + bias (+ residual)  -- used for all 1x1 convs / QKV / proj
# ----------------------------------------------------------------------------

def _mm_bias_kernel(x_ref, w_ref, b_ref, o_ref, acc_ref):
    @pl.when(pl.program_id(2) == 0)
    def _():
        acc_ref[...] = jnp.zeros_like(acc_ref)

    acc_ref[...] += jnp.dot(x_ref[...], w_ref[...],
                            preferred_element_type=jnp.float32)

    @pl.when(pl.program_id(2) == pl.num_programs(2) - 1)
    def _():
        o_ref[...] = (acc_ref[...] + b_ref[...]).astype(o_ref.dtype)


def _mm_bias_res_kernel(x_ref, w_ref, b_ref, r_ref, o_ref, acc_ref):
    @pl.when(pl.program_id(2) == 0)
    def _():
        acc_ref[...] = jnp.zeros_like(acc_ref)

    acc_ref[...] += jnp.dot(x_ref[...], w_ref[...],
                            preferred_element_type=jnp.float32)

    @pl.when(pl.program_id(2) == pl.num_programs(2) - 1)
    def _():
        o_ref[...] = (acc_ref[...] + b_ref[...]
                      + r_ref[...].astype(jnp.float32)).astype(o_ref.dtype)


def matmul_bias(x, w, b, residual=None, out_dtype=_ACT_DTYPE):
    """out = x @ w + b (+ residual). Tiled / pipelined, bf16 MXU, f32 accum."""
    R, K = x.shape
    K2, M = w.shape
    assert K2 == K
    Kp = _rup(K, LANE)
    Mp = _rup(M, LANE)
    if R >= 256:
        Rp, tm = _rup(R, 256), 256
    else:
        Rp = _rup(R, 8)
        tm = Rp
    tn = _choose_tile(Mp, 256, LANE)
    tk = _choose_tile(Kp, 512, LANE)

    xp = jnp.pad(x.astype(jnp.bfloat16), ((0, Rp - R), (0, Kp - K)))
    wp = jnp.pad(w.astype(jnp.bfloat16), ((0, Kp - K), (0, Mp - M)))
    bp = jnp.pad(b.astype(jnp.float32), ((0, 0), (0, Mp - M)))

    in_specs = [
        pl.BlockSpec((tm, tk), lambda i, j, k: (i, k)),
        pl.BlockSpec((tk, tn), lambda i, j, k: (k, j)),
        pl.BlockSpec((1, tn), lambda i, j, k: (0, j)),
    ]
    args = [xp, wp, bp]
    if residual is None:
        kernel = _mm_bias_kernel
    else:
        rp = jnp.pad(residual.astype(jnp.bfloat16), ((0, Rp - R), (0, Mp - M)))
        in_specs.append(pl.BlockSpec((tm, tn), lambda i, j, k: (i, j)))
        args.append(rp)
        kernel = _mm_bias_res_kernel

    out = pl.pallas_call(
        kernel,
        grid=(Rp // tm, Mp // tn, Kp // tk),
        in_specs=in_specs,
        out_specs=pl.BlockSpec((tm, tn), lambda i, j, k: (i, j)),
        out_shape=jax.ShapeDtypeStruct((Rp, Mp), out_dtype),
        scratch_shapes=[pltpu.VMEM((tm, tn), jnp.float32)],
        compiler_params=pltpu.CompilerParams(
            dimension_semantics=("parallel", "parallel", "arbitrary"),
            vmem_limit_bytes=_VMEM_LIMIT),
        cost_estimate=pl.CostEstimate(
            flops=2 * Rp * Kp * Mp,
            transcendentals=0,
            bytes_accessed=2 * (Rp * Kp + Kp * Mp + Rp * Mp)),
    )(*args)
    if Rp > R or Mp > M:
        out = out[:R, :M]
    return out


# ----------------------------------------------------------------------------
# 3x3 conv with the im2col fused into the kernel (row-wise grid, 9-tap accum)
# ----------------------------------------------------------------------------

def _conv3x3_kernel(x0_ref, x1_ref, x2_ref, w_ref, b_ref, o_ref, acc_ref):
    Wd = o_ref.shape[2]
    acc_ref[...] = jnp.zeros_like(acc_ref)
    x_refs = (x0_ref, x1_ref, x2_ref)
    for dy in range(3):
        for dx in range(3):
            acc_ref[...] += jnp.dot(x_refs[dy][0, 0, dx:dx + Wd, :],
                                    w_ref[dy * 3 + dx],
                                    preferred_element_type=jnp.float32)
    o_ref[0, 0] = (acc_ref[...] + b_ref[...]).astype(o_ref.dtype)


def _conv3x3_res_kernel(x0_ref, x1_ref, x2_ref, w_ref, b_ref, r_ref, o_ref,
                        acc_ref):
    Wd = o_ref.shape[2]
    acc_ref[...] = jnp.zeros_like(acc_ref)
    x_refs = (x0_ref, x1_ref, x2_ref)
    for dy in range(3):
        for dx in range(3):
            acc_ref[...] += jnp.dot(x_refs[dy][0, 0, dx:dx + Wd, :],
                                    w_ref[dy * 3 + dx],
                                    preferred_element_type=jnp.float32)
    o_ref[0, 0] = (acc_ref[...] + b_ref[...]
                   + r_ref[0, 0].astype(jnp.float32)).astype(o_ref.dtype)


def conv3x3(x, w, b, residual=None, out_dtype=_ACT_DTYPE):
    """3x3 same-padding conv. x: (B,H,W,Cp) channel-padded NHWC,
    w: (3,3,cin,cout) true shape, b: (1,cout). Output channels padded to 128."""
    B, H, W, Cp = x.shape
    cin, cout = w.shape[2], w.shape[3]
    coutp = _rup(cout, LANE)

    wp = jnp.pad(w, ((0, 0), (0, 0), (0, Cp - cin), (0, coutp - cout)))
    wp = wp.astype(jnp.bfloat16).reshape(9, Cp, coutp)
    bp = jnp.pad(b, ((0, 0), (0, coutp - cout))).astype(jnp.float32)
    xp = jnp.pad(x.astype(jnp.bfloat16), ((0, 0), (1, 1), (1, 1), (0, 0)))

    in_specs = [
        pl.BlockSpec((1, 1, W + 2, Cp), lambda bb, hh: (bb, hh, 0, 0)),
        pl.BlockSpec((1, 1, W + 2, Cp), lambda bb, hh: (bb, hh + 1, 0, 0)),
        pl.BlockSpec((1, 1, W + 2, Cp), lambda bb, hh: (bb, hh + 2, 0, 0)),
        pl.BlockSpec((9, Cp, coutp), lambda bb, hh: (0, 0, 0)),
        pl.BlockSpec((1, coutp), lambda bb, hh: (0, 0)),
    ]
    args = [xp, xp, xp, wp, bp]
    if residual is None:
        kernel = _conv3x3_kernel
    else:
        assert residual.shape[-1] == coutp
        in_specs.append(pl.BlockSpec((1, 1, W, coutp),
                                     lambda bb, hh: (bb, hh, 0, 0)))
        args.append(residual.astype(jnp.bfloat16))
        kernel = _conv3x3_res_kernel

    return pl.pallas_call(
        kernel,
        grid=(B, H),
        in_specs=in_specs,
        out_specs=pl.BlockSpec((1, 1, W, coutp), lambda bb, hh: (bb, hh, 0, 0)),
        out_shape=jax.ShapeDtypeStruct((B, H, W, coutp), out_dtype),
        scratch_shapes=[pltpu.VMEM((W, coutp), jnp.float32)],
        compiler_params=pltpu.CompilerParams(
            dimension_semantics=("parallel", "parallel"),
            vmem_limit_bytes=_VMEM_LIMIT),
        cost_estimate=pl.CostEstimate(
            flops=2 * B * H * W * 9 * Cp * coutp,
            transcendentals=0,
            bytes_accessed=(2 * 3 * B * (H + 2) * (W + 2) * Cp
                            + 2 * 9 * Cp * coutp + 4 * B * H * W * coutp)),
    )(*args)


def conv1x1(x, w, b, residual=None, out_dtype=_ACT_DTYPE):
    """1x1 conv as a gridded matmul. x: (B,H,W,Cp); w: (cin,cout) true shape."""
    B, H, W, Cp = x.shape
    cin, cout = w.shape
    coutp = _rup(cout, LANE)
    wp = jnp.pad(w, ((0, Cp - cin), (0, coutp - cout)))
    bp = jnp.pad(b, ((0, 0), (0, coutp - cout)))
    r2 = None
    if residual is not None:
        r2 = residual.reshape(B * H * W, residual.shape[-1])
    out = matmul_bias(x.reshape(B * H * W, Cp), wp, bp, residual=r2,
                      out_dtype=out_dtype)
    return out.reshape(B, H, W, coutp)


# ----------------------------------------------------------------------------
# GroupNorm (+ fused swish): two-pass, token-tiled, channel-padding aware
# ----------------------------------------------------------------------------

def _gn_stats_kernel(x_ref, g_ref, gt_ref, mean_ref, rstd_ref, s_ref, s2_ref,
                     *, inv_count, eps):
    t = pl.program_id(1)

    @pl.when(t == 0)
    def _():
        s_ref[...] = jnp.zeros_like(s_ref)
        s2_ref[...] = jnp.zeros_like(s2_ref)

    x = x_ref[0].astype(jnp.float32)                       # (TN, Cp)
    s_ref[...] += jnp.sum(x, axis=0, keepdims=True)
    s2_ref[...] += jnp.sum(x * x, axis=0, keepdims=True)

    @pl.when(t == pl.num_programs(1) - 1)
    def _():
        mean_g = jnp.dot(s_ref[...], g_ref[...],
                         preferred_element_type=jnp.float32) * inv_count
        ex2_g = jnp.dot(s2_ref[...], g_ref[...],
                        preferred_element_type=jnp.float32) * inv_count
        # TODO(synk): exact two-pass variance would avoid E[x^2]-E[x]^2
        # cancellation for very large activations; clamp keeps it >= 0.
        var_g = jnp.maximum(ex2_g - mean_g * mean_g, 0.0)
        mean_c = jnp.dot(mean_g, gt_ref[...],
                         preferred_element_type=jnp.float32)   # (1, Cp)
        var_c = jnp.dot(var_g, gt_ref[...],
                        preferred_element_type=jnp.float32)
        mean_ref[0] = mean_c
        rstd_ref[0] = jax.lax.rsqrt(var_c + eps)


def _gn_apply_kernel(x_ref, mean_ref, rstd_ref, gamma_ref, beta_ref, o_ref,
                     *, swish):
    x = x_ref[0].astype(jnp.float32)                       # (TN, Cp)
    y = (x - mean_ref[0]) * rstd_ref[0] * gamma_ref[...] + beta_ref[...]
    if swish:
        y = y * jax.nn.sigmoid(y)
    o_ref[0] = y.astype(o_ref.dtype)


def groupnorm(x, gamma, beta, *, num_groups=32, eps=1e-6, swish=False,
              out_dtype=_ACT_DTYPE):
    """GroupNorm over channel-padded NHWC input; stats per (batch, group)."""
    B, H, W, Cp = x.shape
    C = gamma.shape[-1]                                    # true channel count
    N = H * W
    gsize = C // num_groups
    TN = _choose_tile(N, 512, 8)
    xr = x.reshape(B, N, Cp).astype(jnp.bfloat16)
    gammap = jnp.pad(gamma.astype(jnp.float32), ((0, 0), (0, Cp - C)))
    betap = jnp.pad(beta.astype(jnp.float32), ((0, 0), (0, Cp - C)))

    ids = jnp.arange(Cp) // gsize
    valid = jnp.arange(Cp) < C
    G = ((ids[:, None] == jnp.arange(num_groups)[None, :])
         & valid[:, None]).astype(jnp.float32)             # (Cp, ng)
    GT = jnp.transpose(G)                                  # (ng, Cp)
    inv_count = 1.0 / float(N * gsize)

    mean, rstd = pl.pallas_call(
        functools.partial(_gn_stats_kernel, inv_count=inv_count, eps=eps),
        grid=(B, N // TN),
        in_specs=[pl.BlockSpec((1, TN, Cp), lambda b, t: (b, t, 0)),
                  pl.BlockSpec((Cp, num_groups), lambda b, t: (0, 0)),
                  pl.BlockSpec((num_groups, Cp), lambda b, t: (0, 0))],
        out_specs=(pl.BlockSpec((1, 1, Cp), lambda b, t: (b, 0, 0)),
                   pl.BlockSpec((1, 1, Cp), lambda b, t: (b, 0, 0))),
        out_shape=(jax.ShapeDtypeStruct((B, 1, Cp), jnp.float32),
                   jax.ShapeDtypeStruct((B, 1, Cp), jnp.float32)),
        scratch_shapes=[pltpu.VMEM((1, Cp), jnp.float32),
                        pltpu.VMEM((1, Cp), jnp.float32)],
        compiler_params=pltpu.CompilerParams(
            dimension_semantics=("parallel", "arbitrary"),
            vmem_limit_bytes=_VMEM_LIMIT),
    )(xr, G, GT)

    out = pl.pallas_call(
        functools.partial(_gn_apply_kernel, swish=swish),
        grid=(B, N // TN),
        in_specs=[pl.BlockSpec((1, TN, Cp), lambda b, t: (b, t, 0)),
                  pl.BlockSpec((1, 1, Cp), lambda b, t: (b, 0, 0)),
                  pl.BlockSpec((1, 1, Cp), lambda b, t: (b, 0, 0)),
                  pl.BlockSpec((1, Cp), lambda b, t: (0, 0)),
                  pl.BlockSpec((1, Cp), lambda b, t: (0, 0))],
        out_specs=pl.BlockSpec((1, TN, Cp), lambda b, t: (b, t, 0)),
        out_shape=jax.ShapeDtypeStruct((B, N, Cp), out_dtype),
        compiler_params=pltpu.CompilerParams(
            dimension_semantics=("parallel", "parallel"),
            vmem_limit_bytes=_VMEM_LIMIT),
    )(xr, mean, rstd, gammap, betap)
    return out.reshape(B, H, W, Cp)


# ----------------------------------------------------------------------------
# Flash-style spatial self-attention
# ----------------------------------------------------------------------------

def _attn_kernel(q_ref, k_ref, v_ref, o_ref, m_sc, l_sc, acc_sc, *, scale):
    kv = pl.program_id(2)

    @pl.when(kv == 0)
    def _():
        m_sc[...] = jnp.full_like(m_sc, -jnp.inf)
        l_sc[...] = jnp.zeros_like(l_sc)
        acc_sc[...] = jnp.zeros_like(acc_sc)

    q = q_ref[0]                                           # (TQ, Cp) bf16
    k = k_ref[0]
    v = v_ref[0]
    s = jax.lax.dot_general(q, k, (((1,), (1,)), ((), ())),
                            preferred_element_type=jnp.float32) * scale
    m_prev = m_sc[...]
    m_new = jnp.maximum(m_prev, jnp.max(s, axis=-1, keepdims=True))
    alpha = jnp.exp(m_prev - m_new)
    p = jnp.exp(s - m_new)
    l_sc[...] = alpha * l_sc[...] + jnp.sum(p, axis=-1, keepdims=True)
    acc_sc[...] = alpha * acc_sc[...] + jnp.dot(
        p.astype(v.dtype), v, preferred_element_type=jnp.float32)
    m_sc[...] = m_new

    @pl.when(kv == pl.num_programs(2) - 1)
    def _():
        o_ref[0] = (acc_sc[...] * pl.reciprocal(l_sc[...], approx=True)
                    ).astype(o_ref.dtype)


def attention(q, k, v, scale, out_dtype=_ACT_DTYPE):
    """q, k, v: (B, N, Cp) token-major; online-softmax attention per batch."""
    B, N, Cp = q.shape
    TQ = _choose_tile(N, 512, 8)
    TK = _choose_tile(N, 512, 8)
    return pl.pallas_call(
        functools.partial(_attn_kernel, scale=scale),
        grid=(B, N // TQ, N // TK),
        in_specs=[pl.BlockSpec((1, TQ, Cp), lambda b, qi, ki: (b, qi, 0)),
                  pl.BlockSpec((1, TK, Cp), lambda b, qi, ki: (b, ki, 0)),
                  pl.BlockSpec((1, TK, Cp), lambda b, qi, ki: (b, ki, 0))],
        out_specs=pl.BlockSpec((1, TQ, Cp), lambda b, qi, ki: (b, qi, 0)),
        out_shape=jax.ShapeDtypeStruct((B, N, Cp), out_dtype),
        scratch_shapes=[pltpu.VMEM((TQ, 1), jnp.float32),
                        pltpu.VMEM((TQ, 1), jnp.float32),
                        pltpu.VMEM((TQ, Cp), jnp.float32)],
        compiler_params=pltpu.CompilerParams(
            dimension_semantics=("parallel", "parallel", "arbitrary"),
            vmem_limit_bytes=_VMEM_LIMIT),
        cost_estimate=pl.CostEstimate(
            flops=4 * B * N * N * Cp,
            transcendentals=B * N * N,
            bytes_accessed=2 * 4 * B * N * Cp),
    )(q.astype(jnp.bfloat16), k.astype(jnp.bfloat16), v.astype(jnp.bfloat16))


# ----------------------------------------------------------------------------
# Decoder blocks
# ----------------------------------------------------------------------------

def resnet_block(x, p):
    # temb is None in the Decoder (temb_ch == 0); dropout prob = 0 -> identity.
    h = groupnorm(x, p['norm1_g'], p['norm1_b'], swish=True)
    h = conv3x3(h, p['conv1_w'], p['conv1_b'])
    h = groupnorm(h, p['norm2_g'], p['norm2_b'], swish=True)
    if 'nin_w' in p:
        shortcut = conv1x1(x, p['nin_w'], p['nin_b'])
    else:
        shortcut = x
    return conv3x3(h, p['conv2_w'], p['conv2_b'], residual=shortcut)


def attn_block(x, p):
    B, H, W, Cp = x.shape
    C = p['q_w'].shape[0]                                  # true channel count
    N = H * W
    h = groupnorm(x, p['norm_g'], p['norm_b'], swish=False)
    h2 = h.reshape(B * N, Cp)

    def _pad_w(w):
        return jnp.pad(w, ((0, Cp - w.shape[0]), (0, Cp - w.shape[1])))

    def _pad_b(b):
        return jnp.pad(b, ((0, 0), (0, Cp - b.shape[1])))

    # Fused QKV projection: read h once, one lane-dense (Cp, 3*Cp) matmul.
    wqkv = jnp.concatenate([_pad_w(p['q_w']), _pad_w(p['k_w']),
                            _pad_w(p['v_w'])], axis=1)
    bqkv = jnp.concatenate([_pad_b(p['q_b']), _pad_b(p['k_b']),
                            _pad_b(p['v_b'])], axis=1)
    qkv = matmul_bias(h2, wqkv, bqkv)                      # (B*N, 3*Cp)
    q = qkv[:, 0 * Cp:1 * Cp].reshape(B, N, Cp)
    k = qkv[:, 1 * Cp:2 * Cp].reshape(B, N, Cp)
    v = qkv[:, 2 * Cp:3 * Cp].reshape(B, N, Cp)

    a = attention(q, k, v, scale=float(C) ** (-0.5))
    out = matmul_bias(a.reshape(B * N, Cp), _pad_w(p['proj_w']),
                      _pad_b(p['proj_b']), residual=x.reshape(B * N, Cp))
    return out.reshape(B, H, W, Cp)


def upsample_nearest2x(x):
    # TODO(synk): fuse the nearest-neighbour replication into the following
    # conv3x3's row gather instead of materializing the 4x activation in HBM.
    return jnp.repeat(jnp.repeat(x, 2, axis=1), 2, axis=2)


# ----------------------------------------------------------------------------
# Deterministic parameter construction (mirrors Decoder.__init__ shapes)
# ----------------------------------------------------------------------------

class _RNG:
    def __init__(self, key):
        self.key = key

    def next(self):
        self.key, sub = jax.random.split(self.key)
        return sub


def _init_conv3x3(rng, cin, cout, scale=0.05):
    return (scale * jax.random.normal(rng.next(), (3, 3, cin, cout), jnp.float32),
            scale * jax.random.normal(rng.next(), (1, cout), jnp.float32))


def _init_conv1x1(rng, cin, cout, scale=0.05):
    return (scale * jax.random.normal(rng.next(), (cin, cout), jnp.float32),
            scale * jax.random.normal(rng.next(), (1, cout), jnp.float32))


def _init_norm(c):
    # PyTorch GroupNorm default init: weight = 1, bias = 0.
    return jnp.ones((1, c), jnp.float32), jnp.zeros((1, c), jnp.float32)


def _init_resblock(rng, cin, cout):
    p = {}
    p['norm1_g'], p['norm1_b'] = _init_norm(cin)
    p['conv1_w'], p['conv1_b'] = _init_conv3x3(rng, cin, cout)
    p['norm2_g'], p['norm2_b'] = _init_norm(cout)
    p['conv2_w'], p['conv2_b'] = _init_conv3x3(rng, cout, cout)
    if cin != cout:  # use_conv_shortcut=False -> nin_shortcut (1x1)
        p['nin_w'], p['nin_b'] = _init_conv1x1(rng, cin, cout)
    return p


def _init_attn(rng, c):
    p = {}
    p['norm_g'], p['norm_b'] = _init_norm(c)
    p['q_w'], p['q_b'] = _init_conv1x1(rng, c, c)
    p['k_w'], p['k_b'] = _init_conv1x1(rng, c, c)
    p['v_w'], p['v_b'] = _init_conv1x1(rng, c, c)
    p['proj_w'], p['proj_b'] = _init_conv1x1(rng, c, c)
    return p


def init_decoder_params(key, *, ch, out_ch, ch_mult, num_res_blocks,
                        attn_resolutions, resolution, z_channels,
                        resamp_with_conv=True):
    rng = _RNG(key)
    num_resolutions = len(ch_mult)
    block_in = ch * ch_mult[num_resolutions - 1]
    curr_res = resolution // 2 ** (num_resolutions - 1)

    P = {}
    P['conv_in_w'], P['conv_in_b'] = _init_conv3x3(rng, z_channels, block_in)
    P['mid_block_1'] = _init_resblock(rng, block_in, block_in)
    P['mid_attn_1'] = _init_attn(rng, block_in)
    P['mid_block_2'] = _init_resblock(rng, block_in, block_in)

    up_list = []
    for i_level in reversed(range(num_resolutions)):
        block_out = ch * ch_mult[i_level]
        blocks, attns = [], []
        for _ in range(num_res_blocks + 1):
            blocks.append(_init_resblock(rng, block_in, block_out))
            block_in = block_out
            if curr_res in attn_resolutions:
                attns.append(_init_attn(rng, block_in))
        up = {'block': blocks, 'attn': attns}
        if i_level != 0:
            if resamp_with_conv:
                up['upsample_w'], up['upsample_b'] = _init_conv3x3(rng, block_in, block_in)
            curr_res = curr_res * 2
        up_list.insert(0, up)
    P['up'] = up_list

    P['norm_out_g'], P['norm_out_b'] = _init_norm(block_in)
    P['conv_out_w'], P['conv_out_b'] = _init_conv3x3(rng, block_in, out_ch)
    return P


# ----------------------------------------------------------------------------
# Decoder forward (semantics of Decoder.forward, give_pre_end=False)
# ----------------------------------------------------------------------------

def decoder_forward(z_nchw, params, cfg):
    num_resolutions = len(cfg['ch_mult'])
    num_res_blocks = cfg['num_res_blocks']

    # NCHW -> NHWC, pad channels to the lane width so every Pallas block is
    # lane-dense (padded channels stay exactly zero through the whole net).
    h = jnp.transpose(z_nchw, (0, 2, 3, 1))
    h = _pad_channels(h, _rup(h.shape[-1], LANE))

    h = conv3x3(h, params['conv_in_w'], params['conv_in_b'])
    h = resnet_block(h, params['mid_block_1'])
    h = attn_block(h, params['mid_attn_1'])
    h = resnet_block(h, params['mid_block_2'])

    for i_level in reversed(range(num_resolutions)):
        up = params['up'][i_level]
        for i_block in range(num_res_blocks + 1):
            h = resnet_block(h, up['block'][i_block])
            if len(up['attn']) > 0:
                h = attn_block(h, up['attn'][i_block])
        if i_level != 0:
            h = upsample_nearest2x(h)
            if 'upsample_w' in up:
                h = conv3x3(h, up['upsample_w'], up['upsample_b'])

    h = groupnorm(h, params['norm_out_g'], params['norm_out_b'], swish=True)
    h = conv3x3(h, params['conv_out_w'], params['conv_out_b'],
                out_dtype=jnp.float32)
    h = h[..., :cfg['out_ch']]                             # drop channel padding
    return jnp.transpose(h, (0, 3, 1, 2))                  # NHWC -> NCHW


# ----------------------------------------------------------------------------
# Main
# ----------------------------------------------------------------------------

CFG = dict(ch=32, out_ch=3, ch_mult=(1, 2), num_res_blocks=1,
           attn_resolutions=(8,), resolution=16, z_channels=4,
           resamp_with_conv=True)

if __name__ == "__main__":
    root = jax.random.PRNGKey(0)
    k_params, k_input = jax.random.split(root)

    params = init_decoder_params(k_params, **CFG)

    # z spatial = resolution // 2**(num_resolutions-1) = 16 // 2 = 8
    B = 2
    z_res = CFG['resolution'] // 2 ** (len(CFG['ch_mult']) - 1)
    z = jax.random.normal(k_input, (B, CFG['z_channels'], z_res, z_res),
                          jnp.float32)  # NCHW, matches PyTorch input convention

    fwd = jax.jit(lambda zz, pp: decoder_forward(zz, pp, CFG))
    out = fwd(z, params)
    out = jax.block_until_ready(out)

    assert out.shape == (B, CFG['out_ch'], CFG['resolution'], CFG['resolution']), out.shape
    assert bool(jnp.all(jnp.isfinite(out)))
    print("KERNEL_OK")
</pallas_src>

<mosaic_0001>
module attributes {stable_mosaic.version = 11 : i64} {
  func.func @_gn_stats_kernel(%arg0: i32, %arg1: i32, %arg2: memref<1x64x128xbf16, #tpu.memory_space<vmem>>, %arg3: memref<128x32xf32, #tpu.memory_space<vmem>>, %arg4: memref<32x128xf32, #tpu.memory_space<vmem>>, %arg5: memref<1x1x128xf32, #tpu.memory_space<vmem>>, %arg6: memref<1x1x128xf32, #tpu.memory_space<vmem>>, %arg7: memref<1x128xf32, #tpu.memory_space<vmem>>, %arg8: memref<1x128xf32, #tpu.memory_space<vmem>>) attributes {dimension_semantics = [#tpu.dimension_semantics<parallel>, #tpu.dimension_semantics<arbitrary>], iteration_bounds = array<i64: 2, 1>, scalar_prefetch = 0 : i64, scratch_operands = 2 : i64, tpu.core_type = #tpu.core_type<tc>, window_params = [{transform_indices = @transform_0, window_bounds = array<i64: 1, 64, 128>}, {pipeline_mode = #tpu.pipeline_mode<synchronous>, transform_indices = @transform_1, window_bounds = array<i64: 128, 32>}, {pipeline_mode = #tpu.pipeline_mode<synchronous>, transform_indices = @transform_2, window_bounds = array<i64: 32, 128>}, {transform_indices = @transform_3, window_bounds = array<i64: 1, 1, 128>}, {transform_indices = @transform_4, window_bounds = array<i64: 1, 1, 128>}]} {
    %c0_i32 = arith.constant 0 : i32
    %0 = arith.cmpi eq, %arg1, %c0_i32 : i32
    %1 = arith.extui %0 : i1 to i32
    %c0_i32_0 = arith.constant 0 : i32
    %2 = arith.cmpi ne, %1, %c0_i32_0 : i32
    scf.if %2 {
      %cst_14 = arith.constant 0.000000e+00 : f32
      %20 = vector.broadcast %cst_14 : f32 to vector<1x128xf32>
      %c0_15 = arith.constant 0 : index
      %c0_16 = arith.constant 0 : index
      %21 = vector.load %arg7[%c0_15, %c0_16] : memref<1x128xf32, #tpu.memory_space<vmem>>, vector<1x128xf32>
      tpu.vector_store %arg7[%c0_15, %c0_16], %20 {strides = array<i32>} : memref<1x128xf32, #tpu.memory_space<vmem>>, vector<1x128xf32>,
      %cst_17 = arith.constant 0.000000e+00 : f32
      %22 = vector.broadcast %cst_17 : f32 to vector<1x128xf32>
      %c0_18 = arith.constant 0 : index
      %c0_19 = arith.constant 0 : index
      %23 = vector.load %arg8[%c0_18, %c0_19] : memref<1x128xf32, #tpu.memory_space<vmem>>, vector<1x128xf32>
      tpu.vector_store %arg8[%c0_18, %c0_19], %22 {strides = array<i32>} : memref<1x128xf32, #tpu.memory_space<vmem>>, vector<1x128xf32>,
    } else {
    }
    %c0 = arith.constant 0 : index
    %c0_1 = arith.constant 0 : index
    %c0_2 = arith.constant 0 : index
    %3 = vector.load %arg2[%c0, %c0_1, %c0_2] : memref<1x64x128xbf16, #tpu.memory_space<vmem>>, vector<1x64x128xbf16>
    %4 = vector.shape_cast %3 : vector<1x64x128xbf16> to vector<64x128xbf16>
    %5 = arith.extf %4 : vector<64x128xbf16> to vector<64x128xf32>
    %c0_3 = arith.constant 0 : index
    %c0_4 = arith.constant 0 : index
    %6 = vector.load %arg7[%c0_3, %c0_4] : memref<1x128xf32, #tpu.memory_space<vmem>>, vector<1x128xf32>
    %cst = arith.constant dense<0.000000e+00> : vector<128xf32>
    %7 = vector.multi_reduction <add>, %5, %cst [0] : vector<64x128xf32> to vector<128xf32>
    %8 = vector.shape_cast %7 : vector<128xf32> to vector<1x128xf32>
    %9 = arith.addf %6, %8 : vector<1x128xf32>
    %c0_5 = arith.constant 0 : index
    %c0_6 = arith.constant 0 : index
    %10 = vector.load %arg7[%c0_5, %c0_6] : memref<1x128xf32, #tpu.memory_space<vmem>>, vector<1x128xf32>
    tpu.vector_store %arg7[%c0_5, %c0_6], %9 {strides = array<i32>} : memref<1x128xf32, #tpu.memory_space<vmem>>, vector<1x128xf32>,
    %c0_7 = arith.constant 0 : index
    %c0_8 = arith.constant 0 : index
    %11 = vector.load %arg8[%c0_7, %c0_8] : memref<1x128xf32, #tpu.memory_space<vmem>>, vector<1x128xf32>
    %12 = arith.mulf %5, %5 : vector<64x128xf32>
    %cst_9 = arith.constant dense<0.000000e+00> : vector<128xf32>
    %13 = vector.multi_reduction <add>, %12, %cst_9 [0] : vector<64x128xf32> to vector<128xf32>
    %14 = vector.shape_cast %13 : vector<128xf32> to vector<1x128xf32>
    %15 = arith.addf %11, %14 : vector<1x128xf32>
    %c0_10 = arith.constant 0 : index
    %c0_11 = arith.constant 0 : index
    %16 = vector.load %arg8[%c0_10, %c0_11] : memref<1x128xf32, #tpu.memory_space<vmem>>, vector<1x128xf32>
    tpu.vector_store %arg8[%c0_10, %c0_11], %15 {strides = array<i32>} : memref<1x128xf32, #tpu.memory_space<vmem>>, vector<1x128xf32>,
    %c0_i32_12 = arith.constant 0 : i32
    %17 = arith.cmpi eq, %arg1, %c0_i32_12 : i32
    %18 = arith.extui %17 : i1 to i32
    %c0_i32_13 = arith.constant 0 : i32
    %19 = arith.cmpi ne, %18, %c0_i32_13 : i32
    scf.if %19 {
      %c0_14 = arith.constant 0 : index
      %c0_15 = arith.constant 0 : index
      %20 = vector.load %arg7[%c0_14, %c0_15] : memref<1x128xf32, #tpu.memory_space<vmem>>, vector<1x128xf32>
      %c0_16 = arith.constant 0 : index
      %c0_17 = arith.constant 0 : index
      %21 = vector.load %arg3[%c0_16, %c0_17] : memref<128x32xf32, #tpu.memory_space<vmem>>, vector<128x32xf32>
      %cst_18 = arith.constant dense<0.000000e+00> : vector<1x32xf32>
      %22 = tpu.matmul %20, %21, %cst_18 {dimension_numbers = #tpu.dot_dimension_numbers<[1], [0], [0], [1], [0, 0, 1, 1], [], []>} : vector<1x128xf32>, vector<128x32xf32>, vector<1x32xf32> -> vector<1x32xf32>
      %cst_19 = arith.constant 7.812500e-03 : f32
      %23 = vector.broadcast %cst_19 : f32 to vector<1x32xf32>
      %24 = arith.mulf %22, %23 : vector<1x32xf32>
      %c0_20 = arith.constant 0 : index
      %c0_21 = arith.constant 0 : index
      %25 = vector.load %arg8[%c0_20, %c0_21] : memref<1x128xf32, #tpu.memory_space<vmem>>, vector<1x128xf32>
      %c0_22 = arith.constant 0 : index
      %c0_23 = arith.constant 0 : index
      %26 = vector.load %arg3[%c0_22, %c0_23] : memref<128x32xf32, #tpu.memory_space<vmem>>, vector<128x32xf32>
      %cst_24 = arith.constant dense<0.000000e+00> : vector<1x32xf32>
      %27 = tpu.matmul %25, %26, %cst_24 {dimension_numbers = #tpu.dot_dimension_numbers<[1], [0], [0], [1], [0, 0, 1, 1], [], []>} : vector<1x128xf32>, vector<128x32xf32>, vector<1x32xf32> -> vector<1x32xf32>
      %cst_25 = arith.constant 7.812500e-03 : f32
      %28 = vector.broadcast %cst_25 : f32 to vector<1x32xf32>
      %29 = arith.mulf %27, %28 : vector<1x32xf32>
      %30 = arith.mulf %24, %24 : vector<1x32xf32>
      %31 = arith.subf %29, %30 : vector<1x32xf32>
      %cst_26 = arith.constant 0.000000e+00 : f32
      %32 = vector.broadcast %cst_26 : f32 to vector<1x32xf32>
      %33 = arith.maximumf %31, %32 : vector<1x32xf32>
      %c0_27 = arith.constant 0 : index
      %c0_28 = arith.constant 0 : index
      %34 = vector.load %arg4[%c0_27, %c0_28] : memref<32x128xf32, #tpu.memory_space<vmem>>, vector<32x128xf32>
      %cst_29 = arith.constant dense<0.000000e+00> : vector<1x128xf32>
      %35 = tpu.matmul %24, %34, %cst_29 {dimension_numbers = #tpu.dot_dimension_numbers<[1], [0], [0], [1], [0, 0, 1, 1], [], []>} : vector<1x32xf32>, vector<32x128xf32>, vector<1x128xf32> -> vector<1x128xf32>
      %c0_30 = arith.constant 0 : index
      %c0_31 = arith.constant 0 : index
      %36 = vector.load %arg4[%c0_30, %c0_31] : memref<32x128xf32, #tpu.memory_space<vmem>>, vector<32x128xf32>
      %cst_32 = arith.constant dense<0.000000e+00> : vector<1x128xf32>
      %37 = tpu.matmul %33, %36, %cst_32 {dimension_numbers = #tpu.dot_dimension_numbers<[1], [0], [0], [1], [0, 0, 1, 1], [], []>} : vector<1x32xf32>, vector<32x128xf32>, vector<1x128xf32> -> vector<1x128xf32>
      %c0_33 = arith.constant 0 : index
      %c0_34 = arith.constant 0 : index
      %c0_35 = arith.constant 0 : index
      %38 = vector.load %arg5[%c0_33, %c0_34, %c0_35] : memref<1x1x128xf32, #tpu.memory_space<vmem>>, vector<1x1x128xf32>
      %39 = vector.shape_cast %38 : vector<1x1x128xf32> to vector<1x128xf32>
      %40 = vector.shape_cast %35 : vector<1x128xf32> to vector<1x1x128xf32>
      tpu.vector_store %arg5[%c0_33, %c0_34, %c0_35], %40 {strides = array<i32>} : memref<1x1x128xf32, #tpu.memory_space<vmem>>, vector<1x1x128xf32>,
      %cst_36 = arith.constant 9.99999997E-7 : f32
      %41 = vector.broadcast %cst_36 : f32 to vector<1x128xf32>
      %42 = arith.addf %37, %41 : vector<1x128xf32>
      %43 = math.rsqrt %42 : vector<1x128xf32>
      %c0_37 = arith.constant 0 : index
      %c0_38 = arith.constant 0 : index
      %c0_39 = arith.constant 0 : index
      %44 = vector.load %arg6[%c0_37, %c0_38, %c0_39] : memref<1x1x128xf32, #tpu.memory_space<vmem>>, vector<1x1x128xf32>
      %45 = vector.shape_cast %44 : vector<1x1x128xf32> to vector<1x128xf32>
      %46 = vector.shape_cast %43 : vector<1x128xf32> to vector<1x1x128xf32>
      tpu.vector_store %arg6[%c0_37, %c0_38, %c0_39], %46 {strides = array<i32>} : memref<1x1x128xf32, #tpu.memory_space<vmem>>, vector<1x1x128xf32>,
    } else {
    }
    return
  }
  func.func @transform_0(%arg0: i32, %arg1: i32) -> (i32, i32, i32) {
    %c0_i32 = arith.constant 0 : i32
    %c0_i32_0 = arith.constant 0 : i32
    return %arg0, %arg1, %c0_i32 : i32, i32, i32
  }
  func.func @transform_1(%arg0: i32, %arg1: i32) -> (i32, i32) {
    %c0_i32 = arith.constant 0 : i32
    %c0_i32_0 = arith.constant 0 : i32
    %c0_i32_1 = arith.constant 0 : i32
    return %c0_i32, %c0_i32_0 : i32, i32
  }
  func.func @transform_2(%arg0: i32, %arg1: i32) -> (i32, i32) {
    %c0_i32 = arith.constant 0 : i32
    %c0_i32_0 = arith.constant 0 : i32
    %c0_i32_1 = arith.constant 0 : i32
    return %c0_i32, %c0_i32_0 : i32, i32
  }
  func.func @transform_3(%arg0: i32, %arg1: i32) -> (i32, i32, i32) {
    %c0_i32 = arith.constant 0 : i32
    %c0_i32_0 = arith.constant 0 : i32
    %c0_i32_1 = arith.constant 0 : i32
    return %arg0, %c0_i32, %c0_i32_0 : i32, i32, i32
  }
  func.func @transform_4(%arg0: i32, %arg1: i32) -> (i32, i32, i32) {
    %c0_i32 = arith.constant 0 : i32
    %c0_i32_0 = arith.constant 0 : i32
    %c0_i32_1 = arith.constant 0 : i32
    return %arg0, %c0_i32, %c0_i32_0 : i32, i32, i32
  }
}

module attributes {stable_mosaic.version = 11 : i64} {
  func.func @_conv3x3_kernel(%arg0: i32, %arg1: i32, %arg2: memref<1x1x10x128xbf16, #tpu.memory_space<vmem>>, %arg3: memref<1x1x10x128xbf16, #tpu.memory_space<vmem>>, %arg4: memref<1x1x10x128xbf16, #tpu.memory_space<vmem>>, %arg5: memref<9x128x128xbf16, #tpu.memory_space<vmem>>, %arg6: memref<1x128xf32, #tpu.memory_space<vmem>>, %arg7: memref<1x1x8x128xbf16, #tpu.memory_space<vmem>>, %arg8: memref<8x128xf32, #tpu.memory_space<vmem>>) attributes {dimension_semantics = [#tpu.dimension_semantics<parallel>, #tpu.dimension_semantics<parallel>], iteration_bounds = array<i64: 2, 8>, scalar_prefetch = 0 : i64, scratch_operands = 1 : i64, tpu.core_type = #tpu.core_type<tc>, window_params = [{transform_indices = @transform_0, window_bounds = array<i64: 1, 1, 10, 128>}, {transform_indices = @transform_1, window_bounds = array<i64: 1, 1, 10, 128>}, {transform_indices = @transform_2, window_bounds = array<i64: 1, 1, 10, 128>}, {pipeline_mode = #tpu.pipeline_mode<synchronous>, transform_indices = @transform_3, window_bounds = array<i64: 9, 128, 128>}, {pipeline_mode = #tpu.pipeline_mode<synchronous>, transform_indices = @transform_4, window_bounds = array<i64: 1, 128>}, {transform_indices = @transform_5, window_bounds = array<i64: 1, 1, 8, 128>}]} {
    %cst = arith.constant 0.000000e+00 : f32
    %0 = vector.broadcast %cst : f32 to vector<8x128xf32>
    %c0 = arith.constant 0 : index
    %c0_0 = arith.constant 0 : index
    %1 = vector.load %arg8[%c0, %c0_0] : memref<8x128xf32, #tpu.memory_space<vmem>>, vector<8x128xf32>
    tpu.vector_store %arg8[%c0, %c0_0], %0 {strides = array<i32>} : memref<8x128xf32, #tpu.memory_space<vmem>>, vector<8x128xf32>,
    %c0_1 = arith.constant 0 : index
    %c0_2 = arith.constant 0 : index
    %2 = vector.load %arg8[%c0_1, %c0_2] : memref<8x128xf32, #tpu.memory_space<vmem>>, vector<8x128xf32>
    %c0_3 = arith.constant 0 : index
    %c0_4 = arith.constant 0 : index
    %c0_5 = arith.constant 0 : index
    %c0_6 = arith.constant 0 : index
    %3 = vector.load %arg2[%c0_3, %c0_4, %c0_5, %c0_6] : memref<1x1x10x128xbf16, #tpu.memory_space<vmem>>, vector<1x1x8x128xbf16>
    %4 = vector.shape_cast %3 : vector<1x1x8x128xbf16> to vector<8x128xbf16>
    %c0_7 = arith.constant 0 : index
    %c0_8 = arith.constant 0 : index
    %c0_9 = arith.constant 0 : index
    %5 = vector.load %arg5[%c0_7, %c0_8, %c0_9] : memref<9x128x128xbf16, #tpu.memory_space<vmem>>, vector<1x128x128xbf16>
    %6 = vector.shape_cast %5 : vector<1x128x128xbf16> to vector<128x128xbf16>
    %cst_10 = arith.constant dense<0.000000e+00> : vector<8x128xf32>
    %7 = tpu.matmul %4, %6, %cst_10 {dimension_numbers = #tpu.dot_dimension_numbers<[1], [0], [0], [1], [0, 0, 1, 1], [], []>} : vector<8x128xbf16>, vector<128x128xbf16>, vector<8x128xf32> -> vector<8x128xf32>
    %8 = arith.addf %2, %7 : vector<8x128xf32>
    %c0_11 = arith.constant 0 : index
    %c0_12 = arith.constant 0 : index
    %9 = vector.load %arg8[%c0_11, %c0_12] : memref<8x128xf32, #tpu.memory_space<vmem>>, vector<8x128xf32>
    tpu.vector_store %arg8[%c0_11, %c0_12], %8 {strides = array<i32>} : memref<8x128xf32, #tpu.memory_space<vmem>>, vector<8x128xf32>,
    %c0_13 = arith.constant 0 : index
    %c0_14 = arith.constant 0 : index
    %10 = vector.load %arg8[%c0_13, %c0_14] : memref<8x128xf32, #tpu.memory_space<vmem>>, vector<8x128xf32>
    %c0_15 = arith.constant 0 : index
    %c0_16 = arith.constant 0 : index
    %c1 = arith.constant 1 : index
    %c0_17 = arith.constant 0 : index
    %11 = vector.load %arg2[%c0_15, %c0_16, %c1, %c0_17] : memref<1x1x10x128xbf16, #tpu.memory_space<vmem>>, vector<1x1x8x128xbf16>
    %12 = vector.shape_cast %11 : vector<1x1x8x128xbf16> to vector<8x128xbf16>
    %c1_18 = arith.constant 1 : index
    %c0_19 = arith.constant 0 : index
    %c0_20 = arith.constant 0 : index
    %13 = vector.load %arg5[%c1_18, %c0_19, %c0_20] : memref<9x128x128xbf16, #tpu.memory_space<vmem>>, vector<1x128x128xbf16>
    %14 = vector.shape_cast %13 : vector<1x128x128xbf16> to vector<128x128xbf16>
    %cst_21 = arith.constant dense<0.000000e+00> : vector<8x128xf32>
    %15 = tpu.matmul %12, %14, %cst_21 {dimension_numbers = #tpu.dot_dimension_numbers<[1], [0], [0], [1], [0, 0, 1, 1], [], []>} : vector<8x128xbf16>, vector<128x128xbf16>, vector<8x128xf32> -> vector<8x128xf32>
    %16 = arith.addf %10, %15 : vector<8x128xf32>
    %c0_22 = arith.constant 0 : index
    %c0_23 = arith.constant 0 : index
    %17 = vector.load %arg8[%c0_22, %c0_23] : memref<8x128xf32, #tpu.memory_space<vmem>>, vector<8x128xf32>
    tpu.vector_store %arg8[%c0_22, %c0_23], %16 {strides = array<i32>} : memref<8x128xf32, #tpu.memory_space<vmem>>, vector<8x128xf32>,
    %c0_24 = arith.constant 0 : index
    %c0_25 = arith.constant 0 : index
    %18 = vector.load %arg8[%c0_24, %c0_25] : memref<8x128xf32, #tpu.memory_space<vmem>>, vector<8x128xf32>
    %c0_26 = arith.constant 0 : index
    %c0_27 = arith.constant 0 : index
    %c2 = arith.constant 2 : index
    %c0_28 = arith.constant 0 : index
    %19 = vector.load %arg2[%c0_26, %c0_27, %c2, %c0_28] : memref<1x1x10x128xbf16, #tpu.memory_space<vmem>>, vector<1x1x8x128xbf16>
    %20 = vector.shape_cast %19 : vector<1x1x8x128xbf16> to vector<8x128xbf16>
    %c2_29 = arith.constant 2 : index
    %c0_30 = arith.constant 0 : index
    %c0_31 = arith.constant 0 : index
    %21 = vector.load %arg5[%c2_29, %c0_30, %c0_31] : memref<9x128x128xbf16, #tpu.memory_space<vmem>>, vector<1x128x128xbf16>
    %22 = vector.shape_cast %21 : vector<1x128x128xbf16> to vector<128x128xbf16>
    %cst_32 = arith.constant dense<0.000000e+00> : vector<8x128xf32>
    %23 = tpu.matmul %20, %22, %cst_32 {dimension_numbers = #tpu.dot_dimension_numbers<[1], [0], [0], [1], [0, 0, 1, 1], [], []>} : vector<8x128xbf16>, vector<128x128xbf16>, vector<8x128xf32> -> vector<8x128xf32>
    %24 = arith.addf %18, %23 : vector<8x128xf32>
    %c0_33 = arith.constant 0 : index
    %c0_34 = arith.constant 0 : index
    %25 = vector.load %arg8[%c0_33, %c0_34] : memref<8x128xf32, #tpu.memory_space<vmem>>, vector<8x128xf32>
    tpu.vector_store %arg8[%c0_33, %c0_34], %24 {strides = array<i32>} : memref<8x128xf32, #tpu.memory_space<vmem>>, vector<8x128xf32>,
    %c0_35 = arith.constant 0 : index
    %c0_36 = arith.constant 0 : index
    %26 = vector.load %arg8[%c0_35, %c0_36] : memref<8x128xf32, #tpu.memory_space<vmem>>, vector<8x128xf32>
    %c0_37 = arith.constant 0 : index
    %c0_38 = arith.constant 0 : index
    %c0_39 = arith.constant 0 : index
    %c0_40 = arith.constant 0 : index
    %27 = vector.load %arg3[%c0_37, %c0_38, %c0_39, %c0_40] : memref<1x1x10x128xbf16, #tpu.memory_space<vmem>>, vector<1x1x8x128xbf16>
    %28 = vector.shape_cast %27 : vector<1x1x8x128xbf16> to vector<8x128xbf16>
    %c3 = arith.constant 3 : index
    %c0_41 = arith.constant 0 : index
    %c0_42 = arith.constant 0 : index
    %29 = vector.load %arg5[%c3, %c0_41, %c0_42] : memref<9x128x128xbf16, #tpu.memory_space<vmem>>, vector<1x128x128xbf16>
    %30 = vector.shape_cast %29 : vector<1x128x128xbf16> to vector<128x128xbf16>
    %cst_43 = arith.constant dense<0.000000e+00> : vector<8x128xf32>
    %31 = tpu.matmul %28, %30, %cst_43 {dimension_numbers = #tpu.dot_dimension_numbers<[1], [0], [0], [1], [0, 0, 1, 1], [], []>} : vector<8x128xbf16>, vector<128x128xbf16>, vector<8x128xf32> -> vector<8x128xf32>
    %32 = arith.addf %26, %31 : vector<8x128xf32>
    %c0_44 = arith.constant 0 : index
    %c0_45 = arith.constant 0 : index
    %33 = vector.load %arg8[%c0_44, %c0_45] : memref<8x128xf32, #tpu.memory_space<vmem>>, vector<8x128xf32>
    tpu.vector_store %arg8[%c0_44, %c0_45], %32 {strides = array<i32>} : memref<8x128xf32, #tpu.memory_space<vmem>>, vector<8x128xf32>,
    %c0_46 = arith.constant 0 : index
    %c0_47 = arith.constant 0 : index
    %34 = vector.load %arg8[%c0_46, %c0_47] : memref<8x128xf32, #tpu.memory_space<vmem>>, vector<8x128xf32>
    %c0_48 = arith.constant 0 : index
    %c0_49 = arith.constant 0 : index
    %c1_50 = arith.constant 1 : index
    %c0_51 = arith.constant 0 : index
    %35 = vector.load %arg3[%c0_48, %c0_49, %c1_50, %c0_51] : memref<1x1x10x128xbf16, #tpu.memory_space<vmem>>, vector<1x1x8x128xbf16>
    %36 = vector.shape_cast %35 : vector<1x1x8x128xbf16> to vector<8x128xbf16>
    %c4 = arith.constant 4 : index
    %c0_52 = arith.constant 0 : index
    %c0_53 = arith.constant 0 : index
    %37 = vector.load %arg5[%c4, %c0_52, %c0_53] : memref<9x128x128xbf16, #tpu.memory_space<vmem>>, vector<1x128x128xbf16>
    %38 = vector.shape_cast %37 : vector<1x128x128xbf16> to vector<128x128xbf16>
    %cst_54 = arith.constant dense<0.000000e+00> : vector<8x128xf32>
    %39 = tpu.matmul %36, %38, %cst_54 {dimension_numbers = #tpu.dot_dimension_numbers<[1], [0], [0], [1], [0, 0, 1, 1], [], []>} : vector<8x128xbf16>, vector<128x128xbf16>, vector<8x128xf32> -> vector<8x128xf32>
    %40 = arith.addf %34, %39 : vector<8x128xf32>
    %c0_55 = arith.constant 0 : index
    %c0_56 = arith.constant 0 : index
    %41 = vector.load %arg8[%c0_55, %c0_56] : memref<8x128xf32, #tpu.memory_space<vmem>>, vector<8x128xf32>
    tpu.vector_store %arg8[%c0_55, %c0_56], %40 {strides = array<i32>} : memref<8x128xf32, #tpu.memory_space<vmem>>, vector<8x128xf32>,
    %c0_57 = arith.constant 0 : index
    %c0_58 = arith.constant 0 : index
    %42 = vector.load %arg8[%c0_57, %c0_58] : memref<8x128xf32, #tpu.memory_space<vmem>>, vector<8x128xf32>
    %c0_59 = arith.constant 0 : index
    %c0_60 = arith.constant 0 : index
    %c2_61 = arith.constant 2 : index
    %c0_62 = arith.constant 0 : index
    %43 = vector.load %arg3[%c0_59, %c0_60, %c2_61, %c0_62] : memref<1x1x10x128xbf16, #tpu.memory_space<vmem>>, vector<1x1x8x128xbf16>
    %44 = vector.shape_cast %43 : vector<1x1x8x128xbf16> to vector<8x128xbf16>
    %c5 = arith.constant 5 : index
    %c0_63 = arith.constant 0 : index
    %c0_64 = arith.constant 0 : index
    %45 = vector.load %arg5[%c5, %c0_63, %c0_64] : memref<9x128x128xbf16, #tpu.memory_space<vmem>>, vector<1x128x128xbf16>
    %46 = vector.shape_cast %45 : vector<1x128x128xbf16> to vector<128x128xbf16>
    %cst_65 = arith.constant dense<0.000000e+00> : vector<8x128xf32>
    %47 = tpu.matmul %44, %46, %cst_65 {dimension_numbers = #tpu.dot_dimension_numbers<[1], [0], [0], [1], [0, 0, 1, 1], [], []>} : vector<8x128xbf16>, vector<128x128xbf16>, vector<8x128xf32> -> vector<8x128xf32>
    %48 = arith.addf %42, %47 : vector<8x128xf32>
    %c0_66 = arith.constant 0 : index
    %c0_67 = arith.constant 0 : index
    %49 = vector.load %arg8[%c0_66, %c0_67] : memref<8x128xf32, #tpu.memory_space<vmem>>, vector<8x128xf32>
    tpu.vector_store %arg8[%c0_66, %c0_67], %48 {strides = array<i32>} : memref<8x128xf32, #tpu.memory_space<vmem>>, vector<8x128xf32>,
    %c0_68 = arith.constant 0 : index
    %c0_69 = arith.constant 0 : index
    %50 = vector.load %arg8[%c0_68, %c0_69] : memref<8x128xf32, #tpu.memory_space<vmem>>, vector<8x128xf32>
    %c0_70 = arith.constant 0 : index
    %c0_71 = arith.constant 0 : index
    %c0_72 = arith.constant 0 : index
    %c0_73 = arith.constant 0 : index
    %51 = vector.load %arg4[%c0_70, %c0_71, %c0_72, %c0_73] : memref<1x1x10x128xbf16, #tpu.memory_space<vmem>>, vector<1x1x8x128xbf16>
    %52 = vector.shape_cast %51 : vector<1x1x8x128xbf16> to vector<8x128xbf16>
    %c6 = arith.constant 6 : index
    %c0_74 = arith.constant 0 : index
    %c0_75 = arith.constant 0 : index
    %53 = vector.load %arg5[%c6, %c0_74, %c0_75] : memref<9x128x128xbf16, #tpu.memory_space<vmem>>, vector<1x128x128xbf16>
    %54 = vector.shape_cast %53 : vector<1x128x128xbf16> to vector<128x128xbf16>
    %cst_76 = arith.constant dense<0.000000e+00> : vector<8x128xf32>
    %55 = tpu.matmul %52, %54, %cst_76 {dimension_numbers = #tpu.dot_dimension_numbers<[1], [0], [0], [1], [0, 0, 1, 1], [], []>} : vector<8x128xbf16>, vector<128x128xbf16>, vector<8x128xf32> -> vector<8x128xf32>
    %56 = arith.addf %50, %55 : vector<8x128xf32>
    %c0_77 = arith.constant 0 : index
    %c0_78 = arith.constant 0 : index
    %57 = vector.load %arg8[%c0_77, %c0_78] : memref<8x128xf32, #tpu.memory_space<vmem>>, vector<8x128xf32>
    tpu.vector_store %arg8[%c0_77, %c0_78], %56 {strides = array<i32>} : memref<8x128xf32, #tpu.memory_space<vmem>>, vector<8x128xf32>,
    %c0_79 = arith.constant 0 : index
    %c0_80 = arith.constant 0 : index
    %58 = vector.load %arg8[%c0_79, %c0_80] : memref<8x128xf32, #tpu.memory_space<vmem>>, vector<8x128xf32>
    %c0_81 = arith.constant 0 : index
    %c0_82 = arith.constant 0 : index
    %c1_83 = arith.constant 1 : index
    %c0_84 = arith.constant 0 : index
    %59 = vector.load %arg4[%c0_81, %c0_82, %c1_83, %c0_84] : memref<1x1x10x128xbf16, #tpu.memory_space<vmem>>, vector<1x1x8x128xbf16>
    %60 = vector.shape_cast %59 : vector<1x1x8x128xbf16> to vector<8x128xbf16>
    %c7 = arith.constant 7 : index
    %c0_85 = arith.constant 0 : index
    %c0_86 = arith.constant 0 : index
    %61 = vector.load %arg5[%c7, %c0_85, %c0_86] : memref<9x128x128xbf16, #tpu.memory_space<vmem>>, vector<1x128x128xbf16>
    %62 = vector.shape_cast %61 : vector<1x128x128xbf16> to vector<128x128xbf16>
    %cst_87 = arith.constant dense<0.000000e+00> : vector<8x128xf32>
    %63 = tpu.matmul %60, %62, %cst_87 {dimension_numbers = #tpu.dot_dimension_numbers<[1], [0], [0], [1], [0, 0, 1, 1], [], []>} : vector<8x128xbf16>, vector<128x128xbf16>, vector<8x128xf32> -> vector<8x128xf32>
    %64 = arith.addf %58, %63 : vector<8x128xf32>
    %c0_88 = arith.constant 0 : index
    %c0_89 = arith.constant 0 : index
    %65 = vector.load %arg8[%c0_88, %c0_89] : memref<8x128xf32, #tpu.memory_space<vmem>>, vector<8x128xf32>
    tpu.vector_store %arg8[%c0_88, %c0_89], %64 {strides = array<i32>} : memref<8x128xf32, #tpu.memory_space<vmem>>, vector<8x128xf32>,
    %c0_90 = arith.constant 0 : index
    %c0_91 = arith.constant 0 : index
    %66 = vector.load %arg8[%c0_90, %c0_91] : memref<8x128xf32, #tpu.memory_space<vmem>>, vector<8x128xf32>
    %c0_92 = arith.constant 0 : index
    %c0_93 = arith.constant 0 : index
    %c2_94 = arith.constant 2 : index
    %c0_95 = arith.constant 0 : index
    %67 = vector.load %arg4[%c0_92, %c0_93, %c2_94, %c0_95] : memref<1x1x10x128xbf16, #tpu.memory_space<vmem>>, vector<1x1x8x128xbf16>
    %68 = vector.shape_cast %67 : vector<1x1x8x128xbf16> to vector<8x128xbf16>
    %c8 = arith.constant 8 : index
    %c0_96 = arith.constant 0 : index
    %c0_97 = arith.constant 0 : index
    %69 = vector.load %arg5[%c8, %c0_96, %c0_97] : memref<9x128x128xbf16, #tpu.memory_space<vmem>>, vector<1x128x128xbf16>
    %70 = vector.shape_cast %69 : vector<1x128x128xbf16> to vector<128x128xbf16>
    %cst_98 = arith.constant dense<0.000000e+00> : vector<8x128xf32>
    %71 = tpu.matmul %68, %70, %cst_98 {dimension_numbers = #tpu.dot_dimension_numbers<[1], [0], [0], [1], [0, 0, 1, 1], [], []>} : vector<8x128xbf16>, vector<128x128xbf16>, vector<8x128xf32> -> vector<8x128xf32>
    %72 = arith.addf %66, %71 : vector<8x128xf32>
    %c0_99 = arith.constant 0 : index
    %c0_100 = arith.constant 0 : index
    %73 = vector.load %arg8[%c0_99, %c0_100] : memref<8x128xf32, #tpu.memory_space<vmem>>, vector<8x128xf32>
    tpu.vector_store %arg8[%c0_99, %c0_100], %72 {strides = array<i32>} : memref<8x128xf32, #tpu.memory_space<vmem>>, vector<8x128xf32>,
    %c0_101 = arith.constant 0 : index
    %c0_102 = arith.constant 0 : index
    %74 = vector.load %arg8[%c0_101, %c0_102] : memref<8x128xf32, #tpu.memory_space<vmem>>, vector<8x128xf32>
    %c0_103 = arith.constant 0 : index
    %c0_104 = arith.constant 0 : index
    %75 = vector.load %arg6[%c0_103, %c0_104] : memref<1x128xf32, #tpu.memory_space<vmem>>, vector<1x128xf32>
    %76 = vector.broadcast %75 : vector<1x128xf32> to vector<8x128xf32>
    %77 = arith.addf %74, %76 : vector<8x128xf32>
    %78 = arith.truncf %77 : vector<8x128xf32> to vector<8x128xbf16>
    %c0_105 = arith.constant 0 : index
    %c0_106 = arith.constant 0 : index
    %c0_107 = arith.constant 0 : index
    %c0_108 = arith.constant 0 : index
    %79 = vector.load %arg7[%c0_105, %c0_106, %c0_107, %c0_108] : memref<1x1x8x128xbf16, #tpu.memory_space<vmem>>, vector<1x1x8x128xbf16>
    %80 = vector.shape_cast %79 : vector<1x1x8x128xbf16> to vector<8x128xbf16>
    %81 = vector.shape_cast %78 : vector<8x128xbf16> to vector<1x1x8x128xbf16>
    tpu.vector_store %arg7[%c0_105, %c0_106, %c0_107, %c0_108], %81 {strides = array<i32>} : memref<1x1x8x128xbf16, #tpu.memory_space<vmem>>, vector<1x1x8x128xbf16>,
    return
  }
  func.func @transform_0(%arg0: i32, %arg1: i32) -> (i32, i32, i32, i32) {
    %c0_i32 = arith.constant 0 : i32
    %c0_i32_0 = arith.constant 0 : i32
    %c0_i32_1 = arith.constant 0 : i32
    return %arg0, %arg1, %c0_i32, %c0_i32_0 : i32, i32, i32, i32
  }
  func.func @transform_1(%arg0: i32, %arg1: i32) -> (i32, i32, i32, i32) {
    %c1_i32 = arith.constant 1 : i32
    %0 = arith.addi %arg1, %c1_i32 : i32
    %c0_i32 = arith.constant 0 : i32
    %c0_i32_0 = arith.constant 0 : i32
    %c0_i32_1 = arith.constant 0 : i32
    return %arg0, %0, %c0_i32, %c0_i32_0 : i32, i32, i32, i32
  }
  func.func @transform_2(%arg0: i32, %arg1: i32) -> (i32, i32, i32, i32) {
    %c2_i32 = arith.constant 2 : i32
    %0 = arith.addi %arg1, %c2_i32 : i32
    %c0_i32 = arith.constant 0 : i32
    %c0_i32_0 = arith.constant 0 : i32
    %c0_i32_1 = arith.constant 0 : i32
    return %arg0, %0, %c0_i32, %c0_i32_0 : i32, i32, i32, i32
  }
  func.func @transform_3(%arg0: i32, %arg1: i32) -> (i32, i32, i32) {
    %c0_i32 = arith.constant 0 : i32
    %c0_i32_0 = arith.constant 0 : i32
    %c0_i32_1 = arith.constant 0 : i32
    %c0_i32_2 = arith.constant 0 : i32
    return %c0_i32, %c0_i32_0, %c0_i32_1 : i32, i32, i32
  }
  func.func @transform_4(%arg0: i32, %arg1: i32) -> (i32, i32) {
    %c0_i32 = arith.constant 0 : i32
    %c0_i32_0 = arith.constant 0 : i32
    %c0_i32_1 = arith.constant 0 : i32
    return %c0_i32, %c0_i32_0 : i32, i32
  }
  func.func @transform_5(%arg0: i32, %arg1: i32) -> (i32, i32, i32, i32) {
    %c0_i32 = arith.constant 0 : i32
    %c0_i32_0 = arith.constant 0 : i32
    %c0_i32_1 = arith.constant 0 : i32
    return %arg0, %arg1, %c0_i32, %c0_i32_0 : i32, i32, i32, i32
  }
}

module attributes {stable_mosaic.version = 11 : i64} {
  func.func @_gn_apply_kernel(%arg0: i32, %arg1: i32, %arg2: memref<1x64x128xbf16, #tpu.memory_space<vmem>>, %arg3: memref<1x1x128xf32, #tpu.memory_space<vmem>>, %arg4: memref<1x1x128xf32, #tpu.memory_space<vmem>>, %arg5: memref<1x128xf32, #tpu.memory_space<vmem>>, %arg6: memref<1x128xf32, #tpu.memory_space<vmem>>, %arg7: memref<1x64x128xbf16, #tpu.memory_space<vmem>>) attributes {dimension_semantics = [#tpu.dimension_semantics<parallel>, #tpu.dimension_semantics<parallel>], iteration_bounds = array<i64: 2, 1>, scalar_prefetch = 0 : i64, scratch_operands = 0 : i64, tpu.core_type = #tpu.core_type<tc>, window_params = [{transform_indices = @transform_0, window_bounds = array<i64: 1, 64, 128>}, {transform_indices = @transform_1, window_bounds = array<i64: 1, 1, 128>}, {transform_indices = @transform_2, window_bounds = array<i64: 1, 1, 128>}, {pipeline_mode = #tpu.pipeline_mode<synchronous>, transform_indices = @transform_3, window_bounds = array<i64: 1, 128>}, {pipeline_mode = #tpu.pipeline_mode<synchronous>, transform_indices = @transform_4, window_bounds = array<i64: 1, 128>}, {transform_indices = @transform_5, window_bounds = array<i64: 1, 64, 128>}]} {
    %c0 = arith.constant 0 : index
    %c0_0 = arith.constant 0 : index
    %c0_1 = arith.constant 0 : index
    %0 = vector.load %arg2[%c0, %c0_0, %c0_1] : memref<1x64x128xbf16, #tpu.memory_space<vmem>>, vector<1x64x128xbf16>
    %1 = vector.shape_cast %0 : vector<1x64x128xbf16> to vector<64x128xbf16>
    %2 = arith.extf %1 : vector<64x128xbf16> to vector<64x128xf32>
    %c0_2 = arith.constant 0 : index
    %c0_3 = arith.constant 0 : index
    %c0_4 = arith.constant 0 : index
    %3 = vector.load %arg3[%c0_2, %c0_3, %c0_4] : memref<1x1x128xf32, #tpu.memory_space<vmem>>, vector<1x1x128xf32>
    %4 = vector.shape_cast %3 : vector<1x1x128xf32> to vector<1x128xf32>
    %5 = vector.broadcast %4 : vector<1x128xf32> to vector<64x128xf32>
    %6 = arith.subf %2, %5 : vector<64x128xf32>
    %c0_5 = arith.constant 0 : index
    %c0_6 = arith.constant 0 : index
    %c0_7 = arith.constant 0 : index
    %7 = vector.load %arg4[%c0_5, %c0_6, %c0_7] : memref<1x1x128xf32, #tpu.memory_space<vmem>>, vector<1x1x128xf32>
    %8 = vector.shape_cast %7 : vector<1x1x128xf32> to vector<1x128xf32>
    %9 = vector.broadcast %8 : vector<1x128xf32> to vector<64x128xf32>
    %10 = arith.mulf %6, %9 : vector<64x128xf32>
    %c0_8 = arith.constant 0 : index
    %c0_9 = arith.constant 0 : index
    %11 = vector.load %arg5[%c0_8, %c0_9] : memref<1x128xf32, #tpu.memory_space<vmem>>, vector<1x128xf32>
    %12 = vector.broadcast %11 : vector<1x128xf32> to vector<64x128xf32>
    %13 = arith.mulf %10, %12 : vector<64x128xf32>
    %c0_10 = arith.constant 0 : index
    %c0_11 = arith.constant 0 : index
    %14 = vector.load %arg6[%c0_10, %c0_11] : memref<1x128xf32, #tpu.memory_space<vmem>>, vector<1x128xf32>
    %15 = vector.broadcast %14 : vector<1x128xf32> to vector<64x128xf32>
    %16 = arith.addf %13, %15 : vector<64x128xf32>
    %17 = arith.negf %16 : vector<64x128xf32>
    %18 = math.exp %17 : vector<64x128xf32>
    %cst = arith.constant 1.000000e+00 : f32
    %19 = vector.broadcast %cst : f32 to vector<64x128xf32>
    %20 = arith.addf %19, %18 : vector<64x128xf32>
    %21 = arith.divf %19, %20 : vector<64x128xf32>
    %22 = arith.mulf %16, %21 : vector<64x128xf32>
    %23 = arith.truncf %22 : vector<64x128xf32> to vector<64x128xbf16>
    %c0_12 = arith.constant 0 : index
    %c0_13 = arith.constant 0 : index
    %c0_14 = arith.constant 0 : index
    %24 = vector.load %arg7[%c0_12, %c0_13, %c0_14] : memref<1x64x128xbf16, #tpu.memory_space<vmem>>, vector<1x64x128xbf16>
    %25 = vector.shape_cast %24 : vector<1x64x128xbf16> to vector<64x128xbf16>
    %26 = vector.shape_cast %23 : vector<64x128xbf16> to vector<1x64x128xbf16>
    tpu.vector_store %arg7[%c0_12, %c0_13, %c0_14], %26 {strides = array<i32>} : memref<1x64x128xbf16, #tpu.memory_space<vmem>>, vector<1x64x128xbf16>,
    return
  }
  func.func @transform_0(%arg0: i32, %arg1: i32) -> (i32, i32, i32) {
    %c0_i32 = arith.constant 0 : i32
    %c0_i32_0 = arith.constant 0 : i32
    return %arg0, %arg1, %c0_i32 : i32, i32, i32
  }
  func.func @transform_1(%arg0: i32, %arg1: i32) -> (i32, i32, i32) {
    %c0_i32 = arith.constant 0 : i32
    %c0_i32_0 = arith.constant 0 : i32
    %c0_i32_1 = arith.constant 0 : i32
    return %arg0, %c0_i32, %c0_i32_0 : i32, i32, i32
  }
  func.func @transform_2(%arg0: i32, %arg1: i32) -> (i32, i32, i32) {
    %c0_i32 = arith.constant 0 : i32
    %c0_i32_0 = arith.constant 0 : i32
    %c0_i32_1 = arith.constant 0 : i32
    return %arg0, %c0_i32, %c0_i32_0 : i32, i32, i32
  }
  func.func @transform_3(%arg0: i32, %arg1: i32) -> (i32, i32) {
    %c0_i32 = arith.constant 0 : i32
    %c0_i32_0 = arith.constant 0 : i32
    %c0_i32_1 = arith.constant 0 : i32
    return %c0_i32, %c0_i32_0 : i32, i32
  }
  func.func @transform_4(%arg0: i32, %arg1: i32) -> (i32, i32) {
    %c0_i32 = arith.constant 0 : i32
    %c0_i32_0 = arith.constant 0 : i32
    %c0_i32_1 = arith.constant 0 : i32
    return %c0_i32, %c0_i32_0 : i32, i32
  }
  func.func @transform_5(%arg0: i32, %arg1: i32) -> (i32, i32, i32) {
    %c0_i32 = arith.constant 0 : i32
    %c0_i32_0 = arith.constant 0 : i32
    return %arg0, %arg1, %c0_i32 : i32, i32, i32
  }
}

module attributes {stable_mosaic.version = 11 : i64} {
  func.func @_gn_apply_kernel(%arg0: i32, %arg1: i32, %arg2: memref<1x64x128xbf16, #tpu.memory_space<vmem>>, %arg3: memref<1x1x128xf32, #tpu.memory_space<vmem>>, %arg4: memref<1x1x128xf32, #tpu.memory_space<vmem>>, %arg5: memref<1x128xf32, #tpu.memory_space<vmem>>, %arg6: memref<1x128xf32, #tpu.memory_space<vmem>>, %arg7: memref<1x64x128xbf16, #tpu.memory_space<vmem>>) attributes {dimension_semantics = [#tpu.dimension_semantics<parallel>, #tpu.dimension_semantics<parallel>], iteration_bounds = array<i64: 2, 1>, scalar_prefetch = 0 : i64, scratch_operands = 0 : i64, tpu.core_type = #tpu.core_type<tc>, window_params = [{transform_indices = @transform_0, window_bounds = array<i64: 1, 64, 128>}, {transform_indices = @transform_1, window_bounds = array<i64: 1, 1, 128>}, {transform_indices = @transform_2, window_bounds = array<i64: 1, 1, 128>}, {pipeline_mode = #tpu.pipeline_mode<synchronous>, transform_indices = @transform_3, window_bounds = array<i64: 1, 128>}, {pipeline_mode = #tpu.pipeline_mode<synchronous>, transform_indices = @transform_4, window_bounds = array<i64: 1, 128>}, {transform_indices = @transform_5, window_bounds = array<i64: 1, 64, 128>}]} {
    %c0 = arith.constant 0 : index
    %c0_0 = arith.constant 0 : index
    %c0_1 = arith.constant 0 : index
    %0 = vector.load %arg2[%c0, %c0_0, %c0_1] : memref<1x64x128xbf16, #tpu.memory_space<vmem>>, vector<1x64x128xbf16>
    %1 = vector.shape_cast %0 : vector<1x64x128xbf16> to vector<64x128xbf16>
    %2 = arith.extf %1 : vector<64x128xbf16> to vector<64x128xf32>
    %c0_2 = arith.constant 0 : index
    %c0_3 = arith.constant 0 : index
    %c0_4 = arith.constant 0 : index
    %3 = vector.load %arg3[%c0_2, %c0_3, %c0_4] : memref<1x1x128xf32, #tpu.memory_space<vmem>>, vector<1x1x128xf32>
    %4 = vector.shape_cast %3 : vector<1x1x128xf32> to vector<1x128xf32>
    %5 = vector.broadcast %4 : vector<1x128xf32> to vector<64x128xf32>
    %6 = arith.subf %2, %5 : vector<64x128xf32>
    %c0_5 = arith.constant 0 : index
    %c0_6 = arith.constant 0 : index
    %c0_7 = arith.constant 0 : index
    %7 = vector.load %arg4[%c0_5, %c0_6, %c0_7] : memref<1x1x128xf32, #tpu.memory_space<vmem>>, vector<1x1x128xf32>
    %8 = vector.shape_cast %7 : vector<1x1x128xf32> to vector<1x128xf32>
    %9 = vector.broadcast %8 : vector<1x128xf32> to vector<64x128xf32>
    %10 = arith.mulf %6, %9 : vector<64x128xf32>
    %c0_8 = arith.constant 0 : index
    %c0_9 = arith.constant 0 : index
    %11 = vector.load %arg5[%c0_8, %c0_9] : memref<1x128xf32, #tpu.memory_space<vmem>>, vector<1x128xf32>
    %12 = vector.broadcast %11 : vector<1x128xf32> to vector<64x128xf32>
    %13 = arith.mulf %10, %12 : vector<64x128xf32>
    %c0_10 = arith.constant 0 : index
    %c0_11 = arith.constant 0 : index
    %14 = vector.load %arg6[%c0_10, %c0_11] : memref<1x128xf32, #tpu.memory_space<vmem>>, vector<1x128xf32>
    %15 = vector.broadcast %14 : vector<1x128xf32> to vector<64x128xf32>
    %16 = arith.addf %13, %15 : vector<64x128xf32>
    %17 = arith.truncf %16 : vector<64x128xf32> to vector<64x128xbf16>
    %c0_12 = arith.constant 0 : index
    %c0_13 = arith.constant 0 : index
    %c0_14 = arith.constant 0 : index
    %18 = vector.load %arg7[%c0_12, %c0_13, %c0_14] : memref<1x64x128xbf16, #tpu.memory_space<vmem>>, vector<1x64x128xbf16>
    %19 = vector.shape_cast %18 : vector<1x64x128xbf16> to vector<64x128xbf16>
    %20 = vector.shape_cast %17 : vector<64x128xbf16> to vector<1x64x128xbf16>
    tpu.vector_store %arg7[%c0_12, %c0_13, %c0_14], %20 {strides = array<i32>} : memref<1x64x128xbf16, #tpu.memory_space<vmem>>, vector<1x64x128xbf16>,
    return
  }
  func.func @transform_0(%arg0: i32, %arg1: i32) -> (i32, i32, i32) {
    %c0_i32 = arith.constant 0 : i32
    %c0_i32_0 = arith.constant 0 : i32
    return %arg0, %arg1, %c0_i32 : i32, i32, i32
  }
  func.func @transform_1(%arg0: i32, %arg1: i32) -> (i32, i32, i32) {
    %c0_i32 = arith.constant 0 : i32
    %c0_i32_0 = arith.constant 0 : i32
    %c0_i32_1 = arith.constant 0 : i32
    return %arg0, %c0_i32, %c0_i32_0 : i32, i32, i32
  }
  func.func @transform_2(%arg0: i32, %arg1: i32) -> (i32, i32, i32) {
    %c0_i32 = arith.constant 0 : i32
    %c0_i32_0 = arith.constant 0 : i32
    %c0_i32_1 = arith.constant 0 : i32
    return %arg0, %c0_i32, %c0_i32_0 : i32, i32, i32
  }
  func.func @transform_3(%arg0: i32, %arg1: i32) -> (i32, i32) {
    %c0_i32 = arith.constant 0 : i32
    %c0_i32_0 = arith.constant 0 : i32
    %c0_i32_1 = arith.constant 0 : i32
    return %c0_i32, %c0_i32_0 : i32, i32
  }
  func.func @transform_4(%arg0: i32, %arg1: i32) -> (i32, i32) {
    %c0_i32 = arith.constant 0 : i32
    %c0_i32_0 = arith.constant 0 : i32
    %c0_i32_1 = arith.constant 0 : i32
    return %c0_i32, %c0_i32_0 : i32, i32
  }
  func.func @transform_5(%arg0: i32, %arg1: i32) -> (i32, i32, i32) {
    %c0_i32 = arith.constant 0 : i32
    %c0_i32_0 = arith.constant 0 : i32
    return %arg0, %arg1, %c0_i32 : i32, i32, i32
  }
}

module attributes {stable_mosaic.version = 11 : i64} {
  func.func @_conv3x3_res_kernel(%arg0: i32, %arg1: i32, %arg2: memref<1x1x10x128xbf16, #tpu.memory_space<vmem>>, %arg3: memref<1x1x10x128xbf16, #tpu.memory_space<vmem>>, %arg4: memref<1x1x10x128xbf16, #tpu.memory_space<vmem>>, %arg5: memref<9x128x128xbf16, #tpu.memory_space<vmem>>, %arg6: memref<1x128xf32, #tpu.memory_space<vmem>>, %arg7: memref<1x1x8x128xbf16, #tpu.memory_space<vmem>>, %arg8: memref<1x1x8x128xbf16, #tpu.memory_space<vmem>>, %arg9: memref<8x128xf32, #tpu.memory_space<vmem>>) attributes {dimension_semantics = [#tpu.dimension_semantics<parallel>, #tpu.dimension_semantics<parallel>], iteration_bounds = array<i64: 2, 8>, scalar_prefetch = 0 : i64, scratch_operands = 1 : i64, tpu.core_type = #tpu.core_type<tc>, window_params = [{transform_indices = @transform_0, window_bounds = array<i64: 1, 1, 10, 128>}, {transform_indices = @transform_1, window_bounds = array<i64: 1, 1, 10, 128>}, {transform_indices = @transform_2, window_bounds = array<i64: 1, 1, 10, 128>}, {pipeline_mode = #tpu.pipeline_mode<synchronous>, transform_indices = @transform_3, window_bounds = array<i64: 9, 128, 128>}, {pipeline_mode = #tpu.pipeline_mode<synchronous>, transform_indices = @transform_4, window_bounds = array<i64: 1, 128>}, {transform_indices = @transform_5, window_bounds = array<i64: 1, 1, 8, 128>}, {transform_indices = @transform_6, window_bounds = array<i64: 1, 1, 8, 128>}]} {
    %cst = arith.constant 0.000000e+00 : f32
    %0 = vector.broadcast %cst : f32 to vector<8x128xf32>
    %c0 = arith.constant 0 : index
    %c0_0 = arith.constant 0 : index
    %1 = vector.load %arg9[%c0, %c0_0] : memref<8x128xf32, #tpu.memory_space<vmem>>, vector<8x128xf32>
    tpu.vector_store %arg9[%c0, %c0_0], %0 {strides = array<i32>} : memref<8x128xf32, #tpu.memory_space<vmem>>, vector<8x128xf32>,
    %c0_1 = arith.constant 0 : index
    %c0_2 = arith.constant 0 : index
    %2 = vector.load %arg9[%c0_1, %c0_2] : memref<8x128xf32, #tpu.memory_space<vmem>>, vector<8x128xf32>
    %c0_3 = arith.constant 0 : index
    %c0_4 = arith.constant 0 : index
    %c0_5 = arith.constant 0 : index
    %c0_6 = arith.constant 0 : index
    %3 = vector.load %arg2[%c0_3, %c0_4, %c0_5, %c0_6] : memref<1x1x10x128xbf16, #tpu.memory_space<vmem>>, vector<1x1x8x128xbf16>
    %4 = vector.shape_cast %3 : vector<1x1x8x128xbf16> to vector<8x128xbf16>
    %c0_7 = arith.constant 0 : index
    %c0_8 = arith.constant 0 : index
    %c0_9 = arith.constant 0 : index
    %5 = vector.load %arg5[%c0_7, %c0_8, %c0_9] : memref<9x128x128xbf16, #tpu.memory_space<vmem>>, vector<1x128x128xbf16>
    %6 = vector.shape_cast %5 : vector<1x128x128xbf16> to vector<128x128xbf16>
    %cst_10 = arith.constant dense<0.000000e+00> : vector<8x128xf32>
    %7 = tpu.matmul %4, %6, %cst_10 {dimension_numbers = #tpu.dot_dimension_numbers<[1], [0], [0], [1], [0, 0, 1, 1], [], []>} : vector<8x128xbf16>, vector<128x128xbf16>, vector<8x128xf32> -> vector<8x128xf32>
    %8 = arith.addf %2, %7 : vector<8x128xf32>
    %c0_11 = arith.constant 0 : index
    %c0_12 = arith.constant 0 : index
    %9 = vector.load %arg9[%c0_11, %c0_12] : memref<8x128xf32, #tpu.memory_space<vmem>>, vector<8x128xf32>
    tpu.vector_store %arg9[%c0_11, %c0_12], %8 {strides = array<i32>} : memref<8x128xf32, #tpu.memory_space<vmem>>, vector<8x128xf32>,
    %c0_13 = arith.constant 0 : index
    %c0_14 = arith.constant 0 : index
    %10 = vector.load %arg9[%c0_13, %c0_14] : memref<8x128xf32, #tpu.memory_space<vmem>>, vector<8x128xf32>
    %c0_15 = arith.constant 0 : index
    %c0_16 = arith.constant 0 : index
    %c1 = arith.constant 1 : index
    %c0_17 = arith.constant 0 : index
    %11 = vector.load %arg2[%c0_15, %c0_16, %c1, %c0_17] : memref<1x1x10x128xbf16, #tpu.memory_space<vmem>>, vector<1x1x8x128xbf16>
    %12 = vector.shape_cast %11 : vector<1x1x8x128xbf16> to vector<8x128xbf16>
    %c1_18 = arith.constant 1 : index
    %c0_19 = arith.constant 0 : index
    %c0_20 = arith.constant 0 : index
    %13 = vector.load %arg5[%c1_18, %c0_19, %c0_20] : memref<9x128x128xbf16, #tpu.memory_space<vmem>>, vector<1x128x128xbf16>
    %14 = vector.shape_cast %13 : vector<1x128x128xbf16> to vector<128x128xbf16>
    %cst_21 = arith.constant dense<0.000000e+00> : vector<8x128xf32>
    %15 = tpu.matmul %12, %14, %cst_21 {dimension_numbers = #tpu.dot_dimension_numbers<[1], [0], [0], [1], [0, 0, 1, 1], [], []>} : vector<8x128xbf16>, vector<128x128xbf16>, vector<8x128xf32> -> vector<8x128xf32>
    %16 = arith.addf %10, %15 : vector<8x128xf32>
    %c0_22 = arith.constant 0 : index
    %c0_23 = arith.constant 0 : index
    %17 = vector.load %arg9[%c0_22, %c0_23] : memref<8x128xf32, #tpu.memory_space<vmem>>, vector<8x128xf32>
    tpu.vector_store %arg9[%c0_22, %c0_23], %16 {strides = array<i32>} : memref<8x128xf32, #tpu.memory_space<vmem>>, vector<8x128xf32>,
    %c0_24 = arith.constant 0 : index
    %c0_25 = arith.constant 0 : index
    %18 = vector.load %arg9[%c0_24, %c0_25] : memref<8x128xf32, #tpu.memory_space<vmem>>, vector<8x128xf32>
    %c0_26 = arith.constant 0 : index
    %c0_27 = arith.constant 0 : index
    %c2 = arith.constant 2 : index
    %c0_28 = arith.constant 0 : index
    %19 = vector.load %arg2[%c0_26, %c0_27, %c2, %c0_28] : memref<1x1x10x128xbf16, #tpu.memory_space<vmem>>, vector<1x1x8x128xbf16>
    %20 = vector.shape_cast %19 : vector<1x1x8x128xbf16> to vector<8x128xbf16>
    %c2_29 = arith.constant 2 : index
    %c0_30 = arith.constant 0 : index
    %c0_31 = arith.constant 0 : index
    %21 = vector.load %arg5[%c2_29, %c0_30, %c0_31] : memref<9x128x128xbf16, #tpu.memory_space<vmem>>, vector<1x128x128xbf16>
    %22 = vector.shape_cast %21 : vector<1x128x128xbf16> to vector<128x128xbf16>
    %cst_32 = arith.constant dense<0.000000e+00> : vector<8x128xf32>
    %23 = tpu.matmul %20, %22, %cst_32 {dimension_numbers = #tpu.dot_dimension_numbers<[1], [0], [0], [1], [0, 0, 1, 1], [], []>} : vector<8x128xbf16>, vector<128x128xbf16>, vector<8x128xf32> -> vector<8x128xf32>
    %24 = arith.addf %18, %23 : vector<8x128xf32>
    %c0_33 = arith.constant 0 : index
    %c0_34 = arith.constant 0 : index
    %25 = vector.load %arg9[%c0_33, %c0_34] : memref<8x128xf32, #tpu.memory_space<vmem>>, vector<8x128xf32>
    tpu.vector_store %arg9[%c0_33, %c0_34], %24 {strides = array<i32>} : memref<8x128xf32, #tpu.memory_space<vmem>>, vector<8x128xf32>,
    %c0_35 = arith.constant 0 : index
    %c0_36 = arith.constant 0 : index
    %26 = vector.load %arg9[%c0_35, %c0_36] : memref<8x128xf32, #tpu.memory_space<vmem>>, vector<8x128xf32>
    %c0_37 = arith.constant 0 : index
    %c0_38 = arith.constant 0 : index
    %c0_39 = arith.constant 0 : index
    %c0_40 = arith.constant 0 : index
    %27 = vector.load %arg3[%c0_37, %c0_38, %c0_39, %c0_40] : memref<1x1x10x128xbf16, #tpu.memory_space<vmem>>, vector<1x1x8x128xbf16>
    %28 = vector.shape_cast %27 : vector<1x1x8x128xbf16> to vector<8x128xbf16>
    %c3 = arith.constant 3 : index
    %c0_41 = arith.constant 0 : index
    %c0_42 = arith.constant 0 : index
    %29 = vector.load %arg5[%c3, %c0_41, %c0_42] : memref<9x128x128xbf16, #tpu.memory_space<vmem>>, vector<1x128x128xbf16>
    %30 = vector.shape_cast %29 : vector<1x128x128xbf16> to vector<128x128xbf16>
    %cst_43 = arith.constant dense<0.000000e+00> : vector<8x128xf32>
    %31 = tpu.matmul %28, %30, %cst_43 {dimension_numbers = #tpu.dot_dimension_numbers<[1], [0], [0], [1], [0, 0, 1, 1], [], []>} : vector<8x128xbf16>, vector<128x128xbf16>, vector<8x128xf32> -> vector<8x128xf32>
    %32 = arith.addf %26, %31 : vector<8x128xf32>
    %c0_44 = arith.constant 0 : index
    %c0_45 = arith.constant 0 : index
    %33 = vector.load %arg9[%c0_44, %c0_45] : memref<8x128xf32, #tpu.memory_space<vmem>>, vector<8x128xf32>
    tpu.vector_store %arg9[%c0_44, %c0_45], %32 {strides = array<i32>} : memref<8x128xf32, #tpu.memory_space<vmem>>, vector<8x128xf32>,
    %c0_46 = arith.constant 0 : index
    %c0_47 = arith.constant 0 : index
    %34 = vector.load %arg9[%c0_46, %c0_47] : memref<8x128xf32, #tpu.memory_space<vmem>>, vector<8x128xf32>
    %c0_48 = arith.constant 0 : index
    %c0_49 = arith.constant 0 : index
    %c1_50 = arith.constant 1 : index
    %c0_51 = arith.constant 0 : index
    %35 = vector.load %arg3[%c0_48, %c0_49, %c1_50, %c0_51] : memref<1x1x10x128xbf16, #tpu.memory_space<vmem>>, vector<1x1x8x128xbf16>
    %36 = vector.shape_cast %35 : vector<1x1x8x128xbf16> to vector<8x128xbf16>
    %c4 = arith.constant 4 : index
    %c0_52 = arith.constant 0 : index
    %c0_53 = arith.constant 0 : index
    %37 = vector.load %arg5[%c4, %c0_52, %c0_53] : memref<9x128x128xbf16, #tpu.memory_space<vmem>>, vector<1x128x128xbf16>
    %38 = vector.shape_cast %37 : vector<1x128x128xbf16> to vector<128x128xbf16>
    %cst_54 = arith.constant dense<0.000000e+00> : vector<8x128xf32>
    %39 = tpu.matmul %36, %38, %cst_54 {dimension_numbers = #tpu.dot_dimension_numbers<[1], [0], [0], [1], [0, 0, 1, 1], [], []>} : vector<8x128xbf16>, vector<128x128xbf16>, vector<8x128xf32> -> vector<8x128xf32>
    %40 = arith.addf %34, %39 : vector<8x128xf32>
    %c0_55 = arith.constant 0 : index
    %c0_56 = arith.constant 0 : index
    %41 = vector.load %arg9[%c0_55, %c0_56] : memref<8x128xf32, #tpu.memory_space<vmem>>, vector<8x128xf32>
    tpu.vector_store %arg9[%c0_55, %c0_56], %40 {strides = array<i32>} : memref<8x128xf32, #tpu.memory_space<vmem>>, vector<8x128xf32>,
    %c0_57 = arith.constant 0 : index
    %c0_58 = arith.constant 0 : index
    %42 = vector.load %arg9[%c0_57, %c0_58] : memref<8x128xf32, #tpu.memory_space<vmem>>, vector<8x128xf32>
    %c0_59 = arith.constant 0 : index
    %c0_60 = arith.constant 0 : index
    %c2_61 = arith.constant 2 : index
    %c0_62 = arith.constant 0 : index
    %43 = vector.load %arg3[%c0_59, %c0_60, %c2_61, %c0_62] : memref<1x1x10x128xbf16, #tpu.memory_space<vmem>>, vector<1x1x8x128xbf16>
    %44 = vector.shape_cast %43 : vector<1x1x8x128xbf16> to vector<8x128xbf16>
    %c5 = arith.constant 5 : index
    %c0_63 = arith.constant 0 : index
    %c0_64 = arith.constant 0 : index
    %45 = vector.load %arg5[%c5, %c0_63, %c0_64] : memref<9x128x128xbf16, #tpu.memory_space<vmem>>, vector<1x128x128xbf16>
    %46 = vector.shape_cast %45 : vector<1x128x128xbf16> to vector<128x128xbf16>
    %cst_65 = arith.constant dense<0.000000e+00> : vector<8x128xf32>
    %47 = tpu.matmul %44, %46, %cst_65 {dimension_numbers = #tpu.dot_dimension_numbers<[1], [0], [0], [1], [0, 0, 1, 1], [], []>} : vector<8x128xbf16>, vector<128x128xbf16>, vector<8x128xf32> -> vector<8x128xf32>
    %48 = arith.addf %42, %47 : vector<8x128xf32>
    %c0_66 = arith.constant 0 : index
    %c0_67 = arith.constant 0 : index
    %49 = vector.load %arg9[%c0_66, %c0_67] : memref<8x128xf32, #tpu.memory_space<vmem>>, vector<8x128xf32>
    tpu.vector_store %arg9[%c0_66, %c0_67], %48 {strides = array<i32>} : memref<8x128xf32, #tpu.memory_space<vmem>>, vector<8x128xf32>,
    %c0_68 = arith.constant 0 : index
    %c0_69 = arith.constant 0 : index
    %50 = vector.load %arg9[%c0_68, %c0_69] : memref<8x128xf32, #tpu.memory_space<vmem>>, vector<8x128xf32>
    %c0_70 = arith.constant 0 : index
    %c0_71 = arith.constant 0 : index
    %c0_72 = arith.constant 0 : index
    %c0_73 = arith.constant 0 : index
    %51 = vector.load %arg4[%c0_70, %c0_71, %c0_72, %c0_73] : memref<1x1x10x128xbf16, #tpu.memory_space<vmem>>, vector<1x1x8x128xbf16>
    %52 = vector.shape_cast %51 : vector<1x1x8x128xbf16> to vector<8x128xbf16>
    %c6 = arith.constant 6 : index
    %c0_74 = arith.constant 0 : index
    %c0_75 = arith.constant 0 : index
    %53 = vector.load %arg5[%c6, %c0_74, %c0_75] : memref<9x128x128xbf16, #tpu.memory_space<vmem>>, vector<1x128x128xbf16>
    %54 = vector.shape_cast %53 : vector<1x128x128xbf16> to vector<128x128xbf16>
    %cst_76 = arith.constant dense<0.000000e+00> : vector<8x128xf32>
    %55 = tpu.matmul %52, %54, %cst_76 {dimension_numbers = #tpu.dot_dimension_numbers<[1], [0], [0], [1], [0, 0, 1, 1], [], []>} : vector<8x128xbf16>, vector<128x128xbf16>, vector<8x128xf32> -> vector<8x128xf32>
    %56 = arith.addf %50, %55 : vector<8x128xf32>
    %c0_77 = arith.constant 0 : index
    %c0_78 = arith.constant 0 : index
    %57 = vector.load %arg9[%c0_77, %c0_78] : memref<8x128xf32, #tpu.memory_space<vmem>>, vector<8x128xf32>
    tpu.vector_store %arg9[%c0_77, %c0_78], %56 {strides = array<i32>} : memref<8x128xf32, #tpu.memory_space<vmem>>, vector<8x128xf32>,
    %c0_79 = arith.constant 0 : index
    %c0_80 = arith.constant 0 : index
    %58 = vector.load %arg9[%c0_79, %c0_80] : memref<8x128xf32, #tpu.memory_space<vmem>>, vector<8x128xf32>
    %c0_81 = arith.constant 0 : index
    %c0_82 = arith.constant 0 : index
    %c1_83 = arith.constant 1 : index
    %c0_84 = arith.constant 0 : index
    %59 = vector.load %arg4[%c0_81, %c0_82, %c1_83, %c0_84] : memref<1x1x10x128xbf16, #tpu.memory_space<vmem>>, vector<1x1x8x128xbf16>
    %60 = vector.shape_cast %59 : vector<1x1x8x128xbf16> to vector<8x128xbf16>
    %c7 = arith.constant 7 : index
    %c0_85 = arith.constant 0 : index
    %c0_86 = arith.constant 0 : index
    %61 = vector.load %arg5[%c7, %c0_85, %c0_86] : memref<9x128x128xbf16, #tpu.memory_space<vmem>>, vector<1x128x128xbf16>
    %62 = vector.shape_cast %61 : vector<1x128x128xbf16> to vector<128x128xbf16>
    %cst_87 = arith.constant dense<0.000000e+00> : vector<8x128xf32>
    %63 = tpu.matmul %60, %62, %cst_87 {dimension_numbers = #tpu.dot_dimension_numbers<[1], [0], [0], [1], [0, 0, 1, 1], [], []>} : vector<8x128xbf16>, vector<128x128xbf16>, vector<8x128xf32> -> vector<8x128xf32>
    %64 = arith.addf %58, %63 : vector<8x128xf32>
    %c0_88 = arith.constant 0 : index
    %c0_89 = arith.constant 0 : index
    %65 = vector.load %arg9[%c0_88, %c0_89] : memref<8x128xf32, #tpu.memory_space<vmem>>, vector<8x128xf32>
    tpu.vector_store %arg9[%c0_88, %c0_89], %64 {strides = array<i32>} : memref<8x128xf32, #tpu.memory_space<vmem>>, vector<8x128xf32>,
    %c0_90 = arith.constant 0 : index
    %c0_91 = arith.constant 0 : index
    %66 = vector.load %arg9[%c0_90, %c0_91] : memref<8x128xf32, #tpu.memory_space<vmem>>, vector<8x128xf32>
    %c0_92 = arith.constant 0 : index
    %c0_93 = arith.constant 0 : index
    %c2_94 = arith.constant 2 : index
    %c0_95 = arith.constant 0 : index
    %67 = vector.load %arg4[%c0_92, %c0_93, %c2_94, %c0_95] : memref<1x1x10x128xbf16, #tpu.memory_space<vmem>>, vector<1x1x8x128xbf16>
    %68 = vector.shape_cast %67 : vector<1x1x8x128xbf16> to vector<8x128xbf16>
    %c8 = arith.constant 8 : index
    %c0_96 = arith.constant 0 : index
    %c0_97 = arith.constant 0 : index
    %69 = vector.load %arg5[%c8, %c0_96, %c0_97] : memref<9x128x128xbf16, #tpu.memory_space<vmem>>, vector<1x128x128xbf16>
    %70 = vector.shape_cast %69 : vector<1x128x128xbf16> to vector<128x128xbf16>
    %cst_98 = arith.constant dense<0.000000e+00> : vector<8x128xf32>
    %71 = tpu.matmul %68, %70, %cst_98 {dimension_numbers = #tpu.dot_dimension_numbers<[1], [0], [0], [1], [0, 0, 1, 1], [], []>} : vector<8x128xbf16>, vector<128x128xbf16>, vector<8x128xf32> -> vector<8x128xf32>
    %72 = arith.addf %66, %71 : vector<8x128xf32>
    %c0_99 = arith.constant 0 : index
    %c0_100 = arith.constant 0 : index
    %73 = vector.load %arg9[%c0_99, %c0_100] : memref<8x128xf32, #tpu.memory_space<vmem>>, vector<8x128xf32>
    tpu.vector_store %arg9[%c0_99, %c0_100], %72 {strides = array<i32>} : memref<8x128xf32, #tpu.memory_space<vmem>>, vector<8x128xf32>,
    %c0_101 = arith.constant 0 : index
    %c0_102 = arith.constant 0 : index
    %74 = vector.load %arg9[%c0_101, %c0_102] : memref<8x128xf32, #tpu.memory_space<vmem>>, vector<8x128xf32>
    %c0_103 = arith.constant 0 : index
    %c0_104 = arith.constant 0 : index
    %75 = vector.load %arg6[%c0_103, %c0_104] : memref<1x128xf32, #tpu.memory_space<vmem>>, vector<1x128xf32>
    %76 = vector.broadcast %75 : vector<1x128xf32> to vector<8x128xf32>
    %77 = arith.addf %74, %76 : vector<8x128xf32>
    %c0_105 = arith.constant 0 : index
    %c0_106 = arith.constant 0 : index
    %c0_107 = arith.constant 0 : index
    %c0_108 = arith.constant 0 : index
    %78 = vector.load %arg7[%c0_105, %c0_106, %c0_107, %c0_108] : memref<1x1x8x128xbf16, #tpu.memory_space<vmem>>, vector<1x1x8x128xbf16>
    %79 = vector.shape_cast %78 : vector<1x1x8x128xbf16> to vector<8x128xbf16>
    %80 = arith.extf %79 : vector<8x128xbf16> to vector<8x128xf32>
    %81 = arith.addf %77, %80 : vector<8x128xf32>
    %82 = arith.truncf %81 : vector<8x128xf32> to vector<8x128xbf16>
    %c0_109 = arith.constant 0 : index
    %c0_110 = arith.constant 0 : index
    %c0_111 = arith.constant 0 : index
    %c0_112 = arith.constant 0 : index
    %83 = vector.load %arg8[%c0_109, %c0_110, %c0_111, %c0_112] : memref<1x1x8x128xbf16, #tpu.memory_space<vmem>>, vector<1x1x8x128xbf16>
    %84 = vector.shape_cast %83 : vector<1x1x8x128xbf16> to vector<8x128xbf16>
    %85 = vector.shape_cast %82 : vector<8x128xbf16> to vector<1x1x8x128xbf16>
    tpu.vector_store %arg8[%c0_109, %c0_110, %c0_111, %c0_112], %85 {strides = array<i32>} : memref<1x1x8x128xbf16, #tpu.memory_space<vmem>>, vector<1x1x8x128xbf16>,
    return
  }
  func.func @transform_0(%arg0: i32, %arg1: i32) -> (i32, i32, i32, i32) {
    %c0_i32 = arith.constant 0 : i32
    %c0_i32_0 = arith.constant 0 : i32
    %c0_i32_1 = arith.constant 0 : i32
    return %arg0, %arg1, %c0_i32, %c0_i32_0 : i32, i32, i32, i32
  }
  func.func @transform_1(%arg0: i32, %arg1: i32) -> (i32, i32, i32, i32) {
    %c1_i32 = arith.constant 1 : i32
    %0 = arith.addi %arg1, %c1_i32 : i32
    %c0_i32 = arith.constant 0 : i32
    %c0_i32_0 = arith.constant 0 : i32
    %c0_i32_1 = arith.constant 0 : i32
    return %arg0, %0, %c0_i32, %c0_i32_0 : i32, i32, i32, i32
  }
  func.func @transform_2(%arg0: i32, %arg1: i32) -> (i32, i32, i32, i32) {
    %c2_i32 = arith.constant 2 : i32
    %0 = arith.addi %arg1, %c2_i32 : i32
    %c0_i32 = arith.constant 0 : i32
    %c0_i32_0 = arith.constant 0 : i32
    %c0_i32_1 = arith.constant 0 : i32
    return %arg0, %0, %c0_i32, %c0_i32_0 : i32, i32, i32, i32
  }
  func.func @transform_3(%arg0: i32, %arg1: i32) -> (i32, i32, i32) {
    %c0_i32 = arith.constant 0 : i32
    %c0_i32_0 = arith.constant 0 : i32
    %c0_i32_1 = arith.constant 0 : i32
    %c0_i32_2 = arith.constant 0 : i32
    return %c0_i32, %c0_i32_0, %c0_i32_1 : i32, i32, i32
  }
  func.func @transform_4(%arg0: i32, %arg1: i32) -> (i32, i32) {
    %c0_i32 = arith.constant 0 : i32
    %c0_i32_0 = arith.constant 0 : i32
    %c0_i32_1 = arith.constant 0 : i32
    return %c0_i32, %c0_i32_0 : i32, i32
  }
  func.func @transform_5(%arg0: i32, %arg1: i32) -> (i32, i32, i32, i32) {
    %c0_i32 = arith.constant 0 : i32
    %c0_i32_0 = arith.constant 0 : i32
    %c0_i32_1 = arith.constant 0 : i32
    return %arg0, %arg1, %c0_i32, %c0_i32_0 : i32, i32, i32, i32
  }
  func.func @transform_6(%arg0: i32, %arg1: i32) -> (i32, i32, i32, i32) {
    %c0_i32 = arith.constant 0 : i32
    %c0_i32_0 = arith.constant 0 : i32
    %c0_i32_1 = arith.constant 0 : i32
    return %arg0, %arg1, %c0_i32, %c0_i32_0 : i32, i32, i32, i32
  }
}

module attributes {stable_mosaic.version = 11 : i64} {
  func.func @_attn_kernel(%arg0: i32, %arg1: i32, %arg2: i32, %arg3: memref<1x64x128xbf16, #tpu.memory_space<vmem>>, %arg4: memref<1x64x128xbf16, #tpu.memory_space<vmem>>, %arg5: memref<1x64x128xbf16, #tpu.memory_space<vmem>>, %arg6: memref<1x64x128xbf16, #tpu.memory_space<vmem>>, %arg7: memref<64x1xf32, #tpu.memory_space<vmem>>, %arg8: memref<64x1xf32, #tpu.memory_space<vmem>>, %arg9: memref<64x128xf32, #tpu.memory_space<vmem>>) attributes {dimension_semantics = [#tpu.dimension_semantics<parallel>, #tpu.dimension_semantics<parallel>, #tpu.dimension_semantics<arbitrary>], iteration_bounds = array<i64: 2, 1, 1>, scalar_prefetch = 0 : i64, scratch_operands = 3 : i64, tpu.core_type = #tpu.core_type<tc>, window_params = [{transform_indices = @transform_0, window_bounds = array<i64: 1, 64, 128>}, {transform_indices = @transform_1, window_bounds = array<i64: 1, 64, 128>}, {transform_indices = @transform_2, window_bounds = array<i64: 1, 64, 128>}, {transform_indices = @transform_3, window_bounds = array<i64: 1, 64, 128>}]} {
    %c0_i32 = arith.constant 0 : i32
    %0 = arith.cmpi eq, %arg2, %c0_i32 : i32
    %1 = arith.extui %0 : i1 to i32
    %c0_i32_0 = arith.constant 0 : i32
    %2 = arith.cmpi ne, %1, %c0_i32_0 : i32
    scf.if %2 {
      %cst_27 = arith.constant 0xFF800000 : f32
      %38 = vector.broadcast %cst_27 : f32 to vector<64x1xf32>
      %c0_28 = arith.constant 0 : index
      %c0_29 = arith.constant 0 : index
      %39 = vector.load %arg7[%c0_28, %c0_29] : memref<64x1xf32, #tpu.memory_space<vmem>>, vector<64x1xf32>
      tpu.vector_store %arg7[%c0_28, %c0_29], %38 {strides = array<i32>} : memref<64x1xf32, #tpu.memory_space<vmem>>, vector<64x1xf32>,
      %cst_30 = arith.constant 0.000000e+00 : f32
      %40 = vector.broadcast %cst_30 : f32 to vector<64x1xf32>
      %c0_31 = arith.constant 0 : index
      %c0_32 = arith.constant 0 : index
      %41 = vector.load %arg8[%c0_31, %c0_32] : memref<64x1xf32, #tpu.memory_space<vmem>>, vector<64x1xf32>
      tpu.vector_store %arg8[%c0_31, %c0_32], %40 {strides = array<i32>} : memref<64x1xf32, #tpu.memory_space<vmem>>, vector<64x1xf32>,
      %cst_33 = arith.constant 0.000000e+00 : f32
      %42 = vector.broadcast %cst_33 : f32 to vector<64x128xf32>
      %c0_34 = arith.constant 0 : index
      %c0_35 = arith.constant 0 : index
      %43 = vector.load %arg9[%c0_34, %c0_35] : memref<64x128xf32, #tpu.memory_space<vmem>>, vector<64x128xf32>
      tpu.vector_store %arg9[%c0_34, %c0_35], %42 {strides = array<i32>} : memref<64x128xf32, #tpu.memory_space<vmem>>, vector<64x128xf32>,
    } else {
    }
    %c0 = arith.constant 0 : index
    %c0_1 = arith.constant 0 : index
    %c0_2 = arith.constant 0 : index
    %3 = vector.load %arg3[%c0, %c0_1, %c0_2] : memref<1x64x128xbf16, #tpu.memory_space<vmem>>, vector<1x64x128xbf16>
    %4 = vector.shape_cast %3 : vector<1x64x128xbf16> to vector<64x128xbf16>
    %c0_3 = arith.constant 0 : index
    %c0_4 = arith.constant 0 : index
    %c0_5 = arith.constant 0 : index
    %5 = vector.load %arg4[%c0_3, %c0_4, %c0_5] : memref<1x64x128xbf16, #tpu.memory_space<vmem>>, vector<1x64x128xbf16>
    %6 = vector.shape_cast %5 : vector<1x64x128xbf16> to vector<64x128xbf16>
    %c0_6 = arith.constant 0 : index
    %c0_7 = arith.constant 0 : index
    %c0_8 = arith.constant 0 : index
    %7 = vector.load %arg5[%c0_6, %c0_7, %c0_8] : memref<1x64x128xbf16, #tpu.memory_space<vmem>>, vector<1x64x128xbf16>
    %8 = vector.shape_cast %7 : vector<1x64x128xbf16> to vector<64x128xbf16>
    %cst = arith.constant dense<0.000000e+00> : vector<64x64xf32>
    %9 = tpu.matmul %4, %6, %cst {dimension_numbers = #tpu.dot_dimension_numbers<[1], [1], [0], [0], [0, 0, 1, 0], [], []>} : vector<64x128xbf16>, vector<64x128xbf16>, vector<64x64xf32> -> vector<64x64xf32>
    %cst_9 = arith.constant 1.250000e-01 : f32
    %10 = vector.broadcast %cst_9 : f32 to vector<64x64xf32>
    %11 = arith.mulf %9, %10 : vector<64x64xf32>
    %c0_10 = arith.constant 0 : index
    %c0_11 = arith.constant 0 : index
    %12 = vector.load %arg7[%c0_10, %c0_11] : memref<64x1xf32, #tpu.memory_space<vmem>>, vector<64x1xf32>
    %cst_12 = arith.constant dense<0xFF800000> : vector<64xf32>
    %13 = vector.multi_reduction <maximumf>, %11, %cst_12 [1] : vector<64x64xf32> to vector<64xf32>
    %14 = vector.shape_cast %13 : vector<64xf32> to vector<64x1xf32>
    %15 = arith.maximumf %12, %14 : vector<64x1xf32>
    %16 = arith.subf %12, %15 : vector<64x1xf32>
    %17 = math.exp %16 : vector<64x1xf32>
    %18 = vector.broadcast %15 : vector<64x1xf32> to vector<64x64xf32>
    %19 = arith.subf %11, %18 : vector<64x64xf32>
    %20 = math.exp %19 : vector<64x64xf32>
    %c0_13 = arith.constant 0 : index
    %c0_14 = arith.constant 0 : index
    %21 = vector.load %arg8[%c0_13, %c0_14] : memref<64x1xf32, #tpu.memory_space<vmem>>, vector<64x1xf32>
    %22 = arith.mulf %17, %21 : vector<64x1xf32>
    %cst_15 = arith.constant dense<0.000000e+00> : vector<64xf32>
    %23 = vector.multi_reduction <add>, %20, %cst_15 [1] : vector<64x64xf32> to vector<64xf32>
    %24 = vector.shape_cast %23 : vector<64xf32> to vector<64x1xf32>
    %25 = arith.addf %22, %24 : vector<64x1xf32>
    %c0_16 = arith.constant 0 : index
    %c0_17 = arith.constant 0 : index
    %26 = vector.load %arg8[%c0_16, %c0_17] : memref<64x1xf32, #tpu.memory_space<vmem>>, vector<64x1xf32>
    tpu.vector_store %arg8[%c0_16, %c0_17], %25 {strides = array<i32>} : memref<64x1xf32, #tpu.memory_space<vmem>>, vector<64x1xf32>,
    %c0_18 = arith.constant 0 : index
    %c0_19 = arith.constant 0 : index
    %27 = vector.load %arg9[%c0_18, %c0_19] : memref<64x128xf32, #tpu.memory_space<vmem>>, vector<64x128xf32>
    %28 = vector.broadcast %17 : vector<64x1xf32> to vector<64x128xf32>
    %29 = arith.mulf %28, %27 : vector<64x128xf32>
    %30 = arith.truncf %20 : vector<64x64xf32> to vector<64x64xbf16>
    %cst_20 = arith.constant dense<0.000000e+00> : vector<64x128xf32>
    %31 = tpu.matmul %30, %8, %cst_20 {dimension_numbers = #tpu.dot_dimension_numbers<[1], [0], [0], [1], [0, 0, 1, 1], [], []>} : vector<64x64xbf16>, vector<64x128xbf16>, vector<64x128xf32> -> vector<64x128xf32>
    %32 = arith.addf %29, %31 : vector<64x128xf32>
    %c0_21 = arith.constant 0 : index
    %c0_22 = arith.constant 0 : index
    %33 = vector.load %arg9[%c0_21, %c0_22] : memref<64x128xf32, #tpu.memory_space<vmem>>, vector<64x128xf32>
    tpu.vector_store %arg9[%c0_21, %c0_22], %32 {strides = array<i32>} : memref<64x128xf32, #tpu.memory_space<vmem>>, vector<64x128xf32>,
    %c0_23 = arith.constant 0 : index
    %c0_24 = arith.constant 0 : index
    %34 = vector.load %arg7[%c0_23, %c0_24] : memref<64x1xf32, #tpu.memory_space<vmem>>, vector<64x1xf32>
    tpu.vector_store %arg7[%c0_23, %c0_24], %15 {strides = array<i32>} : memref<64x1xf32, #tpu.memory_space<vmem>>, vector<64x1xf32>,
    %c0_i32_25 = arith.constant 0 : i32
    %35 = arith.cmpi eq, %arg2, %c0_i32_25 : i32
    %36 = arith.extui %35 : i1 to i32
    %c0_i32_26 = arith.constant 0 : i32
    %37 = arith.cmpi ne, %36, %c0_i32_26 : i32
    scf.if %37 {
      %c0_27 = arith.constant 0 : index
      %c0_28 = arith.constant 0 : index
      %38 = vector.load %arg9[%c0_27, %c0_28] : memref<64x128xf32, #tpu.memory_space<vmem>>, vector<64x128xf32>
      %c0_29 = arith.constant 0 : index
      %c0_30 = arith.constant 0 : index
      %39 = vector.load %arg8[%c0_29, %c0_30] : memref<64x1xf32, #tpu.memory_space<vmem>>, vector<64x1xf32>
      %40 = tpu.reciprocal %39 {approx = true} : vector<64x1xf32> -> vector<64x1xf32>
      %41 = vector.broadcast %40 : vector<64x1xf32> to vector<64x128xf32>
      %42 = arith.mulf %38, %41 : vector<64x128xf32>
      %43 = arith.truncf %42 : vector<64x128xf32> to vector<64x128xbf16>
      %c0_31 = arith.constant 0 : index
      %c0_32 = arith.constant 0 : index
      %c0_33 = arith.constant 0 : index
      %44 = vector.load %arg6[%c0_31, %c0_32, %c0_33] : memref<1x64x128xbf16, #tpu.memory_space<vmem>>, vector<1x64x128xbf16>
      %45 = vector.shape_cast %44 : vector<1x64x128xbf16> to vector<64x128xbf16>
      %46 = vector.shape_cast %43 : vector<64x128xbf16> to vector<1x64x128xbf16>
      tpu.vector_store %arg6[%c0_31, %c0_32, %c0_33], %46 {strides = array<i32>} : memref<1x64x128xbf16, #tpu.memory_space<vmem>>, vector<1x64x128xbf16>,
    } else {
    }
    return
  }
  func.func @transform_0(%arg0: i32, %arg1: i32, %arg2: i32) -> (i32, i32, i32) {
    %c0_i32 = arith.constant 0 : i32
    %c0_i32_0 = arith.constant 0 : i32
    return %arg0, %arg1, %c0_i32 : i32, i32, i32
  }
  func.func @transform_1(%arg0: i32, %arg1: i32, %arg2: i32) -> (i32, i32, i32) {
    %c0_i32 = arith.constant 0 : i32
    %c0_i32_0 = arith.constant 0 : i32
    return %arg0, %arg2, %c0_i32 : i32, i32, i32
  }
  func.func @transform_2(%arg0: i32, %arg1: i32, %arg2: i32) -> (i32, i32, i32) {
    %c0_i32 = arith.constant 0 : i32
    %c0_i32_0 = arith.constant 0 : i32
    return %arg0, %arg2, %c0_i32 : i32, i32, i32
  }
  func.func @transform_3(%arg0: i32, %arg1: i32, %arg2: i32) -> (i32, i32, i32) {
    %c0_i32 = arith.constant 0 : i32
    %c0_i32_0 = arith.constant 0 : i32
    return %arg0, %arg1, %c0_i32 : i32, i32, i32
  }
}

module attributes {stable_mosaic.version = 11 : i64} {
  func.func @_mm_bias_kernel(%arg0: i32, %arg1: i32, %arg2: i32, %arg3: memref<128x128xbf16, #tpu.memory_space<vmem>>, %arg4: memref<128x128xbf16, #tpu.memory_space<vmem>>, %arg5: memref<1x128xf32, #tpu.memory_space<vmem>>, %arg6: memref<128x128xbf16, #tpu.memory_space<vmem>>, %arg7: memref<128x128xf32, #tpu.memory_space<vmem>>) attributes {dimension_semantics = [#tpu.dimension_semantics<parallel>, #tpu.dimension_semantics<parallel>, #tpu.dimension_semantics<arbitrary>], iteration_bounds = array<i64: 1, 3, 1>, scalar_prefetch = 0 : i64, scratch_operands = 1 : i64, tpu.core_type = #tpu.core_type<tc>, window_params = [{transform_indices = @transform_0, window_bounds = array<i64: 128, 128>}, {transform_indices = @transform_1, window_bounds = array<i64: 128, 128>}, {transform_indices = @transform_2, window_bounds = array<i64: 1, 128>}, {transform_indices = @transform_3, window_bounds = array<i64: 128, 128>}]} {
    %c0_i32 = arith.constant 0 : i32
    %0 = arith.cmpi eq, %arg2, %c0_i32 : i32
    %1 = arith.extui %0 : i1 to i32
    %c0_i32_0 = arith.constant 0 : i32
    %2 = arith.cmpi ne, %1, %c0_i32_0 : i32
    scf.if %2 {
      %cst_10 = arith.constant 0.000000e+00 : f32
      %12 = vector.broadcast %cst_10 : f32 to vector<128x128xf32>
      %c0_11 = arith.constant 0 : index
      %c0_12 = arith.constant 0 : index
      %13 = vector.load %arg7[%c0_11, %c0_12] : memref<128x128xf32, #tpu.memory_space<vmem>>, vector<128x128xf32>
      tpu.vector_store %arg7[%c0_11, %c0_12], %12 {strides = array<i32>} : memref<128x128xf32, #tpu.memory_space<vmem>>, vector<128x128xf32>,
    } else {
    }
    %c0 = arith.constant 0 : index
    %c0_1 = arith.constant 0 : index
    %3 = vector.load %arg7[%c0, %c0_1] : memref<128x128xf32, #tpu.memory_space<vmem>>, vector<128x128xf32>
    %c0_2 = arith.constant 0 : index
    %c0_3 = arith.constant 0 : index
    %4 = vector.load %arg3[%c0_2, %c0_3] : memref<128x128xbf16, #tpu.memory_space<vmem>>, vector<128x128xbf16>
    %c0_4 = arith.constant 0 : index
    %c0_5 = arith.constant 0 : index
    %5 = vector.load %arg4[%c0_4, %c0_5] : memref<128x128xbf16, #tpu.memory_space<vmem>>, vector<128x128xbf16>
    %cst = arith.constant dense<0.000000e+00> : vector<128x128xf32>
    %6 = tpu.matmul %4, %5, %cst {dimension_numbers = #tpu.dot_dimension_numbers<[1], [0], [0], [1], [0, 0, 1, 1], [], []>} : vector<128x128xbf16>, vector<128x128xbf16>, vector<128x128xf32> -> vector<128x128xf32>
    %7 = arith.addf %3, %6 : vector<128x128xf32>
    %c0_6 = arith.constant 0 : index
    %c0_7 = arith.constant 0 : index
    %8 = vector.load %arg7[%c0_6, %c0_7] : memref<128x128xf32, #tpu.memory_space<vmem>>, vector<128x128xf32>
    tpu.vector_store %arg7[%c0_6, %c0_7], %7 {strides = array<i32>} : memref<128x128xf32, #tpu.memory_space<vmem>>, vector<128x128xf32>,
    %c0_i32_8 = arith.constant 0 : i32
    %9 = arith.cmpi eq, %arg2, %c0_i32_8 : i32
    %10 = arith.extui %9 : i1 to i32
    %c0_i32_9 = arith.constant 0 : i32
    %11 = arith.cmpi ne, %10, %c0_i32_9 : i32
    scf.if %11 {
      %c0_10 = arith.constant 0 : index
      %c0_11 = arith.constant 0 : index
      %12 = vector.load %arg7[%c0_10, %c0_11] : memref<128x128xf32, #tpu.memory_space<vmem>>, vector<128x128xf32>
      %c0_12 = arith.constant 0 : index
      %c0_13 = arith.constant 0 : index
      %13 = vector.load %arg5[%c0_12, %c0_13] : memref<1x128xf32, #tpu.memory_space<vmem>>, vector<1x128xf32>
      %14 = vector.broadcast %13 : vector<1x128xf32> to vector<128x128xf32>
      %15 = arith.addf %12, %14 : vector<128x128xf32>
      %16 = arith.truncf %15 : vector<128x128xf32> to vector<128x128xbf16>
      %c0_14 = arith.constant 0 : index
      %c0_15 = arith.constant 0 : index
      %17 = vector.load %arg6[%c0_14, %c0_15] : memref<128x128xbf16, #tpu.memory_space<vmem>>, vector<128x128xbf16>
      tpu.vector_store %arg6[%c0_14, %c0_15], %16 {strides = array<i32>} : memref<128x128xbf16, #tpu.memory_space<vmem>>, vector<128x128xbf16>,
    } else {
    }
    return
  }
  func.func @transform_0(%arg0: i32, %arg1: i32, %arg2: i32) -> (i32, i32) {
    %c0_i32 = arith.constant 0 : i32
    return %arg0, %arg2 : i32, i32
  }
  func.func @transform_1(%arg0: i32, %arg1: i32, %arg2: i32) -> (i32, i32) {
    %c0_i32 = arith.constant 0 : i32
    return %arg2, %arg1 : i32, i32
  }
  func.func @transform_2(%arg0: i32, %arg1: i32, %arg2: i32) -> (i32, i32) {
    %c0_i32 = arith.constant 0 : i32
    %c0_i32_0 = arith.constant 0 : i32
    return %c0_i32, %arg1 : i32, i32
  }
  func.func @transform_3(%arg0: i32, %arg1: i32, %arg2: i32) -> (i32, i32) {
    %c0_i32 = arith.constant 0 : i32
    return %arg0, %arg1 : i32, i32
  }
}

module attributes {stable_mosaic.version = 11 : i64} {
  func.func @_mm_bias_res_kernel(%arg0: i32, %arg1: i32, %arg2: i32, %arg3: memref<128x128xbf16, #tpu.memory_space<vmem>>, %arg4: memref<128x128xbf16, #tpu.memory_space<vmem>>, %arg5: memref<1x128xf32, #tpu.memory_space<vmem>>, %arg6: memref<128x128xbf16, #tpu.memory_space<vmem>>, %arg7: memref<128x128xbf16, #tpu.memory_space<vmem>>, %arg8: memref<128x128xf32, #tpu.memory_space<vmem>>) attributes {dimension_semantics = [#tpu.dimension_semantics<parallel>, #tpu.dimension_semantics<parallel>, #tpu.dimension_semantics<arbitrary>], iteration_bounds = array<i64: 1, 1, 1>, scalar_prefetch = 0 : i64, scratch_operands = 1 : i64, tpu.core_type = #tpu.core_type<tc>, window_params = [{transform_indices = @transform_0, window_bounds = array<i64: 128, 128>}, {transform_indices = @transform_1, window_bounds = array<i64: 128, 128>}, {transform_indices = @transform_2, window_bounds = array<i64: 1, 128>}, {transform_indices = @transform_3, window_bounds = array<i64: 128, 128>}, {transform_indices = @transform_4, window_bounds = array<i64: 128, 128>}]} {
    %c0_i32 = arith.constant 0 : i32
    %0 = arith.cmpi eq, %arg2, %c0_i32 : i32
    %1 = arith.extui %0 : i1 to i32
    %c0_i32_0 = arith.constant 0 : i32
    %2 = arith.cmpi ne, %1, %c0_i32_0 : i32
    scf.if %2 {
      %cst_10 = arith.constant 0.000000e+00 : f32
      %12 = vector.broadcast %cst_10 : f32 to vector<128x128xf32>
      %c0_11 = arith.constant 0 : index
      %c0_12 = arith.constant 0 : index
      %13 = vector.load %arg8[%c0_11, %c0_12] : memref<128x128xf32, #tpu.memory_space<vmem>>, vector<128x128xf32>
      tpu.vector_store %arg8[%c0_11, %c0_12], %12 {strides = array<i32>} : memref<128x128xf32, #tpu.memory_space<vmem>>, vector<128x128xf32>,
    } else {
    }
    %c0 = arith.constant 0 : index
    %c0_1 = arith.constant 0 : index
    %3 = vector.load %arg8[%c0, %c0_1] : memref<128x128xf32, #tpu.memory_space<vmem>>, vector<128x128xf32>
    %c0_2 = arith.constant 0 : index
    %c0_3 = arith.constant 0 : index
    %4 = vector.load %arg3[%c0_2, %c0_3] : memref<128x128xbf16, #tpu.memory_space<vmem>>, vector<128x128xbf16>
    %c0_4 = arith.constant 0 : index
    %c0_5 = arith.constant 0 : index
    %5 = vector.load %arg4[%c0_4, %c0_5] : memref<128x128xbf16, #tpu.memory_space<vmem>>, vector<128x128xbf16>
    %cst = arith.constant dense<0.000000e+00> : vector<128x128xf32>
    %6 = tpu.matmul %4, %5, %cst {dimension_numbers = #tpu.dot_dimension_numbers<[1], [0], [0], [1], [0, 0, 1, 1], [], []>} : vector<128x128xbf16>, vector<128x128xbf16>, vector<128x128xf32> -> vector<128x128xf32>
    %7 = arith.addf %3, %6 : vector<128x128xf32>
    %c0_6 = arith.constant 0 : index
    %c0_7 = arith.constant 0 : index
    %8 = vector.load %arg8[%c0_6, %c0_7] : memref<128x128xf32, #tpu.memory_space<vmem>>, vector<128x128xf32>
    tpu.vector_store %arg8[%c0_6, %c0_7], %7 {strides = array<i32>} : memref<128x128xf32, #tpu.memory_space<vmem>>, vector<128x128xf32>,
    %c0_i32_8 = arith.constant 0 : i32
    %9 = arith.cmpi eq, %arg2, %c0_i32_8 : i32
    %10 = arith.extui %9 : i1 to i32
    %c0_i32_9 = arith.constant 0 : i32
    %11 = arith.cmpi ne, %10, %c0_i32_9 : i32
    scf.if %11 {
      %c0_10 = arith.constant 0 : index
      %c0_11 = arith.constant 0 : index
      %12 = vector.load %arg8[%c0_10, %c0_11] : memref<128x128xf32, #tpu.memory_space<vmem>>, vector<128x128xf32>
      %c0_12 = arith.constant 0 : index
      %c0_13 = arith.constant 0 : index
      %13 = vector.load %arg5[%c0_12, %c0_13] : memref<1x128xf32, #tpu.memory_space<vmem>>, vector<1x128xf32>
      %14 = vector.broadcast %13 : vector<1x128xf32> to vector<128x128xf32>
      %15 = arith.addf %12, %14 : vector<128x128xf32>
      %c0_14 = arith.constant 0 : index
      %c0_15 = arith.constant 0 : index
      %16 = vector.load %arg6[%c0_14, %c0_15] : memref<128x128xbf16, #tpu.memory_space<vmem>>, vector<128x128xbf16>
      %17 = arith.extf %16 : vector<128x128xbf16> to vector<128x128xf32>
      %18 = arith.addf %15, %17 : vector<128x128xf32>
      %19 = arith.truncf %18 : vector<128x128xf32> to vector<128x128xbf16>
      %c0_16 = arith.constant 0 : index
      %c0_17 = arith.constant 0 : index
      %20 = vector.load %arg7[%c0_16, %c0_17] : memref<128x128xbf16, #tpu.memory_space<vmem>>, vector<128x128xbf16>
      tpu.vector_store %arg7[%c0_16, %c0_17], %19 {strides = array<i32>} : memref<128x128xbf16, #tpu.memory_space<vmem>>, vector<128x128xbf16>,
    } else {
    }
    return
  }
  func.func @transform_0(%arg0: i32, %arg1: i32, %arg2: i32) -> (i32, i32) {
    %c0_i32 = arith.constant 0 : i32
    return %arg0, %arg2 : i32, i32
  }
  func.func @transform_1(%arg0: i32, %arg1: i32, %arg2: i32) -> (i32, i32) {
    %c0_i32 = arith.constant 0 : i32
    return %arg2, %arg1 : i32, i32
  }
  func.func @transform_2(%arg0: i32, %arg1: i32, %arg2: i32) -> (i32, i32) {
    %c0_i32 = arith.constant 0 : i32
    %c0_i32_0 = arith.constant 0 : i32
    return %c0_i32, %arg1 : i32, i32
  }
  func.func @transform_3(%arg0: i32, %arg1: i32, %arg2: i32) -> (i32, i32) {
    %c0_i32 = arith.constant 0 : i32
    return %arg0, %arg1 : i32, i32
  }
  func.func @transform_4(%arg0: i32, %arg1: i32, %arg2: i32) -> (i32, i32) {
    %c0_i32 = arith.constant 0 : i32
    return %arg0, %arg1 : i32, i32
  }
}

module attributes {stable_mosaic.version = 11 : i64} {
  func.func @_conv3x3_kernel(%arg0: i32, %arg1: i32, %arg2: memref<1x1x18x128xbf16, #tpu.memory_space<vmem>>, %arg3: memref<1x1x18x128xbf16, #tpu.memory_space<vmem>>, %arg4: memref<1x1x18x128xbf16, #tpu.memory_space<vmem>>, %arg5: memref<9x128x128xbf16, #tpu.memory_space<vmem>>, %arg6: memref<1x128xf32, #tpu.memory_space<vmem>>, %arg7: memref<1x1x16x128xbf16, #tpu.memory_space<vmem>>, %arg8: memref<16x128xf32, #tpu.memory_space<vmem>>) attributes {dimension_semantics = [#tpu.dimension_semantics<parallel>, #tpu.dimension_semantics<parallel>], iteration_bounds = array<i64: 2, 16>, scalar_prefetch = 0 : i64, scratch_operands = 1 : i64, tpu.core_type = #tpu.core_type<tc>, window_params = [{transform_indices = @transform_0, window_bounds = array<i64: 1, 1, 18, 128>}, {transform_indices = @transform_1, window_bounds = array<i64: 1, 1, 18, 128>}, {transform_indices = @transform_2, window_bounds = array<i64: 1, 1, 18, 128>}, {pipeline_mode = #tpu.pipeline_mode<synchronous>, transform_indices = @transform_3, window_bounds = array<i64: 9, 128, 128>}, {pipeline_mode = #tpu.pipeline_mode<synchronous>, transform_indices = @transform_4, window_bounds = array<i64: 1, 128>}, {transform_indices = @transform_5, window_bounds = array<i64: 1, 1, 16, 128>}]} {
    %cst = arith.constant 0.000000e+00 : f32
    %0 = vector.broadcast %cst : f32 to vector<16x128xf32>
    %c0 = arith.constant 0 : index
    %c0_0 = arith.constant 0 : index
    %1 = vector.load %arg8[%c0, %c0_0] : memref<16x128xf32, #tpu.memory_space<vmem>>, vector<16x128xf32>
    tpu.vector_store %arg8[%c0, %c0_0], %0 {strides = array<i32>} : memref<16x128xf32, #tpu.memory_space<vmem>>, vector<16x128xf32>,
    %c0_1 = arith.constant 0 : index
    %c0_2 = arith.constant 0 : index
    %2 = vector.load %arg8[%c0_1, %c0_2] : memref<16x128xf32, #tpu.memory_space<vmem>>, vector<16x128xf32>
    %c0_3 = arith.constant 0 : index
    %c0_4 = arith.constant 0 : index
    %c0_5 = arith.constant 0 : index
    %c0_6 = arith.constant 0 : index
    %3 = vector.load %arg2[%c0_3, %c0_4, %c0_5, %c0_6] : memref<1x1x18x128xbf16, #tpu.memory_space<vmem>>, vector<1x1x16x128xbf16>
    %4 = vector.shape_cast %3 : vector<1x1x16x128xbf16> to vector<16x128xbf16>
    %c0_7 = arith.constant 0 : index
    %c0_8 = arith.constant 0 : index
    %c0_9 = arith.constant 0 : index
    %5 = vector.load %arg5[%c0_7, %c0_8, %c0_9] : memref<9x128x128xbf16, #tpu.memory_space<vmem>>, vector<1x128x128xbf16>
    %6 = vector.shape_cast %5 : vector<1x128x128xbf16> to vector<128x128xbf16>
    %cst_10 = arith.constant dense<0.000000e+00> : vector<16x128xf32>
    %7 = tpu.matmul %4, %6, %cst_10 {dimension_numbers = #tpu.dot_dimension_numbers<[1], [0], [0], [1], [0, 0, 1, 1], [], []>} : vector<16x128xbf16>, vector<128x128xbf16>, vector<16x128xf32> -> vector<16x128xf32>
    %8 = arith.addf %2, %7 : vector<16x128xf32>
    %c0_11 = arith.constant 0 : index
    %c0_12 = arith.constant 0 : index
    %9 = vector.load %arg8[%c0_11, %c0_12] : memref<16x128xf32, #tpu.memory_space<vmem>>, vector<16x128xf32>
    tpu.vector_store %arg8[%c0_11, %c0_12], %8 {strides = array<i32>} : memref<16x128xf32, #tpu.memory_space<vmem>>, vector<16x128xf32>,
    %c0_13 = arith.constant 0 : index
    %c0_14 = arith.constant 0 : index
    %10 = vector.load %arg8[%c0_13, %c0_14] : memref<16x128xf32, #tpu.memory_space<vmem>>, vector<16x128xf32>
    %c0_15 = arith.constant 0 : index
    %c0_16 = arith.constant 0 : index
    %c1 = arith.constant 1 : index
    %c0_17 = arith.constant 0 : index
    %11 = vector.load %arg2[%c0_15, %c0_16, %c1, %c0_17] : memref<1x1x18x128xbf16, #tpu.memory_space<vmem>>, vector<1x1x16x128xbf16>
    %12 = vector.shape_cast %11 : vector<1x1x16x128xbf16> to vector<16x128xbf16>
    %c1_18 = arith.constant 1 : index
    %c0_19 = arith.constant 0 : index
    %c0_20 = arith.constant 0 : index
    %13 = vector.load %arg5[%c1_18, %c0_19, %c0_20] : memref<9x128x128xbf16, #tpu.memory_space<vmem>>, vector<1x128x128xbf16>
    %14 = vector.shape_cast %13 : vector<1x128x128xbf16> to vector<128x128xbf16>
    %cst_21 = arith.constant dense<0.000000e+00> : vector<16x128xf32>
    %15 = tpu.matmul %12, %14, %cst_21 {dimension_numbers = #tpu.dot_dimension_numbers<[1], [0], [0], [1], [0, 0, 1, 1], [], []>} : vector<16x128xbf16>, vector<128x128xbf16>, vector<16x128xf32> -> vector<16x128xf32>
    %16 = arith.addf %10, %15 : vector<16x128xf32>
    %c0_22 = arith.constant 0 : index
    %c0_23 = arith.constant 0 : index
    %17 = vector.load %arg8[%c0_22, %c0_23] : memref<16x128xf32, #tpu.memory_space<vmem>>, vector<16x128xf32>
    tpu.vector_store %arg8[%c0_22, %c0_23], %16 {strides = array<i32>} : memref<16x128xf32, #tpu.memory_space<vmem>>, vector<16x128xf32>,
    %c0_24 = arith.constant 0 : index
    %c0_25 = arith.constant 0 : index
    %18 = vector.load %arg8[%c0_24, %c0_25] : memref<16x128xf32, #tpu.memory_space<vmem>>, vector<16x128xf32>
    %c0_26 = arith.constant 0 : index
    %c0_27 = arith.constant 0 : index
    %c2 = arith.constant 2 : index
    %c0_28 = arith.constant 0 : index
    %19 = vector.load %arg2[%c0_26, %c0_27, %c2, %c0_28] : memref<1x1x18x128xbf16, #tpu.memory_space<vmem>>, vector<1x1x16x128xbf16>
    %20 = vector.shape_cast %19 : vector<1x1x16x128xbf16> to vector<16x128xbf16>
    %c2_29 = arith.constant 2 : index
    %c0_30 = arith.constant 0 : index
    %c0_31 = arith.constant 0 : index
    %21 = vector.load %arg5[%c2_29, %c0_30, %c0_31] : memref<9x128x128xbf16, #tpu.memory_space<vmem>>, vector<1x128x128xbf16>
    %22 = vector.shape_cast %21 : vector<1x128x128xbf16> to vector<128x128xbf16>
    %cst_32 = arith.constant dense<0.000000e+00> : vector<16x128xf32>
    %23 = tpu.matmul %20, %22, %cst_32 {dimension_numbers = #tpu.dot_dimension_numbers<[1], [0], [0], [1], [0, 0, 1, 1], [], []>} : vector<16x128xbf16>, vector<128x128xbf16>, vector<16x128xf32> -> vector<16x128xf32>
    %24 = arith.addf %18, %23 : vector<16x128xf32>
    %c0_33 = arith.constant 0 : index
    %c0_34 = arith.constant 0 : index
    %25 = vector.load %arg8[%c0_33, %c0_34] : memref<16x128xf32, #tpu.memory_space<vmem>>, vector<16x128xf32>
    tpu.vector_store %arg8[%c0_33, %c0_34], %24 {strides = array<i32>} : memref<16x128xf32, #tpu.memory_space<vmem>>, vector<16x128xf32>,
    %c0_35 = arith.constant 0 : index
    %c0_36 = arith.constant 0 : index
    %26 = vector.load %arg8[%c0_35, %c0_36] : memref<16x128xf32, #tpu.memory_space<vmem>>, vector<16x128xf32>
    %c0_37 = arith.constant 0 : index
    %c0_38 = arith.constant 0 : index
    %c0_39 = arith.constant 0 : index
    %c0_40 = arith.constant 0 : index
    %27 = vector.load %arg3[%c0_37, %c0_38, %c0_39, %c0_40] : memref<1x1x18x128xbf16, #tpu.memory_space<vmem>>, vector<1x1x16x128xbf16>
    %28 = vector.shape_cast %27 : vector<1x1x16x128xbf16> to vector<16x128xbf16>
    %c3 = arith.constant 3 : index
    %c0_41 = arith.constant 0 : index
    %c0_42 = arith.constant 0 : index
    %29 = vector.load %arg5[%c3, %c0_41, %c0_42] : memref<9x128x128xbf16, #tpu.memory_space<vmem>>, vector<1x128x128xbf16>
    %30 = vector.shape_cast %29 : vector<1x128x128xbf16> to vector<128x128xbf16>
    %cst_43 = arith.constant dense<0.000000e+00> : vector<16x128xf32>
    %31 = tpu.matmul %28, %30, %cst_43 {dimension_numbers = #tpu.dot_dimension_numbers<[1], [0], [0], [1], [0, 0, 1, 1], [], []>} : vector<16x128xbf16>, vector<128x128xbf16>, vector<16x128xf32> -> vector<16x128xf32>
    %32 = arith.addf %26, %31 : vector<16x128xf32>
    %c0_44 = arith.constant 0 : index
    %c0_45 = arith.constant 0 : index
    %33 = vector.load %arg8[%c0_44, %c0_45] : memref<16x128xf32, #tpu.memory_space<vmem>>, vector<16x128xf32>
    tpu.vector_store %arg8[%c0_44, %c0_45], %32 {strides = array<i32>} : memref<16x128xf32, #tpu.memory_space<vmem>>, vector<16x128xf32>,
    %c0_46 = arith.constant 0 : index
    %c0_47 = arith.constant 0 : index
    %34 = vector.load %arg8[%c0_46, %c0_47] : memref<16x128xf32, #tpu.memory_space<vmem>>, vector<16x128xf32>
    %c0_48 = arith.constant 0 : index
    %c0_49 = arith.constant 0 : index
    %c1_50 = arith.constant 1 : index
    %c0_51 = arith.constant 0 : index
    %35 = vector.load %arg3[%c0_48, %c0_49, %c1_50, %c0_51] : memref<1x1x18x128xbf16, #tpu.memory_space<vmem>>, vector<1x1x16x128xbf16>
    %36 = vector.shape_cast %35 : vector<1x1x16x128xbf16> to vector<16x128xbf16>
    %c4 = arith.constant 4 : index
    %c0_52 = arith.constant 0 : index
    %c0_53 = arith.constant 0 : index
    %37 = vector.load %arg5[%c4, %c0_52, %c0_53] : memref<9x128x128xbf16, #tpu.memory_space<vmem>>, vector<1x128x128xbf16>
    %38 = vector.shape_cast %37 : vector<1x128x128xbf16> to vector<128x128xbf16>
    %cst_54 = arith.constant dense<0.000000e+00> : vector<16x128xf32>
    %39 = tpu.matmul %36, %38, %cst_54 {dimension_numbers = #tpu.dot_dimension_numbers<[1], [0], [0], [1], [0, 0, 1, 1], [], []>} : vector<16x128xbf16>, vector<128x128xbf16>, vector<16x128xf32> -> vector<16x128xf32>
    %40 = arith.addf %34, %39 : vector<16x128xf32>
    %c0_55 = arith.constant 0 : index
    %c0_56 = arith.constant 0 : index
    %41 = vector.load %arg8[%c0_55, %c0_56] : memref<16x128xf32, #tpu.memory_space<vmem>>, vector<16x128xf32>
    tpu.vector_store %arg8[%c0_55, %c0_56], %40 {strides = array<i32>} : memref<16x128xf32, #tpu.memory_space<vmem>>, vector<16x128xf32>,
    %c0_57 = arith.constant 0 : index
    %c0_58 = arith.constant 0 : index
    %42 = vector.load %arg8[%c0_57, %c0_58] : memref<16x128xf32, #tpu.memory_space<vmem>>, vector<16x128xf32>
    %c0_59 = arith.constant 0 : index
    %c0_60 = arith.constant 0 : index
    %c2_61 = arith.constant 2 : index
    %c0_62 = arith.constant 0 : index
    %43 = vector.load %arg3[%c0_59, %c0_60, %c2_61, %c0_62] : memref<1x1x18x128xbf16, #tpu.memory_space<vmem>>, vector<1x1x16x128xbf16>
    %44 = vector.shape_cast %43 : vector<1x1x16x128xbf16> to vector<16x128xbf16>
    %c5 = arith.constant 5 : index
    %c0_63 = arith.constant 0 : index
    %c0_64 = arith.constant 0 : index
    %45 = vector.load %arg5[%c5, %c0_63, %c0_64] : memref<9x128x128xbf16, #tpu.memory_space<vmem>>, vector<1x128x128xbf16>
    %46 = vector.shape_cast %45 : vector<1x128x128xbf16> to vector<128x128xbf16>
    %cst_65 = arith.constant dense<0.000000e+00> : vector<16x128xf32>
    %47 = tpu.matmul %44, %46, %cst_65 {dimension_numbers = #tpu.dot_dimension_numbers<[1], [0], [0], [1], [0, 0, 1, 1], [], []>} : vector<16x128xbf16>, vector<128x128xbf16>, vector<16x128xf32> -> vector<16x128xf32>
    %48 = arith.addf %42, %47 : vector<16x128xf32>
    %c0_66 = arith.constant 0 : index
    %c0_67 = arith.constant 0 : index
    %49 = vector.load %arg8[%c0_66, %c0_67] : memref<16x128xf32, #tpu.memory_space<vmem>>, vector<16x128xf32>
    tpu.vector_store %arg8[%c0_66, %c0_67], %48 {strides = array<i32>} : memref<16x128xf32, #tpu.memory_space<vmem>>, vector<16x128xf32>,
    %c0_68 = arith.constant 0 : index
    %c0_69 = arith.constant 0 : index
    %50 = vector.load %arg8[%c0_68, %c0_69] : memref<16x128xf32, #tpu.memory_space<vmem>>, vector<16x128xf32>
    %c0_70 = arith.constant 0 : index
    %c0_71 = arith.constant 0 : index
    %c0_72 = arith.constant 0 : index
    %c0_73 = arith.constant 0 : index
    %51 = vector.load %arg4[%c0_70, %c0_71, %c0_72, %c0_73] : memref<1x1x18x128xbf16, #tpu.memory_space<vmem>>, vector<1x1x16x128xbf16>
    %52 = vector.shape_cast %51 : vector<1x1x16x128xbf16> to vector<16x128xbf16>
    %c6 = arith.constant 6 : index
    %c0_74 = arith.constant 0 : index
    %c0_75 = arith.constant 0 : index
    %53 = vector.load %arg5[%c6, %c0_74, %c0_75] : memref<9x128x128xbf16, #tpu.memory_space<vmem>>, vector<1x128x128xbf16>
    %54 = vector.shape_cast %53 : vector<1x128x128xbf16> to vector<128x128xbf16>
    %cst_76 = arith.constant dense<0.000000e+00> : vector<16x128xf32>
    %55 = tpu.matmul %52, %54, %cst_76 {dimension_numbers = #tpu.dot_dimension_numbers<[1], [0], [0], [1], [0, 0, 1, 1], [], []>} : vector<16x128xbf16>, vector<128x128xbf16>, vector<16x128xf32> -> vector<16x128xf32>
    %56 = arith.addf %50, %55 : vector<16x128xf32>
    %c0_77 = arith.constant 0 : index
    %c0_78 = arith.constant 0 : index
    %57 = vector.load %arg8[%c0_77, %c0_78] : memref<16x128xf32, #tpu.memory_space<vmem>>, vector<16x128xf32>
    tpu.vector_store %arg8[%c0_77, %c0_78], %56 {strides = array<i32>} : memref<16x128xf32, #tpu.memory_space<vmem>>, vector<16x128xf32>,
    %c0_79 = arith.constant 0 : index
    %c0_80 = arith.constant 0 : index
    %58 = vector.load %arg8[%c0_79, %c0_80] : memref<16x128xf32, #tpu.memory_space<vmem>>, vector<16x128xf32>
    %c0_81 = arith.constant 0 : index
    %c0_82 = arith.constant 0 : index
    %c1_83 = arith.constant 1 : index
    %c0_84 = arith.constant 0 : index
    %59 = vector.load %arg4[%c0_81, %c0_82, %c1_83, %c0_84] : memref<1x1x18x128xbf16, #tpu.memory_space<vmem>>, vector<1x1x16x128xbf16>
    %60 = vector.shape_cast %59 : vector<1x1x16x128xbf16> to vector<16x128xbf16>
    %c7 = arith.constant 7 : index
    %c0_85 = arith.constant 0 : index
    %c0_86 = arith.constant 0 : index
    %61 = vector.load %arg5[%c7, %c0_85, %c0_86] : memref<9x128x128xbf16, #tpu.memory_space<vmem>>, vector<1x128x128xbf16>
    %62 = vector.shape_cast %61 : vector<1x128x128xbf16> to vector<128x128xbf16>
    %cst_87 = arith.constant dense<0.000000e+00> : vector<16x128xf32>
    %63 = tpu.matmul %60, %62, %cst_87 {dimension_numbers = #tpu.dot_dimension_numbers<[1], [0], [0], [1], [0, 0, 1, 1], [], []>} : vector<16x128xbf16>, vector<128x128xbf16>, vector<16x128xf32> -> vector<16x128xf32>
    %64 = arith.addf %58, %63 : vector<16x128xf32>
    %c0_88 = arith.constant 0 : index
    %c0_89 = arith.constant 0 : index
    %65 = vector.load %arg8[%c0_88, %c0_89] : memref<16x128xf32, #tpu.memory_space<vmem>>, vector<16x128xf32>
    tpu.vector_store %arg8[%c0_88, %c0_89], %64 {strides = array<i32>} : memref<16x128xf32, #tpu.memory_space<vmem>>, vector<16x128xf32>,
    %c0_90 = arith.constant 0 : index
    %c0_91 = arith.constant 0 : index
    %66 = vector.load %arg8[%c0_90, %c0_91] : memref<16x128xf32, #tpu.memory_space<vmem>>, vector<16x128xf32>
    %c0_92 = arith.constant 0 : index
    %c0_93 = arith.constant 0 : index
    %c2_94 = arith.constant 2 : index
    %c0_95 = arith.constant 0 : index
    %67 = vector.load %arg4[%c0_92, %c0_93, %c2_94, %c0_95] : memref<1x1x18x128xbf16, #tpu.memory_space<vmem>>, vector<1x1x16x128xbf16>
    %68 = vector.shape_cast %67 : vector<1x1x16x128xbf16> to vector<16x128xbf16>
    %c8 = arith.constant 8 : index
    %c0_96 = arith.constant 0 : index
    %c0_97 = arith.constant 0 : index
    %69 = vector.load %arg5[%c8, %c0_96, %c0_97] : memref<9x128x128xbf16, #tpu.memory_space<vmem>>, vector<1x128x128xbf16>
    %70 = vector.shape_cast %69 : vector<1x128x128xbf16> to vector<128x128xbf16>
    %cst_98 = arith.constant dense<0.000000e+00> : vector<16x128xf32>
    %71 = tpu.matmul %68, %70, %cst_98 {dimension_numbers = #tpu.dot_dimension_numbers<[1], [0], [0], [1], [0, 0, 1, 1], [], []>} : vector<16x128xbf16>, vector<128x128xbf16>, vector<16x128xf32> -> vector<16x128xf32>
    %72 = arith.addf %66, %71 : vector<16x128xf32>
    %c0_99 = arith.constant 0 : index
    %c0_100 = arith.constant 0 : index
    %73 = vector.load %arg8[%c0_99, %c0_100] : memref<16x128xf32, #tpu.memory_space<vmem>>, vector<16x128xf32>
    tpu.vector_store %arg8[%c0_99, %c0_100], %72 {strides = array<i32>} : memref<16x128xf32, #tpu.memory_space<vmem>>, vector<16x128xf32>,
    %c0_101 = arith.constant 0 : index
    %c0_102 = arith.constant 0 : index
    %74 = vector.load %arg8[%c0_101, %c0_102] : memref<16x128xf32, #tpu.memory_space<vmem>>, vector<16x128xf32>
    %c0_103 = arith.constant 0 : index
    %c0_104 = arith.constant 0 : index
    %75 = vector.load %arg6[%c0_103, %c0_104] : memref<1x128xf32, #tpu.memory_space<vmem>>, vector<1x128xf32>
    %76 = vector.broadcast %75 : vector<1x128xf32> to vector<16x128xf32>
    %77 = arith.addf %74, %76 : vector<16x128xf32>
    %78 = arith.truncf %77 : vector<16x128xf32> to vector<16x128xbf16>
    %c0_105 = arith.constant 0 : index
    %c0_106 = arith.constant 0 : index
    %c0_107 = arith.constant 0 : index
    %c0_108 = arith.constant 0 : index
    %79 = vector.load %arg7[%c0_105, %c0_106, %c0_107, %c0_108] : memref<1x1x16x128xbf16, #tpu.memory_space<vmem>>, vector<1x1x16x128xbf16>
    %80 = vector.shape_cast %79 : vector<1x1x16x128xbf16> to vector<16x128xbf16>
    %81 = vector.shape_cast %78 : vector<16x128xbf16> to vector<1x1x16x128xbf16>
    tpu.vector_store %arg7[%c0_105, %c0_106, %c0_107, %c0_108], %81 {strides = array<i32>} : memref<1x1x16x128xbf16, #tpu.memory_space<vmem>>, vector<1x1x16x128xbf16>,
    return
  }
  func.func @transform_0(%arg0: i32, %arg1: i32) -> (i32, i32, i32, i32) {
    %c0_i32 = arith.constant 0 : i32
    %c0_i32_0 = arith.constant 0 : i32
    %c0_i32_1 = arith.constant 0 : i32
    return %arg0, %arg1, %c0_i32, %c0_i32_0 : i32, i32, i32, i32
  }
  func.func @transform_1(%arg0: i32, %arg1: i32) -> (i32, i32, i32, i32) {
    %c1_i32 = arith.constant 1 : i32
    %0 = arith.addi %arg1, %c1_i32 : i32
    %c0_i32 = arith.constant 0 : i32
    %c0_i32_0 = arith.constant 0 : i32
    %c0_i32_1 = arith.constant 0 : i32
    return %arg0, %0, %c0_i32, %c0_i32_0 : i32, i32, i32, i32
  }
  func.func @transform_2(%arg0: i32, %arg1: i32) -> (i32, i32, i32, i32) {
    %c2_i32 = arith.constant 2 : i32
    %0 = arith.addi %arg1, %c2_i32 : i32
    %c0_i32 = arith.constant 0 : i32
    %c0_i32_0 = arith.constant 0 : i32
    %c0_i32_1 = arith.constant 0 : i32
    return %arg0, %0, %c0_i32, %c0_i32_0 : i32, i32, i32, i32
  }
  func.func @transform_3(%arg0: i32, %arg1: i32) -> (i32, i32, i32) {
    %c0_i32 = arith.constant 0 : i32
    %c0_i32_0 = arith.constant 0 : i32
    %c0_i32_1 = arith.constant 0 : i32
    %c0_i32_2 = arith.constant 0 : i32
    return %c0_i32, %c0_i32_0, %c0_i32_1 : i32, i32, i32
  }
  func.func @transform_4(%arg0: i32, %arg1: i32) -> (i32, i32) {
    %c0_i32 = arith.constant 0 : i32
    %c0_i32_0 = arith.constant 0 : i32
    %c0_i32_1 = arith.constant 0 : i32
    return %c0_i32, %c0_i32_0 : i32, i32
  }
  func.func @transform_5(%arg0: i32, %arg1: i32) -> (i32, i32, i32, i32) {
    %c0_i32 = arith.constant 0 : i32
    %c0_i32_0 = arith.constant 0 : i32
    %c0_i32_1 = arith.constant 0 : i32
    return %arg0, %arg1, %c0_i32, %c0_i32_0 : i32, i32, i32, i32
  }
}

module attributes {stable_mosaic.version = 11 : i64} {
  func.func @_gn_stats_kernel(%arg0: i32, %arg1: i32, %arg2: memref<1x256x128xbf16, #tpu.memory_space<vmem>>, %arg3: memref<128x32xf32, #tpu.memory_space<vmem>>, %arg4: memref<32x128xf32, #tpu.memory_space<vmem>>, %arg5: memref<1x1x128xf32, #tpu.memory_space<vmem>>, %arg6: memref<1x1x128xf32, #tpu.memory_space<vmem>>, %arg7: memref<1x128xf32, #tpu.memory_space<vmem>>, %arg8: memref<1x128xf32, #tpu.memory_space<vmem>>) attributes {dimension_semantics = [#tpu.dimension_semantics<parallel>, #tpu.dimension_semantics<arbitrary>], iteration_bounds = array<i64: 2, 1>, scalar_prefetch = 0 : i64, scratch_operands = 2 : i64, tpu.core_type = #tpu.core_type<tc>, window_params = [{transform_indices = @transform_0, window_bounds = array<i64: 1, 256, 128>}, {pipeline_mode = #tpu.pipeline_mode<synchronous>, transform_indices = @transform_1, window_bounds = array<i64: 128, 32>}, {pipeline_mode = #tpu.pipeline_mode<synchronous>, transform_indices = @transform_2, window_bounds = array<i64: 32, 128>}, {transform_indices = @transform_3, window_bounds = array<i64: 1, 1, 128>}, {transform_indices = @transform_4, window_bounds = array<i64: 1, 1, 128>}]} {
    %c0_i32 = arith.constant 0 : i32
    %0 = arith.cmpi eq, %arg1, %c0_i32 : i32
    %1 = arith.extui %0 : i1 to i32
    %c0_i32_0 = arith.constant 0 : i32
    %2 = arith.cmpi ne, %1, %c0_i32_0 : i32
    scf.if %2 {
      %cst_14 = arith.constant 0.000000e+00 : f32
      %20 = vector.broadcast %cst_14 : f32 to vector<1x128xf32>
      %c0_15 = arith.constant 0 : index
      %c0_16 = arith.constant 0 : index
      %21 = vector.load %arg7[%c0_15, %c0_16] : memref<1x128xf32, #tpu.memory_space<vmem>>, vector<1x128xf32>
      tpu.vector_store %arg7[%c0_15, %c0_16], %20 {strides = array<i32>} : memref<1x128xf32, #tpu.memory_space<vmem>>, vector<1x128xf32>,
      %cst_17 = arith.constant 0.000000e+00 : f32
      %22 = vector.broadcast %cst_17 : f32 to vector<1x128xf32>
      %c0_18 = arith.constant 0 : index
      %c0_19 = arith.constant 0 : index
      %23 = vector.load %arg8[%c0_18, %c0_19] : memref<1x128xf32, #tpu.memory_space<vmem>>, vector<1x128xf32>
      tpu.vector_store %arg8[%c0_18, %c0_19], %22 {strides = array<i32>} : memref<1x128xf32, #tpu.memory_space<vmem>>, vector<1x128xf32>,
    } else {
    }
    %c0 = arith.constant 0 : index
    %c0_1 = arith.constant 0 : index
    %c0_2 = arith.constant 0 : index
    %3 = vector.load %arg2[%c0, %c0_1, %c0_2] : memref<1x256x128xbf16, #tpu.memory_space<vmem>>, vector<1x256x128xbf16>
    %4 = vector.shape_cast %3 : vector<1x256x128xbf16> to vector<256x128xbf16>
    %5 = arith.extf %4 : vector<256x128xbf16> to vector<256x128xf32>
    %c0_3 = arith.constant 0 : index
    %c0_4 = arith.constant 0 : index
    %6 = vector.load %arg7[%c0_3, %c0_4] : memref<1x128xf32, #tpu.memory_space<vmem>>, vector<1x128xf32>
    %cst = arith.constant dense<0.000000e+00> : vector<128xf32>
    %7 = vector.multi_reduction <add>, %5, %cst [0] : vector<256x128xf32> to vector<128xf32>
    %8 = vector.shape_cast %7 : vector<128xf32> to vector<1x128xf32>
    %9 = arith.addf %6, %8 : vector<1x128xf32>
    %c0_5 = arith.constant 0 : index
    %c0_6 = arith.constant 0 : index
    %10 = vector.load %arg7[%c0_5, %c0_6] : memref<1x128xf32, #tpu.memory_space<vmem>>, vector<1x128xf32>
    tpu.vector_store %arg7[%c0_5, %c0_6], %9 {strides = array<i32>} : memref<1x128xf32, #tpu.memory_space<vmem>>, vector<1x128xf32>,
    %c0_7 = arith.constant 0 : index
    %c0_8 = arith.constant 0 : index
    %11 = vector.load %arg8[%c0_7, %c0_8] : memref<1x128xf32, #tpu.memory_space<vmem>>, vector<1x128xf32>
    %12 = arith.mulf %5, %5 : vector<256x128xf32>
    %cst_9 = arith.constant dense<0.000000e+00> : vector<128xf32>
    %13 = vector.multi_reduction <add>, %12, %cst_9 [0] : vector<256x128xf32> to vector<128xf32>
    %14 = vector.shape_cast %13 : vector<128xf32> to vector<1x128xf32>
    %15 = arith.addf %11, %14 : vector<1x128xf32>
    %c0_10 = arith.constant 0 : index
    %c0_11 = arith.constant 0 : index
    %16 = vector.load %arg8[%c0_10, %c0_11] : memref<1x128xf32, #tpu.memory_space<vmem>>, vector<1x128xf32>
    tpu.vector_store %arg8[%c0_10, %c0_11], %15 {strides = array<i32>} : memref<1x128xf32, #tpu.memory_space<vmem>>, vector<1x128xf32>,
    %c0_i32_12 = arith.constant 0 : i32
    %17 = arith.cmpi eq, %arg1, %c0_i32_12 : i32
    %18 = arith.extui %17 : i1 to i32
    %c0_i32_13 = arith.constant 0 : i32
    %19 = arith.cmpi ne, %18, %c0_i32_13 : i32
    scf.if %19 {
      %c0_14 = arith.constant 0 : index
      %c0_15 = arith.constant 0 : index
      %20 = vector.load %arg7[%c0_14, %c0_15] : memref<1x128xf32, #tpu.memory_space<vmem>>, vector<1x128xf32>
      %c0_16 = arith.constant 0 : index
      %c0_17 = arith.constant 0 : index
      %21 = vector.load %arg3[%c0_16, %c0_17] : memref<128x32xf32, #tpu.memory_space<vmem>>, vector<128x32xf32>
      %cst_18 = arith.constant dense<0.000000e+00> : vector<1x32xf32>
      %22 = tpu.matmul %20, %21, %cst_18 {dimension_numbers = #tpu.dot_dimension_numbers<[1], [0], [0], [1], [0, 0, 1, 1], [], []>} : vector<1x128xf32>, vector<128x32xf32>, vector<1x32xf32> -> vector<1x32xf32>
      %cst_19 = arith.constant 0.001953125 : f32
      %23 = vector.broadcast %cst_19 : f32 to vector<1x32xf32>
      %24 = arith.mulf %22, %23 : vector<1x32xf32>
      %c0_20 = arith.constant 0 : index
      %c0_21 = arith.constant 0 : index
      %25 = vector.load %arg8[%c0_20, %c0_21] : memref<1x128xf32, #tpu.memory_space<vmem>>, vector<1x128xf32>
      %c0_22 = arith.constant 0 : index
      %c0_23 = arith.constant 0 : index
      %26 = vector.load %arg3[%c0_22, %c0_23] : memref<128x32xf32, #tpu.memory_space<vmem>>, vector<128x32xf32>
      %cst_24 = arith.constant dense<0.000000e+00> : vector<1x32xf32>
      %27 = tpu.matmul %25, %26, %cst_24 {dimension_numbers = #tpu.dot_dimension_numbers<[1], [0], [0], [1], [0, 0, 1, 1], [], []>} : vector<1x128xf32>, vector<128x32xf32>, vector<1x32xf32> -> vector<1x32xf32>
      %cst_25 = arith.constant 0.001953125 : f32
      %28 = vector.broadcast %cst_25 : f32 to vector<1x32xf32>
      %29 = arith.mulf %27, %28 : vector<1x32xf32>
      %30 = arith.mulf %24, %24 : vector<1x32xf32>
      %31 = arith.subf %29, %30 : vector<1x32xf32>
      %cst_26 = arith.constant 0.000000e+00 : f32
      %32 = vector.broadcast %cst_26 : f32 to vector<1x32xf32>
      %33 = arith.maximumf %31, %32 : vector<1x32xf32>
      %c0_27 = arith.constant 0 : index
      %c0_28 = arith.constant 0 : index
      %34 = vector.load %arg4[%c0_27, %c0_28] : memref<32x128xf32, #tpu.memory_space<vmem>>, vector<32x128xf32>
      %cst_29 = arith.constant dense<0.000000e+00> : vector<1x128xf32>
      %35 = tpu.matmul %24, %34, %cst_29 {dimension_numbers = #tpu.dot_dimension_numbers<[1], [0], [0], [1], [0, 0, 1, 1], [], []>} : vector<1x32xf32>, vector<32x128xf32>, vector<1x128xf32> -> vector<1x128xf32>
      %c0_30 = arith.constant 0 : index
      %c0_31 = arith.constant 0 : index
      %36 = vector.load %arg4[%c0_30, %c0_31] : memref<32x128xf32, #tpu.memory_space<vmem>>, vector<32x128xf32>
      %cst_32 = arith.constant dense<0.000000e+00> : vector<1x128xf32>
      %37 = tpu.matmul %33, %36, %cst_32 {dimension_numbers = #tpu.dot_dimension_numbers<[1], [0], [0], [1], [0, 0, 1, 1], [], []>} : vector<1x32xf32>, vector<32x128xf32>, vector<1x128xf32> -> vector<1x128xf32>
      %c0_33 = arith.constant 0 : index
      %c0_34 = arith.constant 0 : index
      %c0_35 = arith.constant 0 : index
      %38 = vector.load %arg5[%c0_33, %c0_34, %c0_35] : memref<1x1x128xf32, #tpu.memory_space<vmem>>, vector<1x1x128xf32>
      %39 = vector.shape_cast %38 : vector<1x1x128xf32> to vector<1x128xf32>
      %40 = vector.shape_cast %35 : vector<1x128xf32> to vector<1x1x128xf32>
      tpu.vector_store %arg5[%c0_33, %c0_34, %c0_35], %40 {strides = array<i32>} : memref<1x1x128xf32, #tpu.memory_space<vmem>>, vector<1x1x128xf32>,
      %cst_36 = arith.constant 9.99999997E-7 : f32
      %41 = vector.broadcast %cst_36 : f32 to vector<1x128xf32>
      %42 = arith.addf %37, %41 : vector<1x128xf32>
      %43 = math.rsqrt %42 : vector<1x128xf32>
      %c0_37 = arith.constant 0 : index
      %c0_38 = arith.constant 0 : index
      %c0_39 = arith.constant 0 : index
      %44 = vector.load %arg6[%c0_37, %c0_38, %c0_39] : memref<1x1x128xf32, #tpu.memory_space<vmem>>, vector<1x1x128xf32>
      %45 = vector.shape_cast %44 : vector<1x1x128xf32> to vector<1x128xf32>
      %46 = vector.shape_cast %43 : vector<1x128xf32> to vector<1x1x128xf32>
      tpu.vector_store %arg6[%c0_37, %c0_38, %c0_39], %46 {strides = array<i32>} : memref<1x1x128xf32, #tpu.memory_space<vmem>>, vector<1x1x128xf32>,
    } else {
    }
    return
  }
  func.func @transform_0(%arg0: i32, %arg1: i32) -> (i32, i32, i32) {
    %c0_i32 = arith.constant 0 : i32
    %c0_i32_0 = arith.constant 0 : i32
    return %arg0, %arg1, %c0_i32 : i32, i32, i32
  }
  func.func @transform_1(%arg0: i32, %arg1: i32) -> (i32, i32) {
    %c0_i32 = arith.constant 0 : i32
    %c0_i32_0 = arith.constant 0 : i32
    %c0_i32_1 = arith.constant 0 : i32
    return %c0_i32, %c0_i32_0 : i32, i32
  }
  func.func @transform_2(%arg0: i32, %arg1: i32) -> (i32, i32) {
    %c0_i32 = arith.constant 0 : i32
    %c0_i32_0 = arith.constant 0 : i32
    %c0_i32_1 = arith.constant 0 : i32
    return %c0_i32, %c0_i32_0 : i32, i32
  }
  func.func @transform_3(%arg0: i32, %arg1: i32) -> (i32, i32, i32) {
    %c0_i32 = arith.constant 0 : i32
    %c0_i32_0 = arith.constant 0 : i32
    %c0_i32_1 = arith.constant 0 : i32
    return %arg0, %c0_i32, %c0_i32_0 : i32, i32, i32
  }
  func.func @transform_4(%arg0: i32, %arg1: i32) -> (i32, i32, i32) {
    %c0_i32 = arith.constant 0 : i32
    %c0_i32_0 = arith.constant 0 : i32
    %c0_i32_1 = arith.constant 0 : i32
    return %arg0, %c0_i32, %c0_i32_0 : i32, i32, i32
  }
}

module attributes {stable_mosaic.version = 11 : i64} {
  func.func @_gn_apply_kernel(%arg0: i32, %arg1: i32, %arg2: memref<1x256x128xbf16, #tpu.memory_space<vmem>>, %arg3: memref<1x1x128xf32, #tpu.memory_space<vmem>>, %arg4: memref<1x1x128xf32, #tpu.memory_space<vmem>>, %arg5: memref<1x128xf32, #tpu.memory_space<vmem>>, %arg6: memref<1x128xf32, #tpu.memory_space<vmem>>, %arg7: memref<1x256x128xbf16, #tpu.memory_space<vmem>>) attributes {dimension_semantics = [#tpu.dimension_semantics<parallel>, #tpu.dimension_semantics<parallel>], iteration_bounds = array<i64: 2, 1>, scalar_prefetch = 0 : i64, scratch_operands = 0 : i64, tpu.core_type = #tpu.core_type<tc>, window_params = [{transform_indices = @transform_0, window_bounds = array<i64: 1, 256, 128>}, {transform_indices = @transform_1, window_bounds = array<i64: 1, 1, 128>}, {transform_indices = @transform_2, window_bounds = array<i64: 1, 1, 128>}, {pipeline_mode = #tpu.pipeline_mode<synchronous>, transform_indices = @transform_3, window_bounds = array<i64: 1, 128>}, {pipeline_mode = #tpu.pipeline_mode<synchronous>, transform_indices = @transform_4, window_bounds = array<i64: 1, 128>}, {transform_indices = @transform_5, window_bounds = array<i64: 1, 256, 128>}]} {
    %c0 = arith.constant 0 : index
    %c0_0 = arith.constant 0 : index
    %c0_1 = arith.constant 0 : index
    %0 = vector.load %arg2[%c0, %c0_0, %c0_1] : memref<1x256x128xbf16, #tpu.memory_space<vmem>>, vector<1x256x128xbf16>
    %1 = vector.shape_cast %0 : vector<1x256x128xbf16> to vector<256x128xbf16>
    %2 = arith.extf %1 : vector<256x128xbf16> to vector<256x128xf32>
    %c0_2 = arith.constant 0 : index
    %c0_3 = arith.constant 0 : index
    %c0_4 = arith.constant 0 : index
    %3 = vector.load %arg3[%c0_2, %c0_3, %c0_4] : memref<1x1x128xf32, #tpu.memory_space<vmem>>, vector<1x1x128xf32>
    %4 = vector.shape_cast %3 : vector<1x1x128xf32> to vector<1x128xf32>
    %5 = vector.broadcast %4 : vector<1x128xf32> to vector<256x128xf32>
    %6 = arith.subf %2, %5 : vector<256x128xf32>
    %c0_5 = arith.constant 0 : index
    %c0_6 = arith.constant 0 : index
    %c0_7 = arith.constant 0 : index
    %7 = vector.load %arg4[%c0_5, %c0_6, %c0_7] : memref<1x1x128xf32, #tpu.memory_space<vmem>>, vector<1x1x128xf32>
    %8 = vector.shape_cast %7 : vector<1x1x128xf32> to vector<1x128xf32>
    %9 = vector.broadcast %8 : vector<1x128xf32> to vector<256x128xf32>
    %10 = arith.mulf %6, %9 : vector<256x128xf32>
    %c0_8 = arith.constant 0 : index
    %c0_9 = arith.constant 0 : index
    %11 = vector.load %arg5[%c0_8, %c0_9] : memref<1x128xf32, #tpu.memory_space<vmem>>, vector<1x128xf32>
    %12 = vector.broadcast %11 : vector<1x128xf32> to vector<256x128xf32>
    %13 = arith.mulf %10, %12 : vector<256x128xf32>
    %c0_10 = arith.constant 0 : index
    %c0_11 = arith.constant 0 : index
    %14 = vector.load %arg6[%c0_10, %c0_11] : memref<1x128xf32, #tpu.memory_space<vmem>>, vector<1x128xf32>
    %15 = vector.broadcast %14 : vector<1x128xf32> to vector<256x128xf32>
    %16 = arith.addf %13, %15 : vector<256x128xf32>
    %17 = arith.negf %16 : vector<256x128xf32>
    %18 = math.exp %17 : vector<256x128xf32>
    %cst = arith.constant 1.000000e+00 : f32
    %19 = vector.broadcast %cst : f32 to vector<256x128xf32>
    %20 = arith.addf %19, %18 : vector<256x128xf32>
    %21 = arith.divf %19, %20 : vector<256x128xf32>
    %22 = arith.mulf %16, %21 : vector<256x128xf32>
    %23 = arith.truncf %22 : vector<256x128xf32> to vector<256x128xbf16>
    %c0_12 = arith.constant 0 : index
    %c0_13 = arith.constant 0 : index
    %c0_14 = arith.constant 0 : index
    %24 = vector.load %arg7[%c0_12, %c0_13, %c0_14] : memref<1x256x128xbf16, #tpu.memory_space<vmem>>, vector<1x256x128xbf16>
    %25 = vector.shape_cast %24 : vector<1x256x128xbf16> to vector<256x128xbf16>
    %26 = vector.shape_cast %23 : vector<256x128xbf16> to vector<1x256x128xbf16>
    tpu.vector_store %arg7[%c0_12, %c0_13, %c0_14], %26 {strides = array<i32>} : memref<1x256x128xbf16, #tpu.memory_space<vmem>>, vector<1x256x128xbf16>,
    return
  }
  func.func @transform_0(%arg0: i32, %arg1: i32) -> (i32, i32, i32) {
    %c0_i32 = arith.constant 0 : i32
    %c0_i32_0 = arith.constant 0 : i32
    return %arg0, %arg1, %c0_i32 : i32, i32, i32
  }
  func.func @transform_1(%arg0: i32, %arg1: i32) -> (i32, i32, i32) {
    %c0_i32 = arith.constant 0 : i32
    %c0_i32_0 = arith.constant 0 : i32
    %c0_i32_1 = arith.constant 0 : i32
    return %arg0, %c0_i32, %c0_i32_0 : i32, i32, i32
  }
  func.func @transform_2(%arg0: i32, %arg1: i32) -> (i32, i32, i32) {
    %c0_i32 = arith.constant 0 : i32
    %c0_i32_0 = arith.constant 0 : i32
    %c0_i32_1 = arith.constant 0 : i32
    return %arg0, %c0_i32, %c0_i32_0 : i32, i32, i32
  }
  func.func @transform_3(%arg0: i32, %arg1: i32) -> (i32, i32) {
    %c0_i32 = arith.constant 0 : i32
    %c0_i32_0 = arith.constant 0 : i32
    %c0_i32_1 = arith.constant 0 : i32
    return %c0_i32, %c0_i32_0 : i32, i32
  }
  func.func @transform_4(%arg0: i32, %arg1: i32) -> (i32, i32) {
    %c0_i32 = arith.constant 0 : i32
    %c0_i32_0 = arith.constant 0 : i32
    %c0_i32_1 = arith.constant 0 : i32
    return %c0_i32, %c0_i32_0 : i32, i32
  }
  func.func @transform_5(%arg0: i32, %arg1: i32) -> (i32, i32, i32) {
    %c0_i32 = arith.constant 0 : i32
    %c0_i32_0 = arith.constant 0 : i32
    return %arg0, %arg1, %c0_i32 : i32, i32, i32
  }
}

module attributes {stable_mosaic.version = 11 : i64} {
  func.func @_gn_stats_kernel(%arg0: i32, %arg1: i32, %arg2: memref<1x256x128xbf16, #tpu.memory_space<vmem>>, %arg3: memref<128x32xf32, #tpu.memory_space<vmem>>, %arg4: memref<32x128xf32, #tpu.memory_space<vmem>>, %arg5: memref<1x1x128xf32, #tpu.memory_space<vmem>>, %arg6: memref<1x1x128xf32, #tpu.memory_space<vmem>>, %arg7: memref<1x128xf32, #tpu.memory_space<vmem>>, %arg8: memref<1x128xf32, #tpu.memory_space<vmem>>) attributes {dimension_semantics = [#tpu.dimension_semantics<parallel>, #tpu.dimension_semantics<arbitrary>], iteration_bounds = array<i64: 2, 1>, scalar_prefetch = 0 : i64, scratch_operands = 2 : i64, tpu.core_type = #tpu.core_type<tc>, window_params = [{transform_indices = @transform_0, window_bounds = array<i64: 1, 256, 128>}, {pipeline_mode = #tpu.pipeline_mode<synchronous>, transform_indices = @transform_1, window_bounds = array<i64: 128, 32>}, {pipeline_mode = #tpu.pipeline_mode<synchronous>, transform_indices = @transform_2, window_bounds = array<i64: 32, 128>}, {transform_indices = @transform_3, window_bounds = array<i64: 1, 1, 128>}, {transform_indices = @transform_4, window_bounds = array<i64: 1, 1, 128>}]} {
    %c0_i32 = arith.constant 0 : i32
    %0 = arith.cmpi eq, %arg1, %c0_i32 : i32
    %1 = arith.extui %0 : i1 to i32
    %c0_i32_0 = arith.constant 0 : i32
    %2 = arith.cmpi ne, %1, %c0_i32_0 : i32
    scf.if %2 {
      %cst_14 = arith.constant 0.000000e+00 : f32
      %20 = vector.broadcast %cst_14 : f32 to vector<1x128xf32>
      %c0_15 = arith.constant 0 : index
      %c0_16 = arith.constant 0 : index
      %21 = vector.load %arg7[%c0_15, %c0_16] : memref<1x128xf32, #tpu.memory_space<vmem>>, vector<1x128xf32>
      tpu.vector_store %arg7[%c0_15, %c0_16], %20 {strides = array<i32>} : memref<1x128xf32, #tpu.memory_space<vmem>>, vector<1x128xf32>,
      %cst_17 = arith.constant 0.000000e+00 : f32
      %22 = vector.broadcast %cst_17 : f32 to vector<1x128xf32>
      %c0_18 = arith.constant 0 : index
      %c0_19 = arith.constant 0 : index
      %23 = vector.load %arg8[%c0_18, %c0_19] : memref<1x128xf32, #tpu.memory_space<vmem>>, vector<1x128xf32>
      tpu.vector_store %arg8[%c0_18, %c0_19], %22 {strides = array<i32>} : memref<1x128xf32, #tpu.memory_space<vmem>>, vector<1x128xf32>,
    } else {
    }
    %c0 = arith.constant 0 : index
    %c0_1 = arith.constant 0 : index
    %c0_2 = arith.constant 0 : index
    %3 = vector.load %arg2[%c0, %c0_1, %c0_2] : memref<1x256x128xbf16, #tpu.memory_space<vmem>>, vector<1x256x128xbf16>
    %4 = vector.shape_cast %3 : vector<1x256x128xbf16> to vector<256x128xbf16>
    %5 = arith.extf %4 : vector<256x128xbf16> to vector<256x128xf32>
    %c0_3 = arith.constant 0 : index
    %c0_4 = arith.constant 0 : index
    %6 = vector.load %arg7[%c0_3, %c0_4] : memref<1x128xf32, #tpu.memory_space<vmem>>, vector<1x128xf32>
    %cst = arith.constant dense<0.000000e+00> : vector<128xf32>
    %7 = vector.multi_reduction <add>, %5, %cst [0] : vector<256x128xf32> to vector<128xf32>
    %8 = vector.shape_cast %7 : vector<128xf32> to vector<1x128xf32>
    %9 = arith.addf %6, %8 : vector<1x128xf32>
    %c0_5 = arith.constant 0 : index
    %c0_6 = arith.constant 0 : index
    %10 = vector.load %arg7[%c0_5, %c0_6] : memref<1x128xf32, #tpu.memory_space<vmem>>, vector<1x128xf32>
    tpu.vector_store %arg7[%c0_5, %c0_6], %9 {strides = array<i32>} : memref<1x128xf32, #tpu.memory_space<vmem>>, vector<1x128xf32>,
    %c0_7 = arith.constant 0 : index
    %c0_8 = arith.constant 0 : index
    %11 = vector.load %arg8[%c0_7, %c0_8] : memref<1x128xf32, #tpu.memory_space<vmem>>, vector<1x128xf32>
    %12 = arith.mulf %5, %5 : vector<256x128xf32>
    %cst_9 = arith.constant dense<0.000000e+00> : vector<128xf32>
    %13 = vector.multi_reduction <add>, %12, %cst_9 [0] : vector<256x128xf32> to vector<128xf32>
    %14 = vector.shape_cast %13 : vector<128xf32> to vector<1x128xf32>
    %15 = arith.addf %11, %14 : vector<1x128xf32>
    %c0_10 = arith.constant 0 : index
    %c0_11 = arith.constant 0 : index
    %16 = vector.load %arg8[%c0_10, %c0_11] : memref<1x128xf32, #tpu.memory_space<vmem>>, vector<1x128xf32>
    tpu.vector_store %arg8[%c0_10, %c0_11], %15 {strides = array<i32>} : memref<1x128xf32, #tpu.memory_space<vmem>>, vector<1x128xf32>,
    %c0_i32_12 = arith.constant 0 : i32
    %17 = arith.cmpi eq, %arg1, %c0_i32_12 : i32
    %18 = arith.extui %17 : i1 to i32
    %c0_i32_13 = arith.constant 0 : i32
    %19 = arith.cmpi ne, %18, %c0_i32_13 : i32
    scf.if %19 {
      %c0_14 = arith.constant 0 : index
      %c0_15 = arith.constant 0 : index
      %20 = vector.load %arg7[%c0_14, %c0_15] : memref<1x128xf32, #tpu.memory_space<vmem>>, vector<1x128xf32>
      %c0_16 = arith.constant 0 : index
      %c0_17 = arith.constant 0 : index
      %21 = vector.load %arg3[%c0_16, %c0_17] : memref<128x32xf32, #tpu.memory_space<vmem>>, vector<128x32xf32>
      %cst_18 = arith.constant dense<0.000000e+00> : vector<1x32xf32>
      %22 = tpu.matmul %20, %21, %cst_18 {dimension_numbers = #tpu.dot_dimension_numbers<[1], [0], [0], [1], [0, 0, 1, 1], [], []>} : vector<1x128xf32>, vector<128x32xf32>, vector<1x32xf32> -> vector<1x32xf32>
      %cst_19 = arith.constant 3.906250e-03 : f32
      %23 = vector.broadcast %cst_19 : f32 to vector<1x32xf32>
      %24 = arith.mulf %22, %23 : vector<1x32xf32>
      %c0_20 = arith.constant 0 : index
      %c0_21 = arith.constant 0 : index
      %25 = vector.load %arg8[%c0_20, %c0_21] : memref<1x128xf32, #tpu.memory_space<vmem>>, vector<1x128xf32>
      %c0_22 = arith.constant 0 : index
      %c0_23 = arith.constant 0 : index
      %26 = vector.load %arg3[%c0_22, %c0_23] : memref<128x32xf32, #tpu.memory_space<vmem>>, vector<128x32xf32>
      %cst_24 = arith.constant dense<0.000000e+00> : vector<1x32xf32>
      %27 = tpu.matmul %25, %26, %cst_24 {dimension_numbers = #tpu.dot_dimension_numbers<[1], [0], [0], [1], [0, 0, 1, 1], [], []>} : vector<1x128xf32>, vector<128x32xf32>, vector<1x32xf32> -> vector<1x32xf32>
      %cst_25 = arith.constant 3.906250e-03 : f32
      %28 = vector.broadcast %cst_25 : f32 to vector<1x32xf32>
      %29 = arith.mulf %27, %28 : vector<1x32xf32>
      %30 = arith.mulf %24, %24 : vector<1x32xf32>
      %31 = arith.subf %29, %30 : vector<1x32xf32>
      %cst_26 = arith.constant 0.000000e+00 : f32
      %32 = vector.broadcast %cst_26 : f32 to vector<1x32xf32>
      %33 = arith.maximumf %31, %32 : vector<1x32xf32>
      %c0_27 = arith.constant 0 : index
      %c0_28 = arith.constant 0 : index
      %34 = vector.load %arg4[%c0_27, %c0_28] : memref<32x128xf32, #tpu.memory_space<vmem>>, vector<32x128xf32>
      %cst_29 = arith.constant dense<0.000000e+00> : vector<1x128xf32>
      %35 = tpu.matmul %24, %34, %cst_29 {dimension_numbers = #tpu.dot_dimension_numbers<[1], [0], [0], [1], [0, 0, 1, 1], [], []>} : vector<1x32xf32>, vector<32x128xf32>, vector<1x128xf32> -> vector<1x128xf32>
      %c0_30 = arith.constant 0 : index
      %c0_31 = arith.constant 0 : index
      %36 = vector.load %arg4[%c0_30, %c0_31] : memref<32x128xf32, #tpu.memory_space<vmem>>, vector<32x128xf32>
      %cst_32 = arith.constant dense<0.000000e+00> : vector<1x128xf32>
      %37 = tpu.matmul %33, %36, %cst_32 {dimension_numbers = #tpu.dot_dimension_numbers<[1], [0], [0], [1], [0, 0, 1, 1], [], []>} : vector<1x32xf32>, vector<32x128xf32>, vector<1x128xf32> -> vector<1x128xf32>
      %c0_33 = arith.constant 0 : index
      %c0_34 = arith.constant 0 : index
      %c0_35 = arith.constant 0 : index
      %38 = vector.load %arg5[%c0_33, %c0_34, %c0_35] : memref<1x1x128xf32, #tpu.memory_space<vmem>>, vector<1x1x128xf32>
      %39 = vector.shape_cast %38 : vector<1x1x128xf32> to vector<1x128xf32>
      %40 = vector.shape_cast %35 : vector<1x128xf32> to vector<1x1x128xf32>
      tpu.vector_store %arg5[%c0_33, %c0_34, %c0_35], %40 {strides = array<i32>} : memref<1x1x128xf32, #tpu.memory_space<vmem>>, vector<1x1x128xf32>,
      %cst_36 = arith.constant 9.99999997E-7 : f32
      %41 = vector.broadcast %cst_36 : f32 to vector<1x128xf32>
      %42 = arith.addf %37, %41 : vector<1x128xf32>
      %43 = math.rsqrt %42 : vector<1x128xf32>
      %c0_37 = arith.constant 0 : index
      %c0_38 = arith.constant 0 : index
      %c0_39 = arith.constant 0 : index
      %44 = vector.load %arg6[%c0_37, %c0_38, %c0_39] : memref<1x1x128xf32, #tpu.memory_space<vmem>>, vector<1x1x128xf32>
      %45 = vector.shape_cast %44 : vector<1x1x128xf32> to vector<1x128xf32>
      %46 = vector.shape_cast %43 : vector<1x128xf32> to vector<1x1x128xf32>
      tpu.vector_store %arg6[%c0_37, %c0_38, %c0_39], %46 {strides = array<i32>} : memref<1x1x128xf32, #tpu.memory_space<vmem>>, vector<1x1x128xf32>,
    } else {
    }
    return
  }
  func.func @transform_0(%arg0: i32, %arg1: i32) -> (i32, i32, i32) {
    %c0_i32 = arith.constant 0 : i32
    %c0_i32_0 = arith.constant 0 : i32
    return %arg0, %arg1, %c0_i32 : i32, i32, i32
  }
  func.func @transform_1(%arg0: i32, %arg1: i32) -> (i32, i32) {
    %c0_i32 = arith.constant 0 : i32
    %c0_i32_0 = arith.constant 0 : i32
    %c0_i32_1 = arith.constant 0 : i32
    return %c0_i32, %c0_i32_0 : i32, i32
  }
  func.func @transform_2(%arg0: i32, %arg1: i32) -> (i32, i32) {
    %c0_i32 = arith.constant 0 : i32
    %c0_i32_0 = arith.constant 0 : i32
    %c0_i32_1 = arith.constant 0 : i32
    return %c0_i32, %c0_i32_0 : i32, i32
  }
  func.func @transform_3(%arg0: i32, %arg1: i32) -> (i32, i32, i32) {
    %c0_i32 = arith.constant 0 : i32
    %c0_i32_0 = arith.constant 0 : i32
    %c0_i32_1 = arith.constant 0 : i32
    return %arg0, %c0_i32, %c0_i32_0 : i32, i32, i32
  }
  func.func @transform_4(%arg0: i32, %arg1: i32) -> (i32, i32, i32) {
    %c0_i32 = arith.constant 0 : i32
    %c0_i32_0 = arith.constant 0 : i32
    %c0_i32_1 = arith.constant 0 : i32
    return %arg0, %c0_i32, %c0_i32_0 : i32, i32, i32
  }
}

module attributes {stable_mosaic.version = 11 : i64} {
  func.func @_mm_bias_kernel(%arg0: i32, %arg1: i32, %arg2: i32, %arg3: memref<256x128xbf16, #tpu.memory_space<vmem>>, %arg4: memref<128x128xbf16, #tpu.memory_space<vmem>>, %arg5: memref<1x128xf32, #tpu.memory_space<vmem>>, %arg6: memref<256x128xbf16, #tpu.memory_space<vmem>>, %arg7: memref<256x128xf32, #tpu.memory_space<vmem>>) attributes {dimension_semantics = [#tpu.dimension_semantics<parallel>, #tpu.dimension_semantics<parallel>, #tpu.dimension_semantics<arbitrary>], iteration_bounds = array<i64: 2, 1, 1>, scalar_prefetch = 0 : i64, scratch_operands = 1 : i64, tpu.core_type = #tpu.core_type<tc>, window_params = [{transform_indices = @transform_0, window_bounds = array<i64: 256, 128>}, {transform_indices = @transform_1, window_bounds = array<i64: 128, 128>}, {transform_indices = @transform_2, window_bounds = array<i64: 1, 128>}, {transform_indices = @transform_3, window_bounds = array<i64: 256, 128>}]} {
    %c0_i32 = arith.constant 0 : i32
    %0 = arith.cmpi eq, %arg2, %c0_i32 : i32
    %1 = arith.extui %0 : i1 to i32
    %c0_i32_0 = arith.constant 0 : i32
    %2 = arith.cmpi ne, %1, %c0_i32_0 : i32
    scf.if %2 {
      %cst_10 = arith.constant 0.000000e+00 : f32
      %12 = vector.broadcast %cst_10 : f32 to vector<256x128xf32>
      %c0_11 = arith.constant 0 : index
      %c0_12 = arith.constant 0 : index
      %13 = vector.load %arg7[%c0_11, %c0_12] : memref<256x128xf32, #tpu.memory_space<vmem>>, vector<256x128xf32>
      tpu.vector_store %arg7[%c0_11, %c0_12], %12 {strides = array<i32>} : memref<256x128xf32, #tpu.memory_space<vmem>>, vector<256x128xf32>,
    } else {
    }
    %c0 = arith.constant 0 : index
    %c0_1 = arith.constant 0 : index
    %3 = vector.load %arg7[%c0, %c0_1] : memref<256x128xf32, #tpu.memory_space<vmem>>, vector<256x128xf32>
    %c0_2 = arith.constant 0 : index
    %c0_3 = arith.constant 0 : index
    %4 = vector.load %arg3[%c0_2, %c0_3] : memref<256x128xbf16, #tpu.memory_space<vmem>>, vector<256x128xbf16>
    %c0_4 = arith.constant 0 : index
    %c0_5 = arith.constant 0 : index
    %5 = vector.load %arg4[%c0_4, %c0_5] : memref<128x128xbf16, #tpu.memory_space<vmem>>, vector<128x128xbf16>
    %cst = arith.constant dense<0.000000e+00> : vector<256x128xf32>
    %6 = tpu.matmul %4, %5, %cst {dimension_numbers = #tpu.dot_dimension_numbers<[1], [0], [0], [1], [0, 0, 1, 1], [], []>} : vector<256x128xbf16>, vector<128x128xbf16>, vector<256x128xf32> -> vector<256x128xf32>
    %7 = arith.addf %3, %6 : vector<256x128xf32>
    %c0_6 = arith.constant 0 : index
    %c0_7 = arith.constant 0 : index
    %8 = vector.load %arg7[%c0_6, %c0_7] : memref<256x128xf32, #tpu.memory_space<vmem>>, vector<256x128xf32>
    tpu.vector_store %arg7[%c0_6, %c0_7], %7 {strides = array<i32>} : memref<256x128xf32, #tpu.memory_space<vmem>>, vector<256x128xf32>,
    %c0_i32_8 = arith.constant 0 : i32
    %9 = arith.cmpi eq, %arg2, %c0_i32_8 : i32
    %10 = arith.extui %9 : i1 to i32
    %c0_i32_9 = arith.constant 0 : i32
    %11 = arith.cmpi ne, %10, %c0_i32_9 : i32
    scf.if %11 {
      %c0_10 = arith.constant 0 : index
      %c0_11 = arith.constant 0 : index
      %12 = vector.load %arg7[%c0_10, %c0_11] : memref<256x128xf32, #tpu.memory_space<vmem>>, vector<256x128xf32>
      %c0_12 = arith.constant 0 : index
      %c0_13 = arith.constant 0 : index
      %13 = vector.load %arg5[%c0_12, %c0_13] : memref<1x128xf32, #tpu.memory_space<vmem>>, vector<1x128xf32>
      %14 = vector.broadcast %13 : vector<1x128xf32> to vector<256x128xf32>
      %15 = arith.addf %12, %14 : vector<256x128xf32>
      %16 = arith.truncf %15 : vector<256x128xf32> to vector<256x128xbf16>
      %c0_14 = arith.constant 0 : index
      %c0_15 = arith.constant 0 : index
      %17 = vector.load %arg6[%c0_14, %c0_15] : memref<256x128xbf16, #tpu.memory_space<vmem>>, vector<256x128xbf16>
      tpu.vector_store %arg6[%c0_14, %c0_15], %16 {strides = array<i32>} : memref<256x128xbf16, #tpu.memory_space<vmem>>, vector<256x128xbf16>,
    } else {
    }
    return
  }
  func.func @transform_0(%arg0: i32, %arg1: i32, %arg2: i32) -> (i32, i32) {
    %c0_i32 = arith.constant 0 : i32
    return %arg0, %arg2 : i32, i32
  }
  func.func @transform_1(%arg0: i32, %arg1: i32, %arg2: i32) -> (i32, i32) {
    %c0_i32 = arith.constant 0 : i32
    return %arg2, %arg1 : i32, i32
  }
  func.func @transform_2(%arg0: i32, %arg1: i32, %arg2: i32) -> (i32, i32) {
    %c0_i32 = arith.constant 0 : i32
    %c0_i32_0 = arith.constant 0 : i32
    return %c0_i32, %arg1 : i32, i32
  }
  func.func @transform_3(%arg0: i32, %arg1: i32, %arg2: i32) -> (i32, i32) {
    %c0_i32 = arith.constant 0 : i32
    return %arg0, %arg1 : i32, i32
  }
}

module attributes {stable_mosaic.version = 11 : i64} {
  func.func @_conv3x3_res_kernel(%arg0: i32, %arg1: i32, %arg2: memref<1x1x18x128xbf16, #tpu.memory_space<vmem>>, %arg3: memref<1x1x18x128xbf16, #tpu.memory_space<vmem>>, %arg4: memref<1x1x18x128xbf16, #tpu.memory_space<vmem>>, %arg5: memref<9x128x128xbf16, #tpu.memory_space<vmem>>, %arg6: memref<1x128xf32, #tpu.memory_space<vmem>>, %arg7: memref<1x1x16x128xbf16, #tpu.memory_space<vmem>>, %arg8: memref<1x1x16x128xbf16, #tpu.memory_space<vmem>>, %arg9: memref<16x128xf32, #tpu.memory_space<vmem>>) attributes {dimension_semantics = [#tpu.dimension_semantics<parallel>, #tpu.dimension_semantics<parallel>], iteration_bounds = array<i64: 2, 16>, scalar_prefetch = 0 : i64, scratch_operands = 1 : i64, tpu.core_type = #tpu.core_type<tc>, window_params = [{transform_indices = @transform_0, window_bounds = array<i64: 1, 1, 18, 128>}, {transform_indices = @transform_1, window_bounds = array<i64: 1, 1, 18, 128>}, {transform_indices = @transform_2, window_bounds = array<i64: 1, 1, 18, 128>}, {pipeline_mode = #tpu.pipeline_mode<synchronous>, transform_indices = @transform_3, window_bounds = array<i64: 9, 128, 128>}, {pipeline_mode = #tpu.pipeline_mode<synchronous>, transform_indices = @transform_4, window_bounds = array<i64: 1, 128>}, {transform_indices = @transform_5, window_bounds = array<i64: 1, 1, 16, 128>}, {transform_indices = @transform_6, window_bounds = array<i64: 1, 1, 16, 128>}]} {
    %cst = arith.constant 0.000000e+00 : f32
    %0 = vector.broadcast %cst : f32 to vector<16x128xf32>
    %c0 = arith.constant 0 : index
    %c0_0 = arith.constant 0 : index
    %1 = vector.load %arg9[%c0, %c0_0] : memref<16x128xf32, #tpu.memory_space<vmem>>, vector<16x128xf32>
    tpu.vector_store %arg9[%c0, %c0_0], %0 {strides = array<i32>} : memref<16x128xf32, #tpu.memory_space<vmem>>, vector<16x128xf32>,
    %c0_1 = arith.constant 0 : index
    %c0_2 = arith.constant 0 : index
    %2 = vector.load %arg9[%c0_1, %c0_2] : memref<16x128xf32, #tpu.memory_space<vmem>>, vector<16x128xf32>
    %c0_3 = arith.constant 0 : index
    %c0_4 = arith.constant 0 : index
    %c0_5 = arith.constant 0 : index
    %c0_6 = arith.constant 0 : index
    %3 = vector.load %arg2[%c0_3, %c0_4, %c0_5, %c0_6] : memref<1x1x18x128xbf16, #tpu.memory_space<vmem>>, vector<1x1x16x128xbf16>
    %4 = vector.shape_cast %3 : vector<1x1x16x128xbf16> to vector<16x128xbf16>
    %c0_7 = arith.constant 0 : index
    %c0_8 = arith.constant 0 : index
    %c0_9 = arith.constant 0 : index
    %5 = vector.load %arg5[%c0_7, %c0_8, %c0_9] : memref<9x128x128xbf16, #tpu.memory_space<vmem>>, vector<1x128x128xbf16>
    %6 = vector.shape_cast %5 : vector<1x128x128xbf16> to vector<128x128xbf16>
    %cst_10 = arith.constant dense<0.000000e+00> : vector<16x128xf32>
    %7 = tpu.matmul %4, %6, %cst_10 {dimension_numbers = #tpu.dot_dimension_numbers<[1], [0], [0], [1], [0, 0, 1, 1], [], []>} : vector<16x128xbf16>, vector<128x128xbf16>, vector<16x128xf32> -> vector<16x128xf32>
    %8 = arith.addf %2, %7 : vector<16x128xf32>
    %c0_11 = arith.constant 0 : index
    %c0_12 = arith.constant 0 : index
    %9 = vector.load %arg9[%c0_11, %c0_12] : memref<16x128xf32, #tpu.memory_space<vmem>>, vector<16x128xf32>
    tpu.vector_store %arg9[%c0_11, %c0_12], %8 {strides = array<i32>} : memref<16x128xf32, #tpu.memory_space<vmem>>, vector<16x128xf32>,
    %c0_13 = arith.constant 0 : index
    %c0_14 = arith.constant 0 : index
    %10 = vector.load %arg9[%c0_13, %c0_14] : memref<16x128xf32, #tpu.memory_space<vmem>>, vector<16x128xf32>
    %c0_15 = arith.constant 0 : index
    %c0_16 = arith.constant 0 : index
    %c1 = arith.constant 1 : index
    %c0_17 = arith.constant 0 : index
    %11 = vector.load %arg2[%c0_15, %c0_16, %c1, %c0_17] : memref<1x1x18x128xbf16, #tpu.memory_space<vmem>>, vector<1x1x16x128xbf16>
    %12 = vector.shape_cast %11 : vector<1x1x16x128xbf16> to vector<16x128xbf16>
    %c1_18 = arith.constant 1 : index
    %c0_19 = arith.constant 0 : index
    %c0_20 = arith.constant 0 : index
    %13 = vector.load %arg5[%c1_18, %c0_19, %c0_20] : memref<9x128x128xbf16, #tpu.memory_space<vmem>>, vector<1x128x128xbf16>
    %14 = vector.shape_cast %13 : vector<1x128x128xbf16> to vector<128x128xbf16>
    %cst_21 = arith.constant dense<0.000000e+00> : vector<16x128xf32>
    %15 = tpu.matmul %12, %14, %cst_21 {dimension_numbers = #tpu.dot_dimension_numbers<[1], [0], [0], [1], [0, 0, 1, 1], [], []>} : vector<16x128xbf16>, vector<128x128xbf16>, vector<16x128xf32> -> vector<16x128xf32>
    %16 = arith.addf %10, %15 : vector<16x128xf32>
    %c0_22 = arith.constant 0 : index
    %c0_23 = arith.constant 0 : index
    %17 = vector.load %arg9[%c0_22, %c0_23] : memref<16x128xf32, #tpu.memory_space<vmem>>, vector<16x128xf32>
    tpu.vector_store %arg9[%c0_22, %c0_23], %16 {strides = array<i32>} : memref<16x128xf32, #tpu.memory_space<vmem>>, vector<16x128xf32>,
    %c0_24 = arith.constant 0 : index
    %c0_25 = arith.constant 0 : index
    %18 = vector.load %arg9[%c0_24, %c0_25] : memref<16x128xf32, #tpu.memory_space<vmem>>, vector<16x128xf32>
    %c0_26 = arith.constant 0 : index
    %c0_27 = arith.constant 0 : index
    %c2 = arith.constant 2 : index
    %c0_28 = arith.constant 0 : index
    %19 = vector.load %arg2[%c0_26, %c0_27, %c2, %c0_28] : memref<1x1x18x128xbf16, #tpu.memory_space<vmem>>, vector<1x1x16x128xbf16>
    %20 = vector.shape_cast %19 : vector<1x1x16x128xbf16> to vector<16x128xbf16>
    %c2_29 = arith.constant 2 : index
    %c0_30 = arith.constant 0 : index
    %c0_31 = arith.constant 0 : index
    %21 = vector.load %arg5[%c2_29, %c0_30, %c0_31] : memref<9x128x128xbf16, #tpu.memory_space<vmem>>, vector<1x128x128xbf16>
    %22 = vector.shape_cast %21 : vector<1x128x128xbf16> to vector<128x128xbf16>
    %cst_32 = arith.constant dense<0.000000e+00> : vector<16x128xf32>
    %23 = tpu.matmul %20, %22, %cst_32 {dimension_numbers = #tpu.dot_dimension_numbers<[1], [0], [0], [1], [0, 0, 1, 1], [], []>} : vector<16x128xbf16>, vector<128x128xbf16>, vector<16x128xf32> -> vector<16x128xf32>
    %24 = arith.addf %18, %23 : vector<16x128xf32>
    %c0_33 = arith.constant 0 : index
    %c0_34 = arith.constant 0 : index
    %25 = vector.load %arg9[%c0_33, %c0_34] : memref<16x128xf32, #tpu.memory_space<vmem>>, vector<16x128xf32>
    tpu.vector_store %arg9[%c0_33, %c0_34], %24 {strides = array<i32>} : memref<16x128xf32, #tpu.memory_space<vmem>>, vector<16x128xf32>,
    %c0_35 = arith.constant 0 : index
    %c0_36 = arith.constant 0 : index
    %26 = vector.load %arg9[%c0_35, %c0_36] : memref<16x128xf32, #tpu.memory_space<vmem>>, vector<16x128xf32>
    %c0_37 = arith.constant 0 : index
    %c0_38 = arith.constant 0 : index
    %c0_39 = arith.constant 0 : index
    %c0_40 = arith.constant 0 : index
    %27 = vector.load %arg3[%c0_37, %c0_38, %c0_39, %c0_40] : memref<1x1x18x128xbf16, #tpu.memory_space<vmem>>, vector<1x1x16x128xbf16>
    %28 = vector.shape_cast %27 : vector<1x1x16x128xbf16> to vector<16x128xbf16>
    %c3 = arith.constant 3 : index
    %c0_41 = arith.constant 0 : index
    %c0_42 = arith.constant 0 : index
    %29 = vector.load %arg5[%c3, %c0_41, %c0_42] : memref<9x128x128xbf16, #tpu.memory_space<vmem>>, vector<1x128x128xbf16>
    %30 = vector.shape_cast %29 : vector<1x128x128xbf16> to vector<128x128xbf16>
    %cst_43 = arith.constant dense<0.000000e+00> : vector<16x128xf32>
    %31 = tpu.matmul %28, %30, %cst_43 {dimension_numbers = #tpu.dot_dimension_numbers<[1], [0], [0], [1], [0, 0, 1, 1], [], []>} : vector<16x128xbf16>, vector<128x128xbf16>, vector<16x128xf32> -> vector<16x128xf32>
    %32 = arith.addf %26, %31 : vector<16x128xf32>
    %c0_44 = arith.constant 0 : index
    %c0_45 = arith.constant 0 : index
    %33 = vector.load %arg9[%c0_44, %c0_45] : memref<16x128xf32, #tpu.memory_space<vmem>>, vector<16x128xf32>
    tpu.vector_store %arg9[%c0_44, %c0_45], %32 {strides = array<i32>} : memref<16x128xf32, #tpu.memory_space<vmem>>, vector<16x128xf32>,
    %c0_46 = arith.constant 0 : index
    %c0_47 = arith.constant 0 : index
    %34 = vector.load %arg9[%c0_46, %c0_47] : memref<16x128xf32, #tpu.memory_space<vmem>>, vector<16x128xf32>
    %c0_48 = arith.constant 0 : index
    %c0_49 = arith.constant 0 : index
    %c1_50 = arith.constant 1 : index
    %c0_51 = arith.constant 0 : index
    %35 = vector.load %arg3[%c0_48, %c0_49, %c1_50, %c0_51] : memref<1x1x18x128xbf16, #tpu.memory_space<vmem>>, vector<1x1x16x128xbf16>
    %36 = vector.shape_cast %35 : vector<1x1x16x128xbf16> to vector<16x128xbf16>
    %c4 = arith.constant 4 : index
    %c0_52 = arith.constant 0 : index
    %c0_53 = arith.constant 0 : index
    %37 = vector.load %arg5[%c4, %c0_52, %c0_53] : memref<9x128x128xbf16, #tpu.memory_space<vmem>>, vector<1x128x128xbf16>
    %38 = vector.shape_cast %37 : vector<1x128x128xbf16> to vector<128x128xbf16>
    %cst_54 = arith.constant dense<0.000000e+00> : vector<16x128xf32>
    %39 = tpu.matmul %36, %38, %cst_54 {dimension_numbers = #tpu.dot_dimension_numbers<[1], [0], [0], [1], [0, 0, 1, 1], [], []>} : vector<16x128xbf16>, vector<128x128xbf16>, vector<16x128xf32> -> vector<16x128xf32>
    %40 = arith.addf %34, %39 : vector<16x128xf32>
    %c0_55 = arith.constant 0 : index
    %c0_56 = arith.constant 0 : index
    %41 = vector.load %arg9[%c0_55, %c0_56] : memref<16x128xf32, #tpu.memory_space<vmem>>, vector<16x128xf32>
    tpu.vector_store %arg9[%c0_55, %c0_56], %40 {strides = array<i32>} : memref<16x128xf32, #tpu.memory_space<vmem>>, vector<16x128xf32>,
    %c0_57 = arith.constant 0 : index
    %c0_58 = arith.constant 0 : index
    %42 = vector.load %arg9[%c0_57, %c0_58] : memref<16x128xf32, #tpu.memory_space<vmem>>, vector<16x128xf32>
    %c0_59 = arith.constant 0 : index
    %c0_60 = arith.constant 0 : index
    %c2_61 = arith.constant 2 : index
    %c0_62 = arith.constant 0 : index
    %43 = vector.load %arg3[%c0_59, %c0_60, %c2_61, %c0_62] : memref<1x1x18x128xbf16, #tpu.memory_space<vmem>>, vector<1x1x16x128xbf16>
    %44 = vector.shape_cast %43 : vector<1x1x16x128xbf16> to vector<16x128xbf16>
    %c5 = arith.constant 5 : index
    %c0_63 = arith.constant 0 : index
    %c0_64 = arith.constant 0 : index
    %45 = vector.load %arg5[%c5, %c0_63, %c0_64] : memref<9x128x128xbf16, #tpu.memory_space<vmem>>, vector<1x128x128xbf16>
    %46 = vector.shape_cast %45 : vector<1x128x128xbf16> to vector<128x128xbf16>
    %cst_65 = arith.constant dense<0.000000e+00> : vector<16x128xf32>
    %47 = tpu.matmul %44, %46, %cst_65 {dimension_numbers = #tpu.dot_dimension_numbers<[1], [0], [0], [1], [0, 0, 1, 1], [], []>} : vector<16x128xbf16>, vector<128x128xbf16>, vector<16x128xf32> -> vector<16x128xf32>
    %48 = arith.addf %42, %47 : vector<16x128xf32>
    %c0_66 = arith.constant 0 : index
    %c0_67 = arith.constant 0 : index
    %49 = vector.load %arg9[%c0_66, %c0_67] : memref<16x128xf32, #tpu.memory_space<vmem>>, vector<16x128xf32>
    tpu.vector_store %arg9[%c0_66, %c0_67], %48 {strides = array<i32>} : memref<16x128xf32, #tpu.memory_space<vmem>>, vector<16x128xf32>,
    %c0_68 = arith.constant 0 : index
    %c0_69 = arith.constant 0 : index
    %50 = vector.load %arg9[%c0_68, %c0_69] : memref<16x128xf32, #tpu.memory_space<vmem>>, vector<16x128xf32>
    %c0_70 = arith.constant 0 : index
    %c0_71 = arith.constant 0 : index
    %c0_72 = arith.constant 0 : index
    %c0_73 = arith.constant 0 : index
    %51 = vector.load %arg4[%c0_70, %c0_71, %c0_72, %c0_73] : memref<1x1x18x128xbf16, #tpu.memory_space<vmem>>, vector<1x1x16x128xbf16>
    %52 = vector.shape_cast %51 : vector<1x1x16x128xbf16> to vector<16x128xbf16>
    %c6 = arith.constant 6 : index
    %c0_74 = arith.constant 0 : index
    %c0_75 = arith.constant 0 : index
    %53 = vector.load %arg5[%c6, %c0_74, %c0_75] : memref<9x128x128xbf16, #tpu.memory_space<vmem>>, vector<1x128x128xbf16>
    %54 = vector.shape_cast %53 : vector<1x128x128xbf16> to vector<128x128xbf16>
    %cst_76 = arith.constant dense<0.000000e+00> : vector<16x128xf32>
    %55 = tpu.matmul %52, %54, %cst_76 {dimension_numbers = #tpu.dot_dimension_numbers<[1], [0], [0], [1], [0, 0, 1, 1], [], []>} : vector<16x128xbf16>, vector<128x128xbf16>, vector<16x128xf32> -> vector<16x128xf32>
    %56 = arith.addf %50, %55 : vector<16x128xf32>
    %c0_77 = arith.constant 0 : index
    %c0_78 = arith.constant 0 : index
    %57 = vector.load %arg9[%c0_77, %c0_78] : memref<16x128xf32, #tpu.memory_space<vmem>>, vector<16x128xf32>
    tpu.vector_store %arg9[%c0_77, %c0_78], %56 {strides = array<i32>} : memref<16x128xf32, #tpu.memory_space<vmem>>, vector<16x128xf32>,
    %c0_79 = arith.constant 0 : index
    %c0_80 = arith.constant 0 : index
    %58 = vector.load %arg9[%c0_79, %c0_80] : memref<16x128xf32, #tpu.memory_space<vmem>>, vector<16x128xf32>
    %c0_81 = arith.constant 0 : index
    %c0_82 = arith.constant 0 : index
    %c1_83 = arith.constant 1 : index
    %c0_84 = arith.constant 0 : index
    %59 = vector.load %arg4[%c0_81, %c0_82, %c1_83, %c0_84] : memref<1x1x18x128xbf16, #tpu.memory_space<vmem>>, vector<1x1x16x128xbf16>
    %60 = vector.shape_cast %59 : vector<1x1x16x128xbf16> to vector<16x128xbf16>
    %c7 = arith.constant 7 : index
    %c0_85 = arith.constant 0 : index
    %c0_86 = arith.constant 0 : index
    %61 = vector.load %arg5[%c7, %c0_85, %c0_86] : memref<9x128x128xbf16, #tpu.memory_space<vmem>>, vector<1x128x128xbf16>
    %62 = vector.shape_cast %61 : vector<1x128x128xbf16> to vector<128x128xbf16>
    %cst_87 = arith.constant dense<0.000000e+00> : vector<16x128xf32>
    %63 = tpu.matmul %60, %62, %cst_87 {dimension_numbers = #tpu.dot_dimension_numbers<[1], [0], [0], [1], [0, 0, 1, 1], [], []>} : vector<16x128xbf16>, vector<128x128xbf16>, vector<16x128xf32> -> vector<16x128xf32>
    %64 = arith.addf %58, %63 : vector<16x128xf32>
    %c0_88 = arith.constant 0 : index
    %c0_89 = arith.constant 0 : index
    %65 = vector.load %arg9[%c0_88, %c0_89] : memref<16x128xf32, #tpu.memory_space<vmem>>, vector<16x128xf32>
    tpu.vector_store %arg9[%c0_88, %c0_89], %64 {strides = array<i32>} : memref<16x128xf32, #tpu.memory_space<vmem>>, vector<16x128xf32>,
    %c0_90 = arith.constant 0 : index
    %c0_91 = arith.constant 0 : index
    %66 = vector.load %arg9[%c0_90, %c0_91] : memref<16x128xf32, #tpu.memory_space<vmem>>, vector<16x128xf32>
    %c0_92 = arith.constant 0 : index
    %c0_93 = arith.constant 0 : index
    %c2_94 = arith.constant 2 : index
    %c0_95 = arith.constant 0 : index
    %67 = vector.load %arg4[%c0_92, %c0_93, %c2_94, %c0_95] : memref<1x1x18x128xbf16, #tpu.memory_space<vmem>>, vector<1x1x16x128xbf16>
    %68 = vector.shape_cast %67 : vector<1x1x16x128xbf16> to vector<16x128xbf16>
    %c8 = arith.constant 8 : index
    %c0_96 = arith.constant 0 : index
    %c0_97 = arith.constant 0 : index
    %69 = vector.load %arg5[%c8, %c0_96, %c0_97] : memref<9x128x128xbf16, #tpu.memory_space<vmem>>, vector<1x128x128xbf16>
    %70 = vector.shape_cast %69 : vector<1x128x128xbf16> to vector<128x128xbf16>
    %cst_98 = arith.constant dense<0.000000e+00> : vector<16x128xf32>
    %71 = tpu.matmul %68, %70, %cst_98 {dimension_numbers = #tpu.dot_dimension_numbers<[1], [0], [0], [1], [0, 0, 1, 1], [], []>} : vector<16x128xbf16>, vector<128x128xbf16>, vector<16x128xf32> -> vector<16x128xf32>
    %72 = arith.addf %66, %71 : vector<16x128xf32>
    %c0_99 = arith.constant 0 : index
    %c0_100 = arith.constant 0 : index
    %73 = vector.load %arg9[%c0_99, %c0_100] : memref<16x128xf32, #tpu.memory_space<vmem>>, vector<16x128xf32>
    tpu.vector_store %arg9[%c0_99, %c0_100], %72 {strides = array<i32>} : memref<16x128xf32, #tpu.memory_space<vmem>>, vector<16x128xf32>,
    %c0_101 = arith.constant 0 : index
    %c0_102 = arith.constant 0 : index
    %74 = vector.load %arg9[%c0_101, %c0_102] : memref<16x128xf32, #tpu.memory_space<vmem>>, vector<16x128xf32>
    %c0_103 = arith.constant 0 : index
    %c0_104 = arith.constant 0 : index
    %75 = vector.load %arg6[%c0_103, %c0_104] : memref<1x128xf32, #tpu.memory_space<vmem>>, vector<1x128xf32>
    %76 = vector.broadcast %75 : vector<1x128xf32> to vector<16x128xf32>
    %77 = arith.addf %74, %76 : vector<16x128xf32>
    %c0_105 = arith.constant 0 : index
    %c0_106 = arith.constant 0 : index
    %c0_107 = arith.constant 0 : index
    %c0_108 = arith.constant 0 : index
    %78 = vector.load %arg7[%c0_105, %c0_106, %c0_107, %c0_108] : memref<1x1x16x128xbf16, #tpu.memory_space<vmem>>, vector<1x1x16x128xbf16>
    %79 = vector.shape_cast %78 : vector<1x1x16x128xbf16> to vector<16x128xbf16>
    %80 = arith.extf %79 : vector<16x128xbf16> to vector<16x128xf32>
    %81 = arith.addf %77, %80 : vector<16x128xf32>
    %82 = arith.truncf %81 : vector<16x128xf32> to vector<16x128xbf16>
    %c0_109 = arith.constant 0 : index
    %c0_110 = arith.constant 0 : index
    %c0_111 = arith.constant 0 : index
    %c0_112 = arith.constant 0 : index
    %83 = vector.load %arg8[%c0_109, %c0_110, %c0_111, %c0_112] : memref<1x1x16x128xbf16, #tpu.memory_space<vmem>>, vector<1x1x16x128xbf16>
    %84 = vector.shape_cast %83 : vector<1x1x16x128xbf16> to vector<16x128xbf16>
    %85 = vector.shape_cast %82 : vector<16x128xbf16> to vector<1x1x16x128xbf16>
    tpu.vector_store %arg8[%c0_109, %c0_110, %c0_111, %c0_112], %85 {strides = array<i32>} : memref<1x1x16x128xbf16, #tpu.memory_space<vmem>>, vector<1x1x16x128xbf16>,
    return
  }
  func.func @transform_0(%arg0: i32, %arg1: i32) -> (i32, i32, i32, i32) {
    %c0_i32 = arith.constant 0 : i32
    %c0_i32_0 = arith.constant 0 : i32
    %c0_i32_1 = arith.constant 0 : i32
    return %arg0, %arg1, %c0_i32, %c0_i32_0 : i32, i32, i32, i32
  }
  func.func @transform_1(%arg0: i32, %arg1: i32) -> (i32, i32, i32, i32) {
    %c1_i32 = arith.constant 1 : i32
    %0 = arith.addi %arg1, %c1_i32 : i32
    %c0_i32 = arith.constant 0 : i32
    %c0_i32_0 = arith.constant 0 : i32
    %c0_i32_1 = arith.constant 0 : i32
    return %arg0, %0, %c0_i32, %c0_i32_0 : i32, i32, i32, i32
  }
  func.func @transform_2(%arg0: i32, %arg1: i32) -> (i32, i32, i32, i32) {
    %c2_i32 = arith.constant 2 : i32
    %0 = arith.addi %arg1, %c2_i32 : i32
    %c0_i32 = arith.constant 0 : i32
    %c0_i32_0 = arith.constant 0 : i32
    %c0_i32_1 = arith.constant 0 : i32
    return %arg0, %0, %c0_i32, %c0_i32_0 : i32, i32, i32, i32
  }
  func.func @transform_3(%arg0: i32, %arg1: i32) -> (i32, i32, i32) {
    %c0_i32 = arith.constant 0 : i32
    %c0_i32_0 = arith.constant 0 : i32
    %c0_i32_1 = arith.constant 0 : i32
    %c0_i32_2 = arith.constant 0 : i32
    return %c0_i32, %c0_i32_0, %c0_i32_1 : i32, i32, i32
  }
  func.func @transform_4(%arg0: i32, %arg1: i32) -> (i32, i32) {
    %c0_i32 = arith.constant 0 : i32
    %c0_i32_0 = arith.constant 0 : i32
    %c0_i32_1 = arith.constant 0 : i32
    return %c0_i32, %c0_i32_0 : i32, i32
  }
  func.func @transform_5(%arg0: i32, %arg1: i32) -> (i32, i32, i32, i32) {
    %c0_i32 = arith.constant 0 : i32
    %c0_i32_0 = arith.constant 0 : i32
    %c0_i32_1 = arith.constant 0 : i32
    return %arg0, %arg1, %c0_i32, %c0_i32_0 : i32, i32, i32, i32
  }
  func.func @transform_6(%arg0: i32, %arg1: i32) -> (i32, i32, i32, i32) {
    %c0_i32 = arith.constant 0 : i32
    %c0_i32_0 = arith.constant 0 : i32
    %c0_i32_1 = arith.constant 0 : i32
    return %arg0, %arg1, %c0_i32, %c0_i32_0 : i32, i32, i32, i32
  }
}

module attributes {stable_mosaic.version = 11 : i64} {
  func.func @_conv3x3_kernel(%arg0: i32, %arg1: i32, %arg2: memref<1x1x18x128xbf16, #tpu.memory_space<vmem>>, %arg3: memref<1x1x18x128xbf16, #tpu.memory_space<vmem>>, %arg4: memref<1x1x18x128xbf16, #tpu.memory_space<vmem>>, %arg5: memref<9x128x128xbf16, #tpu.memory_space<vmem>>, %arg6: memref<1x128xf32, #tpu.memory_space<vmem>>, %arg7: memref<1x1x16x128xf32, #tpu.memory_space<vmem>>, %arg8: memref<16x128xf32, #tpu.memory_space<vmem>>) attributes {dimension_semantics = [#tpu.dimension_semantics<parallel>, #tpu.dimension_semantics<parallel>], iteration_bounds = array<i64: 2, 16>, scalar_prefetch = 0 : i64, scratch_operands = 1 : i64, tpu.core_type = #tpu.core_type<tc>, window_params = [{transform_indices = @transform_0, window_bounds = array<i64: 1, 1, 18, 128>}, {transform_indices = @transform_1, window_bounds = array<i64: 1, 1, 18, 128>}, {transform_indices = @transform_2, window_bounds = array<i64: 1, 1, 18, 128>}, {pipeline_mode = #tpu.pipeline_mode<synchronous>, transform_indices = @transform_3, window_bounds = array<i64: 9, 128, 128>}, {pipeline_mode = #tpu.pipeline_mode<synchronous>, transform_indices = @transform_4, window_bounds = array<i64: 1, 128>}, {transform_indices = @transform_5, window_bounds = array<i64: 1, 1, 16, 128>}]} {
    %cst = arith.constant 0.000000e+00 : f32
    %0 = vector.broadcast %cst : f32 to vector<16x128xf32>
    %c0 = arith.constant 0 : index
    %c0_0 = arith.constant 0 : index
    %1 = vector.load %arg8[%c0, %c0_0] : memref<16x128xf32, #tpu.memory_space<vmem>>, vector<16x128xf32>
    tpu.vector_store %arg8[%c0, %c0_0], %0 {strides = array<i32>} : memref<16x128xf32, #tpu.memory_space<vmem>>, vector<16x128xf32>,
    %c0_1 = arith.constant 0 : index
    %c0_2 = arith.constant 0 : index
    %2 = vector.load %arg8[%c0_1, %c0_2] : memref<16x128xf32, #tpu.memory_space<vmem>>, vector<16x128xf32>
    %c0_3 = arith.constant 0 : index
    %c0_4 = arith.constant 0 : index
    %c0_5 = arith.constant 0 : index
    %c0_6 = arith.constant 0 : index
    %3 = vector.load %arg2[%c0_3, %c0_4, %c0_5, %c0_6] : memref<1x1x18x128xbf16, #tpu.memory_space<vmem>>, vector<1x1x16x128xbf16>
    %4 = vector.shape_cast %3 : vector<1x1x16x128xbf16> to vector<16x128xbf16>
    %c0_7 = arith.constant 0 : index
    %c0_8 = arith.constant 0 : index
    %c0_9 = arith.constant 0 : index
    %5 = vector.load %arg5[%c0_7, %c0_8, %c0_9] : memref<9x128x128xbf16, #tpu.memory_space<vmem>>, vector<1x128x128xbf16>
    %6 = vector.shape_cast %5 : vector<1x128x128xbf16> to vector<128x128xbf16>
    %cst_10 = arith.constant dense<0.000000e+00> : vector<16x128xf32>
    %7 = tpu.matmul %4, %6, %cst_10 {dimension_numbers = #tpu.dot_dimension_numbers<[1], [0], [0], [1], [0, 0, 1, 1], [], []>} : vector<16x128xbf16>, vector<128x128xbf16>, vector<16x128xf32> -> vector<16x128xf32>
    %8 = arith.addf %2, %7 : vector<16x128xf32>
    %c0_11 = arith.constant 0 : index
    %c0_12 = arith.constant 0 : index
    %9 = vector.load %arg8[%c0_11, %c0_12] : memref<16x128xf32, #tpu.memory_space<vmem>>, vector<16x128xf32>
    tpu.vector_store %arg8[%c0_11, %c0_12], %8 {strides = array<i32>} : memref<16x128xf32, #tpu.memory_space<vmem>>, vector<16x128xf32>,
    %c0_13 = arith.constant 0 : index
    %c0_14 = arith.constant 0 : index
    %10 = vector.load %arg8[%c0_13, %c0_14] : memref<16x128xf32, #tpu.memory_space<vmem>>, vector<16x128xf32>
    %c0_15 = arith.constant 0 : index
    %c0_16 = arith.constant 0 : index
    %c1 = arith.constant 1 : index
    %c0_17 = arith.constant 0 : index
    %11 = vector.load %arg2[%c0_15, %c0_16, %c1, %c0_17] : memref<1x1x18x128xbf16, #tpu.memory_space<vmem>>, vector<1x1x16x128xbf16>
    %12 = vector.shape_cast %11 : vector<1x1x16x128xbf16> to vector<16x128xbf16>
    %c1_18 = arith.constant 1 : index
    %c0_19 = arith.constant 0 : index
    %c0_20 = arith.constant 0 : index
    %13 = vector.load %arg5[%c1_18, %c0_19, %c0_20] : memref<9x128x128xbf16, #tpu.memory_space<vmem>>, vector<1x128x128xbf16>
    %14 = vector.shape_cast %13 : vector<1x128x128xbf16> to vector<128x128xbf16>
    %cst_21 = arith.constant dense<0.000000e+00> : vector<16x128xf32>
    %15 = tpu.matmul %12, %14, %cst_21 {dimension_numbers = #tpu.dot_dimension_numbers<[1], [0], [0], [1], [0, 0, 1, 1], [], []>} : vector<16x128xbf16>, vector<128x128xbf16>, vector<16x128xf32> -> vector<16x128xf32>
    %16 = arith.addf %10, %15 : vector<16x128xf32>
    %c0_22 = arith.constant 0 : index
    %c0_23 = arith.constant 0 : index
    %17 = vector.load %arg8[%c0_22, %c0_23] : memref<16x128xf32, #tpu.memory_space<vmem>>, vector<16x128xf32>
    tpu.vector_store %arg8[%c0_22, %c0_23], %16 {strides = array<i32>} : memref<16x128xf32, #tpu.memory_space<vmem>>, vector<16x128xf32>,
    %c0_24 = arith.constant 0 : index
    %c0_25 = arith.constant 0 : index
    %18 = vector.load %arg8[%c0_24, %c0_25] : memref<16x128xf32, #tpu.memory_space<vmem>>, vector<16x128xf32>
    %c0_26 = arith.constant 0 : index
    %c0_27 = arith.constant 0 : index
    %c2 = arith.constant 2 : index
    %c0_28 = arith.constant 0 : index
    %19 = vector.load %arg2[%c0_26, %c0_27, %c2, %c0_28] : memref<1x1x18x128xbf16, #tpu.memory_space<vmem>>, vector<1x1x16x128xbf16>
    %20 = vector.shape_cast %19 : vector<1x1x16x128xbf16> to vector<16x128xbf16>
    %c2_29 = arith.constant 2 : index
    %c0_30 = arith.constant 0 : index
    %c0_31 = arith.constant 0 : index
    %21 = vector.load %arg5[%c2_29, %c0_30, %c0_31] : memref<9x128x128xbf16, #tpu.memory_space<vmem>>, vector<1x128x128xbf16>
    %22 = vector.shape_cast %21 : vector<1x128x128xbf16> to vector<128x128xbf16>
    %cst_32 = arith.constant dense<0.000000e+00> : vector<16x128xf32>
    %23 = tpu.matmul %20, %22, %cst_32 {dimension_numbers = #tpu.dot_dimension_numbers<[1], [0], [0], [1], [0, 0, 1, 1], [], []>} : vector<16x128xbf16>, vector<128x128xbf16>, vector<16x128xf32> -> vector<16x128xf32>
    %24 = arith.addf %18, %23 : vector<16x128xf32>
    %c0_33 = arith.constant 0 : index
    %c0_34 = arith.constant 0 : index
    %25 = vector.load %arg8[%c0_33, %c0_34] : memref<16x128xf32, #tpu.memory_space<vmem>>, vector<16x128xf32>
    tpu.vector_store %arg8[%c0_33, %c0_34], %24 {strides = array<i32>} : memref<16x128xf32, #tpu.memory_space<vmem>>, vector<16x128xf32>,
    %c0_35 = arith.constant 0 : index
    %c0_36 = arith.constant 0 : index
    %26 = vector.load %arg8[%c0_35, %c0_36] : memref<16x128xf32, #tpu.memory_space<vmem>>, vector<16x128xf32>
    %c0_37 = arith.constant 0 : index
    %c0_38 = arith.constant 0 : index
    %c0_39 = arith.constant 0 : index
    %c0_40 = arith.constant 0 : index
    %27 = vector.load %arg3[%c0_37, %c0_38, %c0_39, %c0_40] : memref<1x1x18x128xbf16, #tpu.memory_space<vmem>>, vector<1x1x16x128xbf16>
    %28 = vector.shape_cast %27 : vector<1x1x16x128xbf16> to vector<16x128xbf16>
    %c3 = arith.constant 3 : index
    %c0_41 = arith.constant 0 : index
    %c0_42 = arith.constant 0 : index
    %29 = vector.load %arg5[%c3, %c0_41, %c0_42] : memref<9x128x128xbf16, #tpu.memory_space<vmem>>, vector<1x128x128xbf16>
    %30 = vector.shape_cast %29 : vector<1x128x128xbf16> to vector<128x128xbf16>
    %cst_43 = arith.constant dense<0.000000e+00> : vector<16x128xf32>
    %31 = tpu.matmul %28, %30, %cst_43 {dimension_numbers = #tpu.dot_dimension_numbers<[1], [0], [0], [1], [0, 0, 1, 1], [], []>} : vector<16x128xbf16>, vector<128x128xbf16>, vector<16x128xf32> -> vector<16x128xf32>
    %32 = arith.addf %26, %31 : vector<16x128xf32>
    %c0_44 = arith.constant 0 : index
    %c0_45 = arith.constant 0 : index
    %33 = vector.load %arg8[%c0_44, %c0_45] : memref<16x128xf32, #tpu.memory_space<vmem>>, vector<16x128xf32>
    tpu.vector_store %arg8[%c0_44, %c0_45], %32 {strides = array<i32>} : memref<16x128xf32, #tpu.memory_space<vmem>>, vector<16x128xf32>,
    %c0_46 = arith.constant 0 : index
    %c0_47 = arith.constant 0 : index
    %34 = vector.load %arg8[%c0_46, %c0_47] : memref<16x128xf32, #tpu.memory_space<vmem>>, vector<16x128xf32>
    %c0_48 = arith.constant 0 : index
    %c0_49 = arith.constant 0 : index
    %c1_50 = arith.constant 1 : index
    %c0_51 = arith.constant 0 : index
    %35 = vector.load %arg3[%c0_48, %c0_49, %c1_50, %c0_51] : memref<1x1x18x128xbf16, #tpu.memory_space<vmem>>, vector<1x1x16x128xbf16>
    %36 = vector.shape_cast %35 : vector<1x1x16x128xbf16> to vector<16x128xbf16>
    %c4 = arith.constant 4 : index
    %c0_52 = arith.constant 0 : index
    %c0_53 = arith.constant 0 : index
    %37 = vector.load %arg5[%c4, %c0_52, %c0_53] : memref<9x128x128xbf16, #tpu.memory_space<vmem>>, vector<1x128x128xbf16>
    %38 = vector.shape_cast %37 : vector<1x128x128xbf16> to vector<128x128xbf16>
    %cst_54 = arith.constant dense<0.000000e+00> : vector<16x128xf32>
    %39 = tpu.matmul %36, %38, %cst_54 {dimension_numbers = #tpu.dot_dimension_numbers<[1], [0], [0], [1], [0, 0, 1, 1], [], []>} : vector<16x128xbf16>, vector<128x128xbf16>, vector<16x128xf32> -> vector<16x128xf32>
    %40 = arith.addf %34, %39 : vector<16x128xf32>
    %c0_55 = arith.constant 0 : index
    %c0_56 = arith.constant 0 : index
    %41 = vector.load %arg8[%c0_55, %c0_56] : memref<16x128xf32, #tpu.memory_space<vmem>>, vector<16x128xf32>
    tpu.vector_store %arg8[%c0_55, %c0_56], %40 {strides = array<i32>} : memref<16x128xf32, #tpu.memory_space<vmem>>, vector<16x128xf32>,
    %c0_57 = arith.constant 0 : index
    %c0_58 = arith.constant 0 : index
    %42 = vector.load %arg8[%c0_57, %c0_58] : memref<16x128xf32, #tpu.memory_space<vmem>>, vector<16x128xf32>
    %c0_59 = arith.constant 0 : index
    %c0_60 = arith.constant 0 : index
    %c2_61 = arith.constant 2 : index
    %c0_62 = arith.constant 0 : index
    %43 = vector.load %arg3[%c0_59, %c0_60, %c2_61, %c0_62] : memref<1x1x18x128xbf16, #tpu.memory_space<vmem>>, vector<1x1x16x128xbf16>
    %44 = vector.shape_cast %43 : vector<1x1x16x128xbf16> to vector<16x128xbf16>
    %c5 = arith.constant 5 : index
    %c0_63 = arith.constant 0 : index
    %c0_64 = arith.constant 0 : index
    %45 = vector.load %arg5[%c5, %c0_63, %c0_64] : memref<9x128x128xbf16, #tpu.memory_space<vmem>>, vector<1x128x128xbf16>
    %46 = vector.shape_cast %45 : vector<1x128x128xbf16> to vector<128x128xbf16>
    %cst_65 = arith.constant dense<0.000000e+00> : vector<16x128xf32>
    %47 = tpu.matmul %44, %46, %cst_65 {dimension_numbers = #tpu.dot_dimension_numbers<[1], [0], [0], [1], [0, 0, 1, 1], [], []>} : vector<16x128xbf16>, vector<128x128xbf16>, vector<16x128xf32> -> vector<16x128xf32>
    %48 = arith.addf %42, %47 : vector<16x128xf32>
    %c0_66 = arith.constant 0 : index
    %c0_67 = arith.constant 0 : index
    %49 = vector.load %arg8[%c0_66, %c0_67] : memref<16x128xf32, #tpu.memory_space<vmem>>, vector<16x128xf32>
    tpu.vector_store %arg8[%c0_66, %c0_67], %48 {strides = array<i32>} : memref<16x128xf32, #tpu.memory_space<vmem>>, vector<16x128xf32>,
    %c0_68 = arith.constant 0 : index
    %c0_69 = arith.constant 0 : index
    %50 = vector.load %arg8[%c0_68, %c0_69] : memref<16x128xf32, #tpu.memory_space<vmem>>, vector<16x128xf32>
    %c0_70 = arith.constant 0 : index
    %c0_71 = arith.constant 0 : index
    %c0_72 = arith.constant 0 : index
    %c0_73 = arith.constant 0 : index
    %51 = vector.load %arg4[%c0_70, %c0_71, %c0_72, %c0_73] : memref<1x1x18x128xbf16, #tpu.memory_space<vmem>>, vector<1x1x16x128xbf16>
    %52 = vector.shape_cast %51 : vector<1x1x16x128xbf16> to vector<16x128xbf16>
    %c6 = arith.constant 6 : index
    %c0_74 = arith.constant 0 : index
    %c0_75 = arith.constant 0 : index
    %53 = vector.load %arg5[%c6, %c0_74, %c0_75] : memref<9x128x128xbf16, #tpu.memory_space<vmem>>, vector<1x128x128xbf16>
    %54 = vector.shape_cast %53 : vector<1x128x128xbf16> to vector<128x128xbf16>
    %cst_76 = arith.constant dense<0.000000e+00> : vector<16x128xf32>
    %55 = tpu.matmul %52, %54, %cst_76 {dimension_numbers = #tpu.dot_dimension_numbers<[1], [0], [0], [1], [0, 0, 1, 1], [], []>} : vector<16x128xbf16>, vector<128x128xbf16>, vector<16x128xf32> -> vector<16x128xf32>
    %56 = arith.addf %50, %55 : vector<16x128xf32>
    %c0_77 = arith.constant 0 : index
    %c0_78 = arith.constant 0 : index
    %57 = vector.load %arg8[%c0_77, %c0_78] : memref<16x128xf32, #tpu.memory_space<vmem>>, vector<16x128xf32>
    tpu.vector_store %arg8[%c0_77, %c0_78], %56 {strides = array<i32>} : memref<16x128xf32, #tpu.memory_space<vmem>>, vector<16x128xf32>,
    %c0_79 = arith.constant 0 : index
    %c0_80 = arith.constant 0 : index
    %58 = vector.load %arg8[%c0_79, %c0_80] : memref<16x128xf32, #tpu.memory_space<vmem>>, vector<16x128xf32>
    %c0_81 = arith.constant 0 : index
    %c0_82 = arith.constant 0 : index
    %c1_83 = arith.constant 1 : index
    %c0_84 = arith.constant 0 : index
    %59 = vector.load %arg4[%c0_81, %c0_82, %c1_83, %c0_84] : memref<1x1x18x128xbf16, #tpu.memory_space<vmem>>, vector<1x1x16x128xbf16>
    %60 = vector.shape_cast %59 : vector<1x1x16x128xbf16> to vector<16x128xbf16>
    %c7 = arith.constant 7 : index
    %c0_85 = arith.constant 0 : index
    %c0_86 = arith.constant 0 : index
    %61 = vector.load %arg5[%c7, %c0_85, %c0_86] : memref<9x128x128xbf16, #tpu.memory_space<vmem>>, vector<1x128x128xbf16>
    %62 = vector.shape_cast %61 : vector<1x128x128xbf16> to vector<128x128xbf16>
    %cst_87 = arith.constant dense<0.000000e+00> : vector<16x128xf32>
    %63 = tpu.matmul %60, %62, %cst_87 {dimension_numbers = #tpu.dot_dimension_numbers<[1], [0], [0], [1], [0, 0, 1, 1], [], []>} : vector<16x128xbf16>, vector<128x128xbf16>, vector<16x128xf32> -> vector<16x128xf32>
    %64 = arith.addf %58, %63 : vector<16x128xf32>
    %c0_88 = arith.constant 0 : index
    %c0_89 = arith.constant 0 : index
    %65 = vector.load %arg8[%c0_88, %c0_89] : memref<16x128xf32, #tpu.memory_space<vmem>>, vector<16x128xf32>
    tpu.vector_store %arg8[%c0_88, %c0_89], %64 {strides = array<i32>} : memref<16x128xf32, #tpu.memory_space<vmem>>, vector<16x128xf32>,
    %c0_90 = arith.constant 0 : index
    %c0_91 = arith.constant 0 : index
    %66 = vector.load %arg8[%c0_90, %c0_91] : memref<16x128xf32, #tpu.memory_space<vmem>>, vector<16x128xf32>
    %c0_92 = arith.constant 0 : index
    %c0_93 = arith.constant 0 : index
    %c2_94 = arith.constant 2 : index
    %c0_95 = arith.constant 0 : index
    %67 = vector.load %arg4[%c0_92, %c0_93, %c2_94, %c0_95] : memref<1x1x18x128xbf16, #tpu.memory_space<vmem>>, vector<1x1x16x128xbf16>
    %68 = vector.shape_cast %67 : vector<1x1x16x128xbf16> to vector<16x128xbf16>
    %c8 = arith.constant 8 : index
    %c0_96 = arith.constant 0 : index
    %c0_97 = arith.constant 0 : index
    %69 = vector.load %arg5[%c8, %c0_96, %c0_97] : memref<9x128x128xbf16, #tpu.memory_space<vmem>>, vector<1x128x128xbf16>
    %70 = vector.shape_cast %69 : vector<1x128x128xbf16> to vector<128x128xbf16>
    %cst_98 = arith.constant dense<0.000000e+00> : vector<16x128xf32>
    %71 = tpu.matmul %68, %70, %cst_98 {dimension_numbers = #tpu.dot_dimension_numbers<[1], [0], [0], [1], [0, 0, 1, 1], [], []>} : vector<16x128xbf16>, vector<128x128xbf16>, vector<16x128xf32> -> vector<16x128xf32>
    %72 = arith.addf %66, %71 : vector<16x128xf32>
    %c0_99 = arith.constant 0 : index
    %c0_100 = arith.constant 0 : index
    %73 = vector.load %arg8[%c0_99, %c0_100] : memref<16x128xf32, #tpu.memory_space<vmem>>, vector<16x128xf32>
    tpu.vector_store %arg8[%c0_99, %c0_100], %72 {strides = array<i32>} : memref<16x128xf32, #tpu.memory_space<vmem>>, vector<16x128xf32>,
    %c0_101 = arith.constant 0 : index
    %c0_102 = arith.constant 0 : index
    %74 = vector.load %arg8[%c0_101, %c0_102] : memref<16x128xf32, #tpu.memory_space<vmem>>, vector<16x128xf32>
    %c0_103 = arith.constant 0 : index
    %c0_104 = arith.constant 0 : index
    %75 = vector.load %arg6[%c0_103, %c0_104] : memref<1x128xf32, #tpu.memory_space<vmem>>, vector<1x128xf32>
    %76 = vector.broadcast %75 : vector<1x128xf32> to vector<16x128xf32>
    %77 = arith.addf %74, %76 : vector<16x128xf32>
    %c0_105 = arith.constant 0 : index
    %c0_106 = arith.constant 0 : index
    %c0_107 = arith.constant 0 : index
    %c0_108 = arith.constant 0 : index
    %78 = vector.load %arg7[%c0_105, %c0_106, %c0_107, %c0_108] : memref<1x1x16x128xf32, #tpu.memory_space<vmem>>, vector<1x1x16x128xf32>
    %79 = vector.shape_cast %78 : vector<1x1x16x128xf32> to vector<16x128xf32>
    %80 = vector.shape_cast %77 : vector<16x128xf32> to vector<1x1x16x128xf32>
    tpu.vector_store %arg7[%c0_105, %c0_106, %c0_107, %c0_108], %80 {strides = array<i32>} : memref<1x1x16x128xf32, #tpu.memory_space<vmem>>, vector<1x1x16x128xf32>,
    return
  }
  func.func @transform_0(%arg0: i32, %arg1: i32) -> (i32, i32, i32, i32) {
    %c0_i32 = arith.constant 0 : i32
    %c0_i32_0 = arith.constant 0 : i32
    %c0_i32_1 = arith.constant 0 : i32
    return %arg0, %arg1, %c0_i32, %c0_i32_0 : i32, i32, i32, i32
  }
  func.func @transform_1(%arg0: i32, %arg1: i32) -> (i32, i32, i32, i32) {
    %c1_i32 = arith.constant 1 : i32
    %0 = arith.addi %arg1, %c1_i32 : i32
    %c0_i32 = arith.constant 0 : i32
    %c0_i32_0 = arith.constant 0 : i32
    %c0_i32_1 = arith.constant 0 : i32
    return %arg0, %0, %c0_i32, %c0_i32_0 : i32, i32, i32, i32
  }
  func.func @transform_2(%arg0: i32, %arg1: i32) -> (i32, i32, i32, i32) {
    %c2_i32 = arith.constant 2 : i32
    %0 = arith.addi %arg1, %c2_i32 : i32
    %c0_i32 = arith.constant 0 : i32
    %c0_i32_0 = arith.constant 0 : i32
    %c0_i32_1 = arith.constant 0 : i32
    return %arg0, %0, %c0_i32, %c0_i32_0 : i32, i32, i32, i32
  }
  func.func @transform_3(%arg0: i32, %arg1: i32) -> (i32, i32, i32) {
    %c0_i32 = arith.constant 0 : i32
    %c0_i32_0 = arith.constant 0 : i32
    %c0_i32_1 = arith.constant 0 : i32
    %c0_i32_2 = arith.constant 0 : i32
    return %c0_i32, %c0_i32_0, %c0_i32_1 : i32, i32, i32
  }
  func.func @transform_4(%arg0: i32, %arg1: i32) -> (i32, i32) {
    %c0_i32 = arith.constant 0 : i32
    %c0_i32_0 = arith.constant 0 : i32
    %c0_i32_1 = arith.constant 0 : i32
    return %c0_i32, %c0_i32_0 : i32, i32
  }
  func.func @transform_5(%arg0: i32, %arg1: i32) -> (i32, i32, i32, i32) {
    %c0_i32 = arith.constant 0 : i32
    %c0_i32_0 = arith.constant 0 : i32
    %c0_i32_1 = arith.constant 0 : i32
    return %arg0, %arg1, %c0_i32, %c0_i32_0 : i32, i32, i32, i32
  }
}

</mosaic_0001>

<bundles_post_ra>
// kernel: _lambda_.58
= control target key start
LH: loop header
LB: loop body
LE: loop exit
PB: predicated region body
PF: predicated region fallthrough
CT: control target
= control target key end

     0   :  { %s616_s15 = smov 0   ;;  %s618_s16 = smov 0   ;;  %s717_s0 = inlined_call_operand.vmem [shape: bf16[2,64,128], index: 0, kind: input, shape index: {}]   ;;  %s718_s1 = inlined_call_operand.vmem [shape: f32[128,32], index: 1, kind: input, shape index: {}]   ;;  %s719_s2 = inlined_call_operand.vmem [shape: f32[32,128], index: 2, kind: input, shape index: {}]   ;;  %s720_s3 = inlined_call_operand.vmem [shape: f32[2,1,128], index: 3, kind: output, shape index: {0}]   ;;  %s721_s4 = inlined_call_operand.vmem [shape: f32[2,1,128], index: 4, kind: output, shape index: {1}]  }
   0x1   :  { %s620_s17 = smov 0  }
   0x2 LB: > { %s27_s18 = sadd.s32 1, %s584_s16  ;;  %p512_p0 = scmp.ge.s32.totalorder %s588_s17, 1  ;;  %s588_s17 = sphi %s620_s17, %s15_s17   ;;  %s584_s16 = sphi %s618_s16, %s723_s16   ;;  %s580_s15 = sphi %s616_s15, %s722_s15  }
   0x3   : > { %p29_p1 = scmp.ge.s32.totalorder %s27_s18, 2  ;;  %p184_p2 = scmp.lt.s32.totalorder %s588_s17, 3 }
   0x5   : > { %s725_s18 = smov (%p29_p1, %s27_s18), 0  ;;  %p185_p3 = pnand %p512_p0, %p184_p2 }
   0x6   : > { %p216_p4 = scmp.lt.s32.totalorder (!%p185_p3), %s580_s15, 1 }
   0x7   : > { %188 = sbr.rel (%p185_p3) target bundleno = 341 (0x155), region = 32 }
   0xc   : > { %v312_v0 = vld [vmem:[%s718_s1 + $0x78] sm:$0xff]  ;;  %v311_v1 = vld [vmem:[%s718_s1 + $0x70] sm:$0xff]  ;;  %v590_v2 = vmov 0.0   ;;  %v310_v3 = vld [vmem:[%s718_s1 + $0x68] sm:$0xff]  ;;  %s727_s15 = smov (!%p216_p4, %s580_s15), 1  ;;  %vm363_vm0 = vcmask 261120  }
   0xd   : > { %313 = vmatpush.msra.mxu0 %v312_v0  ;;  %335 = vmatpush.msra.mxu1 %v312_v0  ;;  %235 = vst [vmem:[#allocation2] sm:$0x1] %v590_v2  ;;  %v309_v4 = vld [vmem:[%s718_s1 + $0x60] sm:$0xff]  ;;  %s519_s27 = sshll.u32 %s727_s15, 5  ;;  %v308_v5 = vld [vmem:[%s718_s1 + $0x58] sm:$0xff]  ;;  %v307_v12 = vld [vmem:[%s718_s1 + $0x50] sm:$0xff]  ;;  %s227_s21 = scalar_lea.vmem %s720_s3, %s727_s15 }
   0xe   : > { %236 = vst [vmem:[#allocation3] sm:$0x1] %v590_v2  ;;  %s223_s30 = scalar_lea.vmem %s717_s0, %s519_s27  ;;  %v306_v17 = vld [vmem:[%s718_s1 + $0x48] sm:$0xff]  ;;  %v305_v22 = vld [vmem:[%s718_s1 + $0x40] sm:$0xff]  ;;  %v304_v27 = vld [vmem:[%s718_s1 + $0x38] sm:$0xff]  ;;  %s230_s24 = scalar_lea.vmem %s721_s4, %s727_s15 }
   0xf   : > { %314 = vmatpush.msra.mxu0 %v311_v1  ;;  %336 = vmatpush.msra.mxu1 %v311_v1  ;;  %v521_v6 = vld [vmem:[%s223_s30] sm:$0xff]   ;;  %v536_v7 = vld [vmem:[%s223_s30 + $0x8] sm:$0xff]   ;;  %v537_v11 = vld [vmem:[%s223_s30 + $0x10] sm:$0xff]  }
  0x10   : > { %v522_v8 = vunpack.c.l.bf16 %v521_v6  ;;  %v523_v9 = vunpack.c.h.bf16 %v521_v6  ;;  %v526_v10 = vunpack.c.l.bf16 %v536_v7  ;;  %v527_v13 = vunpack.c.h.bf16 %v536_v7  ;;  %v538_v20 = vld [vmem:[%s223_s30 + $0x18] sm:$0xff]   ;;  %v303_v32 = vld [vmem:[%s718_s1 + $0x30] sm:$0xff]  ;;  %v302_v39 = vld [vmem:[%s718_s1 + $0x28] sm:$0xff] }
  0x11   : > { %315 = vmatpush.msra.mxu0 %v310_v3  ;;  %337 = vmatpush.msra.mxu1 %v310_v3  ;;  %v530_v18 = vunpack.c.l.bf16 %v537_v11  ;;  %v531_v23 = vunpack.c.h.bf16 %v537_v11  ;;  %v534_v28 = vunpack.c.l.bf16 %v538_v20  ;;  %v535_v33 = vunpack.c.h.bf16 %v538_v20  ;;  %v362_v36 = vld [vmem:[%s719_s2 + $0x18] sm:$0xff]  ;;  %v361_v38 = vld [vmem:[%s719_s2 + $0x10] sm:$0xff]  ;;  %v301_v43 = vld [vmem:[%s718_s1 + $0x20] sm:$0xff] }
  0x12   : > { %v254_v14 = vadd.f32 %v523_v9, %v522_v8  ;;  %v270_v15 = vmul.f32 %v522_v8, %v522_v8  ;;  %v271_v16 = vmul.f32 %v523_v9, %v523_v9  ;;  %v272_v19 = vmul.f32 %v526_v10, %v526_v10  ;;  %379 = vmatpush.msra.mxu2 %v362_v36  ;;  %v300_v47 = vld [vmem:[%s718_s1 + $0x18] sm:$0xff]  ;;  %v299_v50 = vld [vmem:[%s718_s1 + $0x10] sm:$0xff]  ;;  %v298_v53 = vld [vmem:[%s718_s1 + $0x8] sm:$0xff] }
  0x13   : > { %316 = vmatpush.msra.mxu0 %v309_v4  ;;  %338 = vmatpush.msra.mxu1 %v309_v4  ;;  %v273_v24 = vmul.f32 %v527_v13, %v527_v13  ;;  %v274_v29 = vmul.f32 %v530_v18, %v530_v18  ;;  %v275_v34 = vmul.f32 %v531_v23, %v531_v23  ;;  %v297_v56 = vld [vmem:[%s718_s1] sm:$0xff]  ;;  %v360_v7 = vld [vmem:[%s719_s2 + $0x8] sm:$0xff] }
  0x14   : > { %v255_v21 = vadd.f32 %v526_v10, %v254_v14  ;;  %v278_v25 = vadd.f32 %v271_v16, %v270_v15  ;;  %v276_v40 = vmul.f32 %v534_v28, %v534_v28  ;;  %403 = vmatpush.msra.mxu3 %v362_v36  ;;  %v277_v44 = vmul.f32 %v535_v33, %v535_v33  ;;  %v253_v61 = vld [vmem:[#allocation2] sm:$0x1] }
  0x15   : > { %317 = vmatpush.msra.mxu0 %v308_v5  ;;  %339 = vmatpush.msra.mxu1 %v308_v5  ;;  %v269_v2 = vld [vmem:[#allocation3] sm:$0x1] }
  0x16   : > { %v256_v26 = vadd.f32 %v527_v13, %v255_v21  ;;  %v279_v30 = vadd.f32 %v278_v25, %v272_v19  ;;  %380 = vmatpush.msra.mxu2 %v361_v38  ;;  %404 = vmatpush.msra.mxu3 %v361_v38  ;;  %v359_v8 = vld [vmem:[%s719_s2] sm:$0xff] }
  0x17   : > { %318 = vmatpush.msra.mxu0 %v307_v12  ;;  %340 = vmatpush.msra.mxu1 %v307_v12 }
  0x18   : > { %v257_v31 = vadd.f32 %v530_v18, %v256_v26  ;;  %v280_v35 = vadd.f32 %v279_v30, %v273_v24  ;;  %381 = vmatpush.msra.mxu2 %v360_v7  ;;  %405 = vmatpush.msra.mxu3 %v360_v7 }
  0x19   : > { %319 = vmatpush.msra.mxu0 %v306_v17  ;;  %341 = vmatpush.msra.mxu1 %v306_v17 }
  0x1a   : > { %v258_v37 = vadd.f32 %v531_v23, %v257_v31  ;;  %v281_v41 = vadd.f32 %v280_v35, %v274_v29  ;;  %382 = vmatpush.msra.mxu2 %v359_v8  ;;  %406 = vmatpush.msra.mxu3 %v359_v8 }
  0x1b   : > { %320 = vmatpush.msra.mxu0 %v305_v22  ;;  %342 = vmatpush.msra.mxu1 %v305_v22 }
  0x1c   : > { %v259_v42 = vadd.f32 %v534_v28, %v258_v37  ;;  %v282_v45 = vadd.f32 %v281_v41, %v275_v34 }
  0x1d   : > { %321 = vmatpush.msra.mxu0 %v304_v27  ;;  %343 = vmatpush.msra.mxu1 %v304_v27 }
  0x1e   : > { %v260_v46 = vadd.f32 %v535_v33, %v259_v42  ;;  %v283_v48 = vadd.f32 %v282_v45, %v276_v40 }
  0x1f   : > { %322 = vmatpush.msra.mxu0 %v303_v32  ;;  %344 = vmatpush.msra.mxu1 %v303_v32 }
  0x20   : > { %v261_v49 = vrot.slane %v260_v46, 4  ;;  %v284_v51 = vadd.f32 %v283_v48, %v277_v44 }
  0x21   : > { %323 = vmatpush.msra.mxu0 %v302_v39  ;;  %345 = vmatpush.msra.mxu1 %v302_v39 }
  0x22   : > { %v262_v52 = vadd.f32 %v261_v49, %v260_v46  ;;  %v285_v54 = vrot.slane %v284_v51, 4 }
  0x23   : > { %324 = vmatpush.msra.mxu0 %v301_v43  ;;  %346 = vmatpush.msra.mxu1 %v301_v43 }
  0x24   : > { %v263_v55 = vrot.slane %v262_v52, 2  ;;  %v286_v57 = vadd.f32 %v285_v54, %v284_v51 }
  0x25   : > { %325 = vmatpush.msra.mxu0 %v300_v47  ;;  %347 = vmatpush.msra.mxu1 %v300_v47 }
  0x26   : > { %v264_v58 = vadd.f32 %v263_v55, %v262_v52  ;;  %v287_v59 = vrot.slane %v286_v57, 2 }
  0x27   : > { %326 = vmatpush.msra.mxu0 %v299_v50  ;;  %348 = vmatpush.msra.mxu1 %v299_v50 }
  0x28   : > { %v265_v60 = vrot.slane %v264_v58, 1  ;;  %v288_v62 = vadd.f32 %v287_v59, %v286_v57 }
  0x29   : > { %327 = vmatpush.msra.mxu0 %v298_v53  ;;  %349 = vmatpush.msra.mxu1 %v298_v53 }
  0x2a   : > { %v266_v63 = vadd.f32 %v265_v60, %v264_v58  ;;  %v289_v0 = vrot.slane %v288_v62, 1 }
  0x2b   : > { %328 = vmatpush.msra.mxu0 %v297_v56  ;;  %350 = vmatpush.msra.mxu1 %v297_v56 }
  0x2c   : > { %v267_v1 = vadd.f32 %v266_v63, %v253_v61  ;;  %v290_v3 = vadd.f32 %v289_v0, %v288_v62 }
  0x2e   : > { %268 = vst [vmem:[#allocation2] sm:$0x1] %v267_v1  ;;  %v291_v4 = vadd.f32 %v290_v3, %v269_v2 }
  0x30   : > { %292 = vst [vmem:[#allocation3] sm:$0x1] %v291_v4 }
  0x35   : > { %v296_v5 = vld [vmem:[#allocation2] sm:$0x1] }
  0x36   : > { %329 = vmatmul.f32.vlgmr.msra.gmra.mxu0 %v296_v5 }
  0x37   : > { %v334_v6 = vld [vmem:[#allocation3] sm:$0x1] }
  0x38   : > { %351 = vmatmul.f32.vlgmr.msra.gmra.mxu1 %v334_v6 }
  0xb3   : > { %v330_v9 = vpop.f32.mrf.mxu0 }
  0xb4   : > { %v333_v10 = vmul.f32 0.0078125, %v330_v9 }
  0xb5   : > { %v352_v12 = vpop.f32.mrf.mxu1 }
  0xb6   : > { %v356_v11 = vmul.f32 %v333_v10, %v333_v10  ;;  %515 = vmatmul.msk.f32.vlgmr.msra.gmra.mxu2 %vm363_vm0, %v333_v10  ;;  %v355_v13 = vmul.f32 0.0078125, %v352_v12 }
  0xb8   : > { %v357_v14 = vsub.f32 %v355_v13, %v356_v11 }
  0xba   : > { %v358_v15 = vmax.f32 %v357_v14, 0.0 }
  0xbc   : > { %516 = vmatmul.msk.f32.vlgmr.msra.gmra.mxu3 %vm363_vm0, %v358_v15 }
 0x139   : > { %v384_v16 = vpop.f32.mrf.mxu2 }
 0x13a   : > { %387 = vst [vmem:[%s227_s21] sm:$0x1] %v384_v16 }
 0x13f   : > { %v408_v17 = vpop.f32.mrf.mxu3 }
 0x140   : > { %v409_v18 = vadd.f32 1e-06, %v408_v17 }
 0x142   : > { %564 = vrsqrt.f32 %v409_v18  ;;  %vm417_vm2 = vweird.f32 %v409_v18 }
 0x148   : > { %v565_v19 = vpop.eup %564 }
 0x149   : > { %v412_v20 = vmul.f32 %v565_v19, %v409_v18  ;;  %vm418_vm1 = vweird.f32 %v565_v19 }
 0x14a   : > { %vm419_vm3 = vmor %vm417_vm2, %vm418_vm1 }
 0x14b   : > { %v413_v21 = vmul.f32 %v565_v19, %v412_v20 }
 0x14d   : > { %v414_v22 = vmul.f32 0.5, %v413_v21 }
 0x14f   : > { %v415_v23 = vsub.f32 1.5, %v414_v22 }
 0x151   : > { %v416_v24 = vmul.f32 %v565_v19, %v415_v23 }
 0x153   : > { %v420_v25 = vsel %vm419_vm3, %v565_v19, %v416_v24 }
 0x154   : > { %421 = vst [vmem:[%s230_s24] sm:$0x1] %v420_v25 }
 0x155 PF: > { %s15_s17 = sadd.s32 1, %s588_s17   ;;  %s722_s15 = smov %s584_s16 }
 0x156   : > { %p12_p5 = scmp.ge.s32.totalorder %s15_s17, 4   ;;  %s723_s16 = smov %s725_s18 }
 0x158   :  { %14 = sbr.rel (!%p12_p5) target bundleno = 2 (0x2), region = 82 }

// kernel: _lambda_.59
= control target key start
LH: loop header
LB: loop body
LE: loop exit
PB: predicated region body
PF: predicated region fallthrough
CT: control target
= control target key end

     0   :  { %s814_s18 = smov 0   ;;  %s816_s19 = smov 0   ;;  %s1016_s0 = inlined_call_operand.vmem [shape: bf16[2,64,128], index: 0, kind: input, shape index: {}]   ;;  %s1017_s1 = inlined_call_operand.vmem [shape: f32[2,1,128], index: 1, kind: input, shape index: {}]   ;;  %s1018_s2 = inlined_call_operand.vmem [shape: f32[2,1,128], index: 2, kind: input, shape index: {}]   ;;  %s1019_s3 = inlined_call_operand.vmem [shape: f32[1,128], index: 3, kind: input, shape index: {}]   ;;  %s1020_s4 = inlined_call_operand.vmem [shape: f32[1,128], index: 4, kind: input, shape index: {}]   ;;  %s1021_s5 = inlined_call_operand.vmem [shape: bf16[2,64,128], index: 5, kind: output, shape index: {}]  }
   0x1   :  { %s818_s20 = smov 0  }
   0x2 LB: > { %s27_s21 = sadd.s32 1, %s778_s19  ;;  %p641_p0 = scmp.ge.s32.totalorder %s782_s20, 1  ;;  %s782_s20 = sphi %s818_s20, %s15_s20   ;;  %s778_s19 = sphi %s816_s19, %s1043_s19   ;;  %s774_s18 = sphi %s814_s18, %s1042_s18  }
   0x3   : > { %p29_p1 = scmp.ge.s32.totalorder %s27_s21, 2  ;;  %p224_p2 = scmp.lt.s32.totalorder %s782_s20, 3 }
   0x5   : > { %s1045_s21 = smov (%p29_p1, %s27_s21), 0  ;;  %p225_p3 = pnand %p641_p0, %p224_p2 }
   0x6   : > { %p267_p4 = scmp.lt.s32.totalorder (!%p225_p3), %s774_s18, 1 }
   0x7   : > { %228 = sbr.rel (%p225_p3) target bundleno = 78 (0x4e), region = 40 }
   0xc   : > { %s1047_s18 = smov (!%p267_p4, %s774_s18), 1  ;;  %v726_v16 = vld [vmem:[%s1019_s3] ss:$0 sm:$0xff] }
   0xd   : > { %s656_s22 = sshll.u32 %s1047_s18, 5  ;;  %s278_s25 = scalar_lea.vmem %s1017_s1, %s1047_s18  ;;  %v727_v25 = vld [vmem:[%s1020_s4] ss:$0 sm:$0xff] }
   0xe   : > { %s274_s28 = scalar_lea.vmem %s1016_s0, %s656_s22  ;;  %s281_s6 = scalar_lea.vmem %s1018_s2, %s1047_s18  ;;  %v724_v0 = vld [vmem:[%s278_s25] ss:$0 sm:$0xff] }
   0xf   : > { %v659_v1 = vld [vmem:[%s274_s28] sm:$0xff]   ;;  %v694_v2 = vld [vmem:[%s274_s28 + $0x8] sm:$0xff]   ;;  %v695_v3 = vld [vmem:[%s274_s28 + $0x10] sm:$0xff]   ;;  %s981_s13 = scalar_lea.vmem %s1021_s5, %s656_s22 }
  0x10   : > { %v660_v4 = vunpack.c.l.bf16 %v659_v1  ;;  %v661_v5 = vunpack.c.h.bf16 %v659_v1  ;;  %v664_v6 = vunpack.c.l.bf16 %v694_v2  ;;  %v665_v7 = vunpack.c.h.bf16 %v694_v2  ;;  %v696_v8 = vld [vmem:[%s274_s28 + $0x18] sm:$0xff]   ;;  %v725_v9 = vld [vmem:[%s281_s6] ss:$0 sm:$0xff] }
  0x11   : > { %v668_v10 = vunpack.c.l.bf16 %v695_v3  ;;  %v669_v11 = vunpack.c.h.bf16 %v695_v3  ;;  %v672_v12 = vunpack.c.l.bf16 %v696_v8  ;;  %v673_v13 = vunpack.c.h.bf16 %v696_v8 }
  0x12   : > { %v312_v14 = vsub.f32 %v660_v4, %v724_v0  ;;  %v313_v15 = vsub.f32 %v661_v5, %v724_v0  ;;  %v314_v17 = vsub.f32 %v664_v6, %v724_v0  ;;  %v315_v18 = vsub.f32 %v665_v7, %v724_v0 }
  0x13   : > { %v316_v19 = vsub.f32 %v668_v10, %v724_v0  ;;  %v317_v20 = vsub.f32 %v669_v11, %v724_v0  ;;  %v318_v21 = vsub.f32 %v672_v12, %v724_v0  ;;  %v319_v22 = vsub.f32 %v673_v13, %v724_v0 }
  0x14   : > { %v324_v23 = vmul.f32 %v725_v9, %v312_v14  ;;  %v325_v24 = vmul.f32 %v725_v9, %v313_v15  ;;  %v326_v26 = vmul.f32 %v725_v9, %v314_v17  ;;  %v327_v27 = vmul.f32 %v725_v9, %v315_v18 }
  0x15   : > { %v328_v28 = vmul.f32 %v725_v9, %v316_v19  ;;  %v329_v29 = vmul.f32 %v725_v9, %v317_v20  ;;  %v330_v36 = vmul.f32 %v725_v9, %v318_v21  ;;  %v331_v37 = vmul.f32 %v725_v9, %v319_v22 }
  0x16   : > { %v336_v30 = vmul.f32 %v726_v16, %v324_v23  ;;  %v337_v31 = vmul.f32 %v726_v16, %v325_v24  ;;  %v338_v32 = vmul.f32 %v726_v16, %v326_v26  ;;  %v339_v33 = vmul.f32 %v726_v16, %v327_v27 }
  0x17   : > { %v340_v34 = vmul.f32 %v726_v16, %v328_v28  ;;  %v341_v35 = vmul.f32 %v726_v16, %v329_v29  ;;  %v342_v48 = vmul.f32 %v726_v16, %v330_v36  ;;  %v343_v50 = vmul.f32 %v726_v16, %v331_v37 }
  0x18   : > { %v854_v38 = vadd.f32 %v727_v25, %v336_v30  ;;  %v856_v39 = vadd.f32 %v727_v25, %v337_v31  ;;  %v858_v40 = vadd.f32 %v727_v25, %v338_v32  ;;  %v860_v41 = vadd.f32 %v727_v25, %v339_v33 }
  0x19   : > { %v862_v42 = vadd.f32 %v727_v25, %v340_v34  ;;  %v864_v43 = vadd.f32 %v727_v25, %v341_v35  ;;  %v872_v52 = vadd.f32 %v727_v25, %v342_v48  ;;  %v874_v53 = vadd.f32 %v727_v25, %v343_v50 }
  0x1a   : > { %v646_v44 = vmul.f32 -1.442695, %v854_v38  ;;  %v647_v45 = vmul.f32 -1.442695, %v856_v39  ;;  %v648_v46 = vmul.f32 -1.442695, %v858_v40 }
  0x1b   : > { %v649_v47 = vmul.f32 -1.442695, %v860_v41  ;;  %v650_v49 = vmul.f32 -1.442695, %v862_v42  ;;  %v651_v51 = vmul.f32 -1.442695, %v864_v43 }
  0x1c   : > { %728 = vpow2.f32 %v646_v44  ;;  %v652_v57 = vmul.f32 -1.442695, %v872_v52  ;;  %v653_v60 = vmul.f32 -1.442695, %v874_v53 }
  0x1d   : > { %730 = vpow2.f32 %v647_v45 }
  0x1e   : > { %732 = vpow2.f32 %v648_v46 }
  0x1f   : > { %734 = vpow2.f32 %v649_v47 }
  0x20   : > { %736 = vpow2.f32 %v650_v49 }
  0x21   : > { %738 = vpow2.f32 %v651_v51 }
  0x22   : > { %v729_v54 = vpop.eup %728 }
  0x23   : > { %v731_v55 = vpop.eup %730  ;;  %v380_v56 = vadd.f32 1.0, %v729_v54 }
  0x24   : > { %v733_v58 = vpop.eup %732  ;;  %v877_v59 = vadd.f32 1.0, %v731_v55 }
  0x25   : > { %v735_v61 = vpop.eup %734  ;;  %740 = vrcp.f32 %v380_v56  ;;  %v397_v63 = vand.u32 2147483647, %v380_v56  ;;  %v399_v0 = vand.u32 2147483648, %v380_v56  ;;  %v882_v3 = vadd.f32 1.0, %v733_v58 }
  0x26   : > { %v737_v62 = vpop.eup %736  ;;  %742 = vrcp.f32 %v877_v59  ;;  %v412_v2 = vand.u32 2147483647, %v877_v59  ;;  %v884_v4 = vadd.f32 1.0, %v735_v61  ;;  %v414_v5 = vand.u32 2147483648, %v877_v59 }
  0x27   : > { %v739_v1 = vpop.eup %738  ;;  %744 = vpow2.f32 %v652_v57  ;;  %v887_v6 = vadd.f32 1.0, %v737_v62  ;;  %vm393_vm0 = vweird.f32 %v380_v56  ;;  %vm408_vm1 = vweird.f32 %v877_v59 }
  0x28   : > { %746 = vpow2.f32 %v653_v60  ;;  %v429_v7 = vand.u32 2147483648, %v882_v3  ;;  %vm892_vm2 = vcmp.eq.f32.partialorder %v397_v63, 8.507059e+37  ;;  %v400_v9 = vor.u32 1.1754944e-38, %v399_v0 }
  0x29   : > { %748 = vrcp.f32 %v882_v3  ;;  %v427_v10 = vand.u32 2147483647, %v882_v3  ;;  %v898_v11 = vadd.f32 1.0, %v739_v1  ;;  %vm900_vm3 = vcmp.eq.f32.partialorder %v412_v2, 8.507059e+37 }
  0x2a   : > { %750 = vrcp.f32 %v884_v4  ;;  %v442_v14 = vand.u32 2147483647, %v884_v4  ;;  %v444_v15 = vand.u32 2147483648, %v884_v4  ;;  %v415_v18 = vor.u32 1.1754944e-38, %v414_v5 }
  0x2b   : > { %v741_v12 = vpop.eup %740  ;;  %752 = vrcp.f32 %v887_v6  ;;  %vm423_vm4 = vweird.f32 %v882_v3  ;;  %vm438_vm5 = vweird.f32 %v884_v4  ;;  %v430_v21 = vor.u32 1.1754944e-38, %v429_v7 }
  0x2c   : > { %v743_v16 = vpop.eup %742  ;;  %v389_v17 = vmul.f32 %v741_v12, %v380_v56  ;;  %v457_v22 = vand.u32 2147483647, %v887_v6  ;;  %v459_v23 = vand.u32 2147483648, %v887_v6  ;;  %vm394_vm6 = vweird.f32 %v741_v12 }
  0x2d   : > { %v745_v19 = vpop.eup %744  ;;  %v404_v20 = vmul.f32 %v743_v16, %v877_v59  ;;  %vm912_vm7 = vcmp.eq.f32.partialorder %v427_v10, 8.507059e+37  ;;  %vm453_vm8 = vweird.f32 %v887_v6  ;;  %754 = vrcp.f32 %v898_v11  ;;  %vm931_vm13 = vmor %vm393_vm0, %vm394_vm6 }
  0x2e   : > { %v747_v24 = vpop.eup %746  ;;  %v390_v25 = vsub.f32 1.0, %v389_v17  ;;  %vm409_vm9 = vweird.f32 %v743_v16  ;;  %vm918_vm10 = vcmp.eq.f32.partialorder %v442_v14, 8.507059e+37  ;;  %v445_v30 = vor.u32 1.1754944e-38, %v444_v15 }
  0x2f   : > { %v749_v27 = vpop.eup %748  ;;  %v405_v28 = vsub.f32 1.0, %v404_v20  ;;  %vm468_vm11 = vweird.f32 %v898_v11  ;;  %vm924_vm12 = vcmp.eq.f32.partialorder %v457_v22, 8.507059e+37  ;;  %v472_v35 = vand.u32 2147483647, %v898_v11  ;;  %vm940_vm14 = vmor %vm408_vm1, %vm409_vm9 }
  0x30   : > { %v751_v31 = vpop.eup %750  ;;  %v391_v32 = vmul.f32 %v741_v12, %v390_v25  ;;  %v419_v33 = vmul.f32 %v749_v27, %v882_v3  ;;  %v460_v46 = vor.u32 1.1754944e-38, %v459_v23  ;;  %v474_v47 = vand.u32 2147483648, %v898_v11 }
  0x31   : > { %v753_v36 = vpop.eup %752  ;;  %v406_v44 = vmul.f32 %v743_v16, %v405_v28  ;;  %v434_v45 = vmul.f32 %v751_v31, %v884_v4  ;;  %vm424_vm15 = vweird.f32 %v749_v27  ;;  %vm439_vm0 = vweird.f32 %v751_v31 }
  0x32   : > { %v392_v48 = vadd.f32 %v741_v12, %v391_v32  ;;  %v420_v50 = vsub.f32 1.0, %v419_v33  ;;  %v449_v51 = vmul.f32 %v753_v36, %v887_v6  ;;  %vm454_vm6 = vweird.f32 %v753_v36  ;;  %vm953_vm1 = vmor %vm423_vm4, %vm424_vm15 }
  0x33   : > { %v407_v54 = vadd.f32 %v743_v16, %v406_v44  ;;  %v435_v55 = vsub.f32 1.0, %v434_v45  ;;  %v755_v56 = vpop.eup %754  ;;  %v386_v61 = vadd.f32 1.0, %v745_v19  ;;  %vm972_vm4 = vmor %vm453_vm8, %vm454_vm6  ;;  %v387_v13 = vadd.f32 1.0, %v747_v24 }
  0x34   : > { %v396_v57 = vsel %vm931_vm13, %v741_v12, %v392_v48  ;;  %v421_v58 = vmul.f32 %v749_v27, %v420_v50  ;;  %v450_v60 = vsub.f32 1.0, %v449_v51  ;;  %v464_v1 = vmul.f32 %v755_v56, %v898_v11 }
  0x35   : > { %v401_v59 = vsel %vm892_vm2, %v400_v9, %v396_v57  ;;  %v411_v62 = vsel %vm940_vm14, %v743_v16, %v407_v54  ;;  %v436_v0 = vmul.f32 %v751_v31, %v435_v55  ;;  %vm964_vm2 = vmor %vm438_vm5, %vm439_vm0  ;;  %756 = vrcp.f32 %v386_v61 }
  0x36   : > { %v416_v2 = vsel %vm900_vm3, %v415_v18, %v411_v62  ;;  %v508_v5 = vmul.f32 %v401_v59, %v854_v38  ;;  %v422_v7 = vadd.f32 %v749_v27, %v421_v58  ;;  %v451_v3 = vmul.f32 %v753_v36, %v450_v60 }
  0x37   : > { %v509_v9 = vmul.f32 %v416_v2, %v856_v39  ;;  %v437_v10 = vadd.f32 %v751_v31, %v436_v0  ;;  %v465_v38 = vsub.f32 1.0, %v464_v1  ;;  %vm469_vm3 = vweird.f32 %v755_v56 }
  0x38   : > { %v426_v39 = vsel %vm953_vm1, %v749_v27, %v422_v7  ;;  %v452_v4 = vadd.f32 %v753_v36, %v451_v3  ;;  %vm470_vm5 = vmor %vm468_vm11, %vm469_vm3  ;;  %v475_v20 = vor.u32 1.1754944e-38, %v474_v47  ;;  %758 = vrcp.f32 %v387_v13 }
  0x39   : > { %v677_v6 = vpack.c.bf16 %v509_v9, %v508_v5  ;;  %v431_v14 = vsel %vm912_vm7, %v430_v21, %v426_v39  ;;  %v441_v15 = vsel %vm964_vm2, %v751_v31, %v437_v10  ;;  %v466_v16 = vmul.f32 %v755_v56, %v465_v38 }
  0x3a   : > { %v446_v17 = vsel %vm918_vm10, %v445_v30, %v441_v15  ;;  %v510_v18 = vmul.f32 %v431_v14, %v858_v40  ;;  %v456_v19 = vsel %vm972_vm4, %v753_v36, %v452_v4  ;;  %vm473_vm7 = vcmp.eq.f32.partialorder %v472_v35, 8.507059e+37 }
  0x3b   : > { %678 = vst [vmem:[%s981_s13] sm:$0xff] %v677_v6   ;;  %v511_v21 = vmul.f32 %v446_v17, %v860_v41  ;;  %v461_v22 = vsel %vm924_vm12, %v460_v46, %v456_v19  ;;  %v467_v23 = vadd.f32 %v755_v56, %v466_v16  ;;  %v757_v26 = vpop.eup %756  ;;  %v487_v29 = vand.u32 2147483647, %v386_v61 }
  0x3c   : > { %v512_v40 = vmul.f32 %v461_v22, %v862_v42  ;;  %v479_v28 = vmul.f32 %v757_v26, %v386_v61  ;;  %v489_v30 = vand.u32 2147483648, %v386_v61  ;;  %vm483_vm8 = vweird.f32 %v386_v61 }
  0x3d   : > { %v682_v24 = vpack.c.bf16 %v511_v21, %v510_v18  ;;  %v471_v25 = vsel %vm470_vm5, %v755_v56, %v467_v23  ;;  %vm484_vm9 = vweird.f32 %v757_v26  ;;  %vm488_vm11 = vcmp.eq.f32.partialorder %v487_v29, 8.507059e+37 }
  0x3e   : > { %v476_v27 = vsel %vm473_vm7, %v475_v20, %v471_v25  ;;  %v480_v31 = vsub.f32 1.0, %v479_v28  ;;  %v759_v32 = vpop.eup %758  ;;  %vm485_vm10 = vmor %vm483_vm8, %vm484_vm9  ;;  %v490_v35 = vor.u32 1.1754944e-38, %v489_v30  ;;  %vm498_vm12 = vweird.f32 %v387_v13 }
  0x3f   : > { %697 = vst [vmem:[%s981_s13 + $0x8] sm:$0xff] %v682_v24   ;;  %v513_v11 = vmul.f32 %v476_v27, %v864_v43  ;;  %v494_v34 = vmul.f32 %v759_v32, %v387_v13  ;;  %v504_v42 = vand.u32 2147483648, %v387_v13  ;;  %vm499_vm13 = vweird.f32 %v759_v32 }
  0x40   : > { %v481_v33 = vmul.f32 %v757_v26, %v480_v31  ;;  %v502_v43 = vand.u32 2147483647, %v387_v13  ;;  %vm500_vm14 = vmor %vm498_vm12, %vm499_vm13 }
  0x41   : > { %v687_v41 = vpack.c.bf16 %v513_v11, %v512_v40  ;;  %v495_v37 = vsub.f32 1.0, %v494_v34  ;;  %v505_v47 = vor.u32 1.1754944e-38, %v504_v42 }
  0x42   : > { %v482_v36 = vadd.f32 %v757_v26, %v481_v33  ;;  %vm503_vm15 = vcmp.eq.f32.partialorder %v502_v43, 8.507059e+37 }
  0x43   : > { %698 = vst [vmem:[%s981_s13 + $0x10] sm:$0xff] %v687_v41   ;;  %v496_v45 = vmul.f32 %v759_v32, %v495_v37 }
  0x44   : > { %v486_v44 = vsel %vm485_vm10, %v757_v26, %v482_v36 }
  0x45   : > { %v491_v46 = vsel %vm488_vm11, %v490_v35, %v486_v44  ;;  %v497_v48 = vadd.f32 %v759_v32, %v496_v45 }
  0x46   : > { %v514_v50 = vmul.f32 %v491_v46, %v872_v52 }
  0x47   : > { %v501_v49 = vsel %vm500_vm14, %v759_v32, %v497_v48 }
  0x48   : > { %v506_v51 = vsel %vm503_vm15, %v505_v47, %v501_v49 }
  0x49   : > { %v515_v54 = vmul.f32 %v506_v51, %v874_v53 }
  0x4b   : > { %v692_v55 = vpack.c.bf16 %v515_v54, %v514_v50 }
  0x4d   : > { %699 = vst [vmem:[%s981_s13 + $0x18] sm:$0xff] %v692_v55  }
  0x4e PF: > { %s15_s20 = sadd.s32 1, %s782_s20   ;;  %s1042_s18 = smov %s778_s19 }
  0x4f   : > { %p12_p5 = scmp.ge.s32.totalorder %s15_s20, 4   ;;  %s1043_s19 = smov %s1045_s21 }
  0x51   :  { %14 = sbr.rel (!%p12_p5) target bundleno = 2 (0x2), region = 76 }

// kernel: _lambda_.57
= control target key start
LH: loop header
LB: loop body
LE: loop exit
PB: predicated region body
PF: predicated region fallthrough
CT: control target
= control target key end

     0   :  { %s1929_s18 = smov 0   ;;  %s1931_s19 = smov 0   ;;  %s2249_s0 = inlined_call_operand.vmem [shape: bf16[2,10,10,128], index: 0, kind: input, shape index: {}, may-alias: {0,1,2}]   ;;  %s2250_s1 = inlined_call_operand.vmem [shape: bf16[2,10,10,128], index: 1, kind: input, shape index: {}, may-alias: {0,1,2}]   ;;  %s2251_s2 = inlined_call_operand.vmem [shape: bf16[2,10,10,128], index: 2, kind: input, shape index: {}, may-alias: {0,1,2}]   ;;  %s2252_s3 = inlined_call_operand.vmem [shape: bf16[9,128,128], index: 3, kind: input, shape index: {}]   ;;  %s2253_s4 = inlined_call_operand.vmem [shape: f32[1,128], index: 4, kind: input, shape index: {}]   ;;  %s2254_s5 = inlined_call_operand.vmem [shape: bf16[2,8,8,128], index: 5, kind: output, shape index: {}]  }
   0x1   :  { %s1933_s20 = smov 0   ;;  %s1935_s21 = smov 0  }
   0x2   :  { %s1937_s22 = smov 0  }
   0x3 LB: > { %s24_s23 = sadd.s32 1, %s1889_s20  ;;  %s27_s24 = sadd.s32 1, %s1893_s21  ;;  %s1897_s22 = sphi %s1937_s22, %s15_s22   ;;  %s1893_s21 = sphi %s1935_s21, %s2259_s21   ;;  %s1889_s20 = sphi %s1933_s20, %s2258_s20   ;;  %s1885_s19 = sphi %s1931_s19, %s2257_s19   ;;  %s1881_s18 = sphi %s1929_s18, %s2256_s18  }
   0x4   : > { %p25_p0 = scmp.ge.s32.totalorder %s24_s23, 8  ;;  %p1288_p1 = scmp.ge.s32.totalorder %s1897_s22, 1 }
   0x5   : > { %p247_p2 = scmp.lt.s32.totalorder %s1897_s22, 17 }
   0x6   : > { %s2261_s23 = smov (%p25_p0, %s24_s23), 0  ;;  %s2263_s24 = smov (!%p25_p0, %s27_s24), %s1893_s21 }
   0x7   : > { %p248_p3 = pnand %p1288_p1, %p247_p2  ;;  %p29_p4 = scmp.ge.s32.totalorder %s2263_s24, 2 }
   0x8   : > { %p302_p5 = scmp.lt.s32.totalorder (!%p248_p3), %s1885_s19, 1  ;;  %p304_p6 = scmp.lt.s32.totalorder (!%p248_p3), %s1881_s18, 9 }
   0x9   : > { %s2265_s24 = smov (%p29_p4, %s2263_s24), 0  ;;  %251 = sbr.rel (%p248_p3) target bundleno = 244 (0xf4), region = 40 }
   0xa   : > { %s311_s14 = sadd.s32 (!%p248_p3), 1, %s1881_s18  ;;  %s322_s15 = sadd.s32 (!%p248_p3), 2, %s1881_s18 }
   0xb   : > { %p314_p7 = scmp.lt.s32.totalorder (!%p248_p3), %s311_s14, 9  ;;  %p2065_p8 = scmp.lt.s32.totalorder (!%p248_p3), %s322_s15, 9 }
   0xc   : > { %p335_p9 = scmp.lt.s32.totalorder (!%p248_p3), %s1881_s18, 7 }
   0xe   : > { %v1746_v0 = vld [vmem:[%s2252_s3 + $0x38] sm:$0xff]  ;;  %v1745_v4 = vld [vmem:[%s2252_s3 + $0x30] sm:$0xff]  ;;  %s2267_s19 = smov (!%p302_p5, %s1885_s19), 1  ;;  %v1744_v8 = vld [vmem:[%s2252_s3 + $0x28] sm:$0xff]  ;;  %s2269_s14 = smov (!%p314_p7, %s311_s14), 9 }
   0xf   : > { %v1764_v1 = vld [vmem:[%s2252_s3 + $0xb8] sm:$0xff]  ;;  %408 = vmatpush.bf16.msra.mxu0 %v1746_v0  ;;  %v1763_v5 = vld [vmem:[%s2252_s3 + $0xb0] sm:$0xff]  ;;  %s305_s16 = scalar_select %p304_p6, %s1881_s18, 9  ;;  %v1762_v9 = vld [vmem:[%s2252_s3 + $0xa8] sm:$0xff] }
  0x10   : > { %v1772_v2 = vld [vmem:[%s2252_s3 + $0xf8] sm:$0xff]  ;;  %594 = vmatpush.bf16.msra.mxu2 %v1764_v1  ;;  %v1771_v6 = vld [vmem:[%s2252_s3 + $0xf0] sm:$0xff]  ;;  %s1990_s17 = smul.u32 20, %s2267_s19  ;;  %v1770_v10 = vld [vmem:[%s2252_s3 + $0xe8] sm:$0xff]  ;;  %s1291_s6 = sshll.u32 %s2269_s14, 1 }
  0x11   : > { %v1755_v3 = vld [vmem:[%s2252_s3 + $0x78] sm:$0xff]  ;;  %676 = vmatpush.bf16.msra.mxu3 %v1772_v2  ;;  %v1754_v7 = vld [vmem:[%s2252_s3 + $0x70] sm:$0xff]  ;;  %s1289_s29 = sshll.u32 %s305_s16, 1  ;;  %v1753_v11 = vld [vmem:[%s2252_s3 + $0x68] sm:$0xff]  ;;  %s2271_s15 = smov (!%p2065_p8, %s322_s15), 9 }
  0x12   : > { %504 = vmatpush.bf16.msra.mxu1 %v1755_v3  ;;  %s308_s9 = sadd.s32 %s1990_s17, %s1289_s29  ;;  %v1743_v12 = vld [vmem:[%s2252_s3 + $0x20] sm:$0xff]  ;;  %v1742_v16 = vld [vmem:[%s2252_s3 + $0x18] sm:$0xff]  ;;  %v1741_v20 = vld [vmem:[%s2252_s3 + $0x10] sm:$0xff]  ;;  %s318_s14 = sadd.s32 %s1990_s17, %s1291_s6 }
  0x13   : > { %409 = vmatpush.bf16.msra.mxu0 %v1745_v4  ;;  %v1761_v13 = vld [vmem:[%s2252_s3 + $0xa0] sm:$0xff]  ;;  %s1290_s27 = sshll.u32 %s308_s9, 2  ;;  %v1760_v17 = vld [vmem:[%s2252_s3 + $0x98] sm:$0xff]  ;;  %v1759_v21 = vld [vmem:[%s2252_s3 + $0x90] sm:$0xff]  ;;  %s1292_s11 = sshll.u32 %s318_s14, 2 }
  0x14   : > { %595 = vmatpush.bf16.msra.mxu2 %v1763_v5  ;;  %v1769_v14 = vld [vmem:[%s2252_s3 + $0xe0] sm:$0xff]  ;;  %v1768_v18 = vld [vmem:[%s2252_s3 + $0xd8] sm:$0xff]  ;;  %s2033_s13 = scalar_lea.vmem %s2249_s0, %s1290_s27  ;;  %v1767_v24 = vld [vmem:[%s2252_s3 + $0xd0] sm:$0xff]  ;;  %s2098_s7 = scalar_lea.vmem %s2250_s1, %s1292_s11 }
  0x15   : > { %677 = vmatpush.bf16.msra.mxu3 %v1771_v6  ;;  %v1752_v15 = vld [vmem:[%s2252_s3 + $0x60] sm:$0xff]  ;;  %v1751_v19 = vld [vmem:[%s2252_s3 + $0x58] sm:$0xff]  ;;  %v1750_v25 = vld [vmem:[%s2252_s3 + $0x50] sm:$0xff]  ;;  %s1293_s27 = sshll.u32 %s2271_s15, 1  ;;  %s2273_s18 = smov (!%p335_p9, %s1881_s18), 7 }
  0x16   : > { %505 = vmatpush.bf16.msra.mxu1 %v1754_v7  ;;  %v1347_v22 = vld [vmem:[%s2033_s13] sm:$0xf]  ;;  %v1747_v23 = vld [vmem:[%s2033_s13] sm:$0x10]  ;;  %v1740_v27 = vld [vmem:[%s2252_s3 + $0x8] sm:$0xff]  ;;  %s329_s14 = sadd.s32 %s1990_s17, %s1293_s27 }
  0x17   : > { %410 = vmatpush.bf16.msra.mxu0 %v1744_v8  ;;  %v1348_v26 = vor.u32 %v1747_v23, %v1347_v22  ;;  %v1758_v28 = vld [vmem:[%s2252_s3 + $0x88] sm:$0xff]  ;;  %v1399_v31 = vld [vmem:[%s2033_s13] sm:$0xe]  ;;  %v1756_v32 = vld [vmem:[%s2033_s13] sm:$0x10]  ;;  %s1294_s11 = sshll.u32 %s329_s14, 2 }
  0x18   : > { %596 = vmatpush.bf16.msra.mxu2 %v1762_v9  ;;  %v1766_v29 = vld [vmem:[%s2252_s3 + $0xc8] sm:$0xff]  ;;  %v1739_v34 = vld [vmem:[%s2252_s3] sm:$0xff]  ;;  %v1400_v36 = vor.u32 %v1756_v32, %v1399_v31  ;;  %v1781_v37 = vld [vmem:[%s2252_s3 + $0x138] sm:$0xff]  ;;  %s2145_s8 = scalar_lea.vmem %s2251_s2, %s1294_s11 }
  0x19   : > { %678 = vmatpush.bf16.msra.mxu3 %v1770_v10  ;;  %v1749_v30 = vld [vmem:[%s2252_s3 + $0x48] sm:$0xff]  ;;  %v451_v33 = vshll.u32 %v1348_v26, 16  ;;  %v1757_v35 = vld [vmem:[%s2252_s3 + $0x80] sm:$0xff]  ;;  %v1798_v38 = vld [vmem:[%s2252_s3 + $0x1b8] sm:$0xff]  ;;  %v449_v41 = vshrl.u32 %v1348_v26, 16 }
  0x1a   : > { %506 = vmatpush.bf16.msra.mxu1 %v1753_v11  ;;  %v1765_v39 = vld [vmem:[%s2252_s3 + $0xc0] sm:$0xff]  ;;  %v1807_v43 = vld [vmem:[%s2252_s3 + $0x1f8] sm:$0xff]  ;;  %v544_v45 = vrot.slane %v1400_v36, 1  ;;  %v1780_v46 = vld [vmem:[%s2252_s3 + $0x130] sm:$0xff] }
  0x1b   : > { %411 = vmatpush.bf16.msra.mxu0 %v1743_v12  ;;  %v1748_v40 = vld [vmem:[%s2252_s3 + $0x40] sm:$0xff]  ;;  %v453_v42 = vrot.slane %v451_v33, 1  ;;  %v1790_v44 = vld [vmem:[%s2252_s3 + $0x178] sm:$0xff]  ;;  %v1797_v47 = vld [vmem:[%s2252_s3 + $0x1b0] sm:$0xff] }
  0x1c   : > { %597 = vmatpush.bf16.msra.mxu2 %v1761_v13  ;;  %v343_v48 = vld [vmem:[%s2033_s13] sm:$0xf]  ;;  %v1806_v50 = vld [vmem:[%s2252_s3 + $0x1f0] sm:$0xff]  ;;  %v1779_v53 = vld [vmem:[%s2252_s3 + $0x128] sm:$0xff] }
  0x1d   : > { %679 = vmatpush.bf16.msra.mxu3 %v1769_v14  ;;  %v454_v49 = vor.u32 %v453_v42, %v449_v41  ;;  %v1789_v51 = vld [vmem:[%s2252_s3 + $0x170] sm:$0xff]  ;;  %v610_v52 = vld [vmem:[%s2098_s7] sm:$0xf]  ;;  %v1796_v54 = vld [vmem:[%s2252_s3 + $0x1a8] sm:$0xff] }
  0x1e   : > { %507 = vmatpush.bf16.msra.mxu1 %v1752_v15  ;;  %v1805_v55 = vld [vmem:[%s2252_s3 + $0x1e8] sm:$0xff]  ;;  %v1778_v57 = vld [vmem:[%s2252_s3 + $0x120] sm:$0xff]  ;;  %v1777_v61 = vld [vmem:[%s2252_s3 + $0x118] sm:$0xff] }
  0x1f   : > { %412 = vmatpush.bf16.msra.mxu0 %v1742_v16  ;;  %v1788_v56 = vld [vmem:[%s2252_s3 + $0x168] sm:$0xff]  ;;  %v1795_v58 = vld [vmem:[%s2252_s3 + $0x1a0] sm:$0xff]  ;;  %v1794_v62 = vld [vmem:[%s2252_s3 + $0x198] sm:$0xff] }
  0x20   : > { %598 = vmatpush.bf16.msra.mxu2 %v1760_v17  ;;  %v1804_v59 = vld [vmem:[%s2252_s3 + $0x1e0] sm:$0xff]  ;;  %v1803_v1 = vld [vmem:[%s2252_s3 + $0x1d8] sm:$0xff]  ;;  %v1776_v6 = vld [vmem:[%s2252_s3 + $0x110] sm:$0xff] }
  0x21   : > { %680 = vmatpush.bf16.msra.mxu3 %v1768_v18  ;;  %v1787_v60 = vld [vmem:[%s2252_s3 + $0x160] sm:$0xff]  ;;  %v1786_v2 = vld [vmem:[%s2252_s3 + $0x158] sm:$0xff]  ;;  %v1793_v7 = vld [vmem:[%s2252_s3 + $0x190] sm:$0xff] }
  0x22   : > { %508 = vmatpush.bf16.msra.mxu1 %v1751_v19  ;;  %v1499_v63 = vld [vmem:[%s2098_s7] sm:$0xf]  ;;  %v1773_v0 = vld [vmem:[%s2098_s7] sm:$0x10]  ;;  %v1802_v9 = vld [vmem:[%s2252_s3 + $0x1d0] sm:$0xff] }
  0x23   : > { %413 = vmatpush.bf16.msra.mxu0 %v1741_v20  ;;  %v1651_v3 = vld [vmem:[%s2145_s8] sm:$0xf]  ;;  %v1799_v4 = vld [vmem:[%s2145_s8] sm:$0x10]  ;;  %v1500_v5 = vor.u32 %v1773_v0, %v1499_v63  ;;  %v1785_v10 = vld [vmem:[%s2252_s3 + $0x150] sm:$0xff] }
  0x24   : > { %599 = vmatpush.bf16.msra.mxu2 %v1759_v21  ;;  %v1652_v8 = vor.u32 %v1799_v4, %v1651_v3  ;;  %v1775_v12 = vld [vmem:[%s2252_s3 + $0x108] sm:$0xff]  ;;  %v1551_v19 = vld [vmem:[%s2098_s7] sm:$0xe]  ;;  %v1782_v20 = vld [vmem:[%s2098_s7] sm:$0x10] }
  0x25   : > { %681 = vmatpush.bf16.msra.mxu3 %v1767_v24  ;;  %v719_v11 = vshll.u32 %v1500_v5, 16  ;;  %v1792_v13 = vld [vmem:[%s2252_s3 + $0x188] sm:$0xff]  ;;  %v717_v17 = vshrl.u32 %v1500_v5, 16  ;;  %v1774_v21 = vld [vmem:[%s2252_s3 + $0x100] sm:$0xff]  ;;  %v1816_v23 = vld [vmem:[%s2252_s3 + $0x238] sm:$0xff] }
  0x26   : > { %509 = vmatpush.bf16.msra.mxu1 %v1750_v25  ;;  %v987_v14 = vshll.u32 %v1652_v8, 16  ;;  %v1801_v15 = vld [vmem:[%s2252_s3 + $0x1c8] sm:$0xff]  ;;  %v1791_v22 = vld [vmem:[%s2252_s3 + $0x180] sm:$0xff]  ;;  %v985_v24 = vshrl.u32 %v1652_v8, 16  ;;  %v1815_v31 = vld [vmem:[%s2252_s3 + $0x230] sm:$0xff] }
  0x27   : > { %414 = vmatpush.bf16.msra.mxu0 %v1740_v27  ;;  %v1784_v16 = vld [vmem:[%s2252_s3 + $0x148] sm:$0xff]  ;;  %v721_v18 = vrot.slane %v719_v11, 1  ;;  %v1800_v26 = vld [vmem:[%s2252_s3 + $0x1c0] sm:$0xff]  ;;  %v1812_v36 = vld [vmem:[%s2252_s3 + $0x218] sm:$0xff] }
  0x28   : > { %600 = vmatpush.bf16.msra.mxu2 %v1758_v28  ;;  %v989_v25 = vrot.slane %v987_v14, 1  ;;  %v1783_v27 = vld [vmem:[%s2252_s3 + $0x140] sm:$0xff]  ;;  %v1552_v28 = vor.u32 %v1782_v20, %v1551_v19 }
  0x29   : > { %682 = vmatpush.bf16.msra.mxu3 %v1766_v29  ;;  %v722_v29 = vor.u32 %v721_v18, %v717_v17  ;;  %v1809_v42 = vld [vmem:[%s2252_s3 + $0x200] sm:$0xff] }
  0x2a   : > { %510 = vmatpush.bf16.msra.mxu1 %v1749_v30  ;;  %v878_v30 = vld [vmem:[%s2145_s8] sm:$0xf]  ;;  %v990_v32 = vor.u32 %v989_v25, %v985_v24  ;;  %v812_v33 = vrot.slane %v1552_v28, 1 }
  0x2b   : > { %415 = vmatpush.bf16.msra.mxu0 %v1739_v34  ;;  %v1814_v34 = vld [vmem:[%s2252_s3 + $0x228] sm:$0xff]  ;;  %v1858_v3 = vld [vmem:[%s2253_s4] ss:$0 sm:$0xff] }
  0x2c   : > { %601 = vmatpush.bf16.msra.mxu2 %v1757_v35  ;;  %v1813_v35 = vld [vmem:[%s2252_s3 + $0x220] sm:$0xff] }
  0x2d   : > { %683 = vmatpush.bf16.msra.mxu3 %v1765_v39  ;;  %v1703_v39 = vld [vmem:[%s2145_s8] sm:$0xe] }
  0x2e   : > { %511 = vmatpush.bf16.msra.mxu1 %v1748_v40  ;;  %416 = vmatmul.bf16.vlgmr.msra.gmra.mxu0 %v343_v48  ;;  %v1808_v40 = vld [vmem:[%s2145_s8] sm:$0x10]  ;;  %s1295_s8 = sshll.u32 %s2267_s19, 3 }
  0x2f   : > { %772 = vmatpush.bf16.msrb.mxu0 %v1781_v37  ;;  %602 = vmatmul.bf16.vlgmr.msra.gmra.mxu2 %v544_v45  ;;  %v1811_v37 = vld [vmem:[%s2252_s3 + $0x210] sm:$0xff]  ;;  %v1704_v41 = vor.u32 %v1808_v40, %v1703_v39  ;;  %s338_s28 = sadd.s32 %s1295_s8, %s2273_s18 }
  0x30   : > { %944 = vmatpush.bf16.msrb.mxu2 %v1798_v38  ;;  %684 = vmatmul.bf16.vlgmr.msra.gmra.mxu3 %v610_v52  ;;  %v1810_v38 = vld [vmem:[%s2252_s3 + $0x208] sm:$0xff]  ;;  %s1296_s6 = sshll.u32 %s338_s28, 2 }
  0x31   : > { %1040 = vmatpush.bf16.msrb.mxu3 %v1807_v43  ;;  %512 = vmatmul.bf16.vlgmr.msra.gmra.mxu1 %v454_v49  ;;  %v1080_v43 = vrot.slane %v1704_v41, 1  ;;  %s340_s10 = scalar_lea.vmem %s2254_s5, %s1296_s6 }
  0x32   : > { %862 = vmatpush.bf16.msrb.mxu1 %v1790_v44 }
  0x33   : > { %773 = vmatpush.bf16.msrb.mxu0 %v1780_v46 }
  0x34   : > { %945 = vmatpush.bf16.msrb.mxu2 %v1797_v47 }
  0x35   : > { %1041 = vmatpush.bf16.msrb.mxu3 %v1806_v50 }
  0x36   : > { %863 = vmatpush.bf16.msrb.mxu1 %v1789_v51 }
  0x37   : > { %774 = vmatpush.bf16.msrb.mxu0 %v1779_v53 }
  0x38   : > { %946 = vmatpush.bf16.msrb.mxu2 %v1796_v54 }
  0x39   : > { %1042 = vmatpush.bf16.msrb.mxu3 %v1805_v55 }
  0x3a   : > { %864 = vmatpush.bf16.msrb.mxu1 %v1788_v56 }
  0x3b   : > { %775 = vmatpush.bf16.msrb.mxu0 %v1778_v57 }
  0x3c   : > { %947 = vmatpush.bf16.msrb.mxu2 %v1795_v58 }
  0x3d   : > { %1043 = vmatpush.bf16.msrb.mxu3 %v1804_v59 }
  0x3e   : > { %865 = vmatpush.bf16.msrb.mxu1 %v1787_v60 }
  0x3f   : > { %776 = vmatpush.bf16.msrb.mxu0 %v1777_v61 }
  0x40   : > { %948 = vmatpush.bf16.msrb.mxu2 %v1794_v62 }
  0x41   : > { %1044 = vmatpush.bf16.msrb.mxu3 %v1803_v1 }
  0x42   : > { %866 = vmatpush.bf16.msrb.mxu1 %v1786_v2 }
  0x43   : > { %777 = vmatpush.bf16.msrb.mxu0 %v1776_v6 }
  0x44   : > { %949 = vmatpush.bf16.msrb.mxu2 %v1793_v7 }
  0x45   : > { %1045 = vmatpush.bf16.msrb.mxu3 %v1802_v9 }
  0x46   : > { %867 = vmatpush.bf16.msrb.mxu1 %v1785_v10 }
  0x47   : > { %778 = vmatpush.bf16.msrb.mxu0 %v1775_v12 }
  0x48   : > { %950 = vmatpush.bf16.msrb.mxu2 %v1792_v13 }
  0x49   : > { %1046 = vmatpush.bf16.msrb.mxu3 %v1801_v15 }
  0x4a   : > { %868 = vmatpush.bf16.msrb.mxu1 %v1784_v16 }
  0x4b   : > { %779 = vmatpush.bf16.msrb.mxu0 %v1774_v21 }
  0x4c   : > { %951 = vmatpush.bf16.msrb.mxu2 %v1791_v22 }
  0x4d   : > { %1047 = vmatpush.bf16.msrb.mxu3 %v1800_v26 }
  0x4e   : > { %869 = vmatpush.bf16.msrb.mxu1 %v1783_v27  ;;  %780 = vmatmul.bf16.vlgmr.msrb.gmra.mxu0 %v722_v29 }
  0x4f   : > { %1130 = vmatpush.bf16.msra.mxu0 %v1816_v23  ;;  %952 = vmatmul.bf16.vlgmr.msrb.gmra.mxu2 %v878_v30 }
  0x50   : > { %1048 = vmatmul.bf16.vlgmr.msrb.gmra.mxu3 %v990_v32 }
  0x51   : > { %870 = vmatmul.bf16.vlgmr.msrb.gmra.mxu1 %v812_v33 }
  0x53   : > { %1131 = vmatpush.bf16.msra.mxu0 %v1815_v31 }
  0x57   : > { %1132 = vmatpush.bf16.msra.mxu0 %v1814_v34 }
  0x5b   : > { %1133 = vmatpush.bf16.msra.mxu0 %v1813_v35 }
  0x5f   : > { %1134 = vmatpush.bf16.msra.mxu0 %v1812_v36 }
  0x63   : > { %1135 = vmatpush.bf16.msra.mxu0 %v1811_v37 }
  0x67   : > { %1136 = vmatpush.bf16.msra.mxu0 %v1810_v38 }
  0x6b   : > { %1137 = vmatpush.bf16.msra.mxu0 %v1809_v42 }
  0x6e   : > { %1138 = vmatmul.bf16.vlgmr.msra.gmra.mxu0 %v1080_v43 }
  0xab   : > { %v417_v44 = vpop.f32.mrf.mxu0 }
  0xae   : > { %v513_v45 = vpop.f32.mrf.mxu1 }
  0xaf   : > { %v517_v54 = vadd.f32 %v513_v45, %v417_v44 }
  0xb2   : > { %v603_v46 = vpop.f32.mrf.mxu2 }
  0xb3   : > { %v685_v47 = vpop.f32.mrf.mxu3  ;;  %v419_v48 = vpop.f32.mrf.mxu0  ;;  %v607_v56 = vadd.f32 %v603_v46, %v517_v54 }
  0xb5   : > { %v689_v60 = vadd.f32 %v685_v47, %v607_v56 }
  0xb6   : > { %v515_v49 = vpop.f32.mrf.mxu1 }
  0xba   : > { %v605_v50 = vpop.f32.mrf.mxu2 }
  0xbb   : > { %v687_v51 = vpop.f32.mrf.mxu3 }
  0xcb   : > { %v781_v52 = vpop.f32.mrf.mxu0 }
  0xcc   : > { %v785_v62 = vadd.f32 %v781_v52, %v689_v60 }
  0xce   : > { %v871_v53 = vpop.f32.mrf.mxu1 }
  0xcf   : > { %v875_v0 = vadd.f32 %v871_v53, %v785_v62 }
  0xd2   : > { %v953_v55 = vpop.f32.mrf.mxu2 }
  0xd3   : > { %v1049_v57 = vpop.f32.mrf.mxu3  ;;  %v783_v58 = vpop.f32.mrf.mxu0  ;;  %v957_v1 = vadd.f32 %v953_v55, %v875_v0 }
  0xd5   : > { %v1053_v2 = vadd.f32 %v1049_v57, %v957_v1 }
  0xd6   : > { %v873_v59 = vpop.f32.mrf.mxu1 }
  0xda   : > { %v955_v61 = vpop.f32.mrf.mxu2 }
  0xdb   : > { %v1051_v63 = vpop.f32.mrf.mxu3 }
  0xeb   : > { %v1139_v4 = vpop.f32.mrf.mxu0 }
  0xec   : > { %v1143_v5 = vadd.f32 %v1139_v4, %v1053_v2 }
  0xee   : > { %v1150_v6 = vadd.f32 %v1858_v3, %v1143_v5 }
  0xf0   : > { %v1151_v7 = vpack.c.bf16 %v1150_v6, %v1150_v6 }
  0xf2   : > { %1152 = vst [vmem:[%s340_s10] sm:$0xf] %v1151_v7 }
  0xf3   : > { %v1141_v8 = vpop.f32.mrf.mxu0 }
  0xf4 PF: > { %s15_s22 = sadd.s32 1, %s1897_s22   ;;  %s2256_s18 = smov %s1889_s20 }
  0xf5   : > { %p12_p10 = scmp.ge.s32.totalorder %s15_s22, 18   ;;  %s2257_s19 = smov %s1893_s21 }
  0xf6   : > { %s2258_s20 = smov %s2261_s23  ;;  %s2259_s21 = smov %s2265_s24 }
  0xf7   :  { %14 = sbr.rel (!%p12_p10) target bundleno = 3 (0x3), region = 84 }

// kernel: _lambda_.65
= control target key start
LH: loop header
LB: loop body
LE: loop exit
PB: predicated region body
PF: predicated region fallthrough
CT: control target
= control target key end

     0   :  { %s614_s18 = smov 0   ;;  %s616_s19 = smov 0   ;;  %s668_s0 = inlined_call_operand.vmem [shape: bf16[2,64,128], index: 0, kind: input, shape index: {}]   ;;  %s669_s1 = inlined_call_operand.vmem [shape: f32[2,1,128], index: 1, kind: input, shape index: {}]   ;;  %s670_s2 = inlined_call_operand.vmem [shape: f32[2,1,128], index: 2, kind: input, shape index: {}]   ;;  %s671_s3 = inlined_call_operand.vmem [shape: f32[1,128], index: 3, kind: input, shape index: {}]   ;;  %s672_s4 = inlined_call_operand.vmem [shape: f32[1,128], index: 4, kind: input, shape index: {}]   ;;  %s673_s5 = inlined_call_operand.vmem [shape: bf16[2,64,128], index: 5, kind: output, shape index: {}]  }
   0x1   :  { %s618_s20 = smov 0  }
   0x2 LB: > { %s27_s21 = sadd.s32 1, %s578_s19  ;;  %p481_p0 = scmp.ge.s32.totalorder %s582_s20, 1  ;;  %s582_s20 = sphi %s618_s20, %s15_s20   ;;  %s578_s19 = sphi %s616_s19, %s675_s19   ;;  %s574_s18 = sphi %s614_s18, %s674_s18  }
   0x3   : > { %p29_p1 = scmp.ge.s32.totalorder %s27_s21, 2  ;;  %p224_p2 = scmp.lt.s32.totalorder %s582_s20, 3 }
   0x5   : > { %s677_s21 = smov (%p29_p1, %s27_s21), 0  ;;  %p225_p3 = pnand %p481_p0, %p224_p2 }
   0x6   : > { %p267_p4 = scmp.lt.s32.totalorder (!%p225_p3), %s574_s18, 1 }
   0x7   : > { %228 = sbr.rel (%p225_p3) target bundleno = 32 (0x20), region = 40 }
   0xc   : > { %s679_s18 = smov (!%p267_p4, %s574_s18), 1  ;;  %v558_v16 = vld [vmem:[%s671_s3] ss:$0 sm:$0xff] }
   0xd   : > { %s488_s22 = sshll.u32 %s679_s18, 5  ;;  %s278_s25 = scalar_lea.vmem %s669_s1, %s679_s18  ;;  %v559_v25 = vld [vmem:[%s672_s4] ss:$0 sm:$0xff] }
   0xe   : > { %s274_s28 = scalar_lea.vmem %s668_s0, %s488_s22  ;;  %s281_s6 = scalar_lea.vmem %s670_s2, %s679_s18  ;;  %v556_v0 = vld [vmem:[%s278_s25] ss:$0 sm:$0xff] }
   0xf   : > { %v491_v1 = vld [vmem:[%s274_s28] sm:$0xff]   ;;  %v526_v2 = vld [vmem:[%s274_s28 + $0x8] sm:$0xff]   ;;  %v527_v3 = vld [vmem:[%s274_s28 + $0x10] sm:$0xff]   ;;  %s290_s13 = scalar_lea.vmem %s673_s5, %s488_s22 }
  0x10   : > { %v492_v4 = vunpack.c.l.bf16 %v491_v1  ;;  %v493_v5 = vunpack.c.h.bf16 %v491_v1  ;;  %v496_v6 = vunpack.c.l.bf16 %v526_v2  ;;  %v497_v7 = vunpack.c.h.bf16 %v526_v2  ;;  %v528_v8 = vld [vmem:[%s274_s28 + $0x18] sm:$0xff]   ;;  %v557_v9 = vld [vmem:[%s281_s6] ss:$0 sm:$0xff] }
  0x11   : > { %v500_v10 = vunpack.c.l.bf16 %v527_v3  ;;  %v501_v11 = vunpack.c.h.bf16 %v527_v3  ;;  %v504_v12 = vunpack.c.l.bf16 %v528_v8  ;;  %v505_v13 = vunpack.c.h.bf16 %v528_v8 }
  0x12   : > { %v312_v14 = vsub.f32 %v492_v4, %v556_v0  ;;  %v313_v15 = vsub.f32 %v493_v5, %v556_v0  ;;  %v314_v17 = vsub.f32 %v496_v6, %v556_v0  ;;  %v315_v18 = vsub.f32 %v497_v7, %v556_v0 }
  0x13   : > { %v316_v19 = vsub.f32 %v500_v10, %v556_v0  ;;  %v317_v20 = vsub.f32 %v501_v11, %v556_v0  ;;  %v318_v21 = vsub.f32 %v504_v12, %v556_v0  ;;  %v319_v22 = vsub.f32 %v505_v13, %v556_v0 }
  0x14   : > { %v324_v23 = vmul.f32 %v557_v9, %v312_v14  ;;  %v325_v24 = vmul.f32 %v557_v9, %v313_v15  ;;  %v326_v26 = vmul.f32 %v557_v9, %v314_v17  ;;  %v327_v27 = vmul.f32 %v557_v9, %v315_v18 }
  0x15   : > { %v328_v28 = vmul.f32 %v557_v9, %v316_v19  ;;  %v329_v29 = vmul.f32 %v557_v9, %v317_v20  ;;  %v330_v30 = vmul.f32 %v557_v9, %v318_v21  ;;  %v331_v31 = vmul.f32 %v557_v9, %v319_v22 }
  0x16   : > { %v336_v32 = vmul.f32 %v558_v16, %v324_v23  ;;  %v337_v33 = vmul.f32 %v558_v16, %v325_v24  ;;  %v338_v34 = vmul.f32 %v558_v16, %v326_v26  ;;  %v339_v35 = vmul.f32 %v558_v16, %v327_v27 }
  0x17   : > { %v340_v36 = vmul.f32 %v558_v16, %v328_v28  ;;  %v341_v37 = vmul.f32 %v558_v16, %v329_v29  ;;  %v342_v38 = vmul.f32 %v558_v16, %v330_v30  ;;  %v343_v39 = vmul.f32 %v558_v16, %v331_v31 }
  0x18   : > { %v348_v40 = vadd.f32 %v559_v25, %v336_v32  ;;  %v349_v41 = vadd.f32 %v559_v25, %v337_v33  ;;  %v350_v42 = vadd.f32 %v559_v25, %v338_v34  ;;  %v351_v43 = vadd.f32 %v559_v25, %v339_v35 }
  0x19   : > { %v352_v44 = vadd.f32 %v559_v25, %v340_v36  ;;  %v353_v45 = vadd.f32 %v559_v25, %v341_v37  ;;  %v354_v46 = vadd.f32 %v559_v25, %v342_v38  ;;  %v355_v47 = vadd.f32 %v559_v25, %v343_v39 }
  0x1a   : > { %v509_v48 = vpack.c.bf16 %v349_v41, %v348_v40  ;;  %v514_v49 = vpack.c.bf16 %v351_v43, %v350_v42 }
  0x1b   : > { %v519_v50 = vpack.c.bf16 %v353_v45, %v352_v44  ;;  %v524_v51 = vpack.c.bf16 %v355_v47, %v354_v46 }
  0x1c   : > { %510 = vst [vmem:[%s290_s13] sm:$0xff] %v509_v48  }
  0x1d   : > { %529 = vst [vmem:[%s290_s13 + $0x8] sm:$0xff] %v514_v49  }
  0x1e   : > { %530 = vst [vmem:[%s290_s13 + $0x10] sm:$0xff] %v519_v50  }
  0x1f   : > { %531 = vst [vmem:[%s290_s13 + $0x18] sm:$0xff] %v524_v51  }
  0x20 PF: > { %s15_s20 = sadd.s32 1, %s582_s20   ;;  %s674_s18 = smov %s578_s19 }
  0x21   : > { %p12_p5 = scmp.ge.s32.totalorder %s15_s20, 4   ;;  %s675_s19 = smov %s677_s21 }
  0x23   :  { %14 = sbr.rel (!%p12_p5) target bundleno = 2 (0x2), region = 76 }

// kernel: _lambda_.63
= control target key start
LH: loop header
LB: loop body
LE: loop exit
PB: predicated region body
PF: predicated region fallthrough
CT: control target
= control target key end

     0   :  { %s2015_s21 = smov 0   ;;  %s2017_s22 = smov 0   ;;  %s2338_s0 = inlined_call_operand.vmem [shape: bf16[2,10,10,128], index: 0, kind: input, shape index: {}, may-alias: {0,1,2}]   ;;  %s2339_s1 = inlined_call_operand.vmem [shape: bf16[2,10,10,128], index: 1, kind: input, shape index: {}, may-alias: {0,1,2}]   ;;  %s2340_s2 = inlined_call_operand.vmem [shape: bf16[2,10,10,128], index: 2, kind: input, shape index: {}, may-alias: {0,1,2}]   ;;  %s2341_s3 = inlined_call_operand.vmem [shape: bf16[9,128,128], index: 3, kind: input, shape index: {}]   ;;  %s2342_s4 = inlined_call_operand.vmem [shape: f32[1,128], index: 4, kind: input, shape index: {}]   ;;  %s2343_s5 = inlined_call_operand.vmem [shape: bf16[2,8,8,128], index: 5, kind: input, shape index: {}]   ;;  %s2344_s6 = inlined_call_operand.vmem [shape: bf16[2,8,8,128], index: 6, kind: output, shape index: {}]  }
   0x1   :  { %s2019_s23 = smov 0   ;;  %s2021_s24 = smov 0  }
   0x2   :  { %s2023_s25 = smov 0  }
   0x3 LB: > { %s25_s26 = sadd.s32 1, %s1970_s23  ;;  %s28_s27 = sadd.s32 1, %s1974_s24  ;;  %s1978_s25 = sphi %s2023_s25, %s16_s25   ;;  %s1974_s24 = sphi %s2021_s24, %s2349_s24   ;;  %s1970_s23 = sphi %s2019_s23, %s2348_s23   ;;  %s1966_s22 = sphi %s2017_s22, %s2347_s22   ;;  %s1962_s21 = sphi %s2015_s21, %s2346_s21  }
   0x4   : > { %p26_p0 = scmp.ge.s32.totalorder %s25_s26, 8  ;;  %p1367_p1 = scmp.ge.s32.totalorder %s1978_s25, 1 }
   0x5   : > { %p287_p2 = scmp.lt.s32.totalorder %s1978_s25, 17 }
   0x6   : > { %s2351_s26 = smov (%p26_p0, %s25_s26), 0  ;;  %s2353_s27 = smov (!%p26_p0, %s28_s27), %s1974_s24 }
   0x7   : > { %p288_p3 = pnand %p1367_p1, %p287_p2  ;;  %p30_p4 = scmp.ge.s32.totalorder %s2353_s27, 2 }
   0x8   : > { %p352_p5 = scmp.lt.s32.totalorder (!%p288_p3), %s1966_s22, 1  ;;  %p354_p6 = scmp.lt.s32.totalorder (!%p288_p3), %s1962_s21, 9 }
   0x9   : > { %s2355_s27 = smov (%p30_p4, %s2353_s27), 0  ;;  %291 = sbr.rel (%p288_p3) target bundleno = 245 (0xf5), region = 44 }
   0xa   : > { %s361_s19 = sadd.s32 (!%p288_p3), 1, %s1962_s21  ;;  %s372_s30 = sadd.s32 (!%p288_p3), 2, %s1962_s21 }
   0xb   : > { %p364_p7 = scmp.lt.s32.totalorder (!%p288_p3), %s361_s19, 9  ;;  %p2151_p8 = scmp.lt.s32.totalorder (!%p288_p3), %s372_s30, 9 }
   0xc   : > { %p385_p9 = scmp.lt.s32.totalorder (!%p288_p3), %s1962_s21, 7 }
   0xe   : > { %v1827_v0 = vld [vmem:[%s2341_s3 + $0x38] sm:$0xff]  ;;  %v1826_v4 = vld [vmem:[%s2341_s3 + $0x30] sm:$0xff]  ;;  %s2357_s22 = smov (!%p352_p5, %s1966_s22), 1  ;;  %v1825_v8 = vld [vmem:[%s2341_s3 + $0x28] sm:$0xff]  ;;  %s2359_s19 = smov (!%p364_p7, %s361_s19), 9 }
   0xf   : > { %v1845_v1 = vld [vmem:[%s2341_s3 + $0xb8] sm:$0xff]  ;;  %466 = vmatpush.bf16.msra.mxu0 %v1827_v0  ;;  %v1844_v5 = vld [vmem:[%s2341_s3 + $0xb0] sm:$0xff]  ;;  %s355_s20 = scalar_select %p354_p6, %s1962_s21, 9  ;;  %v1843_v9 = vld [vmem:[%s2341_s3 + $0xa8] sm:$0xff] }
  0x10   : > { %v1853_v2 = vld [vmem:[%s2341_s3 + $0xf8] sm:$0xff]  ;;  %652 = vmatpush.bf16.msra.mxu2 %v1845_v1  ;;  %v1852_v6 = vld [vmem:[%s2341_s3 + $0xf0] sm:$0xff]  ;;  %s2076_s28 = smul.u32 20, %s2357_s22  ;;  %v1851_v10 = vld [vmem:[%s2341_s3 + $0xe8] sm:$0xff]  ;;  %s1370_s13 = sshll.u32 %s2359_s19, 1 }
  0x11   : > { %v1836_v3 = vld [vmem:[%s2341_s3 + $0x78] sm:$0xff]  ;;  %734 = vmatpush.bf16.msra.mxu3 %v1853_v2  ;;  %v1835_v7 = vld [vmem:[%s2341_s3 + $0x70] sm:$0xff]  ;;  %s1368_s9 = sshll.u32 %s355_s20, 1  ;;  %v1834_v11 = vld [vmem:[%s2341_s3 + $0x68] sm:$0xff]  ;;  %s2361_s30 = smov (!%p2151_p8, %s372_s30), 9 }
  0x12   : > { %562 = vmatpush.bf16.msra.mxu1 %v1836_v3  ;;  %s358_s14 = sadd.s32 %s2076_s28, %s1368_s9  ;;  %v1824_v12 = vld [vmem:[%s2341_s3 + $0x20] sm:$0xff]  ;;  %v1823_v16 = vld [vmem:[%s2341_s3 + $0x18] sm:$0xff]  ;;  %v1822_v20 = vld [vmem:[%s2341_s3 + $0x10] sm:$0xff]  ;;  %s368_s19 = sadd.s32 %s2076_s28, %s1370_s13 }
  0x13   : > { %467 = vmatpush.bf16.msra.mxu0 %v1826_v4  ;;  %v1842_v13 = vld [vmem:[%s2341_s3 + $0xa0] sm:$0xff]  ;;  %s1369_s8 = sshll.u32 %s358_s14, 2  ;;  %v1841_v17 = vld [vmem:[%s2341_s3 + $0x98] sm:$0xff]  ;;  %v1840_v21 = vld [vmem:[%s2341_s3 + $0x90] sm:$0xff]  ;;  %s1371_s18 = sshll.u32 %s368_s19, 2 }
  0x14   : > { %653 = vmatpush.bf16.msra.mxu2 %v1844_v5  ;;  %v1850_v14 = vld [vmem:[%s2341_s3 + $0xe0] sm:$0xff]  ;;  %v1849_v18 = vld [vmem:[%s2341_s3 + $0xd8] sm:$0xff]  ;;  %s2119_s20 = scalar_lea.vmem %s2338_s0, %s1369_s8  ;;  %v1848_v24 = vld [vmem:[%s2341_s3 + $0xd0] sm:$0xff]  ;;  %s2184_s17 = scalar_lea.vmem %s2339_s1, %s1371_s18 }
  0x15   : > { %735 = vmatpush.bf16.msra.mxu3 %v1852_v6  ;;  %v1833_v15 = vld [vmem:[%s2341_s3 + $0x60] sm:$0xff]  ;;  %v1832_v19 = vld [vmem:[%s2341_s3 + $0x58] sm:$0xff]  ;;  %v1831_v25 = vld [vmem:[%s2341_s3 + $0x50] sm:$0xff]  ;;  %s1372_s12 = sshll.u32 %s2361_s30, 1  ;;  %s2363_s21 = smov (!%p385_p9, %s1962_s21), 7 }
  0x16   : > { %563 = vmatpush.bf16.msra.mxu1 %v1835_v7  ;;  %v1428_v22 = vld [vmem:[%s2119_s20] sm:$0xf]  ;;  %v1828_v23 = vld [vmem:[%s2119_s20] sm:$0x10]  ;;  %v1821_v27 = vld [vmem:[%s2341_s3 + $0x8] sm:$0xff]  ;;  %s379_s16 = sadd.s32 %s2076_s28, %s1372_s12 }
  0x17   : > { %468 = vmatpush.bf16.msra.mxu0 %v1825_v8  ;;  %v1429_v26 = vor.u32 %v1828_v23, %v1428_v22  ;;  %v1839_v28 = vld [vmem:[%s2341_s3 + $0x88] sm:$0xff]  ;;  %v1480_v31 = vld [vmem:[%s2119_s20] sm:$0xe]  ;;  %v1837_v32 = vld [vmem:[%s2119_s20] sm:$0x10]  ;;  %s1373_s10 = sshll.u32 %s379_s16, 2 }
  0x18   : > { %654 = vmatpush.bf16.msra.mxu2 %v1843_v9  ;;  %v1847_v29 = vld [vmem:[%s2341_s3 + $0xc8] sm:$0xff]  ;;  %v1820_v34 = vld [vmem:[%s2341_s3] sm:$0xff]  ;;  %v1481_v36 = vor.u32 %v1837_v32, %v1480_v31  ;;  %v1862_v37 = vld [vmem:[%s2341_s3 + $0x138] sm:$0xff]  ;;  %s2231_s30 = scalar_lea.vmem %s2340_s2, %s1373_s10 }
  0x19   : > { %736 = vmatpush.bf16.msra.mxu3 %v1851_v10  ;;  %v1830_v30 = vld [vmem:[%s2341_s3 + $0x48] sm:$0xff]  ;;  %v509_v33 = vshll.u32 %v1429_v26, 16  ;;  %v1838_v35 = vld [vmem:[%s2341_s3 + $0x80] sm:$0xff]  ;;  %v1879_v38 = vld [vmem:[%s2341_s3 + $0x1b8] sm:$0xff]  ;;  %v507_v41 = vshrl.u32 %v1429_v26, 16 }
  0x1a   : > { %564 = vmatpush.bf16.msra.mxu1 %v1834_v11  ;;  %v1846_v39 = vld [vmem:[%s2341_s3 + $0xc0] sm:$0xff]  ;;  %v1888_v43 = vld [vmem:[%s2341_s3 + $0x1f8] sm:$0xff]  ;;  %v602_v45 = vrot.slane %v1481_v36, 1  ;;  %v1861_v46 = vld [vmem:[%s2341_s3 + $0x130] sm:$0xff] }
  0x1b   : > { %469 = vmatpush.bf16.msra.mxu0 %v1824_v12  ;;  %v1829_v40 = vld [vmem:[%s2341_s3 + $0x40] sm:$0xff]  ;;  %v511_v42 = vrot.slane %v509_v33, 1  ;;  %v1871_v44 = vld [vmem:[%s2341_s3 + $0x178] sm:$0xff]  ;;  %v1878_v47 = vld [vmem:[%s2341_s3 + $0x1b0] sm:$0xff] }
  0x1c   : > { %655 = vmatpush.bf16.msra.mxu2 %v1842_v13  ;;  %v401_v48 = vld [vmem:[%s2119_s20] sm:$0xf]  ;;  %v1887_v50 = vld [vmem:[%s2341_s3 + $0x1f0] sm:$0xff]  ;;  %v1860_v53 = vld [vmem:[%s2341_s3 + $0x128] sm:$0xff] }
  0x1d   : > { %737 = vmatpush.bf16.msra.mxu3 %v1850_v14  ;;  %v512_v49 = vor.u32 %v511_v42, %v507_v41  ;;  %v1870_v51 = vld [vmem:[%s2341_s3 + $0x170] sm:$0xff]  ;;  %v668_v52 = vld [vmem:[%s2184_s17] sm:$0xf]  ;;  %v1877_v54 = vld [vmem:[%s2341_s3 + $0x1a8] sm:$0xff] }
  0x1e   : > { %565 = vmatpush.bf16.msra.mxu1 %v1833_v15  ;;  %v1886_v55 = vld [vmem:[%s2341_s3 + $0x1e8] sm:$0xff]  ;;  %v1859_v57 = vld [vmem:[%s2341_s3 + $0x120] sm:$0xff]  ;;  %v1858_v61 = vld [vmem:[%s2341_s3 + $0x118] sm:$0xff] }
  0x1f   : > { %470 = vmatpush.bf16.msra.mxu0 %v1823_v16  ;;  %v1869_v56 = vld [vmem:[%s2341_s3 + $0x168] sm:$0xff]  ;;  %v1876_v58 = vld [vmem:[%s2341_s3 + $0x1a0] sm:$0xff]  ;;  %v1875_v62 = vld [vmem:[%s2341_s3 + $0x198] sm:$0xff] }
  0x20   : > { %656 = vmatpush.bf16.msra.mxu2 %v1841_v17  ;;  %v1885_v59 = vld [vmem:[%s2341_s3 + $0x1e0] sm:$0xff]  ;;  %v1884_v1 = vld [vmem:[%s2341_s3 + $0x1d8] sm:$0xff]  ;;  %v1857_v6 = vld [vmem:[%s2341_s3 + $0x110] sm:$0xff] }
  0x21   : > { %738 = vmatpush.bf16.msra.mxu3 %v1849_v18  ;;  %v1868_v60 = vld [vmem:[%s2341_s3 + $0x160] sm:$0xff]  ;;  %v1867_v2 = vld [vmem:[%s2341_s3 + $0x158] sm:$0xff]  ;;  %v1874_v7 = vld [vmem:[%s2341_s3 + $0x190] sm:$0xff] }
  0x22   : > { %566 = vmatpush.bf16.msra.mxu1 %v1832_v19  ;;  %v1580_v63 = vld [vmem:[%s2184_s17] sm:$0xf]  ;;  %v1854_v0 = vld [vmem:[%s2184_s17] sm:$0x10]  ;;  %v1883_v9 = vld [vmem:[%s2341_s3 + $0x1d0] sm:$0xff] }
  0x23   : > { %471 = vmatpush.bf16.msra.mxu0 %v1822_v20  ;;  %v1732_v3 = vld [vmem:[%s2231_s30] sm:$0xf]  ;;  %v1880_v4 = vld [vmem:[%s2231_s30] sm:$0x10]  ;;  %v1581_v5 = vor.u32 %v1854_v0, %v1580_v63  ;;  %v1866_v10 = vld [vmem:[%s2341_s3 + $0x150] sm:$0xff] }
  0x24   : > { %657 = vmatpush.bf16.msra.mxu2 %v1840_v21  ;;  %v1733_v8 = vor.u32 %v1880_v4, %v1732_v3  ;;  %v1856_v12 = vld [vmem:[%s2341_s3 + $0x108] sm:$0xff]  ;;  %v1632_v19 = vld [vmem:[%s2184_s17] sm:$0xe]  ;;  %v1863_v20 = vld [vmem:[%s2184_s17] sm:$0x10] }
  0x25   : > { %739 = vmatpush.bf16.msra.mxu3 %v1848_v24  ;;  %v777_v11 = vshll.u32 %v1581_v5, 16  ;;  %v1873_v13 = vld [vmem:[%s2341_s3 + $0x188] sm:$0xff]  ;;  %v775_v17 = vshrl.u32 %v1581_v5, 16  ;;  %v1855_v21 = vld [vmem:[%s2341_s3 + $0x100] sm:$0xff]  ;;  %v1897_v23 = vld [vmem:[%s2341_s3 + $0x238] sm:$0xff] }
  0x26   : > { %567 = vmatpush.bf16.msra.mxu1 %v1831_v25  ;;  %v1045_v14 = vshll.u32 %v1733_v8, 16  ;;  %v1882_v15 = vld [vmem:[%s2341_s3 + $0x1c8] sm:$0xff]  ;;  %v1872_v22 = vld [vmem:[%s2341_s3 + $0x180] sm:$0xff]  ;;  %v1043_v24 = vshrl.u32 %v1733_v8, 16  ;;  %v1896_v31 = vld [vmem:[%s2341_s3 + $0x230] sm:$0xff] }
  0x27   : > { %472 = vmatpush.bf16.msra.mxu0 %v1821_v27  ;;  %v1865_v16 = vld [vmem:[%s2341_s3 + $0x148] sm:$0xff]  ;;  %v779_v18 = vrot.slane %v777_v11, 1  ;;  %v1881_v26 = vld [vmem:[%s2341_s3 + $0x1c0] sm:$0xff]  ;;  %v1893_v36 = vld [vmem:[%s2341_s3 + $0x218] sm:$0xff] }
  0x28   : > { %658 = vmatpush.bf16.msra.mxu2 %v1839_v28  ;;  %v1047_v25 = vrot.slane %v1045_v14, 1  ;;  %v1864_v27 = vld [vmem:[%s2341_s3 + $0x140] sm:$0xff]  ;;  %v1633_v28 = vor.u32 %v1863_v20, %v1632_v19 }
  0x29   : > { %740 = vmatpush.bf16.msra.mxu3 %v1847_v29  ;;  %v780_v29 = vor.u32 %v779_v18, %v775_v17  ;;  %v1890_v42 = vld [vmem:[%s2341_s3 + $0x200] sm:$0xff] }
  0x2a   : > { %568 = vmatpush.bf16.msra.mxu1 %v1830_v30  ;;  %v936_v30 = vld [vmem:[%s2231_s30] sm:$0xf]  ;;  %v1048_v32 = vor.u32 %v1047_v25, %v1043_v24  ;;  %v870_v33 = vrot.slane %v1633_v28, 1 }
  0x2b   : > { %473 = vmatpush.bf16.msra.mxu0 %v1820_v34  ;;  %v1895_v34 = vld [vmem:[%s2341_s3 + $0x228] sm:$0xff]  ;;  %v1939_v4 = vld [vmem:[%s2342_s4] ss:$0 sm:$0xff] }
  0x2c   : > { %659 = vmatpush.bf16.msra.mxu2 %v1838_v35  ;;  %v1894_v35 = vld [vmem:[%s2341_s3 + $0x220] sm:$0xff] }
  0x2d   : > { %741 = vmatpush.bf16.msra.mxu3 %v1846_v39  ;;  %v1784_v39 = vld [vmem:[%s2231_s30] sm:$0xe] }
  0x2e   : > { %569 = vmatpush.bf16.msra.mxu1 %v1829_v40  ;;  %474 = vmatmul.bf16.vlgmr.msra.gmra.mxu0 %v401_v48  ;;  %v1889_v40 = vld [vmem:[%s2231_s30] sm:$0x10]  ;;  %s1374_s30 = sshll.u32 %s2357_s22, 3 }
  0x2f   : > { %830 = vmatpush.bf16.msrb.mxu0 %v1862_v37  ;;  %660 = vmatmul.bf16.vlgmr.msra.gmra.mxu2 %v602_v45  ;;  %v1892_v37 = vld [vmem:[%s2341_s3 + $0x210] sm:$0xff]  ;;  %v1785_v41 = vor.u32 %v1889_v40, %v1784_v39  ;;  %s388_s29 = sadd.s32 %s1374_s30, %s2363_s21 }
  0x30   : > { %1002 = vmatpush.bf16.msrb.mxu2 %v1879_v38  ;;  %742 = vmatmul.bf16.vlgmr.msra.gmra.mxu3 %v668_v52  ;;  %v1891_v38 = vld [vmem:[%s2341_s3 + $0x208] sm:$0xff]  ;;  %s1375_s16 = sshll.u32 %s388_s29, 2 }
  0x31   : > { %1098 = vmatpush.bf16.msrb.mxu3 %v1888_v43  ;;  %570 = vmatmul.bf16.vlgmr.msra.gmra.mxu1 %v512_v49  ;;  %v1138_v43 = vrot.slane %v1785_v41, 1  ;;  %s390_s8 = scalar_lea.vmem %s2343_s5, %s1375_s16  ;;  %s398_s10 = scalar_lea.vmem %s2344_s6, %s1375_s16 }
  0x32   : > { %920 = vmatpush.bf16.msrb.mxu1 %v1871_v44 }
  0x33   : > { %831 = vmatpush.bf16.msrb.mxu0 %v1861_v46 }
  0x34   : > { %1003 = vmatpush.bf16.msrb.mxu2 %v1878_v47 }
  0x35   : > { %1099 = vmatpush.bf16.msrb.mxu3 %v1887_v50 }
  0x36   : > { %921 = vmatpush.bf16.msrb.mxu1 %v1870_v51 }
  0x37   : > { %832 = vmatpush.bf16.msrb.mxu0 %v1860_v53 }
  0x38   : > { %1004 = vmatpush.bf16.msrb.mxu2 %v1877_v54 }
  0x39   : > { %1100 = vmatpush.bf16.msrb.mxu3 %v1886_v55 }
  0x3a   : > { %922 = vmatpush.bf16.msrb.mxu1 %v1869_v56 }
  0x3b   : > { %833 = vmatpush.bf16.msrb.mxu0 %v1859_v57 }
  0x3c   : > { %1005 = vmatpush.bf16.msrb.mxu2 %v1876_v58 }
  0x3d   : > { %1101 = vmatpush.bf16.msrb.mxu3 %v1885_v59 }
  0x3e   : > { %923 = vmatpush.bf16.msrb.mxu1 %v1868_v60 }
  0x3f   : > { %834 = vmatpush.bf16.msrb.mxu0 %v1858_v61 }
  0x40   : > { %1006 = vmatpush.bf16.msrb.mxu2 %v1875_v62 }
  0x41   : > { %1102 = vmatpush.bf16.msrb.mxu3 %v1884_v1 }
  0x42   : > { %924 = vmatpush.bf16.msrb.mxu1 %v1867_v2  ;;  %v1209_v2 = vld [vmem:[%s390_s8] sm:$0xf] }
  0x43   : > { %835 = vmatpush.bf16.msrb.mxu0 %v1857_v6 }
  0x44   : > { %1007 = vmatpush.bf16.msrb.mxu2 %v1874_v7  ;;  %v1210_v7 = vunpack.c.l.bf16 %v1209_v2 }
  0x45   : > { %1103 = vmatpush.bf16.msrb.mxu3 %v1883_v9 }
  0x46   : > { %925 = vmatpush.bf16.msrb.mxu1 %v1866_v10 }
  0x47   : > { %836 = vmatpush.bf16.msrb.mxu0 %v1856_v12 }
  0x48   : > { %1008 = vmatpush.bf16.msrb.mxu2 %v1873_v13 }
  0x49   : > { %1104 = vmatpush.bf16.msrb.mxu3 %v1882_v15 }
  0x4a   : > { %926 = vmatpush.bf16.msrb.mxu1 %v1865_v16 }
  0x4b   : > { %837 = vmatpush.bf16.msrb.mxu0 %v1855_v21 }
  0x4c   : > { %1009 = vmatpush.bf16.msrb.mxu2 %v1872_v22 }
  0x4d   : > { %1105 = vmatpush.bf16.msrb.mxu3 %v1881_v26 }
  0x4e   : > { %927 = vmatpush.bf16.msrb.mxu1 %v1864_v27  ;;  %838 = vmatmul.bf16.vlgmr.msrb.gmra.mxu0 %v780_v29 }
  0x4f   : > { %1188 = vmatpush.bf16.msra.mxu0 %v1897_v23  ;;  %1010 = vmatmul.bf16.vlgmr.msrb.gmra.mxu2 %v936_v30 }
  0x50   : > { %1106 = vmatmul.bf16.vlgmr.msrb.gmra.mxu3 %v1048_v32 }
  0x51   : > { %928 = vmatmul.bf16.vlgmr.msrb.gmra.mxu1 %v870_v33 }
  0x53   : > { %1189 = vmatpush.bf16.msra.mxu0 %v1896_v31 }
  0x57   : > { %1190 = vmatpush.bf16.msra.mxu0 %v1895_v34 }
  0x5b   : > { %1191 = vmatpush.bf16.msra.mxu0 %v1894_v35 }
  0x5f   : > { %1192 = vmatpush.bf16.msra.mxu0 %v1893_v36 }
  0x63   : > { %1193 = vmatpush.bf16.msra.mxu0 %v1892_v37 }
  0x67   : > { %1194 = vmatpush.bf16.msra.mxu0 %v1891_v38 }
  0x6b   : > { %1195 = vmatpush.bf16.msra.mxu0 %v1890_v42 }
  0x6e   : > { %1196 = vmatmul.bf16.vlgmr.msra.gmra.mxu0 %v1138_v43 }
  0xab   : > { %v475_v44 = vpop.f32.mrf.mxu0 }
  0xae   : > { %v571_v45 = vpop.f32.mrf.mxu1 }
  0xaf   : > { %v575_v54 = vadd.f32 %v571_v45, %v475_v44 }
  0xb2   : > { %v661_v46 = vpop.f32.mrf.mxu2 }
  0xb3   : > { %v743_v47 = vpop.f32.mrf.mxu3  ;;  %v477_v48 = vpop.f32.mrf.mxu0  ;;  %v665_v56 = vadd.f32 %v661_v46, %v575_v54 }
  0xb5   : > { %v747_v60 = vadd.f32 %v743_v47, %v665_v56 }
  0xb6   : > { %v573_v49 = vpop.f32.mrf.mxu1 }
  0xba   : > { %v663_v50 = vpop.f32.mrf.mxu2 }
  0xbb   : > { %v745_v51 = vpop.f32.mrf.mxu3 }
  0xcb   : > { %v839_v52 = vpop.f32.mrf.mxu0 }
  0xcc   : > { %v843_v62 = vadd.f32 %v839_v52, %v747_v60 }
  0xce   : > { %v929_v53 = vpop.f32.mrf.mxu1 }
  0xcf   : > { %v933_v0 = vadd.f32 %v929_v53, %v843_v62 }
  0xd2   : > { %v1011_v55 = vpop.f32.mrf.mxu2 }
  0xd3   : > { %v1107_v57 = vpop.f32.mrf.mxu3  ;;  %v841_v58 = vpop.f32.mrf.mxu0  ;;  %v1015_v1 = vadd.f32 %v1011_v55, %v933_v0 }
  0xd5   : > { %v1111_v3 = vadd.f32 %v1107_v57, %v1015_v1 }
  0xd6   : > { %v931_v59 = vpop.f32.mrf.mxu1 }
  0xda   : > { %v1013_v61 = vpop.f32.mrf.mxu2 }
  0xdb   : > { %v1109_v63 = vpop.f32.mrf.mxu3 }
  0xeb   : > { %v1197_v5 = vpop.f32.mrf.mxu0 }
  0xec   : > { %v1201_v6 = vadd.f32 %v1197_v5, %v1111_v3 }
  0xee   : > { %v1208_v8 = vadd.f32 %v1939_v4, %v1201_v6 }
  0xf0   : > { %v1211_v9 = vadd.f32 %v1210_v7, %v1208_v8 }
  0xf2   : > { %v1212_v10 = vpack.c.bf16 %v1211_v9, %v1211_v9 }
  0xf3   : > { %v1199_v11 = vpop.f32.mrf.mxu0 }
  0xf4   : > { %1213 = vst [vmem:[%s398_s10] sm:$0xf] %v1212_v10 }
  0xf5 PF: > { %s16_s25 = sadd.s32 1, %s1978_s25   ;;  %s2346_s21 = smov %s1970_s23 }
  0xf6   : > { %p13_p10 = scmp.ge.s32.totalorder %s16_s25, 18   ;;  %s2347_s22 = smov %s1974_s24 }
  0xf7   : > { %s2348_s23 = smov %s2351_s26  ;;  %s2349_s24 = smov %s2355_s27 }
  0xf8   :  { %15 = sbr.rel (!%p13_p10) target bundleno = 3 (0x3), region = 91 }

// kernel: _lambda_.66
= control target key start
LH: loop header
LB: loop body
LE: loop exit
PB: predicated region body
PF: predicated region fallthrough
CT: control target
= control target key end

     0   :  { %s1137_s12 = smov 0   ;;  %s1139_s13 = smov 0   ;;  %s1304_s0 = inlined_call_operand.vmem [shape: bf16[128,128], index: 0, kind: input, shape index: {}]   ;;  %s1305_s1 = inlined_call_operand.vmem [shape: bf16[128,384], index: 1, kind: input, shape index: {}]   ;;  %s1306_s2 = inlined_call_operand.vmem [shape: f32[1,384], index: 2, kind: input, shape index: {}]   ;;  %s1307_s3 = inlined_call_operand.vmem [shape: bf16[128,384], index: 3, kind: output, shape index: {}]  }
   0x1   :  { %s1141_s14 = smov 0   ;;  %s1143_s15 = smov 0  }
   0x2   :  { %s1145_s16 = smov 0  }
   0x3 LB: > { %s28_s17 = sadd.s32 1, %s1111_s15  ;;  %s871_s18 = sadd.s32 4294967295, %s1115_s16   ;;  %s1115_s16 = sphi %s1145_s16, %s13_s16   ;;  %s1111_s15 = sphi %s1143_s15, %s1312_s15   ;;  %s1107_s14 = sphi %s1141_s14, %s1311_s14   ;;  %s1103_s13 = sphi %s1139_s13, %s1310_s13   ;;  %s1099_s12 = sphi %s1137_s12, %s1309_s12  }
   0x4   : > { %p30_p0 = scmp.ge.s32.totalorder %s28_s17, 3  ;;  %p76_p1 = scmp.ne.s32.totalorder %s1103_s13, %s1099_s12 }
   0x5   : > { %p77_p2 = scmp.eq.s32.totalorder %s1115_s16, 0  ;;  %p134_p4 = scmp.eq.s32.totalorder %s871_s18, 2 }
   0x6   : > { %s1314_s17 = smov (%p30_p0, %s28_s17), 0  ;;  %s69_s20 = sadd.s32 1, %s1103_s13 }
   0x7   : > { %p78_p3 = por %p77_p2, %p76_p1  ;;  %s65_s19 = ssub.s32 %s1111_s15, %s1314_s17 }
   0x8   : > { %p67_p5 = scmp.eq.s32.totalorder %s65_s19, 0  ;;  %p1172_p6 = por %p134_p4, %p76_p1 }
   0x9   : > { %p875_p7 = scmp.ge.s32.totalorder %s1115_s16, 3 }
   0xa   : > { %s1177_s22 = scalar_select %p67_p5, %s1103_s13, %s69_s20  }
   0xb   : > { %168 = sbr.rel (%p875_p7) target bundleno = 36 (0x24), region = 20 }
  0x10   : > { %171 = sbr.rel (!%p78_p3) target bundleno = 36 (0x24), region = 24  ;;  %s173_s23 = sand.u32 (%p78_p3), 1, %s1103_s13  }
  0x11   : > { %s877_s24 = sshll.u32 (%p78_p3), %s1111_s15, 2  ;;  %s876_s25 = sshll.u32 (%p78_p3), %s173_s23, 6 }
  0x12   : > { %s1185_s28 = scalar_lea.vmem (%p78_p3), %s1305_s1, %s877_s24  ;;  %s175_s29 = scalar_lea.vmem (%p78_p3), [#allocation3], %s876_s25 }
  0x13   : > { %v197_v0 = vld [vmem:[%s1185_s28] sm:$0xf] (%p78_p3)  ;;  %v199_v1 = vld [vmem:[%s1185_s28 + $0xc] sm:$0xf] (%p78_p3)  ;;  %v201_v2 = vld [vmem:[%s1185_s28 + $0x18] sm:$0xf] (%p78_p3) }
  0x14   : > { %198 = vst [vmem:[%s175_s29] sm:$0xf] (%p78_p3), %v197_v0  ;;  %v203_v3 = vld [vmem:[%s1185_s28 + $0x24] sm:$0xf] (%p78_p3)  ;;  %v205_v4 = vld [vmem:[%s1185_s28 + $0x30] sm:$0xf] (%p78_p3) }
  0x15   : > { %200 = vst [vmem:[%s175_s29 + $0x4] sm:$0xf] %v199_v1  ;;  %v207_v5 = vld [vmem:[%s1185_s28 + $0x3c] sm:$0xf]  ;;  %v209_v6 = vld [vmem:[%s1185_s28 + $0x48] sm:$0xf] }
  0x16   : > { %202 = vst [vmem:[%s175_s29 + $0x8] sm:$0xf] %v201_v2  ;;  %v211_v7 = vld [vmem:[%s1185_s28 + $0x54] sm:$0xf]  ;;  %v213_v8 = vld [vmem:[%s1185_s28 + $0x60] sm:$0xf] }
  0x17   : > { %204 = vst [vmem:[%s175_s29 + $0xc] sm:$0xf] %v203_v3  ;;  %v215_v9 = vld [vmem:[%s1185_s28 + $0x6c] sm:$0xf]  ;;  %v217_v10 = vld [vmem:[%s1185_s28 + $0x78] sm:$0xf] }
  0x18   : > { %206 = vst [vmem:[%s175_s29 + $0x10] sm:$0xf] %v205_v4  ;;  %v219_v11 = vld [vmem:[%s1185_s28 + $0x84] sm:$0xf]  ;;  %v221_v12 = vld [vmem:[%s1185_s28 + $0x90] sm:$0xf] }
  0x19   : > { %208 = vst [vmem:[%s175_s29 + $0x14] sm:$0xf] %v207_v5  ;;  %v223_v13 = vld [vmem:[%s1185_s28 + $0x9c] sm:$0xf]  ;;  %v225_v14 = vld [vmem:[%s1185_s28 + $0xa8] sm:$0xf] }
  0x1a   : > { %210 = vst [vmem:[%s175_s29 + $0x18] sm:$0xf] %v209_v6  ;;  %v227_v15 = vld [vmem:[%s1185_s28 + $0xb4] sm:$0xf] }
  0x1b   : > { %212 = vst [vmem:[%s175_s29 + $0x1c] sm:$0xf] %v211_v7 }
  0x1c   : > { %214 = vst [vmem:[%s175_s29 + $0x20] sm:$0xf] %v213_v8 }
  0x1d   : > { %216 = vst [vmem:[%s175_s29 + $0x24] sm:$0xf] %v215_v9 }
  0x1e   : > { %218 = vst [vmem:[%s175_s29 + $0x28] sm:$0xf] %v217_v10 }
  0x1f   : > { %220 = vst [vmem:[%s175_s29 + $0x2c] sm:$0xf] %v219_v11 }
  0x20   : > { %222 = vst [vmem:[%s175_s29 + $0x30] sm:$0xf] %v221_v12 }
  0x21   : > { %224 = vst [vmem:[%s175_s29 + $0x34] sm:$0xf] %v223_v13 }
  0x22   : > { %226 = vst [vmem:[%s175_s29 + $0x38] sm:$0xf] %v225_v14 }
  0x23   : > { %228 = vst [vmem:[%s175_s29 + $0x3c] sm:$0xf] %v227_v15 }
  0x24 PF: > { %p878_p8 = scmp.ge.s32.totalorder %s1115_s16, 1  ;;  %p289_p9 = scmp.lt.s32.totalorder %s1115_s16, 4 }
  0x26   : > { %p290_p10 = pnand %p878_p8, %p289_p9 }
  0x27   : > { %s296_s30 = sand.u32 (!%p290_p10), 1, %s1099_s12   ;;  %p339_p11 = scmp.lt.s32.totalorder (!%p290_p10), %s1107_s14, 2 }
  0x28   : > { %293 = sbr.rel (%p290_p10) target bundleno = 250 (0xfa), region = 69  ;;  %s1207_s4 = sshll.u32 (!%p290_p10), %s296_s30, 6 }
  0x29   : > { %s1210_s5 = scalar_lea.vmem (!%p290_p10), [#allocation3], %s1207_s4  ;;  %s1257_s11 = scalar_lea.vmem (!%p290_p10), [#allocation4], %s1207_s4 }
  0x2d   : > { %v964_v16 = vld [vmem:[%s1210_s5 + $0x38] sm:$0xff]  ;;  %s1214_s6 = scalar_select %p339_p11, %s1107_s14, 2  ;;  %v963_v17 = vld [vmem:[%s1210_s5 + $0x30] sm:$0xff]  ;;  %v962_v18 = vld [vmem:[%s1210_s5 + $0x28] sm:$0xff] }
  0x2e   : > { %507 = vmatpush.bf16.msra.mxu0 %v964_v16  ;;  %1012 = vmatpush.bf16.msra.mxu1 %v964_v16  ;;  %v961_v19 = vld [vmem:[%s1210_s5 + $0x20] sm:$0xff]  ;;  %v960_v20 = vld [vmem:[%s1210_s5 + $0x18] sm:$0xff]  ;;  %v959_v21 = vld [vmem:[%s1210_s5 + $0x10] sm:$0xff]  ;;  %s946_s4 = sshll.u32 (%p1172_p6), %s1107_s14, 2 }
  0x2f   : > { %1013 = vmatpush.bf16.msra.mxu2 %v964_v16  ;;  %1014 = vmatpush.bf16.msra.mxu3 %v964_v16  ;;  %s341_s9 = scalar_lea.vmem %s1306_s2, %s1214_s6  ;;  %v958_v22 = vld [vmem:[%s1210_s5 + $0x8] sm:$0xff]  ;;  %v957_v23 = vld [vmem:[%s1210_s5] sm:$0xff]  ;;  %v951_v25 = vld [vmem:[%s1304_s0 + $0x10] sm:$0xff]  ;;  %s670_s12 = scalar_lea.vmem (%p1172_p6), %s1307_s3, %s946_s4 }
  0x30   : > { %v949_v24 = vld [vmem:[%s1304_s0] sm:$0xff]  ;;  %v955_v27 = vld [vmem:[%s1304_s0 + $0x30] sm:$0xff]  ;;  %v950_v28 = vld [vmem:[%s1304_s0 + $0x8] sm:$0xff] }
  0x31   : > { %v953_v26 = vld [vmem:[%s1304_s0 + $0x20] sm:$0xff]  ;;  %v952_v29 = vld [vmem:[%s1304_s0 + $0x18] sm:$0xff]  ;;  %v954_v30 = vld [vmem:[%s1304_s0 + $0x28] sm:$0xff] }
  0x32   : > { %508 = vmatpush.bf16.msra.mxu0 %v963_v17  ;;  %1015 = vmatpush.bf16.msra.mxu1 %v963_v17  ;;  %v956_v31 = vld [vmem:[%s1304_s0 + $0x38] sm:$0xff]  ;;  %v1076_v34 = vld [vmem:[%s341_s9] ss:$0 sm:$0xff] }
  0x33   : > { %1016 = vmatpush.bf16.msra.mxu2 %v963_v17  ;;  %1017 = vmatpush.bf16.msra.mxu3 %v963_v17 }
  0x36   : > { %509 = vmatpush.bf16.msra.mxu0 %v962_v18  ;;  %1018 = vmatpush.bf16.msra.mxu1 %v962_v18 }
  0x37   : > { %1019 = vmatpush.bf16.msra.mxu2 %v962_v18  ;;  %1020 = vmatpush.bf16.msra.mxu3 %v962_v18 }
  0x3a   : > { %510 = vmatpush.bf16.msra.mxu0 %v961_v19  ;;  %1021 = vmatpush.bf16.msra.mxu1 %v961_v19 }
  0x3b   : > { %1022 = vmatpush.bf16.msra.mxu2 %v961_v19  ;;  %1023 = vmatpush.bf16.msra.mxu3 %v961_v19 }
  0x3e   : > { %511 = vmatpush.bf16.msra.mxu0 %v960_v20  ;;  %1024 = vmatpush.bf16.msra.mxu1 %v960_v20 }
  0x3f   : > { %1025 = vmatpush.bf16.msra.mxu2 %v960_v20  ;;  %1026 = vmatpush.bf16.msra.mxu3 %v960_v20 }
  0x42   : > { %512 = vmatpush.bf16.msra.mxu0 %v959_v21  ;;  %1027 = vmatpush.bf16.msra.mxu1 %v959_v21 }
  0x43   : > { %1028 = vmatpush.bf16.msra.mxu2 %v959_v21  ;;  %1029 = vmatpush.bf16.msra.mxu3 %v959_v21 }
  0x46   : > { %513 = vmatpush.bf16.msra.mxu0 %v958_v22  ;;  %1030 = vmatpush.bf16.msra.mxu1 %v958_v22 }
  0x47   : > { %1031 = vmatpush.bf16.msra.mxu2 %v958_v22  ;;  %1032 = vmatpush.bf16.msra.mxu3 %v958_v22 }
  0x4a   : > { %514 = vmatpush.bf16.msra.mxu0 %v957_v23  ;;  %1033 = vmatpush.bf16.msra.mxu1 %v957_v23 }
  0x4b   : > { %1034 = vmatpush.bf16.msra.mxu2 %v957_v23  ;;  %1035 = vmatpush.bf16.msra.mxu3 %v957_v23 }
  0x4d   : > { %515 = vmatmul.bf16.vlgmr.msra.gmra.mxu0 %v949_v24  ;;  %525 = vmatmul.bf16.vlgmr.msra.gmra.mxu1 %v951_v25 }
  0x4e   : > { %535 = vmatmul.bf16.vlgmr.msra.gmra.mxu2 %v953_v26  ;;  %545 = vmatmul.bf16.vlgmr.msra.gmra.mxu3 %v955_v27 }
  0x5d   : > { %520 = vmatmul.bf16.gmra.mxu0 %v950_v28  ;;  %530 = vmatmul.bf16.gmra.mxu1 %v952_v29 }
  0x5e   : > { %540 = vmatmul.bf16.gmra.mxu2 %v954_v30  ;;  %550 = vmatmul.bf16.gmra.mxu3 %v956_v31 }
  0xca   : > { %v516_v32 = vpop.f32.mrf.mxu0  ;;  %v526_v33 = vpop.f32.mrf.mxu1 }
  0xcb   : > { %v611_v39 = vadd.f32 %v1076_v34, %v516_v32  ;;  %v615_v40 = vadd.f32 %v1076_v34, %v526_v33 }
  0xd1   : > { %v536_v35 = vpop.f32.mrf.mxu2  ;;  %v546_v36 = vpop.f32.mrf.mxu3 }
  0xd2   : > { %v518_v37 = vpop.f32.mrf.mxu0  ;;  %v528_v38 = vpop.f32.mrf.mxu1  ;;  %v619_v47 = vadd.f32 %v1076_v34, %v536_v35  ;;  %v623_v48 = vadd.f32 %v1076_v34, %v546_v36 }
  0xd3   : > { %v612_v41 = vadd.f32 %v1076_v34, %v518_v37  ;;  %v616_v42 = vadd.f32 %v1076_v34, %v528_v38 }
  0xd5   : > { %v968_v43 = vpack.c.bf16 %v612_v41, %v611_v39  ;;  %v978_v44 = vpack.c.bf16 %v616_v42, %v615_v40 }
  0xd7   : > { %969 = vst [vmem:[%s1257_s11] sm:$0xff] %v968_v43  }
  0xd8   : > { %1006 = vst [vmem:[%s1257_s11 + $0x10] sm:$0xff] %v978_v44  }
  0xd9   : > { %v538_v45 = vpop.f32.mrf.mxu2  ;;  %v548_v46 = vpop.f32.mrf.mxu3 }
  0xda   : > { %v620_v49 = vadd.f32 %v1076_v34, %v538_v45  ;;  %v624_v50 = vadd.f32 %v1076_v34, %v548_v46  ;;  %v521_v51 = vpop.f32.mrf.mxu0  ;;  %v531_v52 = vpop.f32.mrf.mxu1 }
  0xdb   : > { %v613_v59 = vadd.f32 %v1076_v34, %v521_v51  ;;  %v617_v60 = vadd.f32 %v1076_v34, %v531_v52 }
  0xdc   : > { %v988_v53 = vpack.c.bf16 %v620_v49, %v619_v47  ;;  %v998_v54 = vpack.c.bf16 %v624_v50, %v623_v48 }
  0xde   : > { %1008 = vst [vmem:[%s1257_s11 + $0x20] sm:$0xff] %v988_v53   ;;  %v687_v9 = vld [vmem:[%s1257_s11] sm:$0xf] (%p1172_p6)  ;;  %v689_v10 = vld [vmem:[%s1257_s11 + $0x4] sm:$0xf] (%p1172_p6) }
  0xdf   : > { %1010 = vst [vmem:[%s1257_s11 + $0x30] sm:$0xff] %v998_v54   ;;  %v695_v13 = vld [vmem:[%s1257_s11 + $0x10] sm:$0xf] (%p1172_p6)  ;;  %v697_v14 = vld [vmem:[%s1257_s11 + $0x14] sm:$0xf] (%p1172_p6) }
  0xe0   : > { %688 = vst [vmem:[%s670_s12] sm:$0xf] (%p1172_p6), %v687_v9 }
  0xe1   : > { %v541_v55 = vpop.f32.mrf.mxu2  ;;  %v551_v56 = vpop.f32.mrf.mxu3  ;;  %690 = vst [vmem:[%s670_s12 + $0xc] sm:$0xf] (%p1172_p6), %v689_v10 }
  0xe2   : > { %v523_v57 = vpop.f32.mrf.mxu0  ;;  %v533_v58 = vpop.f32.mrf.mxu1  ;;  %v621_v3 = vadd.f32 %v1076_v34, %v541_v55  ;;  %v625_v4 = vadd.f32 %v1076_v34, %v551_v56  ;;  %696 = vst [vmem:[%s670_s12 + $0x30] sm:$0xf] (%p1172_p6), %v695_v13 }
  0xe3   : > { %v614_v61 = vadd.f32 %v1076_v34, %v523_v57  ;;  %v618_v62 = vadd.f32 %v1076_v34, %v533_v58  ;;  %698 = vst [vmem:[%s670_s12 + $0x3c] sm:$0xf] (%p1172_p6), %v697_v14 }
  0xe5   : > { %v973_v63 = vpack.c.bf16 %v614_v61, %v613_v59  ;;  %v983_v0 = vpack.c.bf16 %v618_v62, %v617_v60  ;;  %v703_v17 = vld [vmem:[%s1257_s11 + $0x20] sm:$0xf] (%p1172_p6)  ;;  %v705_v18 = vld [vmem:[%s1257_s11 + $0x24] sm:$0xf] (%p1172_p6) }
  0xe6   : > { %704 = vst [vmem:[%s670_s12 + $0x60] sm:$0xf] (%p1172_p6), %v703_v17  ;;  %v711_v21 = vld [vmem:[%s1257_s11 + $0x30] sm:$0xf] (%p1172_p6)  ;;  %v713_v22 = vld [vmem:[%s1257_s11 + $0x34] sm:$0xf] (%p1172_p6) }
  0xe7   : > { %1005 = vst [vmem:[%s1257_s11 + $0x8] sm:$0xff] %v973_v63  }
  0xe8   : > { %1007 = vst [vmem:[%s1257_s11 + $0x18] sm:$0xff] %v983_v0  }
  0xe9   : > { %v543_v1 = vpop.f32.mrf.mxu2  ;;  %v553_v2 = vpop.f32.mrf.mxu3  ;;  %706 = vst [vmem:[%s670_s12 + $0x6c] sm:$0xf] (%p1172_p6), %v705_v18 }
  0xea   : > { %v622_v5 = vadd.f32 %v1076_v34, %v543_v1  ;;  %v626_v6 = vadd.f32 %v1076_v34, %v553_v2  ;;  %712 = vst [vmem:[%s670_s12 + $0x90] sm:$0xf] (%p1172_p6), %v711_v21 }
  0xeb   : > { %665 = sbr.rel (!%p1172_p6) target bundleno = 250 (0xfa), region = 85  ;;  %714 = vst [vmem:[%s670_s12 + $0x9c] sm:$0xf] (%p1172_p6), %v713_v22 }
  0xec   : > { %v993_v7 = vpack.c.bf16 %v622_v5, %v621_v3  ;;  %v1003_v8 = vpack.c.bf16 %v626_v6, %v625_v4 }
  0xee   : > { %1009 = vst [vmem:[%s1257_s11 + $0x28] sm:$0xff] %v993_v7   ;;  %v691_v11 = vld [vmem:[%s1257_s11 + $0x8] sm:$0xf] (%p1172_p6)  ;;  %v693_v12 = vld [vmem:[%s1257_s11 + $0xc] sm:$0xf] (%p1172_p6) }
  0xef   : > { %1011 = vst [vmem:[%s1257_s11 + $0x38] sm:$0xff] %v1003_v8   ;;  %v699_v15 = vld [vmem:[%s1257_s11 + $0x18] sm:$0xf] (%p1172_p6)  ;;  %v701_v16 = vld [vmem:[%s1257_s11 + $0x1c] sm:$0xf] (%p1172_p6) }
  0xf0   : > { %692 = vst [vmem:[%s670_s12 + $0x18] sm:$0xf] %v691_v11 }
  0xf1   : > { %694 = vst [vmem:[%s670_s12 + $0x24] sm:$0xf] %v693_v12 }
  0xf2   : > { %700 = vst [vmem:[%s670_s12 + $0x48] sm:$0xf] %v699_v15 }
  0xf3   : > { %702 = vst [vmem:[%s670_s12 + $0x54] sm:$0xf] %v701_v16 }
  0xf5   : > { %v707_v19 = vld [vmem:[%s1257_s11 + $0x28] sm:$0xf]  ;;  %v709_v20 = vld [vmem:[%s1257_s11 + $0x2c] sm:$0xf] }
  0xf6   : > { %708 = vst [vmem:[%s670_s12 + $0x78] sm:$0xf] %v707_v19  ;;  %v715_v23 = vld [vmem:[%s1257_s11 + $0x38] sm:$0xf]  ;;  %v717_v24 = vld [vmem:[%s1257_s11 + $0x3c] sm:$0xf] }
  0xf7   : > { %710 = vst [vmem:[%s670_s12 + $0x84] sm:$0xf] %v709_v20 }
  0xf8   : > { %716 = vst [vmem:[%s670_s12 + $0xa8] sm:$0xf] %v715_v23 }
  0xf9   : > { %718 = vst [vmem:[%s670_s12 + $0xb4] sm:$0xf] %v717_v24 }
  0xfa PF: > { %s13_s16 = sadd.s32 1, %s1115_s16   ;;  %s1309_s12 = smov %s1103_s13 }
  0xfb   : > { %p10_p12 = scmp.ge.s32.totalorder %s13_s16, 5   ;;  %s1310_s13 = smov %s1177_s22 }
  0xfc   : > { %s1311_s14 = smov %s1111_s15  ;;  %s1312_s15 = smov %s1314_s17 }
  0xfd   :  { %12 = sbr.rel (!%p10_p12) target bundleno = 3 (0x3), region = 163 }

// kernel: _lambda_.67
= control target key start
LH: loop header
LB: loop body
LE: loop exit
PB: predicated region body
PF: predicated region fallthrough
CT: control target
= control target key end

     0   :  { %s1219_s12 = smov 0   ;;  %s1221_s13 = smov 0   ;;  %s1412_s0 = inlined_call_operand.vmem [shape: bf16[2,64,128], index: 0, kind: input, shape index: {}]   ;;  %s1413_s1 = inlined_call_operand.vmem [shape: bf16[2,64,128], index: 1, kind: input, shape index: {}]   ;;  %s1414_s2 = inlined_call_operand.vmem [shape: bf16[2,64,128], index: 2, kind: input, shape index: {}]   ;;  %s1415_s3 = inlined_call_operand.vmem [shape: bf16[2,64,128], index: 3, kind: output, shape index: {}]  }
   0x1   :  { %s1223_s14 = smov 0  }
   0x2 LB: > { %s32_s15 = sadd.s32 1, %s1190_s13  ;;  %p984_p0 = scmp.ge.s32.totalorder %s1194_s14, 1  ;;  %s1194_s14 = sphi %s1223_s14, %s13_s14   ;;  %s1190_s13 = sphi %s1221_s13, %s1417_s13   ;;  %s1186_s12 = sphi %s1219_s12, %s1416_s12  }
   0x3   : > { %p34_p1 = scmp.ge.s32.totalorder %s32_s15, 2  ;;  %p199_p2 = scmp.lt.s32.totalorder %s1194_s14, 3 }
   0x5   : > { %s1419_s15 = smov (%p34_p1, %s32_s15), 0  ;;  %p200_p3 = pnand %p984_p0, %p199_p2 }
   0x6   : > { %p250_p4 = scmp.lt.s32.totalorder (!%p200_p3), %s1186_s12, 1 }
   0x7   : > { %203 = sbr.rel (%p200_p3) target bundleno = 720 (0x2d0), region = 32 }
   0xc   : > { %s1421_s12 = smov (!%p250_p4, %s1186_s12), 1  ;;  %vm436_vm0 = vcmask 523264   ;;  %vm294_vm1 = vcmask 7168   ;;  %v1196_v11 = vmov -inf   ;;  %v1197_v33 = vmov 0  }
   0xd   : > { %s1237_s16 = sshll.u32 %s1421_s12, 5  ;;  %299 = vst.msk [vmem:[#allocation2 + $0x20] sm:$0xff] %vm294_vm1, %v1196_v11  ;;  %1123 = vset.pattern.permute.xlu1 %v1197_v33  ;;  %1121 = vset.pattern.permute.xlu2 %v1197_v33  ;;  %v1198_v34 = vmov 0.0  }
   0xe   : > { %s267_s19 = scalar_lea.vmem %s1413_s1, %s1237_s16  ;;  %s257_s22 = scalar_lea.vmem %s1412_s0, %s1237_s16  ;;  %295 = vst.msk [vmem:[#allocation2] sm:$0xff] %vm294_vm1, %v1196_v11  ;;  %1122 = vset.pattern.permute.xlu0 %v1197_v33 }
   0xf   : > { %v1058_v0 = vld [vmem:[%s267_s19 + $0x18] sm:$0xff]  ;;  %v1057_v1 = vld [vmem:[%s267_s19 + $0x10] sm:$0xff]  ;;  %v1056_v2 = vld [vmem:[%s267_s19 + $0x8] sm:$0xff]  ;;  %296 = vst.msk [vmem:[#allocation2 + $0x8] sm:$0xff] %vm294_vm1, %v1196_v11  ;;  %s277_s25 = scalar_lea.vmem %s1414_s2, %s1237_s16  ;;  %s1392_s28 = scalar_lea.vmem %s1415_s3, %s1237_s16 }
  0x10   : > { %395 = vmatpush.bf16.xpose.msra.mxu0 %v1058_v0  ;;  %1086 = vmatpush.bf16.xpose.msra.mxu2 %v1058_v0  ;;  %v1055_v3 = vld [vmem:[%s267_s19] sm:$0xff]  ;;  %v1053_v5 = vld [vmem:[%s257_s22 + $0x10] sm:$0xff]  ;;  %v1052_v6 = vld [vmem:[%s257_s22 + $0x8] sm:$0xff]  ;;  %297 = vst.msk [vmem:[#allocation2 + $0x10] sm:$0xff] %vm294_vm1, %v1196_v11 }
  0x11   : > { %v1051_v4 = vld [vmem:[%s257_s22] sm:$0xff]  ;;  %v1054_v7 = vld [vmem:[%s257_s22 + $0x18] sm:$0xff]  ;;  %298 = vst.msk [vmem:[#allocation2 + $0x18] sm:$0xff] %vm294_vm1, %v1196_v11 }
  0x12   : > { %300 = vst.msk [vmem:[#allocation2 + $0x28] sm:$0xff] %vm294_vm1, %v1196_v11 }
  0x13   : > { %301 = vst.msk [vmem:[#allocation2 + $0x30] sm:$0xff] %vm294_vm1, %v1196_v11 }
  0x14   : > { %302 = vst.msk [vmem:[#allocation2 + $0x38] sm:$0xff] %vm294_vm1, %v1196_v11  ;;  %v432_v38 = vld [vmem:[#allocation2 + $0x20] sm:$0xff] }
  0x15   : > { %308 = vst.msk [vmem:[#allocation3 + $0x28] sm:$0xff] %vm294_vm1, %v1198_v34  ;;  %v428_v35 = vld [vmem:[#allocation2] sm:$0xff] }
  0x16   : > { %303 = vst.msk [vmem:[#allocation3] sm:$0xff] %vm294_vm1, %v1198_v34  ;;  %v429_v41 = vld [vmem:[#allocation2 + $0x8] sm:$0xff] }
  0x17   : > { %304 = vst.msk [vmem:[#allocation3 + $0x8] sm:$0xff] %vm294_vm1, %v1198_v34  ;;  %v430_v43 = vld [vmem:[#allocation2 + $0x10] sm:$0xff] }
  0x18   : > { %396 = vmatpush.bf16.xpose.msra.mxu0 %v1057_v1  ;;  %1087 = vmatpush.bf16.xpose.msra.mxu2 %v1057_v1  ;;  %305 = vst.msk [vmem:[#allocation3 + $0x10] sm:$0xff] %vm294_vm1, %v1198_v34  ;;  %v431_v53 = vld [vmem:[#allocation2 + $0x18] sm:$0xff] }
  0x19   : > { %306 = vst.msk [vmem:[#allocation3 + $0x18] sm:$0xff] %vm294_vm1, %v1198_v34  ;;  %v433_v49 = vld [vmem:[#allocation2 + $0x28] sm:$0xff] }
  0x1a   : > { %307 = vst.msk [vmem:[#allocation3 + $0x20] sm:$0xff] %vm294_vm1, %v1198_v34  ;;  %v434_v48 = vld [vmem:[#allocation2 + $0x30] sm:$0xff] }
  0x1b   : > { %309 = vst.msk [vmem:[#allocation3 + $0x30] sm:$0xff] %vm294_vm1, %v1198_v34  ;;  %v1302_v59 = vld [vmem:[#allocation2 + $0x38] sm:$0xff] }
  0x1c   : > { %310 = vst.msk [vmem:[#allocation3 + $0x38] sm:$0xff] %vm294_vm1, %v1198_v34 }
  0x20   : > { %397 = vmatpush.bf16.xpose.msra.mxu0 %v1056_v2  ;;  %1088 = vmatpush.bf16.xpose.msra.mxu2 %v1056_v2 }
  0x28   : > { %398 = vmatpush.bf16.xpose.msra.mxu0 %v1055_v3  ;;  %1089 = vmatpush.bf16.xpose.msra.mxu2 %v1055_v3 }
  0x2f   : > { %399 = vmatmul.bf16.vlgmr.msra.gmra.mxu0 %v1051_v4  ;;  %409 = vmatmul.bf16.vlgmr.msra.gmra.mxu2 %v1053_v5 }
  0x3f   : > { %404 = vmatmul.bf16.gmra.mxu0 %v1052_v6  ;;  %414 = vmatmul.bf16.gmra.mxu2 %v1054_v7 }
  0xac   : > { %v400_v8 = vpop.f32.mrf.mxu0 }
  0xad   : > { %v1247_v9 = vmul.f32 0.125, %v400_v8 }
  0xaf   : > { %v437_v10 = vsel %vm436_vm0, %v1247_v9, -inf }
  0xb0   : > { %438 = vmax.xlane.f32.xlu0 %v437_v10 }
  0xb2   : > { %v410_v12 = vpop.f32.mrf.mxu2 }
  0xb3   : > { %v1255_v13 = vmul.f32 0.125, %v410_v12 }
  0xb4   : > { %v402_v14 = vpop.f32.mrf.mxu0 }
  0xb5   : > { %v449_v15 = vsel %vm436_vm0, %v1255_v13, -inf  ;;  %v1263_v16 = vmul.f32 0.125, %v402_v14 }
  0xb6   : > { %450 = vmax.xlane.f32.xlu1 %v449_v15 }
  0xb7   : > { %v440_v20 = vsel %vm436_vm0, %v1263_v16, -inf }
  0xba   : > { %v412_v17 = vpop.f32.mrf.mxu2 }
  0xbb   : > { %v1271_v22 = vmul.f32 0.125, %v412_v17 }
  0xbc   : > { %v405_v18 = vpop.f32.mrf.mxu0 }
  0xbd   : > { %v1265_v19 = vmul.f32 0.125, %v405_v18  ;;  %v452_v28 = vsel %vm436_vm0, %v1271_v22, -inf }
  0xbe   : > { %441 = vmax.xlane.f32.xlu1 %v440_v20 }
  0xbf   : > { %v443_v21 = vsel %vm436_vm0, %v1265_v19, -inf }
  0xc0   : > { %444 = vmax.xlane.f32.xlu0 %v443_v21  ;;  %v1062_v21 = vld [vmem:[%s277_s25 + $0x18] sm:$0xff] }
  0xc1   : > { %1090 = vmatpush.bf16.msra.mxu3 %v1062_v21  ;;  %714 = vmatpush.bf16.msra.mxu1 %v1062_v21 }
  0xc2   : > { %v415_v23 = vpop.f32.mrf.mxu2 }
  0xc3   : > { %v1273_v24 = vmul.f32 0.125, %v415_v23 }
  0xc4   : > { %v407_v25 = vpop.f32.mrf.mxu0 }
  0xc5   : > { %v1275_v26 = vmul.f32 0.125, %v407_v25  ;;  %v455_v27 = vsel %vm436_vm0, %v1273_v24, -inf  ;;  %v1061_v25 = vld [vmem:[%s277_s25 + $0x10] sm:$0xff] }
  0xc6   : > { %456 = vmax.xlane.f32.xlu2 %v455_v27  ;;  %453 = vmax.xlane.f32.xlu1 %v452_v28  ;;  %v1060_v27 = vld [vmem:[%s277_s25 + $0x8] sm:$0xff] }
  0xc7   : > { %v446_v29 = vsel %vm436_vm0, %v1275_v26, -inf  ;;  %1091 = vmatpush.bf16.msra.mxu3 %v1061_v25  ;;  %715 = vmatpush.bf16.msra.mxu1 %v1061_v25 }
  0xc8   : > { %447 = vmax.xlane.f32.xlu0 %v446_v29 }
  0xca   : > { %v417_v30 = vpop.f32.mrf.mxu2 }
  0xcb   : > { %v1283_v31 = vmul.f32 0.125, %v417_v30  ;;  %1092 = vmatpush.bf16.msra.mxu3 %v1060_v27  ;;  %716 = vmatpush.bf16.msra.mxu1 %v1060_v27  ;;  %v1059_v30 = vld [vmem:[%s277_s25] sm:$0xff] }
  0xcd   : > { %v458_v32 = vsel %vm436_vm0, %v1283_v31, -inf }
  0xce   : > { %459 = vmax.xlane.f32.xlu2 %v458_v32 }
  0xcf   : > { %1093 = vmatpush.bf16.msra.mxu3 %v1059_v30  ;;  %717 = vmatpush.bf16.msra.mxu1 %v1059_v30  ;;  %v557_v30 = vld [vmem:[#allocation3] sm:$0xff] }
 0x123   : > { %v439_v36 = vpop.xlane.xlu0 %438 }
 0x124   : > { %v461_v37 = vmax.f32 %v428_v35, %v439_v36 }
 0x126   : > { %755 = vst.msk [vmem:[#allocation2] sm:$0xff] %vm294_vm1, %v461_v37  ;;  %v469_v1 = vsub.f32 %v428_v35, %v461_v37 }
 0x128   : > { %v477_v3 = vmul.f32 1.442695, %v469_v1 }
 0x129   : > { %v451_v39 = vpop.xlane.xlu1 %450 }
 0x12a   : > { %v465_v40 = vmax.f32 %v432_v38, %v451_v39 }
 0x12c   : > { %759 = vst.msk [vmem:[#allocation2 + $0x20] sm:$0xff] %vm294_vm1, %v465_v40  ;;  %515 = vperm.xlu1 %1123, %v465_v40   ;;  %v473_v58 = vsub.f32 %v432_v38, %v465_v40 }
 0x12e   : > { %v485_v63 = vmul.f32 1.442695, %v473_v58 }
 0x131   : > { %v442_v42 = vpop.xlane.xlu1 %441 }
 0x132   : > { %v462_v44 = vmax.f32 %v429_v41, %v442_v42 }
 0x133   : > { %v445_v45 = vpop.xlane.xlu0 %444 }
 0x134   : > { %756 = vst.msk [vmem:[#allocation2 + $0x8] sm:$0xff] %vm294_vm1, %v462_v44  ;;  %v463_v46 = vmax.f32 %v430_v43, %v445_v45  ;;  %v470_v2 = vsub.f32 %v429_v41, %v462_v44 }
 0x136   : > { %v471_v47 = vsub.f32 %v430_v43, %v463_v46  ;;  %757 = vst.msk [vmem:[#allocation2 + $0x10] sm:$0xff] %vm294_vm1, %v463_v46  ;;  %505 = vperm.xlu2 %1121, %v463_v46   ;;  %v479_v4 = vmul.f32 1.442695, %v470_v2 }
 0x138   : > { %v481_v50 = vmul.f32 1.442695, %v471_v47 }
 0x139   : > { %v457_v51 = vpop.xlane.xlu2 %456  ;;  %v454_v52 = vpop.xlane.xlu1 %453 }
 0x13a   : > { %v467_v54 = vmax.f32 %v434_v48, %v457_v51  ;;  %v466_v55 = vmax.f32 %v433_v49, %v454_v52  ;;  %1124 = vpow2.f32 %v481_v50 }
 0x13b   : > { %v448_v56 = vpop.xlane.xlu0 %447  ;;  %1126 = vpow2.f32 %v485_v63 }
 0x13c   : > { %761 = vst.msk [vmem:[#allocation2 + $0x30] sm:$0xff] %vm294_vm1, %v467_v54  ;;  %v464_v57 = vmax.f32 %v431_v53, %v448_v56  ;;  %1128 = vpow2.f32 %v477_v3  ;;  %v475_v6 = vsub.f32 %v434_v48, %v467_v54  ;;  %v474_v7 = vsub.f32 %v433_v49, %v466_v55 }
 0x13d   : > { %760 = vst.msk [vmem:[#allocation2 + $0x28] sm:$0xff] %vm294_vm1, %v466_v55  ;;  %1130 = vpow2.f32 %v479_v4 }
 0x13e   : > { %758 = vst.msk [vmem:[#allocation2 + $0x18] sm:$0xff] %vm294_vm1, %v464_v57  ;;  %520 = vperm.xlu2 %1121, %v466_v55   ;;  %510 = vperm.xlu0 %1122, %v464_v57   ;;  %v489_v8 = vmul.f32 1.442695, %v475_v6  ;;  %v487_v11 = vmul.f32 1.442695, %v474_v7  ;;  %v472_v14 = vsub.f32 %v431_v53, %v464_v57 }
 0x140   : > { %v1307_v62 = vpop.eup %1124  ;;  %1132 = vpow2.f32 %v489_v8  ;;  %v483_v15 = vmul.f32 1.442695, %v472_v14 }
 0x141   : > { %v460_v60 = vpop.xlane.xlu2 %459  ;;  %v1315_v5 = vpop.eup %1126  ;;  %1134 = vpow2.f32 %v487_v11 }
 0x142   : > { %v1305_v61 = vmax.f32 %v1302_v59, %v460_v60  ;;  %v1318_v10 = vpop.eup %1128  ;;  %1136 = vpow2.f32 %v483_v15 }
 0x143   : > { %v1321_v12 = vpop.eup %1130 }
 0x144   : > { %v476_v0 = vsub.f32 %v1302_v59, %v1305_v61  ;;  %762 = vst.msk [vmem:[#allocation2 + $0x38] sm:$0xff] %vm294_vm1, %v1305_v61  ;;  %530 = vperm.xlu1 %1123, %v1305_v61   ;;  %v562_v61 = vld [vmem:[#allocation3 + $0x28] sm:$0xff] }
 0x146   : > { %525 = vperm.xlu2 %1121, %v467_v54   ;;  %634 = vperm.xlu0 %1122, %v1307_v62   ;;  %v1324_v17 = vpop.eup %1132 }
 0x147   : > { %v1327_v18 = vpop.eup %1134 }
 0x148   : > { %v1330_v20 = vpop.eup %1136  ;;  %v570_v14 = vmul.f32 %v1327_v18, %v562_v61 }
 0x14c   : > { %500 = vperm.xlu1 %1123, %v462_v44  }
 0x14e   : > { %495 = vperm.xlu2 %1121, %v461_v37   ;;  %644 = vperm.xlu0 %1122, %v1315_v5  }
 0x154   : > { %624 = vperm.xlu1 %1123, %v1318_v10  }
 0x156   : > { %629 = vperm.xlu2 %1121, %v1321_v12  }
 0x15c   : > { %654 = vperm.xlu1 %1123, %v1324_v17  }
 0x15e   : > { %649 = vperm.xlu2 %1121, %v1327_v18  }
 0x164   : > { %639 = vperm.xlu1 %1123, %v1330_v20  }
 0x190   : > { %v506_v23 = vpop.permute.xlu2 %505 }
 0x191   : > { %v535_v32 = vsub.f32 %v1265_v19, %v506_v23  ;;  %v559_v23 = vld [vmem:[#allocation3 + $0x10] sm:$0xff] }
 0x192   : > { %v567_v25 = vmul.f32 %v1307_v62, %v559_v23 }
 0x193   : > { %v545_v34 = vmul.f32 1.442695, %v535_v32  ;;  %v565_v32 = vmul.f32 %v1318_v10, %v557_v30  ;;  %v564_v10 = vld [vmem:[#allocation3 + $0x38] sm:$0xff] }
 0x198   : > { %v521_v28 = vpop.permute.xlu2 %520 }
 0x199   : > { %v538_v29 = vsub.f32 %v1271_v22, %v521_v28 }
 0x19b   : > { %v551_v33 = vmul.f32 1.442695, %v538_v29 }
 0x19d   : > { %1138 = vpow2.f32 %v551_v33 }
 0x19e   : > { %1140 = vpow2.f32 %v545_v34  ;;  %v516_v38 = vpop.permute.xlu1 %515 }
 0x19f   : > { %v537_v22 = vsub.f32 %v1255_v13, %v516_v38 }
 0x1a0   : > { %v526_v35 = vpop.permute.xlu2 %525 }
 0x1a1   : > { %v549_v43 = vmul.f32 1.442695, %v537_v22  ;;  %v539_v56 = vsub.f32 %v1273_v24, %v526_v35 }
 0x1a3   : > { %v1139_v36 = vpop.eup %1138  ;;  %v553_v58 = vmul.f32 1.442695, %v539_v56 }
 0x1a4   : > { %v588_v37 = vsel %vm436_vm0, %v1139_v36, 0.0  ;;  %v1141_v40 = vpop.eup %1140 }
 0x1a5   : > { %589 = vadd.xlane.f32.xlu1 %v588_v37  ;;  %v579_v19 = vsel %vm436_vm0, %v1141_v40, 0.0 }
 0x1a8   : > { %v496_v39 = vpop.permute.xlu2 %495 }
 0x1a9   : > { %v533_v41 = vsub.f32 %v1247_v9, %v496_v39 }
 0x1ab   : > { %v541_v42 = vmul.f32 1.442695, %v533_v41 }
 0x1ad   : > { %1142 = vpow2.f32 %v541_v42  ;;  %580 = vadd.xlane.f32.xlu1 %v579_v19 }
 0x1ae   : > { %1144 = vpow2.f32 %v549_v43 }
 0x1b0   : > { %v511_v44 = vpop.permute.xlu0 %510  ;;  %v1376_v18 = vpop.permute.xlu2 %629 }
 0x1b1   : > { %v536_v45 = vsub.f32 %v1275_v26, %v511_v44 }
 0x1b3   : > { %v1143_v46 = vpop.eup %1142  ;;  %v547_v47 = vmul.f32 1.442695, %v536_v45 }
 0x1b4   : > { %v573_v48 = vsel %vm436_vm0, %v1143_v46, 0.0  ;;  %v1145_v13 = vpop.eup %1144 }
 0x1b5   : > { %1146 = vpow2.f32 %v547_v47  ;;  %574 = vadd.xlane.f32.xlu0 %v573_v48  ;;  %v585_v52 = vsel %vm436_vm0, %v1145_v13, 0.0  ;;  %v672_v2 = vpack.c.bf16 %v1139_v36, %v1145_v13  ;;  %v561_v36 = vld [vmem:[#allocation3 + $0x20] sm:$0xff]  ;;  %v563_v13 = vld [vmem:[#allocation3 + $0x30] sm:$0xff] }
 0x1b6   : > { %v531_v49 = vpop.permute.xlu1 %530  ;;  %v569_v62 = vmul.f32 %v1315_v5, %v561_v36  ;;  %v558_v5 = vld [vmem:[#allocation3 + $0x8] sm:$0xff] }
 0x1b7   : > { %v540_v9 = vsub.f32 %v1283_v31, %v531_v49  ;;  %v566_v47 = vmul.f32 %v1321_v12, %v558_v5 }
 0x1b8   : > { %v650_v22 = vpop.permute.xlu2 %649 }
 0x1b9   : > { %v555_v50 = vmul.f32 1.442695, %v540_v9 }
 0x1bb   : > { %v1147_v51 = vpop.eup %1146  ;;  %1148 = vpow2.f32 %v555_v50  ;;  %v571_v50 = vmul.f32 %v1324_v17, %v563_v13 }
 0x1bc   : > { %v671_v53 = vpack.c.bf16 %v1147_v51, %v1141_v40  ;;  %v582_v6 = vsel %vm436_vm0, %v1147_v51, 0.0 }
 0x1bd   : > { %586 = vadd.xlane.f32.xlu0 %v585_v52 }
 0x1be   : > { %v501_v54 = vpop.permute.xlu1 %500  ;;  %1042 = vmatmul.msk.bf16.vlgmr.msra.gmra.mxu3 %vm436_vm0, %v671_v53 }
 0x1bf   : > { %v534_v26 = vsub.f32 %v1263_v16, %v501_v54  ;;  %v491_v16 = vmul.f32 1.442695, %v476_v0  ;;  %v1366_v0 = vpop.permute.xlu0 %634  ;;  %v560_v54 = vld [vmem:[#allocation3 + $0x18] sm:$0xff] }
 0x1c1   : > { %v1149_v55 = vpop.eup %1148  ;;  %v543_v57 = vmul.f32 1.442695, %v534_v26  ;;  %v568_v26 = vmul.f32 %v1330_v20, %v560_v54 }
 0x1c2   : > { %v594_v31 = vsel %vm436_vm0, %v1149_v55, 0.0 }
 0x1c3   : > { %1150 = vpow2.f32 %v543_v57 }
 0x1c4   : > { %1152 = vpow2.f32 %v553_v58 }
 0x1c5   : > { %595 = vadd.xlane.f32.xlu0 %v594_v31  ;;  %1154 = vpow2.f32 %v491_v16 }
 0x1c6   : > { %v1360_v8 = vpop.permute.xlu1 %624 }
 0x1c7   : > { %v1371_v27 = vpop.permute.xlu0 %644 }
 0x1c9   : > { %v1151_v60 = vpop.eup %1150 }
 0x1ca   : > { %v576_v63 = vsel %vm436_vm0, %v1151_v60, 0.0  ;;  %v670_v1 = vpack.c.bf16 %v1151_v60, %v1143_v46  ;;  %v1153_v24 = vpop.eup %1152 }
 0x1cb   : > { %577 = vadd.xlane.f32.xlu2 %v576_v63  ;;  %v591_v3 = vsel %vm436_vm0, %v1153_v24, 0.0  ;;  %v1155_v4 = vpop.eup %1154  ;;  %v673_v7 = vpack.c.bf16 %v1149_v55, %v1153_v24 }
 0x1cc   : > { %1041 = vmatmul.msk.bf16.vlgmr.msra.gmra.mxu1 %vm436_vm0, %v670_v1  ;;  %v572_v42 = vmul.f32 %v1155_v4, %v564_v10 }
 0x1ce   : > { %1043 = vmatmul.msk.bf16.gmra.mxu3 %vm436_vm0, %v672_v2  ;;  %v1362_v11 = vpop.permute.xlu1 %654 }
 0x1d3   : > { %592 = vadd.xlane.f32.xlu2 %v591_v3 }
 0x1d6   : > { %v1364_v59 = vpop.permute.xlu1 %639 }
 0x1d7   : > { %v665_v30 = vmul.f32 0.0, %v1364_v59 }
 0x1d9   : > { %659 = vperm.xlu0 %1122, %v1155_v4   ;;  %v667_v4 = vmul.f32 0.0, %v650_v22 }
 0x1db   : > { %583 = vadd.xlane.f32.xlu2 %v582_v6  ;;  %v666_v6 = vmul.f32 0.0, %v1371_v27 }
 0x1de   : > { %1044 = vmatmul.msk.bf16.gmra.mxu3 %vm436_vm0, %v673_v7 }
 0x218   : > { %v590_v15 = vpop.xlane.xlu1 %589 }
 0x219   : > { %v602_v21 = vadd.f32 %v590_v15, %v570_v14 }
 0x21b   : > { %611 = vst.msk [vmem:[#allocation3 + $0x28] sm:$0xff] %vm294_vm1, %v602_v21 }
 0x220   : > { %v581_v28 = vpop.xlane.xlu1 %580 }
 0x221   : > { %v599_v29 = vadd.f32 %v581_v28, %v567_v25 }
 0x222   : > { %v779_v37 = vld [vmem:[#allocation3 + $0x28] sm:$0xff] }
 0x223   : > { %608 = vst.msk [vmem:[#allocation3 + $0x10] sm:$0xff] %vm294_vm1, %v599_v29  ;;  %v664_v29 = vmul.f32 0.0, %v1366_v0 }
 0x228   : > { %v575_v33 = vpop.xlane.xlu0 %574 }
 0x229   : > { %v597_v34 = vadd.f32 %v575_v33, %v565_v32 }
 0x22a   : > { %v776_v35 = vld [vmem:[#allocation3 + $0x10] sm:$0xff] }
 0x22b   : > { %606 = vst.msk [vmem:[#allocation3] sm:$0xff] %vm294_vm1, %v597_v34  ;;  %1156 = vrcp.f32 %v776_v35 }
 0x22c   : > { %1158 = vrcp.f32 %v779_v37 }
 0x230   : > { %v587_v38 = vpop.xlane.xlu0 %586 }
 0x231   : > { %v1157_v39 = vpop.eup %1156  ;;  %v601_v40 = vadd.f32 %v587_v38, %v569_v62 }
 0x232   : > { %802 = vperm.xlu0 %1122, %v1157_v39   ;;  %v774_v41 = vld [vmem:[#allocation3] sm:$0xff]  ;;  %v1159_v19 = vpop.eup %1158  ;;  %v663_v39 = vmul.f32 0.0, %v1376_v18 }
 0x233   : > { %610 = vst.msk [vmem:[#allocation3 + $0x20] sm:$0xff] %vm294_vm1, %v601_v40  ;;  %1160 = vrcp.f32 %v774_v41  ;;  %v662_v40 = vmul.f32 0.0, %v1360_v8 }
 0x238   : > { %v596_v43 = vpop.xlane.xlu0 %595 }
 0x239   : > { %v1161_v44 = vpop.eup %1160  ;;  %v604_v45 = vadd.f32 %v596_v43, %v572_v42  ;;  %v668_v43 = vmul.f32 0.0, %v1362_v11 }
 0x23a   : > { %792 = vperm.xlu2 %1121, %v1161_v44   ;;  %817 = vperm.xlu0 %1122, %v1159_v19   ;;  %v778_v46 = vld [vmem:[#allocation3 + $0x20] sm:$0xff] }
 0x23b   : > { %613 = vst.msk [vmem:[#allocation3 + $0x38] sm:$0xff] %vm294_vm1, %v604_v45  ;;  %1162 = vrcp.f32 %v778_v46 }
 0x23e   : > { %v578_v48 = vpop.xlane.xlu2 %577 }
 0x23f   : > { %v598_v49 = vadd.f32 %v578_v48, %v566_v47 }
 0x241   : > { %v1163_v9 = vpop.eup %1162  ;;  %607 = vst.msk [vmem:[#allocation3 + $0x8] sm:$0xff] %vm294_vm1, %v598_v49  ;;  %v724_v1 = vpop.f32.mrf.mxu3 }
 0x242   : > { %812 = vperm.xlu1 %1123, %v1163_v9   ;;  %v781_v12 = vld [vmem:[#allocation3 + $0x38] sm:$0xff]  ;;  %v741_v32 = vadd.f32 %v724_v1, %v664_v29 }
 0x246   : > { %v593_v51 = vpop.xlane.xlu2 %592 }
 0x247   : > { %v603_v52 = vadd.f32 %v593_v51, %v571_v50 }
 0x248   : > { %v775_v53 = vld [vmem:[#allocation3 + $0x8] sm:$0xff] }
 0x249   : > { %612 = vst.msk [vmem:[#allocation3 + $0x30] sm:$0xff] %vm294_vm1, %v603_v52  ;;  %1164 = vrcp.f32 %v775_v53  ;;  %v726_v20 = vpop.f32.mrf.mxu3  ;;  %v719_v21 = vpop.f32.mrf.mxu1 }
 0x24a   : > { %1166 = vrcp.f32 %v781_v12  ;;  %v742_v33 = vadd.f32 %v726_v20, %v665_v30  ;;  %v739_v41 = vadd.f32 %v719_v21, %v662_v40 }
 0x24b   : > { %v660_v2 = vpop.permute.xlu0 %659 }
 0x24c   : > { %v669_v44 = vmul.f32 0.0, %v660_v2 }
 0x24e   : > { %v584_v55 = vpop.xlane.xlu2 %583 }
 0x24f   : > { %v1165_v56 = vpop.eup %1164  ;;  %v600_v57 = vadd.f32 %v584_v55, %v568_v26 }
 0x250   : > { %797 = vperm.xlu1 %1123, %v1165_v56   ;;  %v1167_v31 = vpop.eup %1166  ;;  %v780_v58 = vld [vmem:[#allocation3 + $0x30] sm:$0xff] }
 0x251   : > { %609 = vst.msk [vmem:[#allocation3 + $0x18] sm:$0xff] %vm294_vm1, %v600_v57  ;;  %v729_v16 = vpop.f32.mrf.mxu3  ;;  %v721_v38 = vpop.f32.mrf.mxu1 }
 0x252   : > { %v743_v14 = vadd.f32 %v729_v16, %v666_v6  ;;  %v740_v0 = vadd.f32 %v721_v38, %v663_v39 }
 0x258   : > { %827 = vperm.xlu1 %1123, %v1167_v31   ;;  %v777_v17 = vld [vmem:[#allocation3 + $0x18] sm:$0xff] }
 0x259   : > { %1168 = vrcp.f32 %v777_v17  ;;  %v731_v3 = vpop.f32.mrf.mxu3 }
 0x25a   : > { %1170 = vrcp.f32 %v780_v58  ;;  %v744_v15 = vadd.f32 %v731_v3, %v667_v4 }
 0x25f   : > { %v1169_v60 = vpop.eup %1168 }
 0x260   : > { %807 = vperm.xlu2 %1121, %v1169_v60   ;;  %v1171_v63 = vpop.eup %1170 }
 0x261   : > { %v734_v62 = vpop.f32.mrf.mxu3 }
 0x262   : > { %v745_v5 = vadd.f32 %v734_v62, %v668_v43 }
 0x268   : > { %822 = vperm.xlu2 %1121, %v1171_v63  }
 0x269   : > { %v736_v19 = vpop.f32.mrf.mxu3 }
 0x26a   : > { %v746_v46 = vadd.f32 %v736_v19, %v669_v44 }
 0x294   : > { %v793_v7 = vpop.permute.xlu2 %792 }
 0x295   : > { %v830_v10 = vmul.f32 %v793_v7, %v739_v41 }
 0x2a4   : > { %v803_v24 = vpop.permute.xlu0 %802 }
 0x2a5   : > { %v832_v35 = vmul.f32 %v803_v24, %v741_v32 }
 0x2ac   : > { %v818_v61 = vpop.permute.xlu0 %817 }
 0x2ad   : > { %v835_v25 = vmul.f32 %v818_v61, %v744_v15 }
 0x2b4   : > { %v813_v23 = vpop.permute.xlu1 %812 }
 0x2b5   : > { %v834_v28 = vmul.f32 %v813_v23, %v743_v14 }
 0x2b7   : > { %v1076_v27 = vpack.c.bf16 %v835_v25, %v834_v28 }
 0x2b9   : > { %1084 = vst [vmem:[%s1392_s28 + $0x10] sm:$0xff] %v1076_v27  }
 0x2ba   : > { %v808_v34 = vpop.permute.xlu2 %807 }
 0x2bb   : > { %v833_v36 = vmul.f32 %v808_v34, %v742_v33 }
 0x2bd   : > { %v1071_v37 = vpack.c.bf16 %v833_v36, %v832_v35 }
 0x2bf   : > { %1083 = vst [vmem:[%s1392_s28 + $0x8] sm:$0xff] %v1071_v37  }
 0x2c2   : > { %v798_v59 = vpop.permute.xlu1 %797  ;;  %v823_v45 = vpop.permute.xlu2 %822 }
 0x2c3   : > { %v831_v22 = vmul.f32 %v798_v59, %v740_v0  ;;  %v836_v18 = vmul.f32 %v823_v45, %v745_v5 }
 0x2c5   : > { %v1066_v42 = vpack.c.bf16 %v831_v22, %v830_v10 }
 0x2c7   : > { %1067 = vst [vmem:[%s1392_s28] sm:$0xff] %v1066_v42  }
 0x2ca   : > { %v828_v47 = vpop.permute.xlu1 %827 }
 0x2cb   : > { %v837_v48 = vmul.f32 %v828_v47, %v746_v46 }
 0x2cd   : > { %v1081_v8 = vpack.c.bf16 %v837_v48, %v836_v18 }
 0x2cf   : > { %1085 = vst [vmem:[%s1392_s28 + $0x18] sm:$0xff] %v1081_v8  }
 0x2d0 PF: > { %s13_s14 = sadd.s32 1, %s1194_s14   ;;  %s1416_s12 = smov %s1190_s13 }
 0x2d1   : > { %p10_p5 = scmp.ge.s32.totalorder %s13_s14, 4   ;;  %s1417_s13 = smov %s1419_s15 }
 0x2d3   :  { %12 = sbr.rel (!%p10_p5) target bundleno = 2 (0x2), region = 76 }

// kernel: _lambda_.68
= control target key start
LH: loop header
LB: loop body
LE: loop exit
PB: predicated region body
PF: predicated region fallthrough
CT: control target
= control target key end

     0   :  { %s718_s1 = inlined_call_operand.vmem [shape: bf16[128,128], index: 1, kind: input, shape index: {}]   ;;  %s719_s2 = inlined_call_operand.vmem [shape: f32[1,128], index: 2, kind: input, shape index: {}]   ;;  %s720_s0 = inlined_call_operand.vmem [shape: bf16[128,128], index: 0, kind: input, shape index: {}]   ;;  %s721_s3 = inlined_call_operand.vmem [shape: bf16[128,128], index: 3, kind: input, shape index: {}]   ;;  %s722_s4 = inlined_call_operand.vmem [shape: bf16[128,128], index: 4, kind: output, shape index: {}]  }
   0x1   :  { %v464_v0 = vld [vmem:[%s718_s1 + $0x38] sm:$0xff]  ;;  %v463_v1 = vld [vmem:[%s718_s1 + $0x30] sm:$0xff]  ;;  %v462_v2 = vld [vmem:[%s718_s1 + $0x28] sm:$0xff] }
   0x2   :  { %181 = vmatpush.bf16.msra.mxu0 %v464_v0  ;;  %551 = vmatpush.bf16.msra.mxu1 %v464_v0  ;;  %v461_v3 = vld [vmem:[%s718_s1 + $0x20] sm:$0xff]  ;;  %v460_v4 = vld [vmem:[%s718_s1 + $0x18] sm:$0xff]  ;;  %v459_v5 = vld [vmem:[%s718_s1 + $0x10] sm:$0xff] }
   0x3   :  { %552 = vmatpush.bf16.msra.mxu2 %v464_v0  ;;  %553 = vmatpush.bf16.msra.mxu3 %v464_v0  ;;  %v458_v6 = vld [vmem:[%s718_s1 + $0x8] sm:$0xff]  ;;  %v457_v7 = vld [vmem:[%s718_s1] sm:$0xff]  ;;  %v451_v9 = vld [vmem:[%s720_s0 + $0x10] sm:$0xff] }
   0x4   :  { %v449_v8 = vld [vmem:[%s720_s0] sm:$0xff]  ;;  %v455_v11 = vld [vmem:[%s720_s0 + $0x30] sm:$0xff]  ;;  %v450_v12 = vld [vmem:[%s720_s0 + $0x8] sm:$0xff] }
   0x5   :  { %v453_v10 = vld [vmem:[%s720_s0 + $0x20] sm:$0xff]  ;;  %v452_v13 = vld [vmem:[%s720_s0 + $0x18] sm:$0xff]  ;;  %v454_v14 = vld [vmem:[%s720_s0 + $0x28] sm:$0xff] }
   0x6   :  { %182 = vmatpush.bf16.msra.mxu0 %v463_v1  ;;  %554 = vmatpush.bf16.msra.mxu1 %v463_v1  ;;  %v456_v15 = vld [vmem:[%s720_s0 + $0x38] sm:$0xff]  ;;  %v652_v18 = vld [vmem:[%s719_s2] ss:$0 sm:$0xff]  ;;  %v538_v20 = vld [vmem:[%s721_s3 + $0x10] sm:$0xff]  }
   0x7   :  { %555 = vmatpush.bf16.msra.mxu2 %v463_v1  ;;  %556 = vmatpush.bf16.msra.mxu3 %v463_v1  ;;  %v466_v19 = vld [vmem:[%s721_s3] sm:$0xff]   ;;  %v475_v22 = vunpack.c.l.bf16 %v538_v20  ;;  %v476_v28 = vunpack.c.h.bf16 %v538_v20  ;;  %v542_v34 = vld [vmem:[%s721_s3 + $0x30] sm:$0xff]   ;;  %v537_v57 = vld [vmem:[%s721_s3 + $0x8] sm:$0xff]  }
   0x8   :  { %v467_v21 = vunpack.c.l.bf16 %v466_v19  ;;  %v468_v27 = vunpack.c.h.bf16 %v466_v19  ;;  %v540_v33 = vld [vmem:[%s721_s3 + $0x20] sm:$0xff]   ;;  %v491_v40 = vunpack.c.l.bf16 %v542_v34  ;;  %v492_v46 = vunpack.c.h.bf16 %v542_v34  ;;  %v539_v58 = vld [vmem:[%s721_s3 + $0x18] sm:$0xff]  }
   0x9   :  { %v483_v39 = vunpack.c.l.bf16 %v540_v33  ;;  %v484_v45 = vunpack.c.h.bf16 %v540_v33  ;;  %v471_v61 = vunpack.c.l.bf16 %v537_v57  ;;  %v479_v62 = vunpack.c.l.bf16 %v539_v58 }
   0xa   :  { %183 = vmatpush.bf16.msra.mxu0 %v462_v2  ;;  %557 = vmatpush.bf16.msra.mxu1 %v462_v2 }
   0xb   :  { %558 = vmatpush.bf16.msra.mxu2 %v462_v2  ;;  %559 = vmatpush.bf16.msra.mxu3 %v462_v2 }
   0xe   :  { %184 = vmatpush.bf16.msra.mxu0 %v461_v3  ;;  %560 = vmatpush.bf16.msra.mxu1 %v461_v3 }
   0xf   :  { %561 = vmatpush.bf16.msra.mxu2 %v461_v3  ;;  %562 = vmatpush.bf16.msra.mxu3 %v461_v3  ;;  %v472_v3 = vunpack.c.h.bf16 %v537_v57 }
  0x12   :  { %185 = vmatpush.bf16.msra.mxu0 %v460_v4  ;;  %563 = vmatpush.bf16.msra.mxu1 %v460_v4 }
  0x13   :  { %564 = vmatpush.bf16.msra.mxu2 %v460_v4  ;;  %565 = vmatpush.bf16.msra.mxu3 %v460_v4  ;;  %v480_v4 = vunpack.c.h.bf16 %v539_v58 }
  0x16   :  { %186 = vmatpush.bf16.msra.mxu0 %v459_v5  ;;  %566 = vmatpush.bf16.msra.mxu1 %v459_v5 }
  0x17   :  { %567 = vmatpush.bf16.msra.mxu2 %v459_v5  ;;  %568 = vmatpush.bf16.msra.mxu3 %v459_v5 }
  0x1a   :  { %187 = vmatpush.bf16.msra.mxu0 %v458_v6  ;;  %569 = vmatpush.bf16.msra.mxu1 %v458_v6 }
  0x1b   :  { %570 = vmatpush.bf16.msra.mxu2 %v458_v6  ;;  %571 = vmatpush.bf16.msra.mxu3 %v458_v6 }
  0x1e   :  { %188 = vmatpush.bf16.msra.mxu0 %v457_v7  ;;  %572 = vmatpush.bf16.msra.mxu1 %v457_v7 }
  0x1f   :  { %573 = vmatpush.bf16.msra.mxu2 %v457_v7  ;;  %574 = vmatpush.bf16.msra.mxu3 %v457_v7 }
  0x21   :  { %189 = vmatmul.bf16.vlgmr.msra.gmra.mxu0 %v449_v8  ;;  %199 = vmatmul.bf16.vlgmr.msra.gmra.mxu1 %v451_v9  ;;  %v541_v9 = vld [vmem:[%s721_s3 + $0x28] sm:$0xff]  }
  0x22   :  { %209 = vmatmul.bf16.vlgmr.msra.gmra.mxu2 %v453_v10  ;;  %219 = vmatmul.bf16.vlgmr.msra.gmra.mxu3 %v455_v11  ;;  %v543_v10 = vld [vmem:[%s721_s3 + $0x38] sm:$0xff]  }
  0x31   :  { %194 = vmatmul.bf16.gmra.mxu0 %v450_v12  ;;  %204 = vmatmul.bf16.gmra.mxu1 %v452_v13 }
  0x32   :  { %214 = vmatmul.bf16.gmra.mxu2 %v454_v14  ;;  %224 = vmatmul.bf16.gmra.mxu3 %v456_v15  ;;  %v487_v15 = vunpack.c.l.bf16 %v541_v9 }
  0x9e   :  { %v190_v16 = vpop.f32.mrf.mxu0  ;;  %v200_v17 = vpop.f32.mrf.mxu1 }
  0x9f   :  { %v285_v23 = vadd.f32 %v652_v18, %v190_v16  ;;  %v289_v24 = vadd.f32 %v652_v18, %v200_v17  ;;  %v495_v16 = vunpack.c.l.bf16 %v543_v10 }
  0xa1   :  { %v333_v35 = vadd.f32 %v467_v21, %v285_v23  ;;  %v337_v36 = vadd.f32 %v475_v22, %v289_v24  ;;  %v488_v22 = vunpack.c.h.bf16 %v541_v9  ;;  %v496_v23 = vunpack.c.h.bf16 %v543_v10 }
  0xa5   :  { %v210_v25 = vpop.f32.mrf.mxu2  ;;  %v220_v26 = vpop.f32.mrf.mxu3 }
  0xa6   :  { %v192_v29 = vpop.f32.mrf.mxu0  ;;  %v202_v30 = vpop.f32.mrf.mxu1  ;;  %v293_v43 = vadd.f32 %v652_v18, %v210_v25  ;;  %v297_v44 = vadd.f32 %v652_v18, %v220_v26 }
  0xa7   :  { %v286_v31 = vadd.f32 %v652_v18, %v192_v29  ;;  %v290_v32 = vadd.f32 %v652_v18, %v202_v30 }
  0xa8   :  { %v341_v53 = vadd.f32 %v483_v39, %v293_v43  ;;  %v345_v54 = vadd.f32 %v491_v40, %v297_v44 }
  0xa9   :  { %v334_v37 = vadd.f32 %v468_v27, %v286_v31  ;;  %v338_v38 = vadd.f32 %v476_v28, %v290_v32 }
  0xab   :  { %v500_v41 = vpack.c.bf16 %v334_v37, %v333_v35  ;;  %v510_v42 = vpack.c.bf16 %v338_v38, %v337_v36 }
  0xad   :  { %501 = vst [vmem:[%s722_s4] sm:$0xff] %v500_v41   ;;  %v212_v47 = vpop.f32.mrf.mxu2  ;;  %v222_v48 = vpop.f32.mrf.mxu3 }
  0xae   :  { %545 = vst [vmem:[%s722_s4 + $0x10] sm:$0xff] %v510_v42   ;;  %v294_v49 = vadd.f32 %v652_v18, %v212_v47  ;;  %v298_v50 = vadd.f32 %v652_v18, %v222_v48  ;;  %v195_v51 = vpop.f32.mrf.mxu0  ;;  %v205_v52 = vpop.f32.mrf.mxu1 }
  0xaf   :  { %v287_v63 = vadd.f32 %v652_v18, %v195_v51  ;;  %v291_v0 = vadd.f32 %v652_v18, %v205_v52 }
  0xb0   :  { %v342_v55 = vadd.f32 %v484_v45, %v294_v49  ;;  %v346_v56 = vadd.f32 %v492_v46, %v298_v50 }
  0xb1   :  { %v335_v11 = vadd.f32 %v471_v61, %v287_v63  ;;  %v339_v12 = vadd.f32 %v479_v62, %v291_v0 }
  0xb2   :  { %v520_v59 = vpack.c.bf16 %v342_v55, %v341_v53  ;;  %v530_v60 = vpack.c.bf16 %v346_v56, %v345_v54 }
  0xb4   :  { %547 = vst [vmem:[%s722_s4 + $0x20] sm:$0xff] %v520_v59  }
  0xb5   :  { %549 = vst [vmem:[%s722_s4 + $0x30] sm:$0xff] %v530_v60   ;;  %v215_v1 = vpop.f32.mrf.mxu2  ;;  %v225_v2 = vpop.f32.mrf.mxu3 }
  0xb6   :  { %v197_v5 = vpop.f32.mrf.mxu0  ;;  %v207_v6 = vpop.f32.mrf.mxu1  ;;  %v295_v20 = vadd.f32 %v652_v18, %v215_v1  ;;  %v299_v21 = vadd.f32 %v652_v18, %v225_v2 }
  0xb7   :  { %v288_v7 = vadd.f32 %v652_v18, %v197_v5  ;;  %v292_v8 = vadd.f32 %v652_v18, %v207_v6 }
  0xb8   :  { %v343_v28 = vadd.f32 %v487_v15, %v295_v20  ;;  %v347_v29 = vadd.f32 %v495_v16, %v299_v21 }
  0xb9   :  { %v336_v13 = vadd.f32 %v472_v3, %v288_v7  ;;  %v340_v14 = vadd.f32 %v480_v4, %v292_v8 }
  0xbb   :  { %v505_v17 = vpack.c.bf16 %v336_v13, %v335_v11  ;;  %v515_v19 = vpack.c.bf16 %v340_v14, %v339_v12 }
  0xbd   :  { %544 = vst [vmem:[%s722_s4 + $0x8] sm:$0xff] %v505_v17   ;;  %v217_v24 = vpop.f32.mrf.mxu2  ;;  %v227_v25 = vpop.f32.mrf.mxu3 }
  0xbe   :  { %546 = vst [vmem:[%s722_s4 + $0x18] sm:$0xff] %v515_v19   ;;  %v296_v26 = vadd.f32 %v652_v18, %v217_v24  ;;  %v300_v27 = vadd.f32 %v652_v18, %v227_v25 }
  0xc0   :  { %v344_v30 = vadd.f32 %v488_v22, %v296_v26  ;;  %v348_v31 = vadd.f32 %v496_v23, %v300_v27 }
  0xc2   :  { %v525_v32 = vpack.c.bf16 %v344_v30, %v343_v28  ;;  %v535_v33 = vpack.c.bf16 %v348_v31, %v347_v29 }
  0xc4   :  { %548 = vst [vmem:[%s722_s4 + $0x28] sm:$0xff] %v525_v32  }
  0xc5   :  { %550 = vst [vmem:[%s722_s4 + $0x38] sm:$0xff] %v535_v33  }

// kernel: _lambda_.98
= control target key start
LH: loop header
LB: loop body
LE: loop exit
PB: predicated region body
PF: predicated region fallthrough
CT: control target
= control target key end

     0   :  { %s796_s15 = smov 0   ;;  %s798_s16 = smov 0   ;;  %s915_s0 = inlined_call_operand.vmem [shape: bf16[2,256,128], index: 0, kind: input, shape index: {}]   ;;  %s916_s1 = inlined_call_operand.vmem [shape: f32[128,32], index: 1, kind: input, shape index: {}]   ;;  %s917_s2 = inlined_call_operand.vmem [shape: f32[32,128], index: 2, kind: input, shape index: {}]   ;;  %s918_s3 = inlined_call_operand.vmem [shape: f32[2,1,128], index: 3, kind: output, shape index: {0}]   ;;  %s919_s4 = inlined_call_operand.vmem [shape: f32[2,1,128], index: 4, kind: output, shape index: {1}]  }
   0x1   :  { %s800_s17 = smov 0  }
   0x2 LB: > { %s27_s18 = sadd.s32 1, %s764_s16  ;;  %p632_p0 = scmp.ge.s32.totalorder %s768_s17, 1  ;;  %s768_s17 = sphi %s800_s17, %s15_s17   ;;  %s764_s16 = sphi %s798_s16, %s921_s16   ;;  %s760_s15 = sphi %s796_s15, %s920_s15  }
   0x3   : > { %p29_p1 = scmp.ge.s32.totalorder %s27_s18, 2  ;;  %p184_p2 = scmp.lt.s32.totalorder %s768_s17, 3 }
   0x5   : > { %s923_s18 = smov (%p29_p1, %s27_s18), 0  ;;  %p185_p3 = pnand %p632_p0, %p184_p2 }
   0x6   : > { %p216_p4 = scmp.lt.s32.totalorder (!%p185_p3), %s760_s15, 1 }
   0x7   : > { %188 = sbr.rel (%p185_p3) target bundleno = 389 (0x185), region = 32 }
   0xc   : > { %v432_v0 = vld [vmem:[%s916_s1 + $0x78] sm:$0xff]  ;;  %v431_v1 = vld [vmem:[%s916_s1 + $0x70] sm:$0xff]  ;;  %v770_v2 = vmov 0.0   ;;  %v430_v3 = vld [vmem:[%s916_s1 + $0x68] sm:$0xff]  ;;  %s925_s15 = smov (!%p216_p4, %s760_s15), 1  ;;  %vm483_vm0 = vcmask 261120  }
   0xd   : > { %433 = vmatpush.msra.mxu0 %v432_v0  ;;  %455 = vmatpush.msra.mxu1 %v432_v0  ;;  %235 = vst [vmem:[#allocation2] sm:$0x1] %v770_v2  ;;  %v429_v4 = vld [vmem:[%s916_s1 + $0x60] sm:$0xff]  ;;  %s639_s27 = sshll.u32 %s925_s15, 7  ;;  %v428_v5 = vld [vmem:[%s916_s1 + $0x58] sm:$0xff]  ;;  %v427_v6 = vld [vmem:[%s916_s1 + $0x50] sm:$0xff]  ;;  %s227_s21 = scalar_lea.vmem %s918_s3, %s925_s15 }
   0xe   : > { %236 = vst [vmem:[#allocation3] sm:$0x1] %v770_v2  ;;  %s832_s30 = scalar_lea.vmem %s915_s0, %s639_s27  ;;  %v426_v8 = vld [vmem:[%s916_s1 + $0x48] sm:$0xff]  ;;  %v425_v12 = vld [vmem:[%s916_s1 + $0x40] sm:$0xff]  ;;  %v424_v14 = vld [vmem:[%s916_s1 + $0x38] sm:$0xff]  ;;  %s230_s24 = scalar_lea.vmem %s919_s4, %s925_s15 }
   0xf   : > { %434 = vmatpush.msra.mxu0 %v431_v1  ;;  %456 = vmatpush.msra.mxu1 %v431_v1  ;;  %v641_v7 = vld [vmem:[%s832_s30] sm:$0xff]   ;;  %v704_v9 = vld [vmem:[%s832_s30 + $0x8] sm:$0xff]   ;;  %v705_v15 = vld [vmem:[%s832_s30 + $0x10] sm:$0xff]  }
  0x10   : > { %v642_v10 = vunpack.c.l.bf16 %v641_v7  ;;  %v643_v11 = vunpack.c.h.bf16 %v641_v7  ;;  %v646_v13 = vunpack.c.l.bf16 %v704_v9  ;;  %v647_v16 = vunpack.c.h.bf16 %v704_v9  ;;  %v423_v18 = vld [vmem:[%s916_s1 + $0x30] sm:$0xff]  ;;  %v422_v21 = vld [vmem:[%s916_s1 + $0x28] sm:$0xff]  ;;  %v706_v22 = vld [vmem:[%s832_s30 + $0x18] sm:$0xff]  }
  0x11   : > { %435 = vmatpush.msra.mxu0 %v430_v3  ;;  %457 = vmatpush.msra.mxu1 %v430_v3  ;;  %v650_v19 = vunpack.c.l.bf16 %v705_v15  ;;  %v651_v25 = vunpack.c.h.bf16 %v705_v15  ;;  %v421_v27 = vld [vmem:[%s916_s1 + $0x20] sm:$0xff]  ;;  %v654_v29 = vunpack.c.l.bf16 %v706_v22  ;;  %v420_v31 = vld [vmem:[%s916_s1 + $0x18] sm:$0xff]  ;;  %v655_v35 = vunpack.c.h.bf16 %v706_v22  ;;  %v419_v37 = vld [vmem:[%s916_s1 + $0x10] sm:$0xff] }
  0x12   : > { %v302_v17 = vadd.f32 %v643_v11, %v642_v10  ;;  %v342_v23 = vmul.f32 %v642_v10, %v642_v10  ;;  %v343_v24 = vmul.f32 %v643_v11, %v643_v11  ;;  %v344_v28 = vmul.f32 %v646_v13, %v646_v13  ;;  %v707_v32 = vld [vmem:[%s832_s30 + $0x20] sm:$0xff]   ;;  %v418_v42 = vld [vmem:[%s916_s1 + $0x8] sm:$0xff]  ;;  %v709_v53 = vld [vmem:[%s832_s30 + $0x30] sm:$0xff]  }
  0x13   : > { %436 = vmatpush.msra.mxu0 %v429_v4  ;;  %458 = vmatpush.msra.mxu1 %v429_v4  ;;  %v345_v33 = vmul.f32 %v647_v16, %v647_v16  ;;  %v346_v38 = vmul.f32 %v650_v19, %v650_v19  ;;  %v658_v40 = vunpack.c.l.bf16 %v707_v32  ;;  %v708_v43 = vld [vmem:[%s832_s30 + $0x28] sm:$0xff]   ;;  %v347_v44 = vmul.f32 %v651_v25, %v651_v25  ;;  %v417_v48 = vld [vmem:[%s916_s1] sm:$0xff]  ;;  %v710_v62 = vld [vmem:[%s832_s30 + $0x38] sm:$0xff]  }
  0x14   : > { %v303_v20 = vadd.f32 %v646_v13, %v302_v17  ;;  %v374_v34 = vadd.f32 %v343_v24, %v342_v23  ;;  %v659_v46 = vunpack.c.h.bf16 %v707_v32  ;;  %v348_v49 = vmul.f32 %v654_v29, %v654_v29  ;;  %v711_v7 = vld [vmem:[%s832_s30 + $0x40] sm:$0xff]  }
  0x15   : > { %437 = vmatpush.msra.mxu0 %v428_v5  ;;  %459 = vmatpush.msra.mxu1 %v428_v5  ;;  %v662_v51 = vunpack.c.l.bf16 %v708_v43  ;;  %v349_v54 = vmul.f32 %v655_v35, %v655_v35  ;;  %v663_v56 = vunpack.c.h.bf16 %v708_v43  ;;  %v350_v58 = vmul.f32 %v658_v40, %v658_v40  ;;  %v715_v43 = vld [vmem:[%s832_s30 + $0x60] sm:$0xff]  }
  0x16   : > { %v304_v26 = vadd.f32 %v647_v16, %v303_v20  ;;  %v375_v39 = vadd.f32 %v374_v34, %v344_v28  ;;  %v666_v60 = vunpack.c.l.bf16 %v709_v53  ;;  %v351_v63 = vmul.f32 %v659_v46, %v659_v46  ;;  %v712_v16 = vld [vmem:[%s832_s30 + $0x48] sm:$0xff]   ;;  %v714_v34 = vld [vmem:[%s832_s30 + $0x58] sm:$0xff]  }
  0x17   : > { %438 = vmatpush.msra.mxu0 %v427_v6  ;;  %460 = vmatpush.msra.mxu1 %v427_v6  ;;  %v667_v1 = vunpack.c.h.bf16 %v709_v53  ;;  %v352_v3 = vmul.f32 %v662_v51, %v662_v51  ;;  %v670_v5 = vunpack.c.l.bf16 %v710_v62  ;;  %v671_v10 = vunpack.c.h.bf16 %v710_v62 }
  0x18   : > { %v305_v30 = vadd.f32 %v650_v19, %v304_v26  ;;  %v376_v45 = vadd.f32 %v375_v39, %v345_v33  ;;  %v675_v19 = vunpack.c.h.bf16 %v711_v7  ;;  %v678_v23 = vunpack.c.l.bf16 %v712_v16 }
  0x19   : > { %439 = vmatpush.msra.mxu0 %v426_v8  ;;  %461 = vmatpush.msra.mxu1 %v426_v8  ;;  %v353_v8 = vmul.f32 %v663_v56, %v663_v56  ;;  %v355_v17 = vmul.f32 %v667_v1, %v667_v1  ;;  %v357_v26 = vmul.f32 %v671_v10, %v671_v10  ;;  %v679_v28 = vunpack.c.h.bf16 %v712_v16 }
  0x1a   : > { %v306_v36 = vadd.f32 %v651_v25, %v305_v30  ;;  %v377_v50 = vadd.f32 %v376_v45, %v346_v38  ;;  %v713_v25 = vld [vmem:[%s832_s30 + $0x50] sm:$0xff]   ;;  %v360_v39 = vmul.f32 %v678_v23, %v678_v23 }
  0x1b   : > { %440 = vmatpush.msra.mxu0 %v425_v12  ;;  %462 = vmatpush.msra.mxu1 %v425_v12  ;;  %v354_v12 = vmul.f32 %v666_v60, %v666_v60  ;;  %v682_v32 = vunpack.c.l.bf16 %v713_v25 }
  0x1c   : > { %v307_v41 = vadd.f32 %v654_v29, %v306_v36  ;;  %v378_v55 = vadd.f32 %v377_v50, %v347_v44  ;;  %v361_v44 = vmul.f32 %v679_v28, %v679_v28  ;;  %v690_v50 = vunpack.c.l.bf16 %v715_v43 }
  0x1d   : > { %441 = vmatpush.msra.mxu0 %v424_v14  ;;  %463 = vmatpush.msra.mxu1 %v424_v14  ;;  %v674_v14 = vunpack.c.l.bf16 %v711_v7 }
  0x1e   : > { %v308_v47 = vadd.f32 %v655_v35, %v307_v41  ;;  %v379_v59 = vadd.f32 %v378_v55, %v348_v49  ;;  %v359_v35 = vmul.f32 %v675_v19, %v675_v19  ;;  %v686_v41 = vunpack.c.l.bf16 %v714_v34 }
  0x1f   : > { %442 = vmatpush.msra.mxu0 %v423_v18  ;;  %464 = vmatpush.msra.mxu1 %v423_v18  ;;  %v358_v30 = vmul.f32 %v674_v14, %v674_v14  ;;  %v691_v55 = vunpack.c.h.bf16 %v715_v43 }
  0x20   : > { %v309_v52 = vadd.f32 %v658_v40, %v308_v47  ;;  %v380_v0 = vadd.f32 %v379_v59, %v349_v54 }
  0x21   : > { %443 = vmatpush.msra.mxu0 %v422_v21  ;;  %465 = vmatpush.msra.mxu1 %v422_v21  ;;  %v356_v21 = vmul.f32 %v670_v5, %v670_v5  ;;  %v367_v7 = vmul.f32 %v691_v55, %v691_v55 }
  0x22   : > { %v310_v57 = vadd.f32 %v659_v46, %v309_v52  ;;  %v381_v4 = vadd.f32 %v380_v0, %v350_v58  ;;  %v687_v46 = vunpack.c.h.bf16 %v714_v34  ;;  %v716_v52 = vld [vmem:[%s832_s30 + $0x68] sm:$0xff]  }
  0x23   : > { %444 = vmatpush.msra.mxu0 %v421_v27  ;;  %466 = vmatpush.msra.mxu1 %v421_v27  ;;  %v694_v59 = vunpack.c.l.bf16 %v716_v52  ;;  %v695_v0 = vunpack.c.h.bf16 %v716_v52  ;;  %v479_v52 = vld [vmem:[%s917_s2] sm:$0xff] }
  0x24   : > { %v311_v61 = vadd.f32 %v662_v51, %v310_v57  ;;  %v382_v9 = vadd.f32 %v381_v4, %v351_v63  ;;  %v364_v57 = vmul.f32 %v686_v41, %v686_v41  ;;  %v365_v62 = vmul.f32 %v687_v46, %v687_v46 }
  0x25   : > { %445 = vmatpush.msra.mxu0 %v420_v31  ;;  %467 = vmatpush.msra.mxu1 %v420_v31 }
  0x26   : > { %v312_v2 = vadd.f32 %v663_v56, %v311_v61  ;;  %v383_v13 = vadd.f32 %v382_v9, %v352_v3  ;;  %v717_v61 = vld [vmem:[%s832_s30 + $0x70] sm:$0xff]  }
  0x27   : > { %446 = vmatpush.msra.mxu0 %v419_v37  ;;  %468 = vmatpush.msra.mxu1 %v419_v37  ;;  %v683_v37 = vunpack.c.h.bf16 %v713_v25  ;;  %v698_v4 = vunpack.c.l.bf16 %v717_v61  ;;  %v699_v9 = vunpack.c.h.bf16 %v717_v61  ;;  %v481_v25 = vld [vmem:[%s917_s2 + $0x10] sm:$0xff] }
  0x28   : > { %v313_v6 = vadd.f32 %v666_v60, %v312_v2  ;;  %v384_v18 = vadd.f32 %v383_v13, %v353_v8  ;;  %v366_v2 = vmul.f32 %v690_v50, %v690_v50 }
  0x29   : > { %447 = vmatpush.msra.mxu0 %v418_v42  ;;  %469 = vmatpush.msra.mxu1 %v418_v42  ;;  %v363_v53 = vmul.f32 %v683_v37, %v683_v37 }
  0x2a   : > { %v314_v11 = vadd.f32 %v667_v1, %v313_v6  ;;  %v385_v22 = vadd.f32 %v384_v18, %v354_v12  ;;  %v718_v6 = vld [vmem:[%s832_s30 + $0x78] sm:$0xff]  }
  0x2b   : > { %448 = vmatpush.msra.mxu0 %v417_v48  ;;  %470 = vmatpush.msra.mxu1 %v417_v48  ;;  %v362_v48 = vmul.f32 %v682_v32, %v682_v32  ;;  %v702_v13 = vunpack.c.l.bf16 %v718_v6 }
  0x2c   : > { %v315_v15 = vadd.f32 %v670_v5, %v314_v11  ;;  %v386_v27 = vadd.f32 %v385_v22, %v355_v17  ;;  %v368_v11 = vmul.f32 %v694_v59, %v694_v59  ;;  %v703_v17 = vunpack.c.h.bf16 %v718_v6 }
  0x2d   : > { %v371_v22 = vmul.f32 %v699_v9, %v699_v9 }
  0x2e   : > { %v316_v20 = vadd.f32 %v671_v10, %v315_v15  ;;  %v387_v31 = vadd.f32 %v386_v27, %v356_v21  ;;  %v369_v15 = vmul.f32 %v695_v0, %v695_v0  ;;  %v372_v27 = vmul.f32 %v702_v13, %v702_v13 }
  0x30   : > { %v317_v24 = vadd.f32 %v674_v14, %v316_v20  ;;  %v388_v36 = vadd.f32 %v387_v31, %v357_v26 }
  0x32   : > { %v318_v29 = vadd.f32 %v675_v19, %v317_v24  ;;  %v389_v40 = vadd.f32 %v388_v36, %v358_v30  ;;  %v370_v19 = vmul.f32 %v698_v4, %v698_v4  ;;  %v482_v24 = vld [vmem:[%s917_s2 + $0x18] sm:$0xff]  ;;  %v373_v30 = vmul.f32 %v703_v17, %v703_v17 }
  0x33   : > { %499 = vmatpush.msra.mxu2 %v482_v24  ;;  %523 = vmatpush.msra.mxu3 %v482_v24 }
  0x34   : > { %v319_v33 = vadd.f32 %v678_v23, %v318_v29  ;;  %v390_v45 = vadd.f32 %v389_v40, %v359_v35 }
  0x35   : > { %500 = vmatpush.msra.mxu2 %v481_v25  ;;  %524 = vmatpush.msra.mxu3 %v481_v25 }
  0x36   : > { %v320_v38 = vadd.f32 %v679_v28, %v319_v33  ;;  %v391_v49 = vadd.f32 %v390_v45, %v360_v39  ;;  %v301_v39 = vld [vmem:[#allocation2] sm:$0x1] }
  0x38   : > { %v321_v42 = vadd.f32 %v682_v32, %v320_v38  ;;  %v392_v54 = vadd.f32 %v391_v49, %v361_v44 }
  0x3a   : > { %v322_v47 = vadd.f32 %v683_v37, %v321_v42  ;;  %v393_v58 = vadd.f32 %v392_v54, %v362_v48 }
  0x3c   : > { %v323_v51 = vadd.f32 %v686_v41, %v322_v47  ;;  %v394_v63 = vadd.f32 %v393_v58, %v363_v53 }
  0x3e   : > { %v324_v56 = vadd.f32 %v687_v46, %v323_v51  ;;  %v395_v3 = vadd.f32 %v394_v63, %v364_v57  ;;  %v341_v46 = vld [vmem:[#allocation3] sm:$0x1]  ;;  %v480_v51 = vld [vmem:[%s917_s2 + $0x8] sm:$0xff] }
  0x3f   : > { %501 = vmatpush.msra.mxu2 %v480_v51  ;;  %525 = vmatpush.msra.mxu3 %v480_v51 }
  0x40   : > { %v325_v60 = vadd.f32 %v690_v50, %v324_v56  ;;  %v396_v8 = vadd.f32 %v395_v3, %v365_v62 }
  0x41   : > { %502 = vmatpush.msra.mxu2 %v479_v52  ;;  %526 = vmatpush.msra.mxu3 %v479_v52 }
  0x42   : > { %v326_v1 = vadd.f32 %v691_v55, %v325_v60  ;;  %v397_v12 = vadd.f32 %v396_v8, %v366_v2 }
  0x44   : > { %v327_v5 = vadd.f32 %v694_v59, %v326_v1  ;;  %v398_v16 = vadd.f32 %v397_v12, %v367_v7 }
  0x46   : > { %v328_v10 = vadd.f32 %v695_v0, %v327_v5  ;;  %v399_v20 = vadd.f32 %v398_v16, %v368_v11 }
  0x48   : > { %v329_v14 = vadd.f32 %v698_v4, %v328_v10  ;;  %v400_v23 = vadd.f32 %v399_v20, %v369_v15 }
  0x4a   : > { %v330_v18 = vadd.f32 %v699_v9, %v329_v14  ;;  %v401_v28 = vadd.f32 %v400_v23, %v370_v19 }
  0x4c   : > { %v331_v21 = vadd.f32 %v702_v13, %v330_v18  ;;  %v402_v31 = vadd.f32 %v401_v28, %v371_v22 }
  0x4e   : > { %v332_v26 = vadd.f32 %v703_v17, %v331_v21  ;;  %v403_v33 = vadd.f32 %v402_v31, %v372_v27 }
  0x50   : > { %v333_v29 = vrot.slane %v332_v26, 4  ;;  %v404_v35 = vadd.f32 %v403_v33, %v373_v30 }
  0x52   : > { %v334_v32 = vadd.f32 %v333_v29, %v332_v26  ;;  %v405_v37 = vrot.slane %v404_v35, 4 }
  0x54   : > { %v335_v34 = vrot.slane %v334_v32, 2  ;;  %v406_v40 = vadd.f32 %v405_v37, %v404_v35 }
  0x56   : > { %v336_v36 = vadd.f32 %v335_v34, %v334_v32  ;;  %v407_v42 = vrot.slane %v406_v40, 2 }
  0x58   : > { %v337_v38 = vrot.slane %v336_v36, 1  ;;  %v408_v44 = vadd.f32 %v407_v42, %v406_v40 }
  0x5a   : > { %v338_v41 = vadd.f32 %v337_v38, %v336_v36  ;;  %v409_v45 = vrot.slane %v408_v44, 1 }
  0x5c   : > { %v339_v43 = vadd.f32 %v338_v41, %v301_v39  ;;  %v410_v47 = vadd.f32 %v409_v45, %v408_v44 }
  0x5e   : > { %340 = vst [vmem:[#allocation2] sm:$0x1] %v339_v43  ;;  %v411_v48 = vadd.f32 %v410_v47, %v341_v46 }
  0x60   : > { %412 = vst [vmem:[#allocation3] sm:$0x1] %v411_v48 }
  0x65   : > { %v416_v49 = vld [vmem:[#allocation2] sm:$0x1] }
  0x66   : > { %449 = vmatmul.f32.vlgmr.msra.gmra.mxu0 %v416_v49 }
  0x67   : > { %v454_v50 = vld [vmem:[#allocation3] sm:$0x1] }
  0x68   : > { %471 = vmatmul.f32.vlgmr.msra.gmra.mxu1 %v454_v50 }
  0xe3   : > { %v450_v53 = vpop.f32.mrf.mxu0 }
  0xe4   : > { %v453_v54 = vmul.f32 0.001953125, %v450_v53 }
  0xe5   : > { %v472_v56 = vpop.f32.mrf.mxu1 }
  0xe6   : > { %635 = vmatmul.msk.f32.vlgmr.msra.gmra.mxu2 %vm483_vm0, %v453_v54  ;;  %v476_v55 = vmul.f32 %v453_v54, %v453_v54  ;;  %v475_v57 = vmul.f32 0.001953125, %v472_v56 }
  0xe8   : > { %v477_v58 = vsub.f32 %v475_v57, %v476_v55 }
  0xea   : > { %v478_v59 = vmax.f32 %v477_v58, 0.0 }
  0xec   : > { %636 = vmatmul.msk.f32.vlgmr.msra.gmra.mxu3 %vm483_vm0, %v478_v59 }
 0x169   : > { %v504_v60 = vpop.f32.mrf.mxu2 }
 0x16a   : > { %507 = vst [vmem:[%s227_s21] sm:$0x1] %v504_v60 }
 0x16f   : > { %v528_v61 = vpop.f32.mrf.mxu3 }
 0x170   : > { %v529_v62 = vadd.f32 1e-06, %v528_v61 }
 0x172   : > { %744 = vrsqrt.f32 %v529_v62  ;;  %vm537_vm2 = vweird.f32 %v529_v62 }
 0x178   : > { %v745_v63 = vpop.eup %744 }
 0x179   : > { %v532_v0 = vmul.f32 %v745_v63, %v529_v62  ;;  %vm538_vm1 = vweird.f32 %v745_v63 }
 0x17a   : > { %vm539_vm3 = vmor %vm537_vm2, %vm538_vm1 }
 0x17b   : > { %v533_v1 = vmul.f32 %v745_v63, %v532_v0 }
 0x17d   : > { %v534_v2 = vmul.f32 0.5, %v533_v1 }
 0x17f   : > { %v535_v3 = vsub.f32 1.5, %v534_v2 }
 0x181   : > { %v536_v4 = vmul.f32 %v745_v63, %v535_v3 }
 0x183   : > { %v540_v5 = vsel %vm539_vm3, %v745_v63, %v536_v4 }
 0x184   : > { %541 = vst [vmem:[%s230_s24] sm:$0x1] %v540_v5 }
 0x185 PF: > { %s15_s17 = sadd.s32 1, %s768_s17   ;;  %s920_s15 = smov %s764_s16 }
 0x186   : > { %p12_p5 = scmp.ge.s32.totalorder %s15_s17, 4   ;;  %s921_s16 = smov %s923_s18 }
 0x188   :  { %14 = sbr.rel (!%p12_p5) target bundleno = 2 (0x2), region = 82 }

// kernel: _lambda_.99
= control target key start
LH: loop header
LB: loop body
LE: loop exit
PB: predicated region body
PF: predicated region fallthrough
CT: control target
= control target key end

     0   :  { %s1742_s18 = smov 0   ;;  %s1744_s19 = smov 0   ;;  %s2738_s0 = inlined_call_operand.vmem [shape: bf16[2,256,128], index: 0, kind: input, shape index: {}]   ;;  %s2739_s1 = inlined_call_operand.vmem [shape: f32[2,1,128], index: 1, kind: input, shape index: {}]   ;;  %s2740_s2 = inlined_call_operand.vmem [shape: f32[2,1,128], index: 2, kind: input, shape index: {}]   ;;  %s2741_s3 = inlined_call_operand.vmem [shape: f32[1,128], index: 3, kind: input, shape index: {}]   ;;  %s2742_s4 = inlined_call_operand.vmem [shape: f32[1,128], index: 4, kind: input, shape index: {}]   ;;  %s2743_s5 = inlined_call_operand.vmem [shape: bf16[2,256,128], index: 5, kind: output, shape index: {}]  }
   0x1   :  { %s1746_s20 = smov 0  }
   0x2 LB: > { %s27_s21 = sadd.s32 1, %s1706_s19  ;;  %p1313_p0 = scmp.ge.s32.totalorder %s1710_s20, 1  ;;  %s1710_s20 = sphi %s1746_s20, %s15_s20   ;;  %s1706_s19 = sphi %s1744_s19, %s2852_s19   ;;  %s1702_s18 = sphi %s1742_s18, %s2851_s18  }
   0x3   : > { %p29_p1 = scmp.ge.s32.totalorder %s27_s21, 2  ;;  %p224_p2 = scmp.lt.s32.totalorder %s1710_s20, 3 }
   0x5   : > { %s2854_s21 = smov (%p29_p1, %s27_s21), 0  ;;  %p225_p3 = pnand %p1313_p0, %p224_p2 }
   0x6   : > { %p267_p4 = scmp.lt.s32.totalorder (!%p225_p3), %s1702_s18, 1 }
   0x7   : > { %228 = sbr.rel (%p225_p3) target bundleno = 215 (0xd7), region = 40 }
   0xc   : > { %s2856_s18 = smov (!%p267_p4, %s1702_s18), 1  ;;  %v1797_v14 = vld [vmem:[%s2741_s3] ss:$0 sm:$0xff] }
   0xd   : > { %s1352_s22 = sshll.u32 %s2856_s18, 7  ;;  %s1767_s25 = scalar_lea.vmem %s2739_s1, %s2856_s18  ;;  %v1808_v23 = vld [vmem:[%s2742_s4] ss:$0 sm:$0xff] }
   0xe   : > { %s1774_s28 = scalar_lea.vmem %s2738_s0, %s1352_s22  ;;  %s1780_s6 = scalar_lea.vmem %s2740_s2, %s2856_s18  ;;  %v1783_v0 = vld [vmem:[%s1767_s25] ss:$0 sm:$0xff] }
   0xf   : > { %v1355_v1 = vld [vmem:[%s1774_s28] sm:$0xff]   ;;  %v1498_v5 = vld [vmem:[%s1774_s28 + $0x8] sm:$0xff]   ;;  %v1499_v6 = vld [vmem:[%s1774_s28 + $0x10] sm:$0xff]   ;;  %s2015_s13 = scalar_lea.vmem %s2743_s5, %s1352_s22 }
  0x10   : > { %v1787_v2 = vld [vmem:[%s1780_s6] ss:$0 sm:$0xff]  ;;  %v1356_v3 = vunpack.c.l.bf16 %v1355_v1  ;;  %v1357_v4 = vunpack.c.h.bf16 %v1355_v1  ;;  %v1500_v7 = vld [vmem:[%s1774_s28 + $0x18] sm:$0xff]   ;;  %v1360_v8 = vunpack.c.l.bf16 %v1498_v5  ;;  %v1361_v9 = vunpack.c.h.bf16 %v1498_v5  ;;  %v1502_v49 = vld [vmem:[%s1774_s28 + $0x28] sm:$0xff]  }
  0x11   : > { %v1364_v10 = vunpack.c.l.bf16 %v1499_v6  ;;  %v1365_v11 = vunpack.c.h.bf16 %v1499_v6  ;;  %v1368_v15 = vunpack.c.l.bf16 %v1500_v7  ;;  %v1369_v16 = vunpack.c.h.bf16 %v1500_v7  ;;  %v1501_v42 = vld [vmem:[%s1774_s28 + $0x20] sm:$0xff]   ;;  %v1503_v54 = vld [vmem:[%s1774_s28 + $0x30] sm:$0xff]  }
  0x12   : > { %v360_v12 = vsub.f32 %v1356_v3, %v1783_v0  ;;  %v361_v13 = vsub.f32 %v1357_v4, %v1783_v0  ;;  %v362_v17 = vsub.f32 %v1360_v8, %v1783_v0  ;;  %v363_v18 = vsub.f32 %v1361_v9, %v1783_v0 }
  0x13   : > { %v364_v19 = vsub.f32 %v1364_v10, %v1783_v0  ;;  %v365_v20 = vsub.f32 %v1365_v11, %v1783_v0  ;;  %v366_v24 = vsub.f32 %v1368_v15, %v1783_v0  ;;  %v367_v25 = vsub.f32 %v1369_v16, %v1783_v0 }
  0x14   : > { %v396_v21 = vmul.f32 %v1787_v2, %v360_v12  ;;  %v397_v22 = vmul.f32 %v1787_v2, %v361_v13  ;;  %v398_v26 = vmul.f32 %v1787_v2, %v362_v17  ;;  %v399_v27 = vmul.f32 %v1787_v2, %v363_v18 }
  0x15   : > { %v400_v28 = vmul.f32 %v1787_v2, %v364_v19  ;;  %v401_v29 = vmul.f32 %v1787_v2, %v365_v20  ;;  %v402_v32 = vmul.f32 %v1787_v2, %v366_v24  ;;  %v403_v33 = vmul.f32 %v1787_v2, %v367_v25 }
  0x16   : > { %v432_v30 = vmul.f32 %v1797_v14, %v396_v21  ;;  %v433_v31 = vmul.f32 %v1797_v14, %v397_v22  ;;  %v434_v34 = vmul.f32 %v1797_v14, %v398_v26  ;;  %v435_v35 = vmul.f32 %v1797_v14, %v399_v27 }
  0x17   : > { %v436_v36 = vmul.f32 %v1797_v14, %v400_v28  ;;  %v437_v37 = vmul.f32 %v1797_v14, %v401_v29  ;;  %v438_v40 = vmul.f32 %v1797_v14, %v402_v32  ;;  %v439_v41 = vmul.f32 %v1797_v14, %v403_v33 }
  0x18   : > { %v1825_v38 = vadd.f32 %v1808_v23, %v432_v30  ;;  %v1828_v39 = vadd.f32 %v1808_v23, %v433_v31  ;;  %v1834_v43 = vadd.f32 %v1808_v23, %v434_v34  ;;  %v1837_v44 = vadd.f32 %v1808_v23, %v435_v35 }
  0x19   : > { %v1840_v45 = vadd.f32 %v1808_v23, %v436_v36  ;;  %v1843_v46 = vadd.f32 %v1808_v23, %v437_v37  ;;  %v1851_v52 = vadd.f32 %v1808_v23, %v438_v40  ;;  %v1372_v53 = vunpack.c.l.bf16 %v1501_v42 }
  0x1a   : > { %v1318_v47 = vmul.f32 -1.442695, %v1825_v38  ;;  %v1319_v48 = vmul.f32 -1.442695, %v1828_v39  ;;  %v1320_v50 = vmul.f32 -1.442695, %v1834_v43  ;;  %v1857_v57 = vadd.f32 %v1808_v23, %v439_v41 }
  0x1b   : > { %v1321_v51 = vmul.f32 -1.442695, %v1837_v44  ;;  %v1322_v55 = vmul.f32 -1.442695, %v1840_v45  ;;  %v1323_v56 = vmul.f32 -1.442695, %v1843_v46  ;;  %v1373_v58 = vunpack.c.h.bf16 %v1501_v42 }
  0x1c   : > { %1556 = vpow2.f32 %v1318_v47  ;;  %v368_v59 = vsub.f32 %v1372_v53, %v1783_v0  ;;  %v1376_v60 = vunpack.c.l.bf16 %v1502_v49  ;;  %v1377_v61 = vunpack.c.h.bf16 %v1502_v49 }
  0x1d   : > { %1558 = vpow2.f32 %v1319_v48  ;;  %v1380_v62 = vunpack.c.l.bf16 %v1503_v54  ;;  %v1381_v63 = vunpack.c.h.bf16 %v1503_v54  ;;  %v1324_v1 = vmul.f32 -1.442695, %v1851_v52 }
  0x1e   : > { %1560 = vpow2.f32 %v1320_v50  ;;  %v369_v3 = vsub.f32 %v1373_v58, %v1783_v0  ;;  %v404_v4 = vmul.f32 %v1787_v2, %v368_v59  ;;  %v1325_v5 = vmul.f32 -1.442695, %v1857_v57 }
  0x1f   : > { %1562 = vpow2.f32 %v1321_v51  ;;  %v370_v6 = vsub.f32 %v1376_v60, %v1783_v0  ;;  %v371_v7 = vsub.f32 %v1377_v61, %v1783_v0  ;;  %v372_v8 = vsub.f32 %v1380_v62, %v1783_v0 }
  0x20   : > { %1564 = vpow2.f32 %v1322_v55  ;;  %v373_v9 = vsub.f32 %v1381_v63, %v1783_v0  ;;  %v405_v11 = vmul.f32 %v1787_v2, %v369_v3  ;;  %v440_v12 = vmul.f32 %v1797_v14, %v404_v4 }
  0x21   : > { %1566 = vpow2.f32 %v1323_v56  ;;  %v406_v18 = vmul.f32 %v1787_v2, %v370_v6  ;;  %v407_v19 = vmul.f32 %v1787_v2, %v371_v7  ;;  %v1879_v22 = vmul.f32 %v1787_v2, %v372_v8 }
  0x22   : > { %v1557_v10 = vpop.eup %1556  ;;  %1568 = vpow2.f32 %v1324_v1  ;;  %v1882_v24 = vmul.f32 %v1787_v2, %v373_v9  ;;  %v1887_v27 = vmul.f32 %v1797_v14, %v405_v11  ;;  %v1890_v28 = vadd.f32 %v1808_v23, %v440_v12 }
  0x23   : > { %v1559_v13 = vpop.eup %1558  ;;  %v1870_v15 = vadd.f32 1.0, %v1557_v10  ;;  %1570 = vpow2.f32 %v1325_v5  ;;  %v1902_v35 = vmul.f32 %v1797_v14, %v406_v18  ;;  %v1905_v36 = vmul.f32 %v1797_v14, %v407_v19 }
  0x24   : > { %v1561_v16 = vpop.eup %1560  ;;  %v1872_v17 = vadd.f32 1.0, %v1559_v13 }
  0x25   : > { %v1563_v20 = vpop.eup %1562  ;;  %1572 = vrcp.f32 %v1870_v15  ;;  %v639_v21 = vand.u32 2147483648, %v1870_v15  ;;  %v637_v26 = vand.u32 2147483647, %v1870_v15  ;;  %v1894_v32 = vadd.f32 1.0, %v1561_v16 }
  0x26   : > { %v1565_v25 = vpop.eup %1564  ;;  %1574 = vrcp.f32 %v1872_v17  ;;  %v652_v30 = vand.u32 2147483647, %v1872_v17  ;;  %v654_v31 = vand.u32 2147483648, %v1872_v17  ;;  %v1896_v33 = vadd.f32 1.0, %v1563_v20 }
  0x27   : > { %v1567_v29 = vpop.eup %1566  ;;  %vm633_vm0 = vweird.f32 %v1870_v15  ;;  %v1899_v34 = vadd.f32 1.0, %v1565_v25  ;;  %v1907_v40 = vor.u32 1.1754944e-38, %v639_v21  ;;  %vm648_vm1 = vweird.f32 %v1872_v17 }
  0x28   : > { %v1569_v37 = vpop.eup %1568  ;;  %1576 = vrcp.f32 %v1894_v32  ;;  %v669_v41 = vand.u32 2147483648, %v1894_v32  ;;  %vm1912_vm2 = vcmp.eq.f32.partialorder %v637_v26, 8.507059e+37  ;;  %v667_v48 = vand.u32 2147483647, %v1894_v32 }
  0x29   : > { %v1571_v42 = vpop.eup %1570  ;;  %1578 = vrcp.f32 %v1896_v33  ;;  %v684_v49 = vand.u32 2147483648, %v1896_v33  ;;  %v1919_v50 = vadd.f32 1.0, %v1567_v29  ;;  %vm1921_vm3 = vcmp.eq.f32.partialorder %v652_v30, 8.507059e+37 }
  0x2a   : > { %v655_v54 = vor.u32 1.1754944e-38, %v654_v31  ;;  %vm663_vm4 = vweird.f32 %v1894_v32  ;;  %v682_v55 = vand.u32 2147483647, %v1896_v33  ;;  %1580 = vrcp.f32 %v1899_v34 }
  0x2b   : > { %v1573_v51 = vpop.eup %1572  ;;  %v1929_v59 = vor.u32 1.1754944e-38, %v669_v41  ;;  %vm678_vm5 = vweird.f32 %v1896_v33  ;;  %vm693_vm6 = vweird.f32 %v1899_v34  ;;  %v697_v61 = vand.u32 2147483647, %v1899_v34 }
  0x2c   : > { %v1575_v56 = vpop.eup %1574  ;;  %v629_v58 = vmul.f32 %v1573_v51, %v1870_v15  ;;  %vm634_vm7 = vweird.f32 %v1573_v51  ;;  %v699_v62 = vand.u32 2147483648, %v1899_v34  ;;  %vm1936_vm9 = vcmp.eq.f32.partialorder %v667_v48, 8.507059e+37 }
  0x2d   : > { %v644_v60 = vmul.f32 %v1575_v56, %v1872_v17  ;;  %vm649_vm8 = vweird.f32 %v1575_v56  ;;  %v685_v3 = vor.u32 1.1754944e-38, %v684_v49  ;;  %1582 = vrcp.f32 %v1919_v50  ;;  %vm1956_vm13 = vmor %vm633_vm0, %vm634_vm7 }
  0x2e   : > { %v630_v63 = vsub.f32 1.0, %v629_v58  ;;  %v1577_v4 = vpop.eup %1576  ;;  %vm1941_vm10 = vcmp.eq.f32.partialorder %v682_v55, 8.507059e+37  ;;  %v712_v7 = vand.u32 2147483647, %v1919_v50  ;;  %v714_v8 = vand.u32 2147483648, %v1919_v50  ;;  %vm1964_vm11 = vmor %vm648_vm1, %vm649_vm8 }
  0x2f   : > { %v645_v5 = vsub.f32 1.0, %v644_v60  ;;  %v1579_v9 = vpop.eup %1578  ;;  %v659_v11 = vmul.f32 %v1577_v4, %v1894_v32  ;;  %vm1949_vm12 = vcmp.eq.f32.partialorder %v697_v61, 8.507059e+37  ;;  %v700_v13 = vor.u32 1.1754944e-38, %v699_v62 }
  0x30   : > { %v631_v10 = vmul.f32 %v1573_v51, %v630_v63  ;;  %v1581_v16 = vpop.eup %1580  ;;  %vm664_vm14 = vweird.f32 %v1577_v4  ;;  %v674_v20 = vmul.f32 %v1579_v9, %v1896_v33  ;;  %vm679_vm15 = vweird.f32 %v1579_v9 }
  0x31   : > { %v646_v19 = vmul.f32 %v1575_v56, %v645_v5  ;;  %v660_v26 = vsub.f32 1.0, %v659_v11  ;;  %v689_v15 = vmul.f32 %v1581_v16, %v1899_v34  ;;  %v715_v29 = vor.u32 1.1754944e-38, %v714_v8  ;;  %vm1987_vm1 = vmor %vm663_vm4, %vm664_vm14 }
  0x32   : > { %v632_v21 = vadd.f32 %v1573_v51, %v631_v10  ;;  %v675_v31 = vsub.f32 1.0, %v674_v20  ;;  %vm694_vm0 = vweird.f32 %v1581_v16  ;;  %vm1969_vm7 = vcmp.eq.f32.partialorder %v712_v7, 8.507059e+37 }
  0x33   : > { %v647_v30 = vadd.f32 %v1575_v56, %v646_v19  ;;  %v1973_v48 = vadd.f32 1.0, %v1569_v37  ;;  %v1583_v49 = vpop.eup %1582  ;;  %v661_v55 = vmul.f32 %v1577_v4, %v660_v26  ;;  %v690_v58 = vsub.f32 1.0, %v689_v15  ;;  %vm2006_vm4 = vmor %vm693_vm6, %vm694_vm0 }
  0x34   : > { %v636_v17 = vsel %vm1956_vm13, %v1573_v51, %v632_v21  ;;  %v1977_v60 = vadd.f32 1.0, %v1571_v42  ;;  %v676_v51 = vmul.f32 %v1579_v9, %v675_v31  ;;  %v704_v63 = vmul.f32 %v1583_v49, %v1919_v50  ;;  %v1504_v31 = vld [vmem:[%s1774_s28 + $0x38] sm:$0xff]  }
  0x35   : > { %v641_v61 = vsel %vm1912_vm2, %v1907_v40, %v636_v17  ;;  %v651_v62 = vsel %vm1964_vm11, %v1575_v56, %v647_v30  ;;  %v662_v5 = vadd.f32 %v1577_v4, %v661_v55  ;;  %vm1998_vm2 = vmor %vm678_vm5, %vm679_vm15  ;;  %v691_v32 = vmul.f32 %v1581_v16, %v690_v58 }
  0x36   : > { %v656_v42 = vsel %vm1921_vm3, %v655_v54, %v651_v62  ;;  %v1108_v47 = vmul.f32 %v641_v61, %v1825_v38  ;;  %v677_v7 = vadd.f32 %v1579_v9, %v676_v51  ;;  %v705_v38 = vsub.f32 1.0, %v704_v63 }
  0x37   : > { %v1109_v56 = vmul.f32 %v656_v42, %v1828_v39  ;;  %vm709_vm3 = vweird.f32 %v1583_v49  ;;  %v666_v39 = vsel %vm1987_vm1, %v1577_v4, %v662_v5  ;;  %v692_v33 = vadd.f32 %v1581_v16, %v691_v32 }
  0x38   : > { %1584 = vrcp.f32 %v1973_v48  ;;  %v2022_v34 = vadd.f32 %v1808_v23, %v1887_v27  ;;  %v671_v8 = vsel %vm1936_vm9, %v1929_v59, %v666_v39  ;;  %v681_v10 = vsel %vm1998_vm2, %v1579_v9, %v677_v7 }
  0x39   : > { %v1421_v54 = vpack.c.bf16 %v1109_v56, %v1108_v47  ;;  %v706_v11 = vmul.f32 %v1583_v49, %v705_v38  ;;  %v686_v18 = vsel %vm1941_vm10, %v685_v3, %v681_v10  ;;  %v1110_v4 = vmul.f32 %v671_v8, %v1834_v43 }
  0x3a   : > { %v696_v19 = vsel %vm2006_vm4, %v1581_v16, %v692_v33  ;;  %vm2766_vm5 = vweird.f32 %v1919_v50  ;;  %v727_v59 = vand.u32 2147483647, %v1973_v48  ;;  %v1111_v1 = vmul.f32 %v686_v18, %v1837_v44 }
  0x3b   : > { %vm2036_vm6 = vmor %vm2766_vm5, %vm709_vm3  ;;  %1422 = vst [vmem:[%s2015_s13] sm:$0xff] %v1421_v54   ;;  %v701_v6 = vsel %vm1949_vm12, %v700_v13, %v696_v19  ;;  %v707_v3 = vadd.f32 %v1583_v49, %v706_v11  ;;  %v729_v43 = vand.u32 2147483648, %v1973_v48  ;;  %vm723_vm8 = vweird.f32 %v1973_v48 }
  0x3c   : > { %v1112_v9 = vmul.f32 %v701_v6, %v1840_v45  ;;  %1586 = vrcp.f32 %v1977_v60  ;;  %v444_v50 = vmul.f32 %v1797_v14, %v1879_v22  ;;  %v1426_v16 = vpack.c.bf16 %v1111_v1, %v1110_v4 }
  0x3d   : > { %v711_v44 = vsel %vm2036_vm6, %v1583_v49, %v707_v3  ;;  %vm2053_vm9 = vcmp.eq.f32.partialorder %v727_v59, 8.507059e+37  ;;  %vm738_vm10 = vweird.f32 %v1977_v60  ;;  %v730_v20 = vor.u32 1.1754944e-38, %v729_v43 }
  0x3e   : > { %v1585_v13 = vpop.eup %1584  ;;  %v716_v45 = vsel %vm1969_vm7, %v715_v29, %v711_v44  ;;  %v1326_v21 = vmul.f32 -1.442695, %v1890_v28  ;;  %v1327_v25 = vmul.f32 -1.442695, %v2022_v34  ;;  %1513 = vst [vmem:[%s2015_s13 + $0x8] sm:$0xff] %v1426_v16   ;;  %v744_v30 = vand.u32 2147483648, %v1977_v60 }
  0x3f   : > { %v1113_v22 = vmul.f32 %v716_v45, %v1843_v46  ;;  %v719_v26 = vmul.f32 %v1585_v13, %v1973_v48  ;;  %v742_v15 = vand.u32 2147483647, %v1977_v60  ;;  %vm724_vm11 = vweird.f32 %v1585_v13  ;;  %v2100_v48 = vld [vmem:[%s1774_s28 + $0x40] sm:$0xff]  }
  0x40   : > { %1588 = vpow2.f32 %v1326_v21  ;;  %v2070_v29 = vadd.f32 %v1808_v23, %v1902_v35  ;;  %v2074_v41 = vadd.f32 %v1808_v23, %v1905_v36  ;;  %v445_v17 = vmul.f32 %v1797_v14, %v1882_v24  ;;  %vm2091_vm13 = vmor %vm723_vm8, %vm724_vm11 }
  0x41   : > { %v1431_v49 = vpack.c.bf16 %v1113_v22, %v1112_v9  ;;  %v720_v46 = vsub.f32 1.0, %v719_v26  ;;  %1590 = vpow2.f32 %v1327_v25  ;;  %v2081_v62 = vadd.f32 %v1808_v23, %v444_v50 }
  0x42   : > { %v1587_v55 = vpop.eup %1586  ;;  %v1328_v58 = vmul.f32 -1.442695, %v2070_v29  ;;  %v1329_v61 = vmul.f32 -1.442695, %v2074_v41  ;;  %v1384_v35 = vunpack.c.l.bf16 %v1504_v31  ;;  %v2086_v51 = vadd.f32 %v1808_v23, %v445_v17 }
  0x43   : > { %1514 = vst [vmem:[%s2015_s13 + $0x10] sm:$0xff] %v1431_v49   ;;  %v721_v37 = vmul.f32 %v1585_v13, %v720_v46  ;;  %v734_v36 = vmul.f32 %v1587_v55, %v1977_v60  ;;  %vm739_vm12 = vweird.f32 %v1587_v55  ;;  %v1330_v63 = vmul.f32 -1.442695, %v2081_v62 }
  0x44   : > { %1592 = vpow2.f32 %v1328_v58  ;;  %v1385_v42 = vunpack.c.h.bf16 %v1504_v31  ;;  %v374_v47 = vsub.f32 %v1384_v35, %v1783_v0  ;;  %v1331_v32 = vmul.f32 -1.442695, %v2086_v51  ;;  %vm2111_vm14 = vmor %vm738_vm10, %vm739_vm12 }
  0x45   : > { %v722_v5 = vadd.f32 %v1585_v13, %v721_v37  ;;  %v735_v40 = vsub.f32 1.0, %v734_v36  ;;  %1594 = vpow2.f32 %v1329_v61  ;;  %v745_v7 = vor.u32 1.1754944e-38, %v744_v30 }
  0x46   : > { %v1589_v56 = vpop.eup %1588  ;;  %v375_v53 = vsub.f32 %v1385_v42, %v1783_v0  ;;  %1596 = vpow2.f32 %v1330_v63  ;;  %v410_v18 = vmul.f32 %v1787_v2, %v374_v47  ;;  %vm743_vm15 = vcmp.eq.f32.partialorder %v742_v15, 8.507059e+37 }
  0x47   : > { %v1591_v38 = vpop.eup %1590  ;;  %v726_v39 = vsel %vm2091_vm13, %v1585_v13, %v722_v5  ;;  %v736_v33 = vmul.f32 %v1587_v55, %v735_v40  ;;  %v2104_v54 = vadd.f32 1.0, %v1589_v56  ;;  %1598 = vpow2.f32 %v1331_v32 }
  0x48   : > { %v731_v8 = vsel %vm2053_vm9, %v730_v20, %v726_v39  ;;  %v2115_v11 = vadd.f32 1.0, %v1591_v38  ;;  %v1388_v19 = vunpack.c.l.bf16 %v2100_v48  ;;  %v411_v1 = vmul.f32 %v1787_v2, %v375_v53 }
  0x49   : > { %v737_v4 = vadd.f32 %v1587_v55, %v736_v33  ;;  %1600 = vrcp.f32 %v2104_v54  ;;  %v757_v59 = vand.u32 2147483647, %v2104_v54  ;;  %v759_v60 = vand.u32 2147483648, %v2104_v54 }
  0x4a   : > { %v1593_v27 = vpop.eup %1592  ;;  %1602 = vrcp.f32 %v2115_v11  ;;  %v1114_v43 = vmul.f32 %v731_v8, %v1851_v52  ;;  %v772_v9 = vand.u32 2147483647, %v2115_v11  ;;  %v774_v44 = vand.u32 2147483648, %v2115_v11 }
  0x4b   : > { %v1595_v6 = vpop.eup %1594  ;;  %v741_v3 = vsel %vm2111_vm14, %v1587_v55, %v737_v4  ;;  %v2128_v50 = vadd.f32 1.0, %v1593_v27  ;;  %v446_v13 = vmul.f32 %v1797_v14, %v410_v18  ;;  %vm753_vm0 = vweird.f32 %v2104_v54 }
  0x4c   : > { %v746_v16 = vsel %vm743_vm15, %v745_v7, %v741_v3  ;;  %v2131_v12 = vadd.f32 1.0, %v1595_v6  ;;  %v1597_v45 = vpop.eup %1596  ;;  %vm768_vm7 = vweird.f32 %v2115_v11  ;;  %vm2138_vm1 = vcmp.eq.f32.partialorder %v757_v59, 8.507059e+37 }
  0x4d   : > { %v1115_v20 = vmul.f32 %v746_v16, %v1857_v57  ;;  %1604 = vrcp.f32 %v2128_v50  ;;  %v1599_v52 = vpop.eup %1598  ;;  %v760_v25 = vor.u32 1.1754944e-38, %v759_v60  ;;  %v787_v22 = vand.u32 2147483647, %v2128_v50 }
  0x4e   : > { %v789_v26 = vand.u32 2147483648, %v2128_v50  ;;  %1606 = vrcp.f32 %v2131_v12  ;;  %vm2145_vm2 = vcmp.eq.f32.partialorder %v772_v9, 8.507059e+37  ;;  %v802_v31 = vand.u32 2147483647, %v2131_v12 }
  0x4f   : > { %v1601_v57 = vpop.eup %1600  ;;  %v1436_v15 = vpack.c.bf16 %v1115_v20, %v1114_v43  ;;  %v804_v49 = vand.u32 2147483648, %v2131_v12  ;;  %v775_v55 = vor.u32 1.1754944e-38, %v774_v44  ;;  %vm783_vm4 = vweird.f32 %v2128_v50 }
  0x50   : > { %v1603_v46 = vpop.eup %1602  ;;  %v749_v17 = vmul.f32 %v1601_v57, %v2104_v54  ;;  %vm798_vm3 = vweird.f32 %v2131_v12  ;;  %vm754_vm5 = vweird.f32 %v1601_v57  ;;  %v790_v61 = vor.u32 1.1754944e-38, %v789_v26 }
  0x51   : > { %1515 = vst [vmem:[%s2015_s13 + $0x18] sm:$0xff] %v1436_v15   ;;  %v764_v58 = vmul.f32 %v1603_v46, %v2115_v11  ;;  %vm769_vm6 = vweird.f32 %v1603_v46  ;;  %vm2156_vm8 = vcmp.eq.f32.partialorder %v787_v22, 8.507059e+37  ;;  %v805_v36 = vor.u32 1.1754944e-38, %v804_v49  ;;  %vm2179_vm10 = vmor %vm753_vm0, %vm754_vm5 }
  0x52   : > { %v750_v35 = vsub.f32 1.0, %v749_v17  ;;  %v2160_v24 = vadd.f32 1.0, %v1597_v45  ;;  %v2162_v63 = vadd.f32 1.0, %v1599_v52  ;;  %vm2164_vm9 = vcmp.eq.f32.partialorder %v802_v31, 8.507059e+37  ;;  %vm2187_vm13 = vmor %vm768_vm7, %vm769_vm6  ;;  %v1506_v17 = vld [vmem:[%s1774_s28 + $0x48] sm:$0xff]  }
  0x53   : > { %v1605_v42 = vpop.eup %1604  ;;  %v765_v47 = vsub.f32 1.0, %v764_v58  ;;  %v447_v40 = vmul.f32 %v1797_v14, %v411_v1  ;;  %v2170_v32 = vadd.f32 %v1808_v23, %v446_v13  ;;  %v1389_v56 = vunpack.c.h.bf16 %v2100_v48 }
  0x54   : > { %v1607_v7 = vpop.eup %1606  ;;  %v751_v53 = vmul.f32 %v1601_v57, %v750_v35  ;;  %v779_v38 = vmul.f32 %v1605_v42, %v2128_v50  ;;  %1608 = vrcp.f32 %v2160_v24  ;;  %v376_v39 = vsub.f32 %v1388_v19, %v1783_v0 }
  0x55   : > { %v766_v8 = vmul.f32 %v1603_v46, %v765_v47  ;;  %vm784_vm11 = vweird.f32 %v1605_v42  ;;  %v794_v10 = vmul.f32 %v1607_v7, %v2131_v12  ;;  %vm799_vm12 = vweird.f32 %v1607_v7 }
  0x56   : > { %v752_v48 = vadd.f32 %v1601_v57, %v751_v53  ;;  %v780_v4 = vsub.f32 1.0, %v779_v38  ;;  %v817_v54 = vand.u32 2147483647, %v2160_v24  ;;  %v819_v19 = vand.u32 2147483648, %v2160_v24  ;;  %vm2205_vm0 = vmor %vm783_vm4, %vm784_vm11 }
  0x57   : > { %v767_v27 = vadd.f32 %v1603_v46, %v766_v8  ;;  %v795_v59 = vsub.f32 1.0, %v794_v10  ;;  %vm813_vm14 = vweird.f32 %v2160_v24  ;;  %1610 = vrcp.f32 %v2162_v63 }
  0x58   : > { %v756_v60 = vsel %vm2179_vm10, %v1601_v57, %v752_v48  ;;  %v781_v1 = vmul.f32 %v1605_v42, %v780_v4  ;;  %v820_v11 = vor.u32 1.1754944e-38, %v819_v19  ;;  %vm828_vm15 = vweird.f32 %v2162_v63 }
  0x59   : > { %v761_v6 = vsel %vm2138_vm1, %v760_v25, %v756_v60  ;;  %v771_v3 = vsel %vm2187_vm13, %v1603_v46, %v767_v27  ;;  %v796_v9 = vmul.f32 %v1607_v7, %v795_v59  ;;  %vm2209_vm7 = vcmp.eq.f32.partialorder %v817_v54, 8.507059e+37  ;;  %vm2220_vm1 = vmor %vm798_vm3, %vm799_vm12 }
  0x5a   : > { %v832_v44 = vand.u32 2147483647, %v2162_v63  ;;  %v1609_v13 = vpop.eup %1608  ;;  %v776_v45 = vsel %vm2145_vm2, %v775_v55, %v771_v3  ;;  %v1116_v20 = vmul.f32 %v761_v6, %v1890_v28  ;;  %v782_v52 = vadd.f32 %v1605_v42, %v781_v1 }
  0x5b   : > { %v834_v21 = vand.u32 2147483648, %v2162_v63  ;;  %v1117_v25 = vmul.f32 %v776_v45, %v2022_v34  ;;  %v797_v22 = vadd.f32 %v1607_v7, %v796_v9  ;;  %v809_v26 = vmul.f32 %v1609_v13, %v2160_v24 }
  0x5c   : > { %vm814_vm2 = vweird.f32 %v1609_v13  ;;  %v786_v28 = vsel %vm2205_vm0, %v1605_v42, %v782_v52  ;;  %vm2229_vm4 = vcmp.eq.f32.partialorder %v832_v44, 8.507059e+37  ;;  %v2234_v15 = vadd.f32 %v1808_v23, %v447_v40 }
  0x5d   : > { %v835_v12 = vor.u32 1.1754944e-38, %v834_v21  ;;  %v1611_v30 = vpop.eup %1610  ;;  %v1441_v31 = vpack.c.bf16 %v1117_v25, %v1116_v20  ;;  %v791_v34 = vsel %vm2156_vm8, %v790_v61, %v786_v28  ;;  %v801_v49 = vsel %vm2220_vm1, %v1607_v7, %v797_v22  ;;  %vm2252_vm5 = vmor %vm813_vm14, %vm814_vm2 }
  0x5e   : > { %v810_v46 = vsub.f32 1.0, %v809_v26  ;;  %v806_v55 = vsel %vm2164_vm9, %v805_v36, %v801_v49  ;;  %v1118_v58 = vmul.f32 %v791_v34, %v2070_v29  ;;  %v824_v35 = vmul.f32 %v1611_v30, %v2162_v63 }
  0x5f   : > { %vm829_vm3 = vweird.f32 %v1611_v30  ;;  %1516 = vst [vmem:[%s2015_s13 + $0x20] sm:$0xff] %v1441_v31   ;;  %v1119_v42 = vmul.f32 %v806_v55, %v2074_v41  ;;  %v1332_v61 = vmul.f32 -1.442695, %v2170_v32  ;;  %v1333_v37 = vmul.f32 -1.442695, %v2234_v15  ;;  %v1507_v41 = vld [vmem:[%s1774_s28 + $0x50] sm:$0xff]  }
  0x60   : > { %v811_v47 = vmul.f32 %v1609_v13, %v810_v46  ;;  %v825_v29 = vsub.f32 1.0, %v824_v35  ;;  %v377_v36 = vsub.f32 %v1389_v56, %v1783_v0  ;;  %v412_v40 = vmul.f32 %v1787_v2, %v376_v39  ;;  %vm2267_vm6 = vmor %vm828_vm15, %vm829_vm3 }
  0x61   : > { %v1392_v7 = vunpack.c.l.bf16 %v1506_v17  ;;  %v1446_v53 = vpack.c.bf16 %v1119_v42, %v1118_v58  ;;  %1612 = vpow2.f32 %v1332_v61  ;;  %v1393_v33 = vunpack.c.h.bf16 %v1506_v17 }
  0x62   : > { %v812_v38 = vadd.f32 %v1609_v13, %v811_v47  ;;  %v826_v8 = vmul.f32 %v1611_v30, %v825_v29  ;;  %1614 = vpow2.f32 %v1333_v37  ;;  %v413_v10 = vmul.f32 %v1787_v2, %v377_v36 }
  0x63   : > { %v448_v24 = vmul.f32 %v1797_v14, %v412_v40  ;;  %1517 = vst [vmem:[%s2015_s13 + $0x28] sm:$0xff] %v1446_v53   ;;  %v378_v39 = vsub.f32 %v1392_v7, %v1783_v0  ;;  %v379_v18 = vsub.f32 %v1393_v33, %v1783_v0  ;;  %v1396_v4 = vunpack.c.l.bf16 %v1507_v41  ;;  %v2331_v53 = vld [vmem:[%s1774_s28 + $0x60] sm:$0xff]  }
  0x64   : > { %v816_v48 = vsel %vm2252_vm5, %v1609_v13, %v812_v38  ;;  %v827_v19 = vadd.f32 %v1611_v30, %v826_v8  ;;  %v449_v27 = vmul.f32 %v1797_v14, %v413_v10  ;;  %v1397_v6 = vunpack.c.h.bf16 %v1507_v41 }
  0x65   : > { %v821_v54 = vsel %vm2209_vm7, %v820_v11, %v816_v48  ;;  %v2277_v59 = vadd.f32 %v1808_v23, %v448_v24  ;;  %v414_v60 = vmul.f32 %v1787_v2, %v378_v39  ;;  %v415_v1 = vmul.f32 %v1787_v2, %v379_v18 }
  0x66   : > { %v1120_v63 = vmul.f32 %v821_v54, %v2081_v62  ;;  %v831_v3 = vsel %vm2267_vm6, %v1611_v30, %v827_v19  ;;  %v2285_v43 = vadd.f32 %v1808_v23, %v449_v27  ;;  %v380_v9 = vsub.f32 %v1396_v4, %v1783_v0  ;;  %v1508_v30 = vld [vmem:[%s1774_s28 + $0x58] sm:$0xff]  }
  0x67   : > { %v1334_v11 = vmul.f32 -1.442695, %v2277_v59  ;;  %v1613_v16 = vpop.eup %1612  ;;  %v836_v44 = vsel %vm2229_vm4, %v835_v12, %v831_v3  ;;  %v450_v62 = vmul.f32 %v1797_v14, %v414_v60  ;;  %v451_v13 = vmul.f32 %v1797_v14, %v415_v1 }
  0x68   : > { %v1615_v45 = vpop.eup %1614  ;;  %v1121_v20 = vmul.f32 %v836_v44, %v2086_v51  ;;  %v610_v52 = vadd.f32 1.0, %v1613_v16  ;;  %v1335_v50 = vmul.f32 -1.442695, %v2285_v43  ;;  %v381_v26 = vsub.f32 %v1397_v6, %v1783_v0 }
  0x69   : > { %1616 = vpow2.f32 %v1334_v11  ;;  %v2295_v21 = vadd.f32 1.0, %v1615_v45  ;;  %v2298_v25 = vadd.f32 %v1808_v23, %v450_v62  ;;  %v2301_v22 = vadd.f32 %v1808_v23, %v451_v13 }
  0x6a   : > { %v1451_v28 = vpack.c.bf16 %v1121_v20, %v1120_v63  ;;  %1618 = vrcp.f32 %v610_v52  ;;  %v416_v57 = vmul.f32 %v1787_v2, %v380_v9  ;;  %v847_v12 = vand.u32 2147483647, %v610_v52 }
  0x6b   : > { %v849_v51 = vand.u32 2147483648, %v610_v52  ;;  %1620 = vrcp.f32 %v2295_v21  ;;  %v862_v31 = vand.u32 2147483647, %v2295_v21  ;;  %v864_v34 = vand.u32 2147483648, %v2295_v21 }
  0x6c   : > { %1518 = vst [vmem:[%s2015_s13 + $0x30] sm:$0xff] %v1451_v28   ;;  %1622 = vpow2.f32 %v1335_v50  ;;  %v1336_v49 = vmul.f32 -1.442695, %v2298_v25  ;;  %v1337_v46 = vmul.f32 -1.442695, %v2301_v22  ;;  %v417_v17 = vmul.f32 %v1787_v2, %v381_v26 }
  0x6d   : > { %vm843_vm8 = vweird.f32 %v610_v52  ;;  %v452_v58 = vmul.f32 %v1797_v14, %v416_v57  ;;  %v1400_v35 = vunpack.c.l.bf16 %v1508_v30  ;;  %vm2314_vm9 = vcmp.eq.f32.partialorder %v847_v12, 8.507059e+37 }
  0x6e   : > { %1624 = vpow2.f32 %v1336_v49  ;;  %vm858_vm10 = vweird.f32 %v2295_v21  ;;  %v850_v37 = vor.u32 1.1754944e-38, %v849_v51  ;;  %vm2321_vm11 = vcmp.eq.f32.partialorder %v862_v31, 8.507059e+37 }
  0x6f   : > { %v1617_v55 = vpop.eup %1616  ;;  %1626 = vpow2.f32 %v1337_v46  ;;  %v865_v5 = vor.u32 1.1754944e-38, %v864_v34  ;;  %v2326_v29 = vadd.f32 %v1808_v23, %v452_v58  ;;  %v453_v7 = vmul.f32 %v1797_v14, %v417_v17 }
  0x70   : > { %v2319_v47 = vadd.f32 1.0, %v1617_v55  ;;  %v1619_v61 = vpop.eup %1618  ;;  %v1401_v41 = vunpack.c.h.bf16 %v1508_v30  ;;  %v2337_v24 = vsub.f32 %v1400_v35, %v1783_v0  ;;  %v1404_v4 = vunpack.c.l.bf16 %v2331_v53 }
  0x71   : > { %v1621_v36 = vpop.eup %1620  ;;  %v839_v40 = vmul.f32 %v1619_v61, %v610_v52  ;;  %vm844_vm12 = vweird.f32 %v1619_v61  ;;  %v1338_v39 = vmul.f32 -1.442695, %v2326_v29  ;;  %v1405_v54 = vunpack.c.h.bf16 %v2331_v53 }
  0x72   : > { %1628 = vrcp.f32 %v2319_v47  ;;  %v1623_v38 = vpop.eup %1622  ;;  %v854_v33 = vmul.f32 %v1621_v36, %v2295_v21  ;;  %v877_v8 = vand.u32 2147483647, %v2319_v47  ;;  %v879_v10 = vand.u32 2147483648, %v2319_v47  ;;  %vm2350_vm15 = vmor %vm843_vm8, %vm844_vm12 }
  0x73   : > { %v840_v48 = vsub.f32 1.0, %v839_v40  ;;  %v2339_v56 = vadd.f32 1.0, %v1623_v38  ;;  %vm859_vm13 = vweird.f32 %v1621_v36  ;;  %vm873_vm14 = vweird.f32 %v2319_v47  ;;  %v2418_v38 = vld [vmem:[%s1780_s6] ss:$0 sm:$0xff] }
  0x74   : > { %v1625_v14 = vpop.eup %1624  ;;  %v855_v18 = vsub.f32 1.0, %v854_v33  ;;  %v2347_v63 = vadd.f32 %v1808_v23, %v453_v7  ;;  %vm2354_vm0 = vcmp.eq.f32.partialorder %v877_v8, 8.507059e+37  ;;  %v880_v3 = vor.u32 1.1754944e-38, %v879_v10  ;;  %vm2366_vm7 = vmor %vm858_vm10, %vm859_vm13 }
  0x75   : > { %v1627_v19 = vpop.eup %1626  ;;  %v841_v27 = vmul.f32 %v1619_v61, %v840_v48  ;;  %1630 = vrcp.f32 %v2339_v56  ;;  %v2358_v11 = vadd.f32 1.0, %v1625_v14  ;;  %v2361_v9 = vsub.f32 %v1401_v41, %v1783_v0 }
  0x76   : > { %v856_v1 = vmul.f32 %v1621_v36, %v855_v18  ;;  %vm888_vm1 = vweird.f32 %v2339_v56  ;;  %v2371_v62 = vadd.f32 1.0, %v1627_v19  ;;  %1632 = vpow2.f32 %v1338_v39 }
  0x77   : > { %v842_v44 = vadd.f32 %v1619_v61, %v841_v27  ;;  %v892_v0 = vand.u32 2147483647, %v2339_v56  ;;  %v894_v20 = vand.u32 2147483648, %v2339_v56  ;;  %1634 = vrcp.f32 %v2358_v11 }
  0x78   : > { %v1629_v16 = vpop.eup %1628  ;;  %v857_v13 = vadd.f32 %v1621_v36, %v856_v1  ;;  %v1339_v50 = vmul.f32 -1.442695, %v2347_v63  ;;  %v907_v57 = vand.u32 2147483647, %v2358_v11  ;;  %v909_v31 = vand.u32 2147483648, %v2358_v11 }
  0x79   : > { %v869_v45 = vmul.f32 %v1629_v16, %v2319_v47  ;;  %v846_v52 = vsel %vm2350_vm15, %v1619_v61, %v842_v44  ;;  %vm874_vm2 = vweird.f32 %v1629_v16  ;;  %1636 = vrcp.f32 %v2371_v62  ;;  %v2447_v44 = vld [vmem:[%s2741_s3] ss:$0 sm:$0xff] }
  0x7a   : > { %v851_v21 = vsel %vm2314_vm9, %v850_v37, %v846_v52  ;;  %v861_v26 = vsel %vm2366_vm7, %v1621_v36, %v857_v13  ;;  %vm2392_vm4 = vcmp.eq.f32.partialorder %v892_v0, 8.507059e+37  ;;  %vm2399_vm3 = vmor %vm873_vm14, %vm874_vm2  ;;  %v895_v58 = vor.u32 1.1754944e-38, %v894_v20 }
  0x7b   : > { %v870_v28 = vsub.f32 1.0, %v869_v45  ;;  %v1631_v12 = vpop.eup %1630  ;;  %v866_v51 = vsel %vm2321_vm11, %v865_v5, %v861_v26  ;;  %v1122_v30 = vmul.f32 %v851_v21, %v2170_v32  ;;  %vm903_vm6 = vweird.f32 %v2358_v11 }
  0x7c   : > { %v1123_v34 = vmul.f32 %v866_v51, %v2234_v15  ;;  %v884_v46 = vmul.f32 %v1631_v12, %v2339_v56  ;;  %v1633_v55 = vpop.eup %1632  ;;  %vm889_vm5 = vweird.f32 %v1631_v12  ;;  %v922_v15 = vand.u32 2147483647, %v2371_v62 }
  0x7d   : > { %v871_v49 = vmul.f32 %v1629_v16, %v870_v28  ;;  %vm2405_vm8 = vcmp.eq.f32.partialorder %v907_v57, 8.507059e+37  ;;  %1638 = vpow2.f32 %v1339_v50  ;;  %v1635_v47 = vpop.eup %1634  ;;  %v910_v2 = vor.u32 1.1754944e-38, %v909_v31  ;;  %vm2427_vm10 = vmor %vm888_vm1, %vm889_vm5 }
  0x7e   : > { %v1456_v35 = vpack.c.bf16 %v1123_v34, %v1122_v30  ;;  %v885_v61 = vsub.f32 1.0, %v884_v46  ;;  %vm918_vm9 = vweird.f32 %v2371_v62  ;;  %v924_v5 = vand.u32 2147483648, %v2371_v62  ;;  %v1510_v46 = vld [vmem:[%s1774_s28 + $0x68] sm:$0xff]  }
  0x7f   : > { %v872_v42 = vadd.f32 %v1629_v16, %v871_v49  ;;  %v2411_v36 = vadd.f32 1.0, %v1633_v55  ;;  %v899_v41 = vmul.f32 %v1635_v47, %v2358_v11  ;;  %v418_v33 = vmul.f32 %v2418_v38, %v2337_v24  ;;  %v1637_v8 = vpop.eup %1636 }
  0x80   : > { %1519 = vst [vmem:[%s2015_s13 + $0x38] sm:$0xff] %v1456_v35   ;;  %v886_v7 = vmul.f32 %v1631_v12, %v885_v61  ;;  %vm904_vm11 = vweird.f32 %v1635_v47  ;;  %vm2431_vm12 = vcmp.eq.f32.partialorder %v922_v15, 8.507059e+37  ;;  %v914_v18 = vmul.f32 %v1637_v8, %v2371_v62 }
  0x81   : > { %v876_v40 = vsel %vm2399_vm3, %v1629_v16, %v872_v42  ;;  %1640 = vrcp.f32 %v2411_v36  ;;  %v900_v24 = vsub.f32 1.0, %v899_v41  ;;  %v937_v19 = vand.u32 2147483647, %v2411_v36  ;;  %vm2455_vm14 = vmor %vm903_vm6, %vm904_vm11  ;;  %v2504_v42 = vld [vmem:[%s1767_s25] ss:$0 sm:$0xff] }
  0x82   : > { %v881_v10 = vsel %vm2354_vm0, %v880_v3, %v876_v40  ;;  %v887_v14 = vadd.f32 %v1631_v12, %v886_v7  ;;  %vm919_vm13 = vweird.f32 %v1637_v8  ;;  %v939_v56 = vand.u32 2147483648, %v2411_v36 }
  0x83   : > { %v1124_v27 = vmul.f32 %v881_v10, %v2277_v59  ;;  %v419_v60 = vmul.f32 %v2418_v38, %v2361_v9  ;;  %v1639_v1 = vpop.eup %1638  ;;  %v901_v3 = vmul.f32 %v1635_v47, %v900_v24  ;;  %v915_v16 = vsub.f32 1.0, %v914_v18  ;;  %vm2467_vm0 = vmor %vm918_vm9, %vm919_vm13 }
  0x84   : > { %v891_v6 = vsel %vm2427_vm10, %v1631_v12, %v887_v14  ;;  %v454_v23 = vmul.f32 %v2447_v44, %v418_v33  ;;  %v925_v13 = vor.u32 1.1754944e-38, %v924_v5  ;;  %v2459_v45 = vadd.f32 1.0, %v1639_v1 }
  0x85   : > { %v896_v59 = vsel %vm2392_vm4, %v895_v58, %v891_v6  ;;  %vm933_vm15 = vweird.f32 %v2411_v36  ;;  %v902_v20 = vadd.f32 %v1635_v47, %v901_v3  ;;  %v916_v52 = vmul.f32 %v1637_v8, %v915_v16 }
  0x86   : > { %v1125_v0 = vmul.f32 %v896_v59, %v2285_v43  ;;  %v455_v50 = vmul.f32 %v2447_v44, %v419_v60  ;;  %vm2471_vm7 = vcmp.eq.f32.partialorder %v937_v19, 8.507059e+37  ;;  %v940_v28 = vor.u32 1.1754944e-38, %v939_v56  ;;  %v2479_v43 = vld [vmem:[%s2742_s4] ss:$0 sm:$0xff] }
  0x87   : > { %v1641_v21 = vpop.eup %1640  ;;  %1642 = vrcp.f32 %v2459_v45  ;;  %v2482_v62 = vadd.f32 %v2479_v43, %v454_v23  ;;  %v906_v12 = vsel %vm2455_vm14, %v1635_v47, %v902_v20  ;;  %v917_v51 = vadd.f32 %v1637_v8, %v916_v52 }
  0x88   : > { %v1461_v57 = vpack.c.bf16 %v1125_v0, %v1124_v27  ;;  %v929_v30 = vmul.f32 %v1641_v21, %v2411_v36  ;;  %vm948_vm1 = vweird.f32 %v2459_v45  ;;  %v911_v31 = vsel %vm2405_vm8, %v910_v2, %v906_v12 }
  0x89   : > { %vm934_vm2 = vweird.f32 %v1641_v21  ;;  %v952_v34 = vand.u32 2147483647, %v2459_v45  ;;  %v954_v49 = vand.u32 2147483648, %v2459_v45  ;;  %v921_v17 = vsel %vm2467_vm0, %v1637_v8, %v917_v51 }
  0x8a   : > { %1520 = vst [vmem:[%s2015_s13 + $0x40] sm:$0xff] %v1461_v57   ;;  %v1126_v55 = vmul.f32 %v911_v31, %v2298_v25  ;;  %v930_v32 = vsub.f32 1.0, %v929_v30  ;;  %v2498_v58 = vadd.f32 %v2479_v43, %v455_v50  ;;  %v926_v15 = vsel %vm2431_vm12, %v925_v13, %v921_v17  ;;  %vm2517_vm4 = vmor %vm933_vm15, %vm934_vm2  ;;  %v2563_v31 = vld [vmem:[%s1774_s28 + $0x78] sm:$0xff]  }
  0x8b   : > { %v1340_v35 = vmul.f32 -1.442695, %v2482_v62  ;;  %v384_v61 = vsub.f32 %v1404_v4, %v2504_v42  ;;  %v385_v25 = vsub.f32 %v1405_v54, %v2504_v42  ;;  %v1127_v37 = vmul.f32 %v926_v15, %v2301_v22  ;;  %v1511_v22 = vld [vmem:[%s1774_s28 + $0x70] sm:$0xff]  }
  0x8c   : > { %v931_v47 = vmul.f32 %v1641_v21, %v930_v32  ;;  %v1341_v2 = vmul.f32 -1.442695, %v2498_v58  ;;  %v1408_v5 = vunpack.c.l.bf16 %v1510_v46  ;;  %v1409_v54 = vunpack.c.h.bf16 %v1510_v46 }
  0x8d   : > { %v1643_v40 = vpop.eup %1642  ;;  %1644 = vpow2.f32 %v1340_v35  ;;  %v420_v4 = vmul.f32 %v2418_v38, %v384_v61  ;;  %v421_v53 = vmul.f32 %v2418_v38, %v385_v25  ;;  %v1466_v41 = vpack.c.bf16 %v1127_v37, %v1126_v55 }
  0x8e   : > { %v932_v33 = vadd.f32 %v1641_v21, %v931_v47  ;;  %v944_v8 = vmul.f32 %v1643_v40, %v2459_v45  ;;  %vm949_vm3 = vweird.f32 %v1643_v40  ;;  %1646 = vpow2.f32 %v1341_v2 }
  0x8f   : > { %v456_v10 = vmul.f32 %v2447_v44, %v420_v4  ;;  %v457_v36 = vmul.f32 %v2447_v44, %v421_v53  ;;  %v386_v48 = vsub.f32 %v1408_v5, %v2504_v42  ;;  %1521 = vst [vmem:[%s2015_s13 + $0x48] sm:$0xff] %v1466_v41   ;;  %v387_v24 = vsub.f32 %v1409_v54, %v2504_v42  ;;  %vm2545_vm5 = vmor %vm948_vm1, %vm949_vm3 }
  0x90   : > { %v936_v39 = vsel %vm2517_vm4, %v1641_v21, %v932_v33  ;;  %v945_v14 = vsub.f32 1.0, %v944_v8  ;;  %v1412_v18 = vunpack.c.l.bf16 %v1511_v22  ;;  %v955_v19 = vor.u32 1.1754944e-38, %v954_v49 }
  0x91   : > { %v2533_v27 = vadd.f32 %v2479_v43, %v456_v10  ;;  %v2536_v56 = vadd.f32 %v2479_v43, %v457_v36  ;;  %v422_v60 = vmul.f32 %v2418_v38, %v386_v48  ;;  %v941_v1 = vsel %vm2471_vm7, %v940_v28, %v936_v39 }
  0x92   : > { %v946_v6 = vmul.f32 %v1643_v40, %v945_v14  ;;  %v423_v3 = vmul.f32 %v2418_v38, %v387_v24  ;;  %v1413_v16 = vunpack.c.h.bf16 %v1511_v22  ;;  %v388_v20 = vsub.f32 %v1412_v18, %v2504_v42 }
  0x93   : > { %v1645_v23 = vpop.eup %1644  ;;  %v1342_v9 = vmul.f32 -1.442695, %v2533_v27  ;;  %v1343_v13 = vmul.f32 -1.442695, %v2536_v56  ;;  %v458_v0 = vmul.f32 %v2447_v44, %v422_v60  ;;  %vm953_vm6 = vcmp.eq.f32.partialorder %v952_v34, 8.507059e+37 }
  0x94   : > { %v947_v52 = vadd.f32 %v1643_v40, %v946_v6  ;;  %v618_v50 = vadd.f32 1.0, %v1645_v23  ;;  %v1647_v21 = vpop.eup %1646  ;;  %v1128_v11 = vmul.f32 %v941_v1, %v2326_v29  ;;  %v459_v45 = vmul.f32 %v2447_v44, %v423_v3 }
  0x95   : > { %1648 = vpow2.f32 %v1342_v9  ;;  %v389_v26 = vsub.f32 %v1413_v16, %v2504_v42  ;;  %v619_v57 = vadd.f32 1.0, %v1647_v21  ;;  %v2559_v12 = vadd.f32 %v2479_v43, %v458_v0 }
  0x96   : > { %v951_v28 = vsel %vm2545_vm5, %v1643_v40, %v947_v52  ;;  %1650 = vrcp.f32 %v618_v50  ;;  %v424_v30 = vmul.f32 %v2418_v38, %v388_v20  ;;  %v2567_v34 = vadd.f32 %v2479_v43, %v459_v45 }
  0x97   : > { %v956_v51 = vsel %vm953_vm6, %v955_v19, %v951_v28  ;;  %1652 = vpow2.f32 %v1343_v13  ;;  %v1344_v46 = vmul.f32 -1.442695, %v2559_v12  ;;  %v425_v17 = vmul.f32 %v2418_v38, %v389_v26 }
  0x98   : > { %v1129_v29 = vmul.f32 %v956_v51, %v2347_v63  ;;  %1654 = vrcp.f32 %v619_v57  ;;  %v1416_v55 = vunpack.c.l.bf16 %v2563_v31  ;;  %vm963_vm8 = vweird.f32 %v618_v50 }
  0x99   : > { %v967_v15 = vand.u32 2147483647, %v618_v50  ;;  %v1345_v35 = vmul.f32 -1.442695, %v2567_v34  ;;  %v460_v61 = vmul.f32 %v2447_v44, %v424_v30  ;;  %v969_v63 = vand.u32 2147483648, %v618_v50 }
  0x9a   : > { %v1471_v49 = vpack.c.bf16 %v1129_v29, %v1128_v11  ;;  %v982_v37 = vand.u32 2147483647, %v619_v57  ;;  %1656 = vpow2.f32 %v1344_v46  ;;  %vm978_vm9 = vweird.f32 %v619_v57 }
  0x9b   : > { %v1649_v32 = vpop.eup %1648  ;;  %v984_v40 = vand.u32 2147483648, %v619_v57  ;;  %1658 = vpow2.f32 %v1345_v35  ;;  %v461_v53 = vmul.f32 %v2447_v44, %v425_v17  ;;  %v2582_v54 = vadd.f32 %v2479_v43, %v460_v61 }
  0x9c   : > { %v1651_v25 = vpop.eup %1650  ;;  %1522 = vst [vmem:[%s2015_s13 + $0x50] sm:$0xff] %v1471_v49   ;;  %v2575_v47 = vadd.f32 1.0, %v1649_v32  ;;  %vm2584_vm11 = vcmp.eq.f32.partialorder %v967_v15, 8.507059e+37  ;;  %v970_v8 = vor.u32 1.1754944e-38, %v969_v63  ;;  %vm2588_vm12 = vcmp.eq.f32.partialorder %v982_v37, 8.507059e+37 }
  0x9d   : > { %v1653_v2 = vpop.eup %1652  ;;  %v959_v5 = vmul.f32 %v1651_v25, %v618_v50  ;;  %vm964_vm10 = vweird.f32 %v1651_v25  ;;  %v985_v14 = vor.u32 1.1754944e-38, %v984_v40  ;;  %v2600_v19 = vadd.f32 %v2479_v43, %v461_v53 }
  0x9e   : > { %v1655_v7 = vpop.eup %1654  ;;  %v2577_v4 = vadd.f32 1.0, %v1653_v2  ;;  %1660 = vrcp.f32 %v2575_v47  ;;  %v997_v36 = vand.u32 2147483647, %v2575_v47  ;;  %vm2595_vm14 = vmor %vm963_vm8, %vm964_vm10  ;;  %v1346_v60 = vmul.f32 -1.442695, %v2582_v54 }
  0x9f   : > { %v960_v22 = vsub.f32 1.0, %v959_v5  ;;  %v974_v33 = vmul.f32 %v1655_v7, %v619_v57  ;;  %vm979_vm13 = vweird.f32 %v1655_v7  ;;  %v1417_v1 = vunpack.c.h.bf16 %v2563_v31 }
  0xa0   : > { %1662 = vrcp.f32 %v2577_v4  ;;  %v1657_v24 = vpop.eup %1656  ;;  %v390_v6 = vsub.f32 %v1416_v55, %v2504_v42  ;;  %vm993_vm15 = vweird.f32 %v2575_v47  ;;  %vm2609_vm0 = vmor %vm978_vm9, %vm979_vm13  ;;  %vm2613_vm7 = vcmp.eq.f32.partialorder %v997_v36, 8.507059e+37 }
  0xa1   : > { %v961_v48 = vmul.f32 %v1651_v25, %v960_v22  ;;  %v975_v39 = vsub.f32 1.0, %v974_v33  ;;  %v1659_v3 = vpop.eup %1658  ;;  %v2606_v59 = vadd.f32 1.0, %v1657_v24  ;;  %v999_v20 = vand.u32 2147483648, %v2575_v47 }
  0xa2   : > { %v1012_v52 = vand.u32 2147483647, %v2577_v4  ;;  %1664 = vpow2.f32 %v1346_v60  ;;  %v2622_v45 = vadd.f32 1.0, %v1659_v3  ;;  %v1347_v57 = vmul.f32 -1.442695, %v2600_v19 }
  0xa3   : > { %v962_v16 = vadd.f32 %v1651_v25, %v961_v48  ;;  %v976_v23 = vmul.f32 %v1655_v7, %v975_v39  ;;  %1666 = vrcp.f32 %v2606_v59  ;;  %vm1008_vm2 = vweird.f32 %v2577_v4 }
  0xa4   : > { %v1661_v9 = vpop.eup %1660  ;;  %v1014_v46 = vand.u32 2147483648, %v2577_v4  ;;  %1668 = vrcp.f32 %v2622_v45  ;;  %v1000_v35 = vor.u32 1.1754944e-38, %v999_v20  ;;  %vm2645_vm5 = vcmp.eq.f32.partialorder %v1012_v52, 8.507059e+37 }
  0xa5   : > { %v966_v50 = vsel %vm2595_vm14, %v1651_v25, %v962_v16  ;;  %v977_v21 = vadd.f32 %v1655_v7, %v976_v23  ;;  %v989_v11 = vmul.f32 %v1661_v9, %v2575_v47  ;;  %vm994_vm1 = vweird.f32 %v1661_v9 }
  0xa6   : > { %v1663_v26 = vpop.eup %1662  ;;  %v971_v28 = vsel %vm2584_vm11, %v970_v8, %v966_v50  ;;  %vm2641_vm3 = vmor %vm993_vm15, %vm994_vm1  ;;  %v391_v25 = vsub.f32 %v1417_v1, %v2504_v42  ;;  %1670 = vpow2.f32 %v1347_v57  ;;  %v1015_v40 = vor.u32 1.1754944e-38, %v1014_v46 }
  0xa7   : > { %v981_v51 = vsel %vm2609_vm0, %v1655_v7, %v977_v21  ;;  %v1130_v30 = vmul.f32 %v971_v28, %v2482_v62  ;;  %v990_v31 = vsub.f32 1.0, %v989_v11  ;;  %v1004_v29 = vmul.f32 %v1663_v26, %v2577_v4 }
  0xa8   : > { %v986_v49 = vsel %vm2588_vm12, %v985_v14, %v981_v51  ;;  %vm1009_vm4 = vweird.f32 %v1663_v26  ;;  %v1665_v15 = vpop.eup %1664  ;;  %vm1023_vm8 = vweird.f32 %v2606_v59  ;;  %v426_v53 = vmul.f32 %v2418_v38, %v390_v6 }
  0xa9   : > { %v1131_v17 = vmul.f32 %v986_v49, %v2498_v58  ;;  %v991_v55 = vmul.f32 %v1661_v9, %v990_v31  ;;  %v1005_v32 = vsub.f32 1.0, %v1004_v29  ;;  %v1029_v58 = vand.u32 2147483648, %v2606_v59  ;;  %v1667_v5 = vpop.eup %1666  ;;  %vm2654_vm6 = vmor %vm1008_vm2, %vm1009_vm4 }
  0xaa   : > { %v2659_v7 = vadd.f32 1.0, %v1665_v15  ;;  %v1019_v41 = vmul.f32 %v1667_v5, %v2606_v59  ;;  %v1027_v4 = vand.u32 2147483647, %v2606_v59  ;;  %v427_v10 = vmul.f32 %v2418_v38, %v391_v25  ;;  %v1669_v36 = vpop.eup %1668 }
  0xab   : > { %v1476_v63 = vpack.c.bf16 %v1131_v17, %v1130_v30  ;;  %v992_v37 = vadd.f32 %v1661_v9, %v991_v55  ;;  %v1006_v2 = vmul.f32 %v1663_v26, %v1005_v32  ;;  %v1030_v8 = vor.u32 1.1754944e-38, %v1029_v58 }
  0xac   : > { %1672 = vrcp.f32 %v2659_v7  ;;  %v1020_v14 = vsub.f32 1.0, %v1019_v41  ;;  %vm1024_vm9 = vweird.f32 %v1667_v5  ;;  %v1034_v18 = vmul.f32 %v1669_v36, %v2622_v45  ;;  %v1671_v1 = vpop.eup %1670 }
  0xad   : > { %1523 = vst [vmem:[%s2015_s13 + $0x58] sm:$0xff] %v1476_v63   ;;  %v996_v42 = vsel %vm2641_vm3, %v1661_v9, %v992_v37  ;;  %v1007_v22 = vadd.f32 %v1663_v26, %v1006_v2  ;;  %vm1038_vm10 = vweird.f32 %v2622_v45  ;;  %v1042_v60 = vand.u32 2147483647, %v2622_v45  ;;  %vm2684_vm11 = vmor %vm1023_vm8, %vm1024_vm9 }
  0xae   : > { %v1001_v33 = vsel %vm2613_vm7, %v1000_v35, %v996_v42  ;;  %v1021_v6 = vmul.f32 %v1667_v5, %v1020_v14  ;;  %v1044_v3 = vand.u32 2147483648, %v2622_v45  ;;  %v1035_v23 = vsub.f32 1.0, %v1034_v18 }
  0xaf   : > { %v1011_v48 = vsel %vm2654_vm6, %v1663_v26, %v1007_v22  ;;  %v1132_v39 = vmul.f32 %v1001_v33, %v2533_v27  ;;  %v462_v27 = vmul.f32 %v2447_v44, %v426_v53  ;;  %vm1039_vm12 = vweird.f32 %v1669_v36 }
  0xb0   : > { %v1016_v24 = vsel %vm2645_vm5, %v1015_v40, %v1011_v48  ;;  %v625_v9 = vadd.f32 1.0, %v1671_v1  ;;  %v463_v13 = vmul.f32 %v2447_v44, %v427_v10  ;;  %v1022_v20 = vadd.f32 %v1667_v5, %v1021_v6  ;;  %vm2697_vm14 = vmor %vm1038_vm10, %vm1039_vm12 }
  0xb1   : > { %v1133_v38 = vmul.f32 %v1016_v24, %v2536_v56  ;;  %vm1028_vm13 = vcmp.eq.f32.partialorder %v1027_v4, 8.507059e+37  ;;  %v2690_v56 = vadd.f32 %v2479_v43, %v462_v27  ;;  %v1036_v50 = vmul.f32 %v1669_v36, %v1035_v23 }
  0xb2   : > { %v1673_v52 = vpop.eup %1672  ;;  %1674 = vrcp.f32 %v625_v9  ;;  %v1026_v59 = vsel %vm2684_vm11, %v1667_v5, %v1022_v20  ;;  %vm1043_vm15 = vcmp.eq.f32.partialorder %v1042_v60, 8.507059e+37  ;;  %v1045_v44 = vor.u32 1.1754944e-38, %v1044_v3 }
  0xb3   : > { %v1481_v0 = vpack.c.bf16 %v1133_v38, %v1132_v39  ;;  %v1049_v11 = vmul.f32 %v1673_v52, %v2659_v7  ;;  %v1031_v26 = vsel %vm1028_vm13, %v1030_v8, %v1026_v59  ;;  %v1037_v28 = vadd.f32 %v1669_v36, %v1036_v50 }
  0xb4   : > { %vm1053_vm0 = vweird.f32 %v2659_v7  ;;  %v2704_v57 = vadd.f32 %v2479_v43, %v463_v13  ;;  %vm1054_vm7 = vweird.f32 %v1673_v52  ;;  %v1057_v30 = vand.u32 2147483647, %v2659_v7 }
  0xb5   : > { %1524 = vst [vmem:[%s2015_s13 + $0x60] sm:$0xff] %v1481_v0   ;;  %v1050_v51 = vsub.f32 1.0, %v1049_v11  ;;  %v1348_v45 = vmul.f32 -1.442695, %v2690_v56  ;;  %v1041_v31 = vsel %vm2697_vm14, %v1669_v36, %v1037_v28  ;;  %v1134_v29 = vmul.f32 %v1031_v26, %v2559_v12  ;;  %vm2716_vm1 = vmor %vm1053_vm0, %vm1054_vm7 }
  0xb6   : > { %v1059_v49 = vand.u32 2147483648, %v2659_v7  ;;  %v1349_v46 = vmul.f32 -1.442695, %v2704_v57  ;;  %v1046_v17 = vsel %vm1043_vm15, %v1045_v44, %v1041_v31  ;;  %vm1058_vm2 = vcmp.eq.f32.partialorder %v1057_v30, 8.507059e+37 }
  0xb7   : > { %v1051_v55 = vmul.f32 %v1673_v52, %v1050_v51  ;;  %1676 = vpow2.f32 %v1348_v45  ;;  %v1135_v32 = vmul.f32 %v1046_v17, %v2567_v34  ;;  %vm1068_vm4 = vweird.f32 %v625_v9 }
  0xb8   : > { %v1675_v43 = vpop.eup %1674  ;;  %1678 = vpow2.f32 %v1349_v46  ;;  %v1060_v61 = vor.u32 1.1754944e-38, %v1059_v49  ;;  %v1074_v58 = vand.u32 2147483648, %v625_v9  ;;  %v1072_v34 = vand.u32 2147483647, %v625_v9 }
  0xb9   : > { %v1052_v62 = vadd.f32 %v1673_v52, %v1051_v55  ;;  %v1064_v12 = vmul.f32 %v1675_v43, %v625_v9  ;;  %v1486_v35 = vpack.c.bf16 %v1135_v32, %v1134_v29  ;;  %vm1069_vm3 = vweird.f32 %v1675_v43 }
  0xba   : > { %vm1070_vm5 = vmor %vm1068_vm4, %vm1069_vm3  ;;  %v1075_v40 = vor.u32 1.1754944e-38, %v1074_v58  ;;  %vm1073_vm6 = vcmp.eq.f32.partialorder %v1072_v34, 8.507059e+37 }
  0xbb   : > { %v1056_v25 = vsel %vm2716_vm1, %v1673_v52, %v1052_v62  ;;  %v1065_v63 = vsub.f32 1.0, %v1064_v12  ;;  %1525 = vst [vmem:[%s2015_s13 + $0x68] sm:$0xff] %v1486_v35  }
  0xbc   : > { %v1061_v47 = vsel %vm1058_vm2, %v1060_v61, %v1056_v25 }
  0xbd   : > { %v1677_v37 = vpop.eup %1676  ;;  %v1066_v2 = vmul.f32 %v1675_v43, %v1065_v63  ;;  %v1136_v41 = vmul.f32 %v1061_v47, %v2582_v54 }
  0xbe   : > { %v1679_v5 = vpop.eup %1678  ;;  %v626_v7 = vadd.f32 1.0, %v1677_v37 }
  0xbf   : > { %v1067_v53 = vadd.f32 %v1675_v43, %v1066_v2  ;;  %v627_v42 = vadd.f32 1.0, %v1679_v5 }
  0xc0   : > { %1680 = vrcp.f32 %v626_v7  ;;  %vm1083_vm8 = vweird.f32 %v626_v7  ;;  %v1089_v39 = vand.u32 2147483648, %v626_v7  ;;  %v1087_v18 = vand.u32 2147483647, %v626_v7 }
  0xc1   : > { %v1071_v22 = vsel %vm1070_vm5, %v1675_v43, %v1067_v53  ;;  %1682 = vrcp.f32 %v627_v42  ;;  %v1104_v60 = vand.u32 2147483648, %v627_v42  ;;  %vm1098_vm10 = vweird.f32 %v627_v42 }
  0xc2   : > { %v1076_v4 = vsel %vm1073_vm6, %v1075_v40, %v1071_v22  ;;  %v1102_v54 = vand.u32 2147483647, %v627_v42  ;;  %vm1088_vm13 = vcmp.eq.f32.partialorder %v1087_v18, 8.507059e+37 }
  0xc3   : > { %v1137_v33 = vmul.f32 %v1076_v4, %v2600_v19  ;;  %v1090_v19 = vor.u32 1.1754944e-38, %v1089_v39  ;;  %v1105_v27 = vor.u32 1.1754944e-38, %v1104_v60 }
  0xc4   : > { %vm1103_vm15 = vcmp.eq.f32.partialorder %v1102_v54, 8.507059e+37 }
  0xc5   : > { %v1491_v8 = vpack.c.bf16 %v1137_v33, %v1136_v41 }
  0xc6   : > { %v1681_v10 = vpop.eup %1680 }
  0xc7   : > { %v1683_v36 = vpop.eup %1682  ;;  %1526 = vst [vmem:[%s2015_s13 + $0x70] sm:$0xff] %v1491_v8   ;;  %v1079_v48 = vmul.f32 %v1681_v10, %v626_v7  ;;  %vm1084_vm9 = vweird.f32 %v1681_v10 }
  0xc8   : > { %v1094_v14 = vmul.f32 %v1683_v36, %v627_v42  ;;  %vm1099_vm11 = vweird.f32 %v1683_v36  ;;  %vm1085_vm12 = vmor %vm1083_vm8, %vm1084_vm9 }
  0xc9   : > { %v1080_v24 = vsub.f32 1.0, %v1079_v48  ;;  %vm1100_vm14 = vmor %vm1098_vm10, %vm1099_vm11 }
  0xca   : > { %v1095_v1 = vsub.f32 1.0, %v1094_v14 }
  0xcb   : > { %v1081_v38 = vmul.f32 %v1681_v10, %v1080_v24 }
  0xcc   : > { %v1096_v6 = vmul.f32 %v1683_v36, %v1095_v1 }
  0xcd   : > { %v1082_v3 = vadd.f32 %v1681_v10, %v1081_v38 }
  0xce   : > { %v1097_v16 = vadd.f32 %v1683_v36, %v1096_v6 }
  0xcf   : > { %v1086_v23 = vsel %vm1085_vm12, %v1681_v10, %v1082_v3 }
  0xd0   : > { %v1091_v9 = vsel %vm1088_vm13, %v1090_v19, %v1086_v23  ;;  %v1101_v13 = vsel %vm1100_vm14, %v1683_v36, %v1097_v16 }
  0xd1   : > { %v1106_v0 = vsel %vm1103_vm15, %v1105_v27, %v1101_v13  ;;  %v1138_v20 = vmul.f32 %v1091_v9, %v2690_v56 }
  0xd2   : > { %v1139_v52 = vmul.f32 %v1106_v0, %v2704_v57 }
  0xd4   : > { %v1496_v50 = vpack.c.bf16 %v1139_v52, %v1138_v20 }
  0xd6   : > { %1527 = vst [vmem:[%s2015_s13 + $0x78] sm:$0xff] %v1496_v50  }
  0xd7 PF: > { %s15_s20 = sadd.s32 1, %s1710_s20   ;;  %s2851_s18 = smov %s1706_s19 }
  0xd8   : > { %p12_p5 = scmp.ge.s32.totalorder %s15_s20, 4   ;;  %s2852_s19 = smov %s2854_s21 }
  0xda   :  { %14 = sbr.rel (!%p12_p5) target bundleno = 2 (0x2), region = 76 }

// kernel: _lambda_.97
= control target key start
LH: loop header
LB: loop body
LE: loop exit
PB: predicated region body
PF: predicated region fallthrough
CT: control target
= control target key end

     0   :  { %s2067_s18 = smov 0   ;;  %s2069_s19 = smov 0   ;;  %s2402_s0 = inlined_call_operand.vmem [shape: bf16[2,18,18,128], index: 0, kind: input, shape index: {}, may-alias: {0,1,2}]   ;;  %s2403_s1 = inlined_call_operand.vmem [shape: bf16[2,18,18,128], index: 1, kind: input, shape index: {}, may-alias: {0,1,2}]   ;;  %s2404_s2 = inlined_call_operand.vmem [shape: bf16[2,18,18,128], index: 2, kind: input, shape index: {}, may-alias: {0,1,2}]   ;;  %s2405_s3 = inlined_call_operand.vmem [shape: bf16[9,128,128], index: 3, kind: input, shape index: {}]   ;;  %s2406_s4 = inlined_call_operand.vmem [shape: f32[1,128], index: 4, kind: input, shape index: {}]   ;;  %s2407_s5 = inlined_call_operand.vmem [shape: bf16[2,16,16,128], index: 5, kind: output, shape index: {}]  }
   0x1   :  { %s2071_s20 = smov 0   ;;  %s2073_s21 = smov 0  }
   0x2   :  { %s2075_s22 = smov 0  }
   0x3 LB: > { %s24_s23 = sadd.s32 1, %s2027_s20  ;;  %s27_s24 = sadd.s32 1, %s2031_s21  ;;  %s2035_s22 = sphi %s2075_s22, %s15_s22   ;;  %s2031_s21 = sphi %s2073_s21, %s2412_s21   ;;  %s2027_s20 = sphi %s2071_s20, %s2411_s20   ;;  %s2023_s19 = sphi %s2069_s19, %s2410_s19   ;;  %s2019_s18 = sphi %s2067_s18, %s2409_s18  }
   0x4   : > { %p25_p0 = scmp.ge.s32.totalorder %s24_s23, 16  ;;  %p1405_p1 = scmp.ge.s32.totalorder %s2035_s22, 1 }
   0x5   : > { %p247_p2 = scmp.lt.s32.totalorder %s2035_s22, 33 }
   0x6   : > { %s2414_s23 = smov (%p25_p0, %s24_s23), 0  ;;  %s2416_s24 = smov (!%p25_p0, %s27_s24), %s2031_s21 }
   0x7   : > { %p248_p3 = pnand %p1405_p1, %p247_p2  ;;  %p29_p4 = scmp.ge.s32.totalorder %s2416_s24, 2 }
   0x8   : > { %p303_p5 = scmp.lt.s32.totalorder (!%p248_p3), %s2023_s19, 1  ;;  %p305_p6 = scmp.lt.s32.totalorder (!%p248_p3), %s2019_s18, 17 }
   0x9   : > { %s2418_s24 = smov (%p29_p4, %s2416_s24), 0  ;;  %251 = sbr.rel (%p248_p3) target bundleno = 251 (0xfb), region = 40 }
   0xa   : > { %s312_s10 = sadd.s32 (!%p248_p3), 1, %s2019_s18  ;;  %p336_p9 = scmp.lt.s32.totalorder (!%p248_p3), %s2019_s18, 15 }
   0xb   : > { %p315_p7 = scmp.lt.s32.totalorder (!%p248_p3), %s312_s10, 17 }
   0xe   : > { %v1874_v0 = vld [vmem:[%s2405_s3 + $0x38] sm:$0xff]  ;;  %v1873_v4 = vld [vmem:[%s2405_s3 + $0x30] sm:$0xff]  ;;  %s2420_s19 = smov (!%p303_p5, %s2023_s19), 1  ;;  %v1872_v8 = vld [vmem:[%s2405_s3 + $0x28] sm:$0xff]  ;;  %s2422_s10 = smov (!%p315_p7, %s312_s10), 17  ;;  %vm577_vm0 = vcmask 1046528  }
   0xf   : > { %v1892_v1 = vld [vmem:[%s2405_s3 + $0xb8] sm:$0xff]  ;;  %419 = vmatpush.bf16.msra.mxu0 %v1874_v0  ;;  %v1891_v5 = vld [vmem:[%s2405_s3 + $0xb0] sm:$0xff]  ;;  %s306_s16 = scalar_select %p305_p6, %s2019_s18, 17  ;;  %v1890_v9 = vld [vmem:[%s2405_s3 + $0xa8] sm:$0xff]  ;;  %vm467_vm1 = vsmask.f32 7424 }
  0x10   : > { %v1883_v2 = vld [vmem:[%s2405_s3 + $0x78] sm:$0xff]  ;;  %630 = vmatpush.bf16.msra.mxu2 %v1892_v1  ;;  %v1882_v6 = vld [vmem:[%s2405_s3 + $0x70] sm:$0xff]  ;;  %s2128_s17 = smul.u32 54, %s2420_s19  ;;  %v1881_v10 = vld [vmem:[%s2405_s3 + $0x68] sm:$0xff] }
  0x11   : > { %v1901_v3 = vld [vmem:[%s2405_s3 + $0xf8] sm:$0xff]  ;;  %529 = vmatpush.bf16.msra.mxu1 %v1883_v2  ;;  %v1900_v7 = vld [vmem:[%s2405_s3 + $0xf0] sm:$0xff]  ;;  %s1952_s25 = smul.u32 3, %s306_s16  ;;  %v1899_v11 = vld [vmem:[%s2405_s3 + $0xe8] sm:$0xff] }
  0x12   : > { %723 = vmatpush.bf16.msra.mxu3 %v1901_v3  ;;  %v1871_v12 = vld [vmem:[%s2405_s3 + $0x20] sm:$0xff]  ;;  %v1870_v16 = vld [vmem:[%s2405_s3 + $0x18] sm:$0xff]  ;;  %v1869_v20 = vld [vmem:[%s2405_s3 + $0x10] sm:$0xff]  ;;  %s1954_s7 = smul.u32 3, %s2422_s10 }
  0x13   : > { %420 = vmatpush.bf16.msra.mxu0 %v1873_v4  ;;  %s309_s9 = sadd.s32 %s2128_s17, %s1952_s25  ;;  %v1889_v13 = vld [vmem:[%s2405_s3 + $0xa0] sm:$0xff]  ;;  %v1888_v17 = vld [vmem:[%s2405_s3 + $0x98] sm:$0xff]  ;;  %v1887_v22 = vld [vmem:[%s2405_s3 + $0x90] sm:$0xff] }
  0x14   : > { %631 = vmatpush.bf16.msra.mxu2 %v1891_v5  ;;  %v1880_v14 = vld [vmem:[%s2405_s3 + $0x60] sm:$0xff]  ;;  %s1406_s25 = sshll.u32 %s309_s9, 2  ;;  %v1879_v18 = vld [vmem:[%s2405_s3 + $0x58] sm:$0xff]  ;;  %v1878_v25 = vld [vmem:[%s2405_s3 + $0x50] sm:$0xff]  ;;  %s319_s27 = sadd.s32 %s1954_s7, %s2128_s17 }
  0x15   : > { %530 = vmatpush.bf16.msra.mxu1 %v1882_v6  ;;  %v1898_v15 = vld [vmem:[%s2405_s3 + $0xe0] sm:$0xff]  ;;  %s2165_s11 = scalar_lea.vmem %s2402_s0, %s1406_s25  ;;  %v1897_v19 = vld [vmem:[%s2405_s3 + $0xd8] sm:$0xff]  ;;  %s323_s25 = sadd.s32 2, %s2019_s18  ;;  %v1896_v26 = vld [vmem:[%s2405_s3 + $0xd0] sm:$0xff] }
  0x16   : > { %724 = vmatpush.bf16.msra.mxu3 %v1900_v7  ;;  %v551_v21 = vld [vmem:[%s2165_s11 + $0x8] sm:$0x1]  ;;  %v1875_v23 = vld [vmem:[%s2165_s11] sm:$0xff]  ;;  %p2194_p8 = scmp.lt.s32.totalorder %s323_s25, 17  ;;  %s1407_s9 = sshll.u32 %s319_s27, 2  ;;  %v1910_v44 = vld [vmem:[%s2405_s3 + $0x138] sm:$0xff] }
  0x17   : > { %421 = vmatpush.bf16.msra.mxu0 %v1872_v8  ;;  %v441_v24 = vld [vmem:[%s2165_s11 + $0x8] sm:$0x1]  ;;  %v574_v27 = vunpack.c.l.b16 %v551_v21  ;;  %v1518_v29 = vld [vmem:[%s2165_s11] sm:$0xe]  ;;  %v1884_v30 = vld [vmem:[%s2165_s11] sm:$0xf0]  ;;  %s2242_s7 = scalar_lea.vmem %s2403_s1, %s1407_s9 }
  0x18   : > { %632 = vmatpush.bf16.msra.mxu2 %v1890_v9  ;;  %v464_v28 = vunpack.c.l.b16 %v441_v24  ;;  %v471_v32 = vshll.u32 %v1875_v23, 16  ;;  %v1868_v33 = vld [vmem:[%s2405_s3 + $0x8] sm:$0xff]  ;;  %v1519_v37 = vor.u32 %v1884_v30, %v1518_v29  ;;  %v469_v39 = vshrl.u32 %v1875_v23, 16  ;;  %s2424_s25 = smov (!%p2194_p8, %s323_s25), 17  ;;  %v1867_v42 = vld [vmem:[%s2405_s3] sm:$0xff]  ;;  %v1928_v45 = vld [vmem:[%s2405_s3 + $0x1b8] sm:$0xff] }
  0x19   : > { %531 = vmatpush.bf16.msra.mxu1 %v1881_v10  ;;  %v1886_v34 = vld [vmem:[%s2405_s3 + $0x88] sm:$0xff]  ;;  %v576_v38 = vpack.c.b16 %v574_v27, %v574_v27  ;;  %v1885_v43 = vld [vmem:[%s2405_s3 + $0x80] sm:$0xff]  ;;  %v1919_v50 = vld [vmem:[%s2405_s3 + $0x178] sm:$0xff]  ;;  %s1955_s12 = smul.u32 3, %s2424_s25  ;;  %s2426_s18 = smov (!%p336_p9, %s2019_s18), 15 }
  0x1a   : > { %725 = vmatpush.bf16.msra.mxu3 %v1899_v11  ;;  %v466_v31 = vpack.c.b16 %v464_v28, %v464_v28  ;;  %v1877_v35 = vld [vmem:[%s2405_s3 + $0x48] sm:$0xff]  ;;  %v473_v40 = vrot.slane %v471_v32, 1  ;;  %v578_v46 = vrot.slane %v1519_v37, 1  ;;  %v1876_v48 = vld [vmem:[%s2405_s3 + $0x40] sm:$0xff]  ;;  %v1937_v51 = vld [vmem:[%s2405_s3 + $0x1f8] sm:$0xff]  ;;  %s1410_s27 = sshll.u32 %s2420_s19, 5 }
  0x1b   : > { %422 = vmatpush.bf16.msra.mxu0 %v1871_v12  ;;  %v1895_v36 = vld [vmem:[%s2405_s3 + $0xc8] sm:$0xff]  ;;  %v579_v47 = vrot.slane %v576_v38, 1  ;;  %v1894_v49 = vld [vmem:[%s2405_s3 + $0xc0] sm:$0xff]  ;;  %v1909_v55 = vld [vmem:[%s2405_s3 + $0x130] sm:$0xff]  ;;  %s330_s16 = sadd.s32 %s1955_s12, %s2128_s17 }
  0x1c   : > { %633 = vmatpush.bf16.msra.mxu2 %v1889_v13  ;;  %v476_v41 = vshll.u32 %v466_v31, 16  ;;  %v474_v52 = vor.u32 %v473_v40, %v469_v39  ;;  %v1866_v54 = vld [vmem:[%s2165_s11] sm:$0xff]  ;;  %v1927_v56 = vld [vmem:[%s2405_s3 + $0x1b0] sm:$0xff]  ;;  %v1908_v62 = vld [vmem:[%s2405_s3 + $0x128] sm:$0xff]  ;;  %s1408_s30 = sshll.u32 %s330_s16, 2 }
  0x1d   : > { %532 = vmatpush.bf16.msra.mxu1 %v1880_v14  ;;  %v580_v57 = vsel %vm577_vm0, %v578_v46, %v579_v47  ;;  %v1893_v58 = vld [vmem:[%s2242_s7] sm:$0xff]  ;;  %v1918_v59 = vld [vmem:[%s2405_s3 + $0x170] sm:$0xff]  ;;  %v1926_v63 = vld [vmem:[%s2405_s3 + $0x1a8] sm:$0xff]  ;;  %s2283_s15 = scalar_lea.vmem %s2404_s2, %s1408_s30 }
  0x1e   : > { %726 = vmatpush.bf16.msra.mxu3 %v1898_v15  ;;  %v478_v53 = vrot.slane %v476_v41, 1  ;;  %v1936_v60 = vld [vmem:[%s2405_s3 + $0x1f0] sm:$0xff]  ;;  %v1917_v0 = vld [vmem:[%s2405_s3 + $0x168] sm:$0xff]  ;;  %v1907_v2 = vld [vmem:[%s2405_s3 + $0x120] sm:$0xff] }
  0x1f   : > { %423 = vmatpush.bf16.msra.mxu0 %v1870_v16  ;;  %v1935_v1 = vld [vmem:[%s2405_s3 + $0x1e8] sm:$0xff]  ;;  %v1925_v3 = vld [vmem:[%s2405_s3 + $0x1a0] sm:$0xff]  ;;  %v1906_v8 = vld [vmem:[%s2405_s3 + $0x118] sm:$0xff] }
  0x20   : > { %634 = vmatpush.bf16.msra.mxu2 %v1888_v17  ;;  %v479_v61 = vsel %vm467_vm1, %v474_v52, %v478_v53  ;;  %v745_v4 = vld [vmem:[%s2242_s7 + $0x8] sm:$0x1]  ;;  %v1916_v5 = vld [vmem:[%s2405_s3 + $0x160] sm:$0xff]  ;;  %v1924_v9 = vld [vmem:[%s2405_s3 + $0x198] sm:$0xff] }
  0x21   : > { %533 = vmatpush.bf16.msra.mxu1 %v1879_v18  ;;  %v1934_v6 = vld [vmem:[%s2405_s3 + $0x1e0] sm:$0xff]  ;;  %v1047_v7 = vld [vmem:[%s2283_s15 + $0x8] sm:$0x1]  ;;  %v768_v11 = vunpack.c.l.b16 %v745_v4  ;;  %v1915_v12 = vld [vmem:[%s2405_s3 + $0x158] sm:$0xff] }
  0x22   : > { %727 = vmatpush.bf16.msra.mxu3 %v1897_v19  ;;  %v1902_v10 = vld [vmem:[%s2242_s7] sm:$0xff]  ;;  %v1933_v13 = vld [vmem:[%s2405_s3 + $0x1d8] sm:$0xff]  ;;  %v1070_v15 = vunpack.c.l.b16 %v1047_v7  ;;  %v854_v16 = vld [vmem:[%s2242_s7 + $0x8] sm:$0x1] }
  0x23   : > { %424 = vmatpush.bf16.msra.mxu0 %v1869_v20  ;;  %v1929_v14 = vld [vmem:[%s2283_s15] sm:$0xff]  ;;  %v1905_v17 = vld [vmem:[%s2405_s3 + $0x110] sm:$0xff]  ;;  %v770_v19 = vpack.c.b16 %v768_v11, %v768_v11  ;;  %v774_v20 = vshll.u32 %v1902_v10, 16  ;;  %v1904_v28 = vld [vmem:[%s2405_s3 + $0x108] sm:$0xff]  ;;  %v772_v30 = vshrl.u32 %v1902_v10, 16 }
  0x24   : > { %635 = vmatpush.bf16.msra.mxu2 %v1887_v22  ;;  %v1923_v18 = vld [vmem:[%s2405_s3 + $0x190] sm:$0xff]  ;;  %v1674_v23 = vld [vmem:[%s2242_s7] sm:$0xe]  ;;  %v1911_v24 = vld [vmem:[%s2242_s7] sm:$0xf0]  ;;  %v1076_v27 = vshll.u32 %v1929_v14, 16 }
  0x25   : > { %534 = vmatpush.bf16.msra.mxu1 %v1878_v25  ;;  %v1914_v21 = vld [vmem:[%s2405_s3 + $0x150] sm:$0xff]  ;;  %v877_v25 = vunpack.c.l.b16 %v854_v16  ;;  %v1922_v29 = vld [vmem:[%s2405_s3 + $0x188] sm:$0xff]  ;;  %v776_v31 = vrot.slane %v774_v20, 1  ;;  %v779_v32 = vshll.u32 %v770_v19, 16  ;;  %v1074_v37 = vshrl.u32 %v1929_v14, 16  ;;  %v1903_v40 = vld [vmem:[%s2405_s3 + $0x100] sm:$0xff] }
  0x26   : > { %728 = vmatpush.bf16.msra.mxu3 %v1896_v26  ;;  %v1932_v22 = vld [vmem:[%s2405_s3 + $0x1d0] sm:$0xff]  ;;  %v1072_v26 = vpack.c.b16 %v1070_v15, %v1070_v15  ;;  %v1078_v38 = vrot.slane %v1076_v27, 1  ;;  %v1921_v41 = vld [vmem:[%s2405_s3 + $0x180] sm:$0xff] }
  0x27   : > { %425 = vmatpush.bf16.msra.mxu0 %v1868_v33  ;;  %v1675_v33 = vor.u32 %v1911_v24, %v1674_v23  ;;  %v1930_v46 = vld [vmem:[%s2405_s3 + $0x1c0] sm:$0xff] }
  0x28   : > { %636 = vmatpush.bf16.msra.mxu2 %v1886_v34  ;;  %v1913_v34 = vld [vmem:[%s2405_s3 + $0x148] sm:$0xff]  ;;  %v1081_v39 = vshll.u32 %v1072_v26, 16 }
  0x29   : > { %535 = vmatpush.bf16.msra.mxu1 %v1877_v35  ;;  %v1931_v35 = vld [vmem:[%s2405_s3 + $0x1c8] sm:$0xff]  ;;  %v880_v47 = vrot.slane %v1675_v33, 1 }
  0x2a   : > { %729 = vmatpush.bf16.msra.mxu3 %v1895_v36  ;;  %v879_v36 = vpack.c.b16 %v877_v25, %v877_v25 }
  0x2b   : > { %426 = vmatpush.bf16.msra.mxu0 %v1867_v42  ;;  %v777_v42 = vor.u32 %v776_v31, %v772_v30 }
  0x2c   : > { %637 = vmatpush.bf16.msra.mxu2 %v1885_v43  ;;  %v781_v43 = vrot.slane %v779_v32, 1 }
  0x2d   : > { %536 = vmatpush.bf16.msra.mxu1 %v1876_v48  ;;  %v881_v48 = vrot.slane %v879_v36, 1 }
  0x2e   : > { %730 = vmatpush.bf16.msra.mxu3 %v1894_v49  ;;  %427 = vmatmul.bf16.vlgmr.msra.gmra.mxu0 %v1866_v54  ;;  %v1079_v49 = vor.u32 %v1078_v38, %v1074_v37  ;;  %v782_v52 = vsel %vm467_vm1, %v777_v42, %v781_v43 }
  0x2f   : > { %832 = vmatpush.bf16.msrb.mxu0 %v1910_v44  ;;  %638 = vmatmul.bf16.vlgmr.msra.gmra.mxu2 %v580_v57  ;;  %v1946_v44 = vld [vmem:[%s2405_s3 + $0x238] sm:$0xff]  ;;  %v882_v53 = vsel %vm577_vm0, %v880_v47, %v881_v48  ;;  %v1943_v57 = vld [vmem:[%s2405_s3 + $0x220] sm:$0xff] }
  0x30   : > { %1025 = vmatpush.bf16.msrb.mxu2 %v1928_v45  ;;  %537 = vmatmul.bf16.vlgmr.msra.gmra.mxu1 %v479_v61  ;;  %v1912_v45 = vld [vmem:[%s2405_s3 + $0x140] sm:$0xff] }
  0x31   : > { %932 = vmatpush.bf16.msrb.mxu1 %v1919_v50  ;;  %731 = vmatmul.bf16.vlgmr.msra.gmra.mxu3 %v1893_v58  ;;  %v1083_v50 = vrot.slane %v1081_v39, 1  ;;  %v1942_v58 = vld [vmem:[%s2405_s3 + $0x218] sm:$0xff]  ;;  %v1996_v39 = vld [vmem:[%s2406_s4] ss:$0 sm:$0xff] }
  0x32   : > { %1134 = vmatpush.bf16.msrb.mxu3 %v1937_v51  ;;  %v1920_v51 = vld [vmem:[%s2283_s15] sm:$0xff] }
  0x33   : > { %833 = vmatpush.bf16.msrb.mxu0 %v1909_v55  ;;  %v1084_v54 = vsel %vm467_vm1, %v1079_v49, %v1083_v50  ;;  %v1945_v55 = vld [vmem:[%s2405_s3 + $0x230] sm:$0xff] }
  0x34   : > { %1026 = vmatpush.bf16.msrb.mxu2 %v1927_v56  ;;  %v1944_v56 = vld [vmem:[%s2405_s3 + $0x228] sm:$0xff] }
  0x35   : > { %933 = vmatpush.bf16.msrb.mxu1 %v1918_v59  ;;  %v1156_v59 = vld [vmem:[%s2283_s15 + $0x8] sm:$0x1] }
  0x36   : > { %1135 = vmatpush.bf16.msrb.mxu3 %v1936_v60  ;;  %v1941_v60 = vld [vmem:[%s2405_s3 + $0x210] sm:$0xff]  ;;  %v1179_v61 = vunpack.c.l.b16 %v1156_v59 }
  0x37   : > { %834 = vmatpush.bf16.msrb.mxu0 %v1908_v62  ;;  %v1830_v62 = vld [vmem:[%s2283_s15] sm:$0xe] }
  0x38   : > { %1027 = vmatpush.bf16.msrb.mxu2 %v1926_v63  ;;  %v1938_v63 = vld [vmem:[%s2283_s15] sm:$0xf0]  ;;  %s1409_s15 = sshll.u32 %s2426_s18, 1 }
  0x39   : > { %934 = vmatpush.bf16.msrb.mxu1 %v1917_v0  ;;  %v1940_v0 = vld [vmem:[%s2405_s3 + $0x208] sm:$0xff]  ;;  %s340_s28 = sadd.s32 %s1410_s27, %s1409_s15 }
  0x3a   : > { %1136 = vmatpush.bf16.msrb.mxu3 %v1935_v1  ;;  %v1831_v1 = vor.u32 %v1938_v63, %v1830_v62  ;;  %s1411_s6 = sshll.u32 %s340_s28, 2 }
  0x3b   : > { %835 = vmatpush.bf16.msrb.mxu0 %v1907_v2  ;;  %v1181_v2 = vpack.c.b16 %v1179_v61, %v1179_v61  ;;  %s342_s12 = scalar_lea.vmem %s2407_s5, %s1411_s6 }
  0x3c   : > { %1028 = vmatpush.bf16.msrb.mxu2 %v1925_v3  ;;  %v1939_v3 = vld [vmem:[%s2405_s3 + $0x200] sm:$0xff]  ;;  %v1182_v4 = vrot.slane %v1831_v1, 1 }
  0x3d   : > { %935 = vmatpush.bf16.msrb.mxu1 %v1916_v5  ;;  %v1183_v5 = vrot.slane %v1181_v2, 1 }
  0x3e   : > { %1137 = vmatpush.bf16.msrb.mxu3 %v1934_v6 }
  0x3f   : > { %836 = vmatpush.bf16.msrb.mxu0 %v1906_v8  ;;  %v1184_v6 = vsel %vm577_vm0, %v1182_v4, %v1183_v5 }
  0x40   : > { %1029 = vmatpush.bf16.msrb.mxu2 %v1924_v9 }
  0x41   : > { %936 = vmatpush.bf16.msrb.mxu1 %v1915_v12 }
  0x42   : > { %1138 = vmatpush.bf16.msrb.mxu3 %v1933_v13 }
  0x43   : > { %837 = vmatpush.bf16.msrb.mxu0 %v1905_v17 }
  0x44   : > { %1030 = vmatpush.bf16.msrb.mxu2 %v1923_v18 }
  0x45   : > { %937 = vmatpush.bf16.msrb.mxu1 %v1914_v21 }
  0x46   : > { %1139 = vmatpush.bf16.msrb.mxu3 %v1932_v22 }
  0x47   : > { %838 = vmatpush.bf16.msrb.mxu0 %v1904_v28 }
  0x48   : > { %1031 = vmatpush.bf16.msrb.mxu2 %v1922_v29 }
  0x49   : > { %938 = vmatpush.bf16.msrb.mxu1 %v1913_v34 }
  0x4a   : > { %1140 = vmatpush.bf16.msrb.mxu3 %v1931_v35 }
  0x4b   : > { %839 = vmatpush.bf16.msrb.mxu0 %v1903_v40 }
  0x4c   : > { %1032 = vmatpush.bf16.msrb.mxu2 %v1921_v41 }
  0x4d   : > { %939 = vmatpush.bf16.msrb.mxu1 %v1912_v45 }
  0x4e   : > { %1141 = vmatpush.bf16.msrb.mxu3 %v1930_v46  ;;  %840 = vmatmul.bf16.vlgmr.msrb.gmra.mxu0 %v782_v52 }
  0x4f   : > { %1234 = vmatpush.bf16.msra.mxu0 %v1946_v44  ;;  %1033 = vmatmul.bf16.vlgmr.msrb.gmra.mxu2 %v1920_v51 }
  0x50   : > { %940 = vmatmul.bf16.vlgmr.msrb.gmra.mxu1 %v882_v53 }
  0x51   : > { %1142 = vmatmul.bf16.vlgmr.msrb.gmra.mxu3 %v1084_v54 }
  0x53   : > { %1235 = vmatpush.bf16.msra.mxu0 %v1945_v55 }
  0x57   : > { %1236 = vmatpush.bf16.msra.mxu0 %v1944_v56 }
  0x5b   : > { %1237 = vmatpush.bf16.msra.mxu0 %v1943_v57 }
  0x5f   : > { %1238 = vmatpush.bf16.msra.mxu0 %v1942_v58 }
  0x63   : > { %1239 = vmatpush.bf16.msra.mxu0 %v1941_v60 }
  0x67   : > { %1240 = vmatpush.bf16.msra.mxu0 %v1940_v0 }
  0x6b   : > { %1241 = vmatpush.bf16.msra.mxu0 %v1939_v3 }
  0x6e   : > { %1242 = vmatmul.bf16.vlgmr.msra.gmra.mxu0 %v1184_v6 }
  0xab   : > { %v428_v7 = vpop.f32.mrf.mxu0 }
  0xad   : > { %v538_v8 = vpop.f32.mrf.mxu1 }
  0xae   : > { %v543_v14 = vadd.f32 %v538_v8, %v428_v7 }
  0xb2   : > { %v639_v9 = vpop.f32.mrf.mxu2 }
  0xb3   : > { %v430_v10 = vpop.f32.mrf.mxu0  ;;  %v644_v17 = vadd.f32 %v639_v9, %v543_v14 }
  0xb4   : > { %v732_v11 = vpop.f32.mrf.mxu3 }
  0xb5   : > { %v540_v12 = vpop.f32.mrf.mxu1  ;;  %v737_v20 = vadd.f32 %v732_v11, %v644_v17 }
  0xb6   : > { %v544_v18 = vadd.f32 %v540_v12, %v430_v10 }
  0xba   : > { %v641_v13 = vpop.f32.mrf.mxu2 }
  0xbb   : > { %v645_v22 = vadd.f32 %v641_v13, %v544_v18 }
  0xbc   : > { %v734_v16 = vpop.f32.mrf.mxu3 }
  0xbd   : > { %v738_v26 = vadd.f32 %v734_v16, %v645_v22 }
  0xcb   : > { %v841_v15 = vpop.f32.mrf.mxu0 }
  0xcc   : > { %v846_v24 = vadd.f32 %v841_v15, %v737_v20 }
  0xcd   : > { %v941_v19 = vpop.f32.mrf.mxu1 }
  0xce   : > { %v946_v27 = vadd.f32 %v941_v19, %v846_v24 }
  0xd2   : > { %v1034_v21 = vpop.f32.mrf.mxu2 }
  0xd3   : > { %v843_v23 = vpop.f32.mrf.mxu0  ;;  %v1039_v32 = vadd.f32 %v1034_v21, %v946_v27 }
  0xd4   : > { %v1143_v25 = vpop.f32.mrf.mxu3  ;;  %v847_v28 = vadd.f32 %v843_v23, %v738_v26 }
  0xd5   : > { %v943_v29 = vpop.f32.mrf.mxu1  ;;  %v1148_v36 = vadd.f32 %v1143_v25, %v1039_v32 }
  0xd6   : > { %v947_v33 = vadd.f32 %v943_v29, %v847_v28 }
  0xda   : > { %v1036_v30 = vpop.f32.mrf.mxu2 }
  0xdb   : > { %v1040_v34 = vadd.f32 %v1036_v30, %v947_v33 }
  0xdc   : > { %v1145_v35 = vpop.f32.mrf.mxu3 }
  0xdd   : > { %v1149_v37 = vadd.f32 %v1145_v35, %v1040_v34 }
  0xeb   : > { %v1243_v31 = vpop.f32.mrf.mxu0 }
  0xec   : > { %v1248_v38 = vadd.f32 %v1243_v31, %v1148_v36 }
  0xee   : > { %v1258_v42 = vadd.f32 %v1996_v39, %v1248_v38 }
  0xf3   : > { %v1245_v40 = vpop.f32.mrf.mxu0 }
  0xf4   : > { %v1249_v41 = vadd.f32 %v1245_v40, %v1149_v37 }
  0xf6   : > { %v1259_v43 = vadd.f32 %v1996_v39, %v1249_v41 }
  0xf8   : > { %v1950_v44 = vpack.c.bf16 %v1259_v43, %v1258_v42 }
  0xfa   : > { %1951 = vst [vmem:[%s342_s12] sm:$0xff] %v1950_v44  }
  0xfb PF: > { %s15_s22 = sadd.s32 1, %s2035_s22   ;;  %s2409_s18 = smov %s2027_s20 }
  0xfc   : > { %p12_p10 = scmp.ge.s32.totalorder %s15_s22, 34   ;;  %s2410_s19 = smov %s2031_s21 }
  0xfd   : > { %s2411_s20 = smov %s2414_s23  ;;  %s2412_s21 = smov %s2418_s24 }
  0xfe   :  { %14 = sbr.rel (!%p12_p10) target bundleno = 3 (0x3), region = 84 }

// kernel: _lambda_.101
= control target key start
LH: loop header
LB: loop body
LE: loop exit
PB: predicated region body
PF: predicated region fallthrough
CT: control target
= control target key end

     0   :  { %s796_s15 = smov 0   ;;  %s798_s16 = smov 0   ;;  %s915_s0 = inlined_call_operand.vmem [shape: bf16[2,256,128], index: 0, kind: input, shape index: {}]   ;;  %s916_s1 = inlined_call_operand.vmem [shape: f32[128,32], index: 1, kind: input, shape index: {}]   ;;  %s917_s2 = inlined_call_operand.vmem [shape: f32[32,128], index: 2, kind: input, shape index: {}]   ;;  %s918_s3 = inlined_call_operand.vmem [shape: f32[2,1,128], index: 3, kind: output, shape index: {0}]   ;;  %s919_s4 = inlined_call_operand.vmem [shape: f32[2,1,128], index: 4, kind: output, shape index: {1}]  }
   0x1   :  { %s800_s17 = smov 0  }
   0x2 LB: > { %s27_s18 = sadd.s32 1, %s764_s16  ;;  %p632_p0 = scmp.ge.s32.totalorder %s768_s17, 1  ;;  %s768_s17 = sphi %s800_s17, %s15_s17   ;;  %s764_s16 = sphi %s798_s16, %s921_s16   ;;  %s760_s15 = sphi %s796_s15, %s920_s15  }
   0x3   : > { %p29_p1 = scmp.ge.s32.totalorder %s27_s18, 2  ;;  %p184_p2 = scmp.lt.s32.totalorder %s768_s17, 3 }
   0x5   : > { %s923_s18 = smov (%p29_p1, %s27_s18), 0  ;;  %p185_p3 = pnand %p632_p0, %p184_p2 }
   0x6   : > { %p216_p4 = scmp.lt.s32.totalorder (!%p185_p3), %s760_s15, 1 }
   0x7   : > { %188 = sbr.rel (%p185_p3) target bundleno = 389 (0x185), region = 32 }
   0xc   : > { %v432_v0 = vld [vmem:[%s916_s1 + $0x78] sm:$0xff]  ;;  %v431_v1 = vld [vmem:[%s916_s1 + $0x70] sm:$0xff]  ;;  %v770_v2 = vmov 0.0   ;;  %v430_v3 = vld [vmem:[%s916_s1 + $0x68] sm:$0xff]  ;;  %s925_s15 = smov (!%p216_p4, %s760_s15), 1  ;;  %vm483_vm0 = vcmask 261120  }
   0xd   : > { %433 = vmatpush.msra.mxu0 %v432_v0  ;;  %455 = vmatpush.msra.mxu1 %v432_v0  ;;  %235 = vst [vmem:[#allocation2] sm:$0x1] %v770_v2  ;;  %v429_v4 = vld [vmem:[%s916_s1 + $0x60] sm:$0xff]  ;;  %s639_s27 = sshll.u32 %s925_s15, 7  ;;  %v428_v5 = vld [vmem:[%s916_s1 + $0x58] sm:$0xff]  ;;  %v427_v6 = vld [vmem:[%s916_s1 + $0x50] sm:$0xff]  ;;  %s227_s21 = scalar_lea.vmem %s918_s3, %s925_s15 }
   0xe   : > { %236 = vst [vmem:[#allocation3] sm:$0x1] %v770_v2  ;;  %s832_s30 = scalar_lea.vmem %s915_s0, %s639_s27  ;;  %v426_v8 = vld [vmem:[%s916_s1 + $0x48] sm:$0xff]  ;;  %v425_v12 = vld [vmem:[%s916_s1 + $0x40] sm:$0xff]  ;;  %v424_v14 = vld [vmem:[%s916_s1 + $0x38] sm:$0xff]  ;;  %s230_s24 = scalar_lea.vmem %s919_s4, %s925_s15 }
   0xf   : > { %434 = vmatpush.msra.mxu0 %v431_v1  ;;  %456 = vmatpush.msra.mxu1 %v431_v1  ;;  %v641_v7 = vld [vmem:[%s832_s30] sm:$0xff]   ;;  %v704_v9 = vld [vmem:[%s832_s30 + $0x8] sm:$0xff]   ;;  %v705_v15 = vld [vmem:[%s832_s30 + $0x10] sm:$0xff]  }
  0x10   : > { %v642_v10 = vunpack.c.l.bf16 %v641_v7  ;;  %v643_v11 = vunpack.c.h.bf16 %v641_v7  ;;  %v646_v13 = vunpack.c.l.bf16 %v704_v9  ;;  %v647_v16 = vunpack.c.h.bf16 %v704_v9  ;;  %v423_v18 = vld [vmem:[%s916_s1 + $0x30] sm:$0xff]  ;;  %v422_v21 = vld [vmem:[%s916_s1 + $0x28] sm:$0xff]  ;;  %v706_v22 = vld [vmem:[%s832_s30 + $0x18] sm:$0xff]  }
  0x11   : > { %435 = vmatpush.msra.mxu0 %v430_v3  ;;  %457 = vmatpush.msra.mxu1 %v430_v3  ;;  %v650_v19 = vunpack.c.l.bf16 %v705_v15  ;;  %v651_v25 = vunpack.c.h.bf16 %v705_v15  ;;  %v421_v27 = vld [vmem:[%s916_s1 + $0x20] sm:$0xff]  ;;  %v654_v29 = vunpack.c.l.bf16 %v706_v22  ;;  %v420_v31 = vld [vmem:[%s916_s1 + $0x18] sm:$0xff]  ;;  %v655_v35 = vunpack.c.h.bf16 %v706_v22  ;;  %v419_v37 = vld [vmem:[%s916_s1 + $0x10] sm:$0xff] }
  0x12   : > { %v302_v17 = vadd.f32 %v643_v11, %v642_v10  ;;  %v342_v23 = vmul.f32 %v642_v10, %v642_v10  ;;  %v343_v24 = vmul.f32 %v643_v11, %v643_v11  ;;  %v344_v28 = vmul.f32 %v646_v13, %v646_v13  ;;  %v707_v32 = vld [vmem:[%s832_s30 + $0x20] sm:$0xff]   ;;  %v418_v42 = vld [vmem:[%s916_s1 + $0x8] sm:$0xff]  ;;  %v709_v53 = vld [vmem:[%s832_s30 + $0x30] sm:$0xff]  }
  0x13   : > { %436 = vmatpush.msra.mxu0 %v429_v4  ;;  %458 = vmatpush.msra.mxu1 %v429_v4  ;;  %v345_v33 = vmul.f32 %v647_v16, %v647_v16  ;;  %v346_v38 = vmul.f32 %v650_v19, %v650_v19  ;;  %v658_v40 = vunpack.c.l.bf16 %v707_v32  ;;  %v708_v43 = vld [vmem:[%s832_s30 + $0x28] sm:$0xff]   ;;  %v347_v44 = vmul.f32 %v651_v25, %v651_v25  ;;  %v417_v48 = vld [vmem:[%s916_s1] sm:$0xff]  ;;  %v710_v62 = vld [vmem:[%s832_s30 + $0x38] sm:$0xff]  }
  0x14   : > { %v303_v20 = vadd.f32 %v646_v13, %v302_v17  ;;  %v374_v34 = vadd.f32 %v343_v24, %v342_v23  ;;  %v659_v46 = vunpack.c.h.bf16 %v707_v32  ;;  %v348_v49 = vmul.f32 %v654_v29, %v654_v29  ;;  %v711_v7 = vld [vmem:[%s832_s30 + $0x40] sm:$0xff]  }
  0x15   : > { %437 = vmatpush.msra.mxu0 %v428_v5  ;;  %459 = vmatpush.msra.mxu1 %v428_v5  ;;  %v662_v51 = vunpack.c.l.bf16 %v708_v43  ;;  %v349_v54 = vmul.f32 %v655_v35, %v655_v35  ;;  %v663_v56 = vunpack.c.h.bf16 %v708_v43  ;;  %v350_v58 = vmul.f32 %v658_v40, %v658_v40  ;;  %v715_v43 = vld [vmem:[%s832_s30 + $0x60] sm:$0xff]  }
  0x16   : > { %v304_v26 = vadd.f32 %v647_v16, %v303_v20  ;;  %v375_v39 = vadd.f32 %v374_v34, %v344_v28  ;;  %v666_v60 = vunpack.c.l.bf16 %v709_v53  ;;  %v351_v63 = vmul.f32 %v659_v46, %v659_v46  ;;  %v712_v16 = vld [vmem:[%s832_s30 + $0x48] sm:$0xff]   ;;  %v714_v34 = vld [vmem:[%s832_s30 + $0x58] sm:$0xff]  }
  0x17   : > { %438 = vmatpush.msra.mxu0 %v427_v6  ;;  %460 = vmatpush.msra.mxu1 %v427_v6  ;;  %v667_v1 = vunpack.c.h.bf16 %v709_v53  ;;  %v352_v3 = vmul.f32 %v662_v51, %v662_v51  ;;  %v670_v5 = vunpack.c.l.bf16 %v710_v62  ;;  %v671_v10 = vunpack.c.h.bf16 %v710_v62 }
  0x18   : > { %v305_v30 = vadd.f32 %v650_v19, %v304_v26  ;;  %v376_v45 = vadd.f32 %v375_v39, %v345_v33  ;;  %v675_v19 = vunpack.c.h.bf16 %v711_v7  ;;  %v678_v23 = vunpack.c.l.bf16 %v712_v16 }
  0x19   : > { %439 = vmatpush.msra.mxu0 %v426_v8  ;;  %461 = vmatpush.msra.mxu1 %v426_v8  ;;  %v353_v8 = vmul.f32 %v663_v56, %v663_v56  ;;  %v355_v17 = vmul.f32 %v667_v1, %v667_v1  ;;  %v357_v26 = vmul.f32 %v671_v10, %v671_v10  ;;  %v679_v28 = vunpack.c.h.bf16 %v712_v16 }
  0x1a   : > { %v306_v36 = vadd.f32 %v651_v25, %v305_v30  ;;  %v377_v50 = vadd.f32 %v376_v45, %v346_v38  ;;  %v713_v25 = vld [vmem:[%s832_s30 + $0x50] sm:$0xff]   ;;  %v360_v39 = vmul.f32 %v678_v23, %v678_v23 }
  0x1b   : > { %440 = vmatpush.msra.mxu0 %v425_v12  ;;  %462 = vmatpush.msra.mxu1 %v425_v12  ;;  %v354_v12 = vmul.f32 %v666_v60, %v666_v60  ;;  %v682_v32 = vunpack.c.l.bf16 %v713_v25 }
  0x1c   : > { %v307_v41 = vadd.f32 %v654_v29, %v306_v36  ;;  %v378_v55 = vadd.f32 %v377_v50, %v347_v44  ;;  %v361_v44 = vmul.f32 %v679_v28, %v679_v28  ;;  %v690_v50 = vunpack.c.l.bf16 %v715_v43 }
  0x1d   : > { %441 = vmatpush.msra.mxu0 %v424_v14  ;;  %463 = vmatpush.msra.mxu1 %v424_v14  ;;  %v674_v14 = vunpack.c.l.bf16 %v711_v7 }
  0x1e   : > { %v308_v47 = vadd.f32 %v655_v35, %v307_v41  ;;  %v379_v59 = vadd.f32 %v378_v55, %v348_v49  ;;  %v359_v35 = vmul.f32 %v675_v19, %v675_v19  ;;  %v686_v41 = vunpack.c.l.bf16 %v714_v34 }
  0x1f   : > { %442 = vmatpush.msra.mxu0 %v423_v18  ;;  %464 = vmatpush.msra.mxu1 %v423_v18  ;;  %v358_v30 = vmul.f32 %v674_v14, %v674_v14  ;;  %v691_v55 = vunpack.c.h.bf16 %v715_v43 }
  0x20   : > { %v309_v52 = vadd.f32 %v658_v40, %v308_v47  ;;  %v380_v0 = vadd.f32 %v379_v59, %v349_v54 }
  0x21   : > { %443 = vmatpush.msra.mxu0 %v422_v21  ;;  %465 = vmatpush.msra.mxu1 %v422_v21  ;;  %v356_v21 = vmul.f32 %v670_v5, %v670_v5  ;;  %v367_v7 = vmul.f32 %v691_v55, %v691_v55 }
  0x22   : > { %v310_v57 = vadd.f32 %v659_v46, %v309_v52  ;;  %v381_v4 = vadd.f32 %v380_v0, %v350_v58  ;;  %v687_v46 = vunpack.c.h.bf16 %v714_v34  ;;  %v716_v52 = vld [vmem:[%s832_s30 + $0x68] sm:$0xff]  }
  0x23   : > { %444 = vmatpush.msra.mxu0 %v421_v27  ;;  %466 = vmatpush.msra.mxu1 %v421_v27  ;;  %v694_v59 = vunpack.c.l.bf16 %v716_v52  ;;  %v695_v0 = vunpack.c.h.bf16 %v716_v52  ;;  %v479_v52 = vld [vmem:[%s917_s2] sm:$0xff] }
  0x24   : > { %v311_v61 = vadd.f32 %v662_v51, %v310_v57  ;;  %v382_v9 = vadd.f32 %v381_v4, %v351_v63  ;;  %v364_v57 = vmul.f32 %v686_v41, %v686_v41  ;;  %v365_v62 = vmul.f32 %v687_v46, %v687_v46 }
  0x25   : > { %445 = vmatpush.msra.mxu0 %v420_v31  ;;  %467 = vmatpush.msra.mxu1 %v420_v31 }
  0x26   : > { %v312_v2 = vadd.f32 %v663_v56, %v311_v61  ;;  %v383_v13 = vadd.f32 %v382_v9, %v352_v3  ;;  %v717_v61 = vld [vmem:[%s832_s30 + $0x70] sm:$0xff]  }
  0x27   : > { %446 = vmatpush.msra.mxu0 %v419_v37  ;;  %468 = vmatpush.msra.mxu1 %v419_v37  ;;  %v683_v37 = vunpack.c.h.bf16 %v713_v25  ;;  %v698_v4 = vunpack.c.l.bf16 %v717_v61  ;;  %v699_v9 = vunpack.c.h.bf16 %v717_v61  ;;  %v481_v25 = vld [vmem:[%s917_s2 + $0x10] sm:$0xff] }
  0x28   : > { %v313_v6 = vadd.f32 %v666_v60, %v312_v2  ;;  %v384_v18 = vadd.f32 %v383_v13, %v353_v8  ;;  %v366_v2 = vmul.f32 %v690_v50, %v690_v50 }
  0x29   : > { %447 = vmatpush.msra.mxu0 %v418_v42  ;;  %469 = vmatpush.msra.mxu1 %v418_v42  ;;  %v363_v53 = vmul.f32 %v683_v37, %v683_v37 }
  0x2a   : > { %v314_v11 = vadd.f32 %v667_v1, %v313_v6  ;;  %v385_v22 = vadd.f32 %v384_v18, %v354_v12  ;;  %v718_v6 = vld [vmem:[%s832_s30 + $0x78] sm:$0xff]  }
  0x2b   : > { %448 = vmatpush.msra.mxu0 %v417_v48  ;;  %470 = vmatpush.msra.mxu1 %v417_v48  ;;  %v362_v48 = vmul.f32 %v682_v32, %v682_v32  ;;  %v702_v13 = vunpack.c.l.bf16 %v718_v6 }
  0x2c   : > { %v315_v15 = vadd.f32 %v670_v5, %v314_v11  ;;  %v386_v27 = vadd.f32 %v385_v22, %v355_v17  ;;  %v368_v11 = vmul.f32 %v694_v59, %v694_v59  ;;  %v703_v17 = vunpack.c.h.bf16 %v718_v6 }
  0x2d   : > { %v371_v22 = vmul.f32 %v699_v9, %v699_v9 }
  0x2e   : > { %v316_v20 = vadd.f32 %v671_v10, %v315_v15  ;;  %v387_v31 = vadd.f32 %v386_v27, %v356_v21  ;;  %v369_v15 = vmul.f32 %v695_v0, %v695_v0  ;;  %v372_v27 = vmul.f32 %v702_v13, %v702_v13 }
  0x30   : > { %v317_v24 = vadd.f32 %v674_v14, %v316_v20  ;;  %v388_v36 = vadd.f32 %v387_v31, %v357_v26 }
  0x32   : > { %v318_v29 = vadd.f32 %v675_v19, %v317_v24  ;;  %v389_v40 = vadd.f32 %v388_v36, %v358_v30  ;;  %v370_v19 = vmul.f32 %v698_v4, %v698_v4  ;;  %v482_v24 = vld [vmem:[%s917_s2 + $0x18] sm:$0xff]  ;;  %v373_v30 = vmul.f32 %v703_v17, %v703_v17 }
  0x33   : > { %499 = vmatpush.msra.mxu2 %v482_v24  ;;  %523 = vmatpush.msra.mxu3 %v482_v24 }
  0x34   : > { %v319_v33 = vadd.f32 %v678_v23, %v318_v29  ;;  %v390_v45 = vadd.f32 %v389_v40, %v359_v35 }
  0x35   : > { %500 = vmatpush.msra.mxu2 %v481_v25  ;;  %524 = vmatpush.msra.mxu3 %v481_v25 }
  0x36   : > { %v320_v38 = vadd.f32 %v679_v28, %v319_v33  ;;  %v391_v49 = vadd.f32 %v390_v45, %v360_v39  ;;  %v301_v39 = vld [vmem:[#allocation2] sm:$0x1] }
  0x38   : > { %v321_v42 = vadd.f32 %v682_v32, %v320_v38  ;;  %v392_v54 = vadd.f32 %v391_v49, %v361_v44 }
  0x3a   : > { %v322_v47 = vadd.f32 %v683_v37, %v321_v42  ;;  %v393_v58 = vadd.f32 %v392_v54, %v362_v48 }
  0x3c   : > { %v323_v51 = vadd.f32 %v686_v41, %v322_v47  ;;  %v394_v63 = vadd.f32 %v393_v58, %v363_v53 }
  0x3e   : > { %v324_v56 = vadd.f32 %v687_v46, %v323_v51  ;;  %v395_v3 = vadd.f32 %v394_v63, %v364_v57  ;;  %v341_v46 = vld [vmem:[#allocation3] sm:$0x1]  ;;  %v480_v51 = vld [vmem:[%s917_s2 + $0x8] sm:$0xff] }
  0x3f   : > { %501 = vmatpush.msra.mxu2 %v480_v51  ;;  %525 = vmatpush.msra.mxu3 %v480_v51 }
  0x40   : > { %v325_v60 = vadd.f32 %v690_v50, %v324_v56  ;;  %v396_v8 = vadd.f32 %v395_v3, %v365_v62 }
  0x41   : > { %502 = vmatpush.msra.mxu2 %v479_v52  ;;  %526 = vmatpush.msra.mxu3 %v479_v52 }
  0x42   : > { %v326_v1 = vadd.f32 %v691_v55, %v325_v60  ;;  %v397_v12 = vadd.f32 %v396_v8, %v366_v2 }
  0x44   : > { %v327_v5 = vadd.f32 %v694_v59, %v326_v1  ;;  %v398_v16 = vadd.f32 %v397_v12, %v367_v7 }
  0x46   : > { %v328_v10 = vadd.f32 %v695_v0, %v327_v5  ;;  %v399_v20 = vadd.f32 %v398_v16, %v368_v11 }
  0x48   : > { %v329_v14 = vadd.f32 %v698_v4, %v328_v10  ;;  %v400_v23 = vadd.f32 %v399_v20, %v369_v15 }
  0x4a   : > { %v330_v18 = vadd.f32 %v699_v9, %v329_v14  ;;  %v401_v28 = vadd.f32 %v400_v23, %v370_v19 }
  0x4c   : > { %v331_v21 = vadd.f32 %v702_v13, %v330_v18  ;;  %v402_v31 = vadd.f32 %v401_v28, %v371_v22 }
  0x4e   : > { %v332_v26 = vadd.f32 %v703_v17, %v331_v21  ;;  %v403_v33 = vadd.f32 %v402_v31, %v372_v27 }
  0x50   : > { %v333_v29 = vrot.slane %v332_v26, 4  ;;  %v404_v35 = vadd.f32 %v403_v33, %v373_v30 }
  0x52   : > { %v334_v32 = vadd.f32 %v333_v29, %v332_v26  ;;  %v405_v37 = vrot.slane %v404_v35, 4 }
  0x54   : > { %v335_v34 = vrot.slane %v334_v32, 2  ;;  %v406_v40 = vadd.f32 %v405_v37, %v404_v35 }
  0x56   : > { %v336_v36 = vadd.f32 %v335_v34, %v334_v32  ;;  %v407_v42 = vrot.slane %v406_v40, 2 }
  0x58   : > { %v337_v38 = vrot.slane %v336_v36, 1  ;;  %v408_v44 = vadd.f32 %v407_v42, %v406_v40 }
  0x5a   : > { %v338_v41 = vadd.f32 %v337_v38, %v336_v36  ;;  %v409_v45 = vrot.slane %v408_v44, 1 }
  0x5c   : > { %v339_v43 = vadd.f32 %v338_v41, %v301_v39  ;;  %v410_v47 = vadd.f32 %v409_v45, %v408_v44 }
  0x5e   : > { %340 = vst [vmem:[#allocation2] sm:$0x1] %v339_v43  ;;  %v411_v48 = vadd.f32 %v410_v47, %v341_v46 }
  0x60   : > { %412 = vst [vmem:[#allocation3] sm:$0x1] %v411_v48 }
  0x65   : > { %v416_v49 = vld [vmem:[#allocation2] sm:$0x1] }
  0x66   : > { %449 = vmatmul.f32.vlgmr.msra.gmra.mxu0 %v416_v49 }
  0x67   : > { %v454_v50 = vld [vmem:[#allocation3] sm:$0x1] }
  0x68   : > { %471 = vmatmul.f32.vlgmr.msra.gmra.mxu1 %v454_v50 }
  0xe3   : > { %v450_v53 = vpop.f32.mrf.mxu0 }
  0xe4   : > { %v453_v54 = vmul.f32 0.00390625, %v450_v53 }
  0xe5   : > { %v472_v56 = vpop.f32.mrf.mxu1 }
  0xe6   : > { %635 = vmatmul.msk.f32.vlgmr.msra.gmra.mxu2 %vm483_vm0, %v453_v54  ;;  %v476_v55 = vmul.f32 %v453_v54, %v453_v54  ;;  %v475_v57 = vmul.f32 0.00390625, %v472_v56 }
  0xe8   : > { %v477_v58 = vsub.f32 %v475_v57, %v476_v55 }
  0xea   : > { %v478_v59 = vmax.f32 %v477_v58, 0.0 }
  0xec   : > { %636 = vmatmul.msk.f32.vlgmr.msra.gmra.mxu3 %vm483_vm0, %v478_v59 }
 0x169   : > { %v504_v60 = vpop.f32.mrf.mxu2 }
 0x16a   : > { %507 = vst [vmem:[%s227_s21] sm:$0x1] %v504_v60 }
 0x16f   : > { %v528_v61 = vpop.f32.mrf.mxu3 }
 0x170   : > { %v529_v62 = vadd.f32 1e-06, %v528_v61 }
 0x172   : > { %744 = vrsqrt.f32 %v529_v62  ;;  %vm537_vm2 = vweird.f32 %v529_v62 }
 0x178   : > { %v745_v63 = vpop.eup %744 }
 0x179   : > { %v532_v0 = vmul.f32 %v745_v63, %v529_v62  ;;  %vm538_vm1 = vweird.f32 %v745_v63 }
 0x17a   : > { %vm539_vm3 = vmor %vm537_vm2, %vm538_vm1 }
 0x17b   : > { %v533_v1 = vmul.f32 %v745_v63, %v532_v0 }
 0x17d   : > { %v534_v2 = vmul.f32 0.5, %v533_v1 }
 0x17f   : > { %v535_v3 = vsub.f32 1.5, %v534_v2 }
 0x181   : > { %v536_v4 = vmul.f32 %v745_v63, %v535_v3 }
 0x183   : > { %v540_v5 = vsel %vm539_vm3, %v745_v63, %v536_v4 }
 0x184   : > { %541 = vst [vmem:[%s230_s24] sm:$0x1] %v540_v5 }
 0x185 PF: > { %s15_s17 = sadd.s32 1, %s768_s17   ;;  %s920_s15 = smov %s764_s16 }
 0x186   : > { %p12_p5 = scmp.ge.s32.totalorder %s15_s17, 4   ;;  %s921_s16 = smov %s923_s18 }
 0x188   :  { %14 = sbr.rel (!%p12_p5) target bundleno = 2 (0x2), region = 82 }

// kernel: _lambda_.103
= control target key start
LH: loop header
LB: loop body
LE: loop exit
PB: predicated region body
PF: predicated region fallthrough
CT: control target
= control target key end

     0   :  { %s1239_s12 = smov 0   ;;  %s1241_s13 = smov 0   ;;  %s1379_s0 = inlined_call_operand.vmem [shape: bf16[512,128], index: 0, kind: input, shape index: {}]   ;;  %s1380_s1 = inlined_call_operand.vmem [shape: bf16[128,128], index: 1, kind: input, shape index: {}]   ;;  %s1381_s2 = inlined_call_operand.vmem [shape: f32[1,128], index: 2, kind: input, shape index: {}]   ;;  %s1382_s3 = inlined_call_operand.vmem [shape: bf16[512,128], index: 3, kind: output, shape index: {}]  }
   0x1   :  { %s1243_s14 = smov 0  }
   0x2 LB: > { %s32_s15 = sadd.s32 1, %s1213_s13  ;;  %p924_p0 = scmp.ge.s32.totalorder %s1217_s14, 1  ;;  %s1217_s14 = sphi %s1243_s14, %s13_s14   ;;  %s1213_s13 = sphi %s1241_s13, %s1384_s13   ;;  %s1209_s12 = sphi %s1239_s12, %s1383_s12  }
   0x3   : > { %p34_p1 = scmp.ge.s32.totalorder %s32_s15, 2  ;;  %p188_p2 = scmp.lt.s32.totalorder %s1217_s14, 3 }
   0x5   : > { %s1386_s15 = smov (%p34_p1, %s32_s15), 0  ;;  %p189_p3 = pnand %p924_p0, %p188_p2 }
   0x6   : > { %s925_s24 = sshll.u32 (!%p189_p3), %s1209_s12, 5 }
   0x7   : > { %192 = sbr.rel (%p189_p3) target bundleno = 239 (0xef), region = 32  ;;  %p230_p4 = scmp.lt.s32.totalorder (!%p189_p3), %s925_s24, 63 }
   0xc   : > { %v1050_v0 = vld [vmem:[%s1380_s1 + $0x38] sm:$0xff]  ;;  %v1049_v1 = vld [vmem:[%s1380_s1 + $0x30] sm:$0xff]  ;;  %v1048_v2 = vld [vmem:[%s1380_s1 + $0x28] sm:$0xff]  ;;  %s1388_s24 = smov (!%p230_p4, %s925_s24), 63 }
   0xd   : > { %519 = vmatpush.bf16.msra.mxu0 %v1050_v0  ;;  %1146 = vmatpush.bf16.msra.mxu1 %v1050_v0  ;;  %v1047_v3 = vld [vmem:[%s1380_s1 + $0x20] sm:$0xff]  ;;  %v1046_v4 = vld [vmem:[%s1380_s1 + $0x18] sm:$0xff]  ;;  %v1045_v5 = vld [vmem:[%s1380_s1 + $0x10] sm:$0xff]  ;;  %s926_s4 = sshll.u32 %s1388_s24, 2 }
   0xe   : > { %1147 = vmatpush.bf16.msra.mxu2 %v1050_v0  ;;  %1148 = vmatpush.bf16.msra.mxu3 %v1050_v0  ;;  %v1044_v6 = vld [vmem:[%s1380_s1 + $0x8] sm:$0xff]  ;;  %v1043_v7 = vld [vmem:[%s1380_s1] sm:$0xff]  ;;  %s1292_s9 = scalar_lea.vmem %s1379_s0, %s926_s4  ;;  %s1324_s17 = scalar_lea.vmem %s1382_s3, %s926_s4 }
   0xf   : > { %v1027_v8 = vld [vmem:[%s1292_s9] sm:$0xff]  ;;  %v1028_v12 = vld [vmem:[%s1292_s9 + $0x8] sm:$0xff]  ;;  %v1029_v16 = vld [vmem:[%s1292_s9 + $0x10] sm:$0xff] }
  0x10   : > { %v1031_v9 = vld [vmem:[%s1292_s9 + $0x20] sm:$0xff]  ;;  %v1032_v13 = vld [vmem:[%s1292_s9 + $0x28] sm:$0xff]  ;;  %v1033_v17 = vld [vmem:[%s1292_s9 + $0x30] sm:$0xff] }
  0x11   : > { %520 = vmatpush.bf16.msra.mxu0 %v1049_v1  ;;  %1149 = vmatpush.bf16.msra.mxu1 %v1049_v1  ;;  %v1035_v10 = vld [vmem:[%s1292_s9 + $0x40] sm:$0xff]  ;;  %v1036_v14 = vld [vmem:[%s1292_s9 + $0x48] sm:$0xff]  ;;  %v1037_v18 = vld [vmem:[%s1292_s9 + $0x50] sm:$0xff] }
  0x12   : > { %1150 = vmatpush.bf16.msra.mxu2 %v1049_v1  ;;  %1151 = vmatpush.bf16.msra.mxu3 %v1049_v1  ;;  %v1039_v11 = vld [vmem:[%s1292_s9 + $0x60] sm:$0xff]  ;;  %v1040_v15 = vld [vmem:[%s1292_s9 + $0x68] sm:$0xff]  ;;  %v1041_v19 = vld [vmem:[%s1292_s9 + $0x70] sm:$0xff] }
  0x13   : > { %v1030_v20 = vld [vmem:[%s1292_s9 + $0x18] sm:$0xff]  ;;  %v1313_v26 = vld [vmem:[%s1381_s2] ss:$0 sm:$0xff] }
  0x14   : > { %v1034_v21 = vld [vmem:[%s1292_s9 + $0x38] sm:$0xff] }
  0x15   : > { %521 = vmatpush.bf16.msra.mxu0 %v1048_v2  ;;  %1152 = vmatpush.bf16.msra.mxu1 %v1048_v2  ;;  %v1038_v22 = vld [vmem:[%s1292_s9 + $0x58] sm:$0xff] }
  0x16   : > { %1153 = vmatpush.bf16.msra.mxu2 %v1048_v2  ;;  %1154 = vmatpush.bf16.msra.mxu3 %v1048_v2  ;;  %v1042_v23 = vld [vmem:[%s1292_s9 + $0x78] sm:$0xff] }
  0x19   : > { %522 = vmatpush.bf16.msra.mxu0 %v1047_v3  ;;  %1155 = vmatpush.bf16.msra.mxu1 %v1047_v3 }
  0x1a   : > { %1156 = vmatpush.bf16.msra.mxu2 %v1047_v3  ;;  %1157 = vmatpush.bf16.msra.mxu3 %v1047_v3 }
  0x1d   : > { %523 = vmatpush.bf16.msra.mxu0 %v1046_v4  ;;  %1158 = vmatpush.bf16.msra.mxu1 %v1046_v4 }
  0x1e   : > { %1159 = vmatpush.bf16.msra.mxu2 %v1046_v4  ;;  %1160 = vmatpush.bf16.msra.mxu3 %v1046_v4 }
  0x21   : > { %524 = vmatpush.bf16.msra.mxu0 %v1045_v5  ;;  %1161 = vmatpush.bf16.msra.mxu1 %v1045_v5 }
  0x22   : > { %1162 = vmatpush.bf16.msra.mxu2 %v1045_v5  ;;  %1163 = vmatpush.bf16.msra.mxu3 %v1045_v5 }
  0x25   : > { %525 = vmatpush.bf16.msra.mxu0 %v1044_v6  ;;  %1164 = vmatpush.bf16.msra.mxu1 %v1044_v6 }
  0x26   : > { %1165 = vmatpush.bf16.msra.mxu2 %v1044_v6  ;;  %1166 = vmatpush.bf16.msra.mxu3 %v1044_v6 }
  0x29   : > { %526 = vmatpush.bf16.msra.mxu0 %v1043_v7  ;;  %1167 = vmatpush.bf16.msra.mxu1 %v1043_v7 }
  0x2a   : > { %1168 = vmatpush.bf16.msra.mxu2 %v1043_v7  ;;  %1169 = vmatpush.bf16.msra.mxu3 %v1043_v7 }
  0x2c   : > { %527 = vmatmul.bf16.vlgmr.msra.gmra.mxu0 %v1027_v8  ;;  %547 = vmatmul.bf16.vlgmr.msra.gmra.mxu1 %v1031_v9 }
  0x2d   : > { %567 = vmatmul.bf16.vlgmr.msra.gmra.mxu2 %v1035_v10  ;;  %587 = vmatmul.bf16.vlgmr.msra.gmra.mxu3 %v1039_v11 }
  0x3c   : > { %532 = vmatmul.bf16.gmra.mxu0 %v1028_v12  ;;  %552 = vmatmul.bf16.gmra.mxu1 %v1032_v13 }
  0x3d   : > { %572 = vmatmul.bf16.gmra.mxu2 %v1036_v14  ;;  %592 = vmatmul.bf16.gmra.mxu3 %v1040_v15 }
  0x4c   : > { %537 = vmatmul.bf16.gmra.mxu0 %v1029_v16  ;;  %557 = vmatmul.bf16.gmra.mxu1 %v1033_v17 }
  0x4d   : > { %577 = vmatmul.bf16.gmra.mxu2 %v1037_v18  ;;  %597 = vmatmul.bf16.gmra.mxu3 %v1041_v19 }
  0x5c   : > { %542 = vmatmul.bf16.gmra.mxu0 %v1030_v20  ;;  %562 = vmatmul.bf16.gmra.mxu1 %v1034_v21 }
  0x5d   : > { %582 = vmatmul.bf16.gmra.mxu2 %v1038_v22  ;;  %602 = vmatmul.bf16.gmra.mxu3 %v1042_v23 }
  0xa9   : > { %v528_v24 = vpop.f32.mrf.mxu0  ;;  %v548_v25 = vpop.f32.mrf.mxu1 }
  0xaa   : > { %v711_v31 = vadd.f32 %v1313_v26, %v528_v24  ;;  %v719_v32 = vadd.f32 %v1313_v26, %v548_v25 }
  0xb0   : > { %v568_v27 = vpop.f32.mrf.mxu2  ;;  %v588_v28 = vpop.f32.mrf.mxu3 }
  0xb1   : > { %v530_v29 = vpop.f32.mrf.mxu0  ;;  %v550_v30 = vpop.f32.mrf.mxu1  ;;  %v727_v39 = vadd.f32 %v1313_v26, %v568_v27  ;;  %v735_v40 = vadd.f32 %v1313_v26, %v588_v28 }
  0xb2   : > { %v712_v33 = vadd.f32 %v1313_v26, %v530_v29  ;;  %v720_v34 = vadd.f32 %v1313_v26, %v550_v30 }
  0xb4   : > { %v1054_v35 = vpack.c.bf16 %v712_v33, %v711_v31  ;;  %v1074_v36 = vpack.c.bf16 %v720_v34, %v719_v32 }
  0xb6   : > { %1055 = vst [vmem:[%s1324_s17] sm:$0xff] %v1054_v35  }
  0xb7   : > { %1134 = vst [vmem:[%s1324_s17 + $0x20] sm:$0xff] %v1074_v36  }
  0xb8   : > { %v570_v37 = vpop.f32.mrf.mxu2  ;;  %v590_v38 = vpop.f32.mrf.mxu3 }
  0xb9   : > { %v728_v41 = vadd.f32 %v1313_v26, %v570_v37  ;;  %v736_v42 = vadd.f32 %v1313_v26, %v590_v38  ;;  %v533_v43 = vpop.f32.mrf.mxu0  ;;  %v553_v44 = vpop.f32.mrf.mxu1 }
  0xba   : > { %v713_v51 = vadd.f32 %v1313_v26, %v533_v43  ;;  %v721_v52 = vadd.f32 %v1313_v26, %v553_v44 }
  0xbb   : > { %v1094_v45 = vpack.c.bf16 %v728_v41, %v727_v39  ;;  %v1114_v46 = vpack.c.bf16 %v736_v42, %v735_v40 }
  0xbd   : > { %1138 = vst [vmem:[%s1324_s17 + $0x40] sm:$0xff] %v1094_v45  }
  0xbe   : > { %1142 = vst [vmem:[%s1324_s17 + $0x60] sm:$0xff] %v1114_v46  }
  0xc0   : > { %v573_v47 = vpop.f32.mrf.mxu2  ;;  %v593_v48 = vpop.f32.mrf.mxu3 }
  0xc1   : > { %v535_v49 = vpop.f32.mrf.mxu0  ;;  %v555_v50 = vpop.f32.mrf.mxu1  ;;  %v729_v59 = vadd.f32 %v1313_v26, %v573_v47  ;;  %v737_v60 = vadd.f32 %v1313_v26, %v593_v48 }
  0xc2   : > { %v714_v53 = vadd.f32 %v1313_v26, %v535_v49  ;;  %v722_v54 = vadd.f32 %v1313_v26, %v555_v50 }
  0xc4   : > { %v1059_v55 = vpack.c.bf16 %v714_v53, %v713_v51  ;;  %v1079_v56 = vpack.c.bf16 %v722_v54, %v721_v52 }
  0xc6   : > { %1131 = vst [vmem:[%s1324_s17 + $0x8] sm:$0xff] %v1059_v55  }
  0xc7   : > { %1135 = vst [vmem:[%s1324_s17 + $0x28] sm:$0xff] %v1079_v56  }
  0xc8   : > { %v575_v57 = vpop.f32.mrf.mxu2  ;;  %v595_v58 = vpop.f32.mrf.mxu3 }
  0xc9   : > { %v730_v61 = vadd.f32 %v1313_v26, %v575_v57  ;;  %v738_v62 = vadd.f32 %v1313_v26, %v595_v58  ;;  %v538_v63 = vpop.f32.mrf.mxu0  ;;  %v558_v0 = vpop.f32.mrf.mxu1 }
  0xca   : > { %v715_v7 = vadd.f32 %v1313_v26, %v538_v63  ;;  %v723_v8 = vadd.f32 %v1313_v26, %v558_v0 }
  0xcb   : > { %v1099_v1 = vpack.c.bf16 %v730_v61, %v729_v59  ;;  %v1119_v2 = vpack.c.bf16 %v738_v62, %v737_v60 }
  0xcd   : > { %1139 = vst [vmem:[%s1324_s17 + $0x48] sm:$0xff] %v1099_v1  }
  0xce   : > { %1143 = vst [vmem:[%s1324_s17 + $0x68] sm:$0xff] %v1119_v2  }
  0xd0   : > { %v578_v3 = vpop.f32.mrf.mxu2  ;;  %v598_v4 = vpop.f32.mrf.mxu3 }
  0xd1   : > { %v540_v5 = vpop.f32.mrf.mxu0  ;;  %v560_v6 = vpop.f32.mrf.mxu1  ;;  %v731_v15 = vadd.f32 %v1313_v26, %v578_v3  ;;  %v739_v16 = vadd.f32 %v1313_v26, %v598_v4 }
  0xd2   : > { %v716_v9 = vadd.f32 %v1313_v26, %v540_v5  ;;  %v724_v10 = vadd.f32 %v1313_v26, %v560_v6 }
  0xd4   : > { %v1064_v11 = vpack.c.bf16 %v716_v9, %v715_v7  ;;  %v1084_v12 = vpack.c.bf16 %v724_v10, %v723_v8 }
  0xd6   : > { %1132 = vst [vmem:[%s1324_s17 + $0x10] sm:$0xff] %v1064_v11  }
  0xd7   : > { %1136 = vst [vmem:[%s1324_s17 + $0x30] sm:$0xff] %v1084_v12  }
  0xd8   : > { %v580_v13 = vpop.f32.mrf.mxu2  ;;  %v600_v14 = vpop.f32.mrf.mxu3 }
  0xd9   : > { %v732_v17 = vadd.f32 %v1313_v26, %v580_v13  ;;  %v740_v18 = vadd.f32 %v1313_v26, %v600_v14  ;;  %v543_v19 = vpop.f32.mrf.mxu0  ;;  %v563_v20 = vpop.f32.mrf.mxu1 }
  0xda   : > { %v717_v28 = vadd.f32 %v1313_v26, %v543_v19  ;;  %v725_v29 = vadd.f32 %v1313_v26, %v563_v20 }
  0xdb   : > { %v1104_v21 = vpack.c.bf16 %v732_v17, %v731_v15  ;;  %v1124_v22 = vpack.c.bf16 %v740_v18, %v739_v16 }
  0xdd   : > { %1140 = vst [vmem:[%s1324_s17 + $0x50] sm:$0xff] %v1104_v21  }
  0xde   : > { %1144 = vst [vmem:[%s1324_s17 + $0x70] sm:$0xff] %v1124_v22  }
  0xe0   : > { %v583_v23 = vpop.f32.mrf.mxu2  ;;  %v603_v24 = vpop.f32.mrf.mxu3 }
  0xe1   : > { %v545_v25 = vpop.f32.mrf.mxu0  ;;  %v565_v27 = vpop.f32.mrf.mxu1  ;;  %v733_v36 = vadd.f32 %v1313_v26, %v583_v23  ;;  %v741_v37 = vadd.f32 %v1313_v26, %v603_v24 }
  0xe2   : > { %v718_v30 = vadd.f32 %v1313_v26, %v545_v25  ;;  %v726_v31 = vadd.f32 %v1313_v26, %v565_v27 }
  0xe4   : > { %v1069_v32 = vpack.c.bf16 %v718_v30, %v717_v28  ;;  %v1089_v33 = vpack.c.bf16 %v726_v31, %v725_v29 }
  0xe6   : > { %1133 = vst [vmem:[%s1324_s17 + $0x18] sm:$0xff] %v1069_v32  }
  0xe7   : > { %1137 = vst [vmem:[%s1324_s17 + $0x38] sm:$0xff] %v1089_v33  }
  0xe8   : > { %v585_v34 = vpop.f32.mrf.mxu2  ;;  %v605_v35 = vpop.f32.mrf.mxu3 }
  0xe9   : > { %v734_v38 = vadd.f32 %v1313_v26, %v585_v34  ;;  %v742_v39 = vadd.f32 %v1313_v26, %v605_v35 }
  0xeb   : > { %v1109_v40 = vpack.c.bf16 %v734_v38, %v733_v36  ;;  %v1129_v41 = vpack.c.bf16 %v742_v39, %v741_v37 }
  0xed   : > { %1141 = vst [vmem:[%s1324_s17 + $0x58] sm:$0xff] %v1109_v40  }
  0xee   : > { %1145 = vst [vmem:[%s1324_s17 + $0x78] sm:$0xff] %v1129_v41  }
  0xef PF: > { %s13_s14 = sadd.s32 1, %s1217_s14   ;;  %s1383_s12 = smov %s1213_s13 }
  0xf0   : > { %p10_p5 = scmp.ge.s32.totalorder %s13_s14, 4   ;;  %s1384_s13 = smov %s1386_s15 }
  0xf2   :  { %12 = sbr.rel (!%p10_p5) target bundleno = 2 (0x2), region = 76 }

// kernel: _lambda_.104
= control target key start
LH: loop header
LB: loop body
LE: loop exit
PB: predicated region body
PF: predicated region fallthrough
CT: control target
= control target key end

     0   :  { %s2167_s21 = smov 0   ;;  %s2169_s22 = smov 0   ;;  %s2505_s0 = inlined_call_operand.vmem [shape: bf16[2,18,18,128], index: 0, kind: input, shape index: {}, may-alias: {0,1,2}]   ;;  %s2506_s1 = inlined_call_operand.vmem [shape: bf16[2,18,18,128], index: 1, kind: input, shape index: {}, may-alias: {0,1,2}]   ;;  %s2507_s2 = inlined_call_operand.vmem [shape: bf16[2,18,18,128], index: 2, kind: input, shape index: {}, may-alias: {0,1,2}]   ;;  %s2508_s3 = inlined_call_operand.vmem [shape: bf16[9,128,128], index: 3, kind: input, shape index: {}]   ;;  %s2509_s4 = inlined_call_operand.vmem [shape: f32[1,128], index: 4, kind: input, shape index: {}]   ;;  %s2510_s5 = inlined_call_operand.vmem [shape: bf16[2,16,16,128], index: 5, kind: input, shape index: {}]   ;;  %s2511_s6 = inlined_call_operand.vmem [shape: bf16[2,16,16,128], index: 6, kind: output, shape index: {}]  }
   0x1   :  { %s2171_s23 = smov 0   ;;  %s2173_s24 = smov 0  }
   0x2   :  { %s2175_s25 = smov 0  }
   0x3 LB: > { %s25_s26 = sadd.s32 1, %s2122_s23  ;;  %s28_s27 = sadd.s32 1, %s2126_s24  ;;  %s2130_s25 = sphi %s2175_s25, %s16_s25   ;;  %s2126_s24 = sphi %s2173_s24, %s2516_s24   ;;  %s2122_s23 = sphi %s2171_s23, %s2515_s23   ;;  %s2118_s22 = sphi %s2169_s22, %s2514_s22   ;;  %s2114_s21 = sphi %s2167_s21, %s2513_s21  }
   0x4   : > { %p26_p0 = scmp.ge.s32.totalorder %s25_s26, 16  ;;  %p1493_p1 = scmp.ge.s32.totalorder %s2130_s25, 1 }
   0x5   : > { %p288_p2 = scmp.lt.s32.totalorder %s2130_s25, 33 }
   0x6   : > { %s2518_s26 = smov (%p26_p0, %s25_s26), 0  ;;  %s2520_s27 = smov (!%p26_p0, %s28_s27), %s2126_s24 }
   0x7   : > { %p289_p3 = pnand %p1493_p1, %p288_p2  ;;  %p30_p4 = scmp.ge.s32.totalorder %s2520_s27, 2 }
   0x8   : > { %p355_p5 = scmp.lt.s32.totalorder (!%p289_p3), %s2118_s22, 1  ;;  %p357_p6 = scmp.lt.s32.totalorder (!%p289_p3), %s2114_s21, 17 }
   0x9   : > { %s2522_s27 = smov (%p30_p4, %s2520_s27), 0  ;;  %292 = sbr.rel (%p289_p3) target bundleno = 253 (0xfd), region = 44 }
   0xa   : > { %s364_s15 = sadd.s32 (!%p289_p3), 1, %s2114_s21  ;;  %s375_s9 = sadd.s32 (!%p289_p3), 2, %s2114_s21 }
   0xb   : > { %p367_p7 = scmp.lt.s32.totalorder (!%p289_p3), %s364_s15, 17  ;;  %p2294_p8 = scmp.lt.s32.totalorder (!%p289_p3), %s375_s9, 17 }
   0xc   : > { %p388_p9 = scmp.lt.s32.totalorder (!%p289_p3), %s2114_s21, 15 }
   0xe   : > { %v1965_v0 = vld [vmem:[%s2508_s3 + $0x38] sm:$0xff]  ;;  %v1964_v4 = vld [vmem:[%s2508_s3 + $0x30] sm:$0xff]  ;;  %s2524_s22 = smov (!%p355_p5, %s2118_s22), 1  ;;  %v1963_v8 = vld [vmem:[%s2508_s3 + $0x28] sm:$0xff]  ;;  %s2526_s15 = smov (!%p367_p7, %s364_s15), 17  ;;  %vm638_vm0 = vcmask 1046528  }
   0xf   : > { %v1983_v1 = vld [vmem:[%s2508_s3 + $0xb8] sm:$0xff]  ;;  %480 = vmatpush.bf16.msra.mxu0 %v1965_v0  ;;  %v1982_v5 = vld [vmem:[%s2508_s3 + $0xb0] sm:$0xff]  ;;  %s358_s20 = scalar_select %p357_p6, %s2114_s21, 17  ;;  %v1981_v9 = vld [vmem:[%s2508_s3 + $0xa8] sm:$0xff]  ;;  %vm528_vm1 = vsmask.f32 7424 }
  0x10   : > { %v1974_v2 = vld [vmem:[%s2508_s3 + $0x78] sm:$0xff]  ;;  %691 = vmatpush.bf16.msra.mxu2 %v1983_v1  ;;  %v1973_v6 = vld [vmem:[%s2508_s3 + $0x70] sm:$0xff]  ;;  %s2228_s28 = smul.u32 54, %s2524_s22  ;;  %v1972_v10 = vld [vmem:[%s2508_s3 + $0x68] sm:$0xff]  ;;  %s2528_s9 = smov (!%p2294_p8, %s375_s9), 17 }
  0x11   : > { %v1992_v3 = vld [vmem:[%s2508_s3 + $0xf8] sm:$0xff]  ;;  %590 = vmatpush.bf16.msra.mxu1 %v1974_v2  ;;  %v1991_v7 = vld [vmem:[%s2508_s3 + $0xf0] sm:$0xff]  ;;  %s2047_s29 = smul.u32 3, %s358_s20  ;;  %v1990_v11 = vld [vmem:[%s2508_s3 + $0xe8] sm:$0xff]  ;;  %s2530_s21 = smov (!%p388_p9, %s2114_s21), 15 }
  0x12   : > { %784 = vmatpush.bf16.msra.mxu3 %v1992_v3  ;;  %v1962_v12 = vld [vmem:[%s2508_s3 + $0x20] sm:$0xff]  ;;  %v1961_v16 = vld [vmem:[%s2508_s3 + $0x18] sm:$0xff]  ;;  %v1960_v20 = vld [vmem:[%s2508_s3 + $0x10] sm:$0xff]  ;;  %s2049_s16 = smul.u32 3, %s2526_s15 }
  0x13   : > { %481 = vmatpush.bf16.msra.mxu0 %v1964_v4  ;;  %s361_s14 = sadd.s32 %s2228_s28, %s2047_s29  ;;  %v1980_v13 = vld [vmem:[%s2508_s3 + $0xa0] sm:$0xff]  ;;  %v1979_v17 = vld [vmem:[%s2508_s3 + $0x98] sm:$0xff]  ;;  %v1978_v22 = vld [vmem:[%s2508_s3 + $0x90] sm:$0xff] }
  0x14   : > { %692 = vmatpush.bf16.msra.mxu2 %v1982_v5  ;;  %v1971_v14 = vld [vmem:[%s2508_s3 + $0x60] sm:$0xff]  ;;  %s1494_s29 = sshll.u32 %s361_s14, 2  ;;  %v1970_v18 = vld [vmem:[%s2508_s3 + $0x58] sm:$0xff]  ;;  %v1969_v25 = vld [vmem:[%s2508_s3 + $0x50] sm:$0xff]  ;;  %s371_s10 = sadd.s32 %s2049_s16, %s2228_s28 }
  0x15   : > { %591 = vmatpush.bf16.msra.mxu1 %v1973_v6  ;;  %v1989_v15 = vld [vmem:[%s2508_s3 + $0xe0] sm:$0xff]  ;;  %s2265_s17 = scalar_lea.vmem %s2505_s0, %s1494_s29  ;;  %v1988_v19 = vld [vmem:[%s2508_s3 + $0xd8] sm:$0xff]  ;;  %v1987_v26 = vld [vmem:[%s2508_s3 + $0xd0] sm:$0xff]  ;;  %s1495_s19 = sshll.u32 %s371_s10, 2 }
  0x16   : > { %785 = vmatpush.bf16.msra.mxu3 %v1991_v7  ;;  %v612_v21 = vld [vmem:[%s2265_s17 + $0x8] sm:$0x1]  ;;  %v1966_v23 = vld [vmem:[%s2265_s17] sm:$0xff]  ;;  %v2001_v44 = vld [vmem:[%s2508_s3 + $0x138] sm:$0xff]  ;;  %s2342_s20 = scalar_lea.vmem %s2506_s1, %s1495_s19  ;;  %s2050_s14 = smul.u32 3, %s2528_s9 }
  0x17   : > { %482 = vmatpush.bf16.msra.mxu0 %v1963_v8  ;;  %v502_v24 = vld [vmem:[%s2265_s17 + $0x8] sm:$0x1]  ;;  %v635_v27 = vunpack.c.l.b16 %v612_v21  ;;  %v1609_v29 = vld [vmem:[%s2265_s17] sm:$0xe]  ;;  %v1975_v30 = vld [vmem:[%s2265_s17] sm:$0xf0] }
  0x18   : > { %693 = vmatpush.bf16.msra.mxu2 %v1981_v9  ;;  %v525_v28 = vunpack.c.l.b16 %v502_v24  ;;  %v532_v32 = vshll.u32 %v1966_v23, 16  ;;  %v1959_v33 = vld [vmem:[%s2508_s3 + $0x8] sm:$0xff]  ;;  %v1610_v37 = vor.u32 %v1975_v30, %v1609_v29  ;;  %v530_v39 = vshrl.u32 %v1966_v23, 16  ;;  %v1958_v42 = vld [vmem:[%s2508_s3] sm:$0xff]  ;;  %v2019_v45 = vld [vmem:[%s2508_s3 + $0x1b8] sm:$0xff]  ;;  %s382_s10 = sadd.s32 %s2050_s14, %s2228_s28 }
  0x19   : > { %592 = vmatpush.bf16.msra.mxu1 %v1972_v10  ;;  %v1977_v34 = vld [vmem:[%s2508_s3 + $0x88] sm:$0xff]  ;;  %v637_v38 = vpack.c.b16 %v635_v27, %v635_v27  ;;  %v1976_v43 = vld [vmem:[%s2508_s3 + $0x80] sm:$0xff]  ;;  %v2010_v50 = vld [vmem:[%s2508_s3 + $0x178] sm:$0xff]  ;;  %s1496_s16 = sshll.u32 %s382_s10, 2 }
  0x1a   : > { %786 = vmatpush.bf16.msra.mxu3 %v1990_v11  ;;  %v527_v31 = vpack.c.b16 %v525_v28, %v525_v28  ;;  %v1968_v35 = vld [vmem:[%s2508_s3 + $0x48] sm:$0xff]  ;;  %v534_v40 = vrot.slane %v532_v32, 1  ;;  %v639_v46 = vrot.slane %v1610_v37, 1  ;;  %v1967_v48 = vld [vmem:[%s2508_s3 + $0x40] sm:$0xff]  ;;  %v2028_v51 = vld [vmem:[%s2508_s3 + $0x1f8] sm:$0xff]  ;;  %s2383_s10 = scalar_lea.vmem %s2507_s2, %s1496_s16  ;;  %s1498_s16 = sshll.u32 %s2524_s22, 5 }
  0x1b   : > { %483 = vmatpush.bf16.msra.mxu0 %v1962_v12  ;;  %v1986_v36 = vld [vmem:[%s2508_s3 + $0xc8] sm:$0xff]  ;;  %v640_v47 = vrot.slane %v637_v38, 1  ;;  %v1985_v49 = vld [vmem:[%s2508_s3 + $0xc0] sm:$0xff]  ;;  %v2000_v55 = vld [vmem:[%s2508_s3 + $0x130] sm:$0xff] }
  0x1c   : > { %694 = vmatpush.bf16.msra.mxu2 %v1980_v13  ;;  %v537_v41 = vshll.u32 %v527_v31, 16  ;;  %v535_v52 = vor.u32 %v534_v40, %v530_v39  ;;  %v1957_v54 = vld [vmem:[%s2265_s17] sm:$0xff]  ;;  %v2018_v56 = vld [vmem:[%s2508_s3 + $0x1b0] sm:$0xff]  ;;  %v1999_v62 = vld [vmem:[%s2508_s3 + $0x128] sm:$0xff] }
  0x1d   : > { %593 = vmatpush.bf16.msra.mxu1 %v1971_v14  ;;  %v641_v57 = vsel %vm638_vm0, %v639_v46, %v640_v47  ;;  %v1984_v58 = vld [vmem:[%s2342_s20] sm:$0xff]  ;;  %v2009_v59 = vld [vmem:[%s2508_s3 + $0x170] sm:$0xff]  ;;  %v2017_v63 = vld [vmem:[%s2508_s3 + $0x1a8] sm:$0xff] }
  0x1e   : > { %787 = vmatpush.bf16.msra.mxu3 %v1989_v15  ;;  %v539_v53 = vrot.slane %v537_v41, 1  ;;  %v2027_v60 = vld [vmem:[%s2508_s3 + $0x1f0] sm:$0xff]  ;;  %v2008_v0 = vld [vmem:[%s2508_s3 + $0x168] sm:$0xff]  ;;  %v1998_v2 = vld [vmem:[%s2508_s3 + $0x120] sm:$0xff] }
  0x1f   : > { %484 = vmatpush.bf16.msra.mxu0 %v1961_v16  ;;  %v2026_v1 = vld [vmem:[%s2508_s3 + $0x1e8] sm:$0xff]  ;;  %v2016_v3 = vld [vmem:[%s2508_s3 + $0x1a0] sm:$0xff]  ;;  %v1997_v8 = vld [vmem:[%s2508_s3 + $0x118] sm:$0xff] }
  0x20   : > { %695 = vmatpush.bf16.msra.mxu2 %v1979_v17  ;;  %v540_v61 = vsel %vm528_vm1, %v535_v52, %v539_v53  ;;  %v806_v4 = vld [vmem:[%s2342_s20 + $0x8] sm:$0x1]  ;;  %v2007_v5 = vld [vmem:[%s2508_s3 + $0x160] sm:$0xff]  ;;  %v2015_v9 = vld [vmem:[%s2508_s3 + $0x198] sm:$0xff] }
  0x21   : > { %594 = vmatpush.bf16.msra.mxu1 %v1970_v18  ;;  %v2025_v6 = vld [vmem:[%s2508_s3 + $0x1e0] sm:$0xff]  ;;  %v1108_v7 = vld [vmem:[%s2383_s10 + $0x8] sm:$0x1]  ;;  %v829_v11 = vunpack.c.l.b16 %v806_v4  ;;  %v2006_v12 = vld [vmem:[%s2508_s3 + $0x158] sm:$0xff] }
  0x22   : > { %788 = vmatpush.bf16.msra.mxu3 %v1988_v19  ;;  %v1993_v10 = vld [vmem:[%s2342_s20] sm:$0xff]  ;;  %v2024_v13 = vld [vmem:[%s2508_s3 + $0x1d8] sm:$0xff]  ;;  %v1131_v15 = vunpack.c.l.b16 %v1108_v7  ;;  %v915_v16 = vld [vmem:[%s2342_s20 + $0x8] sm:$0x1] }
  0x23   : > { %485 = vmatpush.bf16.msra.mxu0 %v1960_v20  ;;  %v2020_v14 = vld [vmem:[%s2383_s10] sm:$0xff]  ;;  %v1996_v17 = vld [vmem:[%s2508_s3 + $0x110] sm:$0xff]  ;;  %v831_v19 = vpack.c.b16 %v829_v11, %v829_v11  ;;  %v835_v20 = vshll.u32 %v1993_v10, 16  ;;  %v1995_v28 = vld [vmem:[%s2508_s3 + $0x108] sm:$0xff]  ;;  %v833_v30 = vshrl.u32 %v1993_v10, 16 }
  0x24   : > { %696 = vmatpush.bf16.msra.mxu2 %v1978_v22  ;;  %v2014_v18 = vld [vmem:[%s2508_s3 + $0x190] sm:$0xff]  ;;  %v1765_v23 = vld [vmem:[%s2342_s20] sm:$0xe]  ;;  %v2002_v24 = vld [vmem:[%s2342_s20] sm:$0xf0]  ;;  %v1137_v27 = vshll.u32 %v2020_v14, 16 }
  0x25   : > { %595 = vmatpush.bf16.msra.mxu1 %v1969_v25  ;;  %v2005_v21 = vld [vmem:[%s2508_s3 + $0x150] sm:$0xff]  ;;  %v938_v25 = vunpack.c.l.b16 %v915_v16  ;;  %v2013_v29 = vld [vmem:[%s2508_s3 + $0x188] sm:$0xff]  ;;  %v837_v31 = vrot.slane %v835_v20, 1  ;;  %v840_v32 = vshll.u32 %v831_v19, 16  ;;  %v1135_v37 = vshrl.u32 %v2020_v14, 16  ;;  %v1994_v40 = vld [vmem:[%s2508_s3 + $0x100] sm:$0xff] }
  0x26   : > { %789 = vmatpush.bf16.msra.mxu3 %v1987_v26  ;;  %v2023_v22 = vld [vmem:[%s2508_s3 + $0x1d0] sm:$0xff]  ;;  %v1133_v26 = vpack.c.b16 %v1131_v15, %v1131_v15  ;;  %v1139_v38 = vrot.slane %v1137_v27, 1  ;;  %v2012_v41 = vld [vmem:[%s2508_s3 + $0x180] sm:$0xff] }
  0x27   : > { %486 = vmatpush.bf16.msra.mxu0 %v1959_v33  ;;  %v1766_v33 = vor.u32 %v2002_v24, %v1765_v23  ;;  %v2021_v46 = vld [vmem:[%s2508_s3 + $0x1c0] sm:$0xff] }
  0x28   : > { %697 = vmatpush.bf16.msra.mxu2 %v1977_v34  ;;  %v2004_v34 = vld [vmem:[%s2508_s3 + $0x148] sm:$0xff]  ;;  %v1142_v39 = vshll.u32 %v1133_v26, 16 }
  0x29   : > { %596 = vmatpush.bf16.msra.mxu1 %v1968_v35  ;;  %v2022_v35 = vld [vmem:[%s2508_s3 + $0x1c8] sm:$0xff]  ;;  %v941_v47 = vrot.slane %v1766_v33, 1 }
  0x2a   : > { %790 = vmatpush.bf16.msra.mxu3 %v1986_v36  ;;  %v940_v36 = vpack.c.b16 %v938_v25, %v938_v25 }
  0x2b   : > { %487 = vmatpush.bf16.msra.mxu0 %v1958_v42  ;;  %v838_v42 = vor.u32 %v837_v31, %v833_v30 }
  0x2c   : > { %698 = vmatpush.bf16.msra.mxu2 %v1976_v43  ;;  %v842_v43 = vrot.slane %v840_v32, 1 }
  0x2d   : > { %597 = vmatpush.bf16.msra.mxu1 %v1967_v48  ;;  %v942_v48 = vrot.slane %v940_v36, 1 }
  0x2e   : > { %791 = vmatpush.bf16.msra.mxu3 %v1985_v49  ;;  %488 = vmatmul.bf16.vlgmr.msra.gmra.mxu0 %v1957_v54  ;;  %v1140_v49 = vor.u32 %v1139_v38, %v1135_v37  ;;  %v843_v52 = vsel %vm528_vm1, %v838_v42, %v842_v43  ;;  %v2091_v38 = vld [vmem:[%s2509_s4] ss:$0 sm:$0xff] }
  0x2f   : > { %893 = vmatpush.bf16.msrb.mxu0 %v2001_v44  ;;  %699 = vmatmul.bf16.vlgmr.msra.gmra.mxu2 %v641_v57  ;;  %v2037_v44 = vld [vmem:[%s2508_s3 + $0x238] sm:$0xff]  ;;  %v943_v53 = vsel %vm638_vm0, %v941_v47, %v942_v48  ;;  %v2034_v57 = vld [vmem:[%s2508_s3 + $0x220] sm:$0xff] }
  0x30   : > { %1086 = vmatpush.bf16.msrb.mxu2 %v2019_v45  ;;  %598 = vmatmul.bf16.vlgmr.msra.gmra.mxu1 %v540_v61  ;;  %v2003_v45 = vld [vmem:[%s2508_s3 + $0x140] sm:$0xff] }
  0x31   : > { %993 = vmatpush.bf16.msrb.mxu1 %v2010_v50  ;;  %792 = vmatmul.bf16.vlgmr.msra.gmra.mxu3 %v1984_v58  ;;  %v1144_v50 = vrot.slane %v1142_v39, 1  ;;  %v2033_v58 = vld [vmem:[%s2508_s3 + $0x218] sm:$0xff] }
  0x32   : > { %1195 = vmatpush.bf16.msrb.mxu3 %v2028_v51  ;;  %v2011_v51 = vld [vmem:[%s2383_s10] sm:$0xff] }
  0x33   : > { %894 = vmatpush.bf16.msrb.mxu0 %v2000_v55  ;;  %v1145_v54 = vsel %vm528_vm1, %v1140_v49, %v1144_v50  ;;  %v2036_v55 = vld [vmem:[%s2508_s3 + $0x230] sm:$0xff] }
  0x34   : > { %1087 = vmatpush.bf16.msrb.mxu2 %v2018_v56  ;;  %v2035_v56 = vld [vmem:[%s2508_s3 + $0x228] sm:$0xff] }
  0x35   : > { %994 = vmatpush.bf16.msrb.mxu1 %v2009_v59  ;;  %v1217_v59 = vld [vmem:[%s2383_s10 + $0x8] sm:$0x1] }
  0x36   : > { %1196 = vmatpush.bf16.msrb.mxu3 %v2027_v60  ;;  %v2032_v60 = vld [vmem:[%s2508_s3 + $0x210] sm:$0xff]  ;;  %v1240_v61 = vunpack.c.l.b16 %v1217_v59 }
  0x37   : > { %895 = vmatpush.bf16.msrb.mxu0 %v1999_v62  ;;  %v1921_v62 = vld [vmem:[%s2383_s10] sm:$0xe] }
  0x38   : > { %1088 = vmatpush.bf16.msrb.mxu2 %v2017_v63  ;;  %v2029_v63 = vld [vmem:[%s2383_s10] sm:$0xf0]  ;;  %s1497_s10 = sshll.u32 %s2530_s21, 1 }
  0x39   : > { %995 = vmatpush.bf16.msrb.mxu1 %v2008_v0  ;;  %v2031_v0 = vld [vmem:[%s2508_s3 + $0x208] sm:$0xff]  ;;  %s392_s28 = sadd.s32 %s1498_s16, %s1497_s10 }
  0x3a   : > { %1197 = vmatpush.bf16.msrb.mxu3 %v2026_v1  ;;  %v1922_v1 = vor.u32 %v2029_v63, %v1921_v62  ;;  %s1499_s14 = sshll.u32 %s392_s28, 2 }
  0x3b   : > { %896 = vmatpush.bf16.msrb.mxu0 %v1998_v2  ;;  %v1242_v2 = vpack.c.b16 %v1240_v61, %v1240_v61  ;;  %s394_s7 = scalar_lea.vmem %s2510_s5, %s1499_s14  ;;  %s403_s17 = scalar_lea.vmem %s2511_s6, %s1499_s14 }
  0x3c   : > { %1089 = vmatpush.bf16.msrb.mxu2 %v2016_v3  ;;  %v2030_v3 = vld [vmem:[%s2508_s3 + $0x200] sm:$0xff]  ;;  %v1243_v4 = vrot.slane %v1922_v1, 1 }
  0x3d   : > { %996 = vmatpush.bf16.msrb.mxu1 %v2007_v5  ;;  %v1244_v5 = vrot.slane %v1242_v2, 1  ;;  %v2039_v39 = vld [vmem:[%s394_s7] sm:$0xff]  }
  0x3e   : > { %1198 = vmatpush.bf16.msrb.mxu3 %v2025_v6  ;;  %v2040_v43 = vunpack.c.l.bf16 %v2039_v39 }
  0x3f   : > { %897 = vmatpush.bf16.msrb.mxu0 %v1997_v8  ;;  %v1245_v6 = vsel %vm638_vm0, %v1243_v4, %v1244_v5 }
  0x40   : > { %1090 = vmatpush.bf16.msrb.mxu2 %v2015_v9 }
  0x41   : > { %997 = vmatpush.bf16.msrb.mxu1 %v2006_v12 }
  0x42   : > { %1199 = vmatpush.bf16.msrb.mxu3 %v2024_v13 }
  0x43   : > { %898 = vmatpush.bf16.msrb.mxu0 %v1996_v17 }
  0x44   : > { %1091 = vmatpush.bf16.msrb.mxu2 %v2014_v18 }
  0x45   : > { %998 = vmatpush.bf16.msrb.mxu1 %v2005_v21 }
  0x46   : > { %1200 = vmatpush.bf16.msrb.mxu3 %v2023_v22 }
  0x47   : > { %899 = vmatpush.bf16.msrb.mxu0 %v1995_v28 }
  0x48   : > { %1092 = vmatpush.bf16.msrb.mxu2 %v2013_v29 }
  0x49   : > { %999 = vmatpush.bf16.msrb.mxu1 %v2004_v34 }
  0x4a   : > { %1201 = vmatpush.bf16.msrb.mxu3 %v2022_v35 }
  0x4b   : > { %900 = vmatpush.bf16.msrb.mxu0 %v1994_v40 }
  0x4c   : > { %1093 = vmatpush.bf16.msrb.mxu2 %v2012_v41 }
  0x4d   : > { %1000 = vmatpush.bf16.msrb.mxu1 %v2003_v45  ;;  %v2041_v45 = vunpack.c.h.bf16 %v2039_v39 }
  0x4e   : > { %1202 = vmatpush.bf16.msrb.mxu3 %v2021_v46  ;;  %901 = vmatmul.bf16.vlgmr.msrb.gmra.mxu0 %v843_v52 }
  0x4f   : > { %1295 = vmatpush.bf16.msra.mxu0 %v2037_v44  ;;  %1094 = vmatmul.bf16.vlgmr.msrb.gmra.mxu2 %v2011_v51 }
  0x50   : > { %1001 = vmatmul.bf16.vlgmr.msrb.gmra.mxu1 %v943_v53 }
  0x51   : > { %1203 = vmatmul.bf16.vlgmr.msrb.gmra.mxu3 %v1145_v54 }
  0x53   : > { %1296 = vmatpush.bf16.msra.mxu0 %v2036_v55 }
  0x57   : > { %1297 = vmatpush.bf16.msra.mxu0 %v2035_v56 }
  0x5b   : > { %1298 = vmatpush.bf16.msra.mxu0 %v2034_v57 }
  0x5f   : > { %1299 = vmatpush.bf16.msra.mxu0 %v2033_v58 }
  0x63   : > { %1300 = vmatpush.bf16.msra.mxu0 %v2032_v60 }
  0x67   : > { %1301 = vmatpush.bf16.msra.mxu0 %v2031_v0 }
  0x6b   : > { %1302 = vmatpush.bf16.msra.mxu0 %v2030_v3 }
  0x6e   : > { %1303 = vmatmul.bf16.vlgmr.msra.gmra.mxu0 %v1245_v6 }
  0xab   : > { %v489_v7 = vpop.f32.mrf.mxu0 }
  0xad   : > { %v599_v8 = vpop.f32.mrf.mxu1 }
  0xae   : > { %v604_v13 = vadd.f32 %v599_v8, %v489_v7 }
  0xb2   : > { %v700_v9 = vpop.f32.mrf.mxu2 }
  0xb3   : > { %v491_v10 = vpop.f32.mrf.mxu0  ;;  %v705_v16 = vadd.f32 %v700_v9, %v604_v13 }
  0xb4   : > { %v793_v11 = vpop.f32.mrf.mxu3 }
  0xb5   : > { %v601_v12 = vpop.f32.mrf.mxu1  ;;  %v798_v18 = vadd.f32 %v793_v11, %v705_v16 }
  0xb6   : > { %v605_v19 = vadd.f32 %v601_v12, %v491_v10 }
  0xba   : > { %v702_v14 = vpop.f32.mrf.mxu2 }
  0xbb   : > { %v706_v22 = vadd.f32 %v702_v14, %v605_v19 }
  0xbc   : > { %v795_v17 = vpop.f32.mrf.mxu3 }
  0xbd   : > { %v799_v26 = vadd.f32 %v795_v17, %v706_v22 }
  0xcb   : > { %v902_v15 = vpop.f32.mrf.mxu0 }
  0xcc   : > { %v907_v23 = vadd.f32 %v902_v15, %v798_v18 }
  0xcd   : > { %v1002_v20 = vpop.f32.mrf.mxu1 }
  0xce   : > { %v1007_v27 = vadd.f32 %v1002_v20, %v907_v23 }
  0xd2   : > { %v1095_v21 = vpop.f32.mrf.mxu2 }
  0xd3   : > { %v904_v24 = vpop.f32.mrf.mxu0  ;;  %v1100_v30 = vadd.f32 %v1095_v21, %v1007_v27 }
  0xd4   : > { %v1204_v25 = vpop.f32.mrf.mxu3  ;;  %v908_v28 = vadd.f32 %v904_v24, %v799_v26 }
  0xd5   : > { %v1004_v29 = vpop.f32.mrf.mxu1  ;;  %v1209_v34 = vadd.f32 %v1204_v25, %v1100_v30 }
  0xd6   : > { %v1008_v33 = vadd.f32 %v1004_v29, %v908_v28 }
  0xda   : > { %v1097_v31 = vpop.f32.mrf.mxu2 }
  0xdb   : > { %v1101_v35 = vadd.f32 %v1097_v31, %v1008_v33 }
  0xdc   : > { %v1206_v36 = vpop.f32.mrf.mxu3 }
  0xdd   : > { %v1210_v40 = vadd.f32 %v1206_v36, %v1101_v35 }
  0xeb   : > { %v1304_v32 = vpop.f32.mrf.mxu0 }
  0xec   : > { %v1309_v37 = vadd.f32 %v1304_v32, %v1209_v34 }
  0xee   : > { %v1319_v42 = vadd.f32 %v2091_v38, %v1309_v37 }
  0xf0   : > { %v1325_v47 = vadd.f32 %v2040_v43, %v1319_v42 }
  0xf3   : > { %v1306_v41 = vpop.f32.mrf.mxu0 }
  0xf4   : > { %v1310_v44 = vadd.f32 %v1306_v41, %v1210_v40 }
  0xf6   : > { %v1320_v46 = vadd.f32 %v2091_v38, %v1310_v44 }
  0xf8   : > { %v1326_v48 = vadd.f32 %v2041_v45, %v1320_v46 }
  0xfa   : > { %v2045_v49 = vpack.c.bf16 %v1326_v48, %v1325_v47 }
  0xfc   : > { %2046 = vst [vmem:[%s403_s17] sm:$0xff] %v2045_v49  }
  0xfd PF: > { %s16_s25 = sadd.s32 1, %s2130_s25   ;;  %s2513_s21 = smov %s2122_s23 }
  0xfe   : > { %p13_p10 = scmp.ge.s32.totalorder %s16_s25, 34   ;;  %s2514_s22 = smov %s2126_s24 }
  0xff   : > { %s2515_s23 = smov %s2518_s26  ;;  %s2516_s24 = smov %s2522_s27 }
 0x100   :  { %15 = sbr.rel (!%p13_p10) target bundleno = 3 (0x3), region = 91 }

// kernel: _lambda_.113
= control target key start
LH: loop header
LB: loop body
LE: loop exit
PB: predicated region body
PF: predicated region fallthrough
CT: control target
= control target key end

     0   :  { %s2060_s18 = smov 0   ;;  %s2062_s19 = smov 0   ;;  %s2395_s0 = inlined_call_operand.vmem [shape: bf16[2,18,18,128], index: 0, kind: input, shape index: {}, may-alias: {0,1,2}]   ;;  %s2396_s1 = inlined_call_operand.vmem [shape: bf16[2,18,18,128], index: 1, kind: input, shape index: {}, may-alias: {0,1,2}]   ;;  %s2397_s2 = inlined_call_operand.vmem [shape: bf16[2,18,18,128], index: 2, kind: input, shape index: {}, may-alias: {0,1,2}]   ;;  %s2398_s3 = inlined_call_operand.vmem [shape: bf16[9,128,128], index: 3, kind: input, shape index: {}]   ;;  %s2399_s4 = inlined_call_operand.vmem [shape: f32[1,128], index: 4, kind: input, shape index: {}]   ;;  %s2400_s5 = inlined_call_operand.vmem [shape: f32[2,16,16,128], index: 5, kind: output, shape index: {}]  }
   0x1   :  { %s2064_s20 = smov 0   ;;  %s2066_s21 = smov 0  }
   0x2   :  { %s2068_s22 = smov 0  }
   0x3 LB: > { %s24_s23 = sadd.s32 1, %s2020_s20  ;;  %s27_s24 = sadd.s32 1, %s2024_s21  ;;  %s2028_s22 = sphi %s2068_s22, %s15_s22   ;;  %s2024_s21 = sphi %s2066_s21, %s2405_s21   ;;  %s2020_s20 = sphi %s2064_s20, %s2404_s20   ;;  %s2016_s19 = sphi %s2062_s19, %s2403_s19   ;;  %s2012_s18 = sphi %s2060_s18, %s2402_s18  }
   0x4   : > { %p25_p0 = scmp.ge.s32.totalorder %s24_s23, 16  ;;  %p1403_p1 = scmp.ge.s32.totalorder %s2028_s22, 1 }
   0x5   : > { %p247_p2 = scmp.lt.s32.totalorder %s2028_s22, 33 }
   0x6   : > { %s2407_s23 = smov (%p25_p0, %s24_s23), 0  ;;  %s2409_s24 = smov (!%p25_p0, %s27_s24), %s2024_s21 }
   0x7   : > { %p248_p3 = pnand %p1403_p1, %p247_p2  ;;  %p29_p4 = scmp.ge.s32.totalorder %s2409_s24, 2 }
   0x8   : > { %p303_p5 = scmp.lt.s32.totalorder (!%p248_p3), %s2016_s19, 1  ;;  %p305_p6 = scmp.lt.s32.totalorder (!%p248_p3), %s2012_s18, 17 }
   0x9   : > { %s2411_s24 = smov (%p29_p4, %s2409_s24), 0  ;;  %251 = sbr.rel (%p248_p3) target bundleno = 249 (0xf9), region = 40 }
   0xa   : > { %s312_s10 = sadd.s32 (!%p248_p3), 1, %s2012_s18  ;;  %p336_p9 = scmp.lt.s32.totalorder (!%p248_p3), %s2012_s18, 15 }
   0xb   : > { %p315_p7 = scmp.lt.s32.totalorder (!%p248_p3), %s312_s10, 17 }
   0xe   : > { %v1872_v0 = vld [vmem:[%s2398_s3 + $0x38] sm:$0xff]  ;;  %v1871_v4 = vld [vmem:[%s2398_s3 + $0x30] sm:$0xff]  ;;  %s2413_s19 = smov (!%p303_p5, %s2016_s19), 1  ;;  %v1870_v8 = vld [vmem:[%s2398_s3 + $0x28] sm:$0xff]  ;;  %s2415_s10 = smov (!%p315_p7, %s312_s10), 17  ;;  %vm577_vm0 = vcmask 1046528  }
   0xf   : > { %v1890_v1 = vld [vmem:[%s2398_s3 + $0xb8] sm:$0xff]  ;;  %419 = vmatpush.bf16.msra.mxu0 %v1872_v0  ;;  %v1889_v5 = vld [vmem:[%s2398_s3 + $0xb0] sm:$0xff]  ;;  %s306_s16 = scalar_select %p305_p6, %s2012_s18, 17  ;;  %v1888_v9 = vld [vmem:[%s2398_s3 + $0xa8] sm:$0xff]  ;;  %vm467_vm1 = vsmask.f32 7424 }
  0x10   : > { %v1881_v2 = vld [vmem:[%s2398_s3 + $0x78] sm:$0xff]  ;;  %630 = vmatpush.bf16.msra.mxu2 %v1890_v1  ;;  %v1880_v6 = vld [vmem:[%s2398_s3 + $0x70] sm:$0xff]  ;;  %s2121_s17 = smul.u32 54, %s2413_s19  ;;  %v1879_v10 = vld [vmem:[%s2398_s3 + $0x68] sm:$0xff] }
  0x11   : > { %v1899_v3 = vld [vmem:[%s2398_s3 + $0xf8] sm:$0xff]  ;;  %529 = vmatpush.bf16.msra.mxu1 %v1881_v2  ;;  %v1898_v7 = vld [vmem:[%s2398_s3 + $0xf0] sm:$0xff]  ;;  %s1945_s25 = smul.u32 3, %s306_s16  ;;  %v1897_v11 = vld [vmem:[%s2398_s3 + $0xe8] sm:$0xff] }
  0x12   : > { %723 = vmatpush.bf16.msra.mxu3 %v1899_v3  ;;  %v1869_v12 = vld [vmem:[%s2398_s3 + $0x20] sm:$0xff]  ;;  %v1868_v16 = vld [vmem:[%s2398_s3 + $0x18] sm:$0xff]  ;;  %v1867_v20 = vld [vmem:[%s2398_s3 + $0x10] sm:$0xff]  ;;  %s1947_s7 = smul.u32 3, %s2415_s10 }
  0x13   : > { %420 = vmatpush.bf16.msra.mxu0 %v1871_v4  ;;  %s309_s9 = sadd.s32 %s2121_s17, %s1945_s25  ;;  %v1887_v13 = vld [vmem:[%s2398_s3 + $0xa0] sm:$0xff]  ;;  %v1886_v17 = vld [vmem:[%s2398_s3 + $0x98] sm:$0xff]  ;;  %v1885_v22 = vld [vmem:[%s2398_s3 + $0x90] sm:$0xff] }
  0x14   : > { %631 = vmatpush.bf16.msra.mxu2 %v1889_v5  ;;  %v1878_v14 = vld [vmem:[%s2398_s3 + $0x60] sm:$0xff]  ;;  %s1404_s25 = sshll.u32 %s309_s9, 2  ;;  %v1877_v18 = vld [vmem:[%s2398_s3 + $0x58] sm:$0xff]  ;;  %v1876_v25 = vld [vmem:[%s2398_s3 + $0x50] sm:$0xff]  ;;  %s319_s27 = sadd.s32 %s1947_s7, %s2121_s17 }
  0x15   : > { %530 = vmatpush.bf16.msra.mxu1 %v1880_v6  ;;  %v1896_v15 = vld [vmem:[%s2398_s3 + $0xe0] sm:$0xff]  ;;  %s2158_s11 = scalar_lea.vmem %s2395_s0, %s1404_s25  ;;  %v1895_v19 = vld [vmem:[%s2398_s3 + $0xd8] sm:$0xff]  ;;  %s323_s25 = sadd.s32 2, %s2012_s18  ;;  %v1894_v26 = vld [vmem:[%s2398_s3 + $0xd0] sm:$0xff] }
  0x16   : > { %724 = vmatpush.bf16.msra.mxu3 %v1898_v7  ;;  %v551_v21 = vld [vmem:[%s2158_s11 + $0x8] sm:$0x1]  ;;  %v1873_v23 = vld [vmem:[%s2158_s11] sm:$0xff]  ;;  %p2187_p8 = scmp.lt.s32.totalorder %s323_s25, 17  ;;  %s1405_s9 = sshll.u32 %s319_s27, 2  ;;  %v1908_v44 = vld [vmem:[%s2398_s3 + $0x138] sm:$0xff] }
  0x17   : > { %421 = vmatpush.bf16.msra.mxu0 %v1870_v8  ;;  %v441_v24 = vld [vmem:[%s2158_s11 + $0x8] sm:$0x1]  ;;  %v574_v27 = vunpack.c.l.b16 %v551_v21  ;;  %v1516_v29 = vld [vmem:[%s2158_s11] sm:$0xe]  ;;  %v1882_v30 = vld [vmem:[%s2158_s11] sm:$0xf0]  ;;  %s2235_s7 = scalar_lea.vmem %s2396_s1, %s1405_s9 }
  0x18   : > { %632 = vmatpush.bf16.msra.mxu2 %v1888_v9  ;;  %v464_v28 = vunpack.c.l.b16 %v441_v24  ;;  %v471_v32 = vshll.u32 %v1873_v23, 16  ;;  %v1866_v33 = vld [vmem:[%s2398_s3 + $0x8] sm:$0xff]  ;;  %v1517_v37 = vor.u32 %v1882_v30, %v1516_v29  ;;  %v469_v39 = vshrl.u32 %v1873_v23, 16  ;;  %s2417_s25 = smov (!%p2187_p8, %s323_s25), 17  ;;  %v1865_v42 = vld [vmem:[%s2398_s3] sm:$0xff]  ;;  %v1926_v45 = vld [vmem:[%s2398_s3 + $0x1b8] sm:$0xff] }
  0x19   : > { %531 = vmatpush.bf16.msra.mxu1 %v1879_v10  ;;  %v1884_v34 = vld [vmem:[%s2398_s3 + $0x88] sm:$0xff]  ;;  %v576_v38 = vpack.c.b16 %v574_v27, %v574_v27  ;;  %v1883_v43 = vld [vmem:[%s2398_s3 + $0x80] sm:$0xff]  ;;  %v1917_v50 = vld [vmem:[%s2398_s3 + $0x178] sm:$0xff]  ;;  %s1948_s12 = smul.u32 3, %s2417_s25  ;;  %s2419_s18 = smov (!%p336_p9, %s2012_s18), 15 }
  0x1a   : > { %725 = vmatpush.bf16.msra.mxu3 %v1897_v11  ;;  %v466_v31 = vpack.c.b16 %v464_v28, %v464_v28  ;;  %v1875_v35 = vld [vmem:[%s2398_s3 + $0x48] sm:$0xff]  ;;  %v473_v40 = vrot.slane %v471_v32, 1  ;;  %v578_v46 = vrot.slane %v1517_v37, 1  ;;  %v1874_v48 = vld [vmem:[%s2398_s3 + $0x40] sm:$0xff]  ;;  %v1935_v51 = vld [vmem:[%s2398_s3 + $0x1f8] sm:$0xff]  ;;  %s1408_s27 = sshll.u32 %s2413_s19, 5 }
  0x1b   : > { %422 = vmatpush.bf16.msra.mxu0 %v1869_v12  ;;  %v1893_v36 = vld [vmem:[%s2398_s3 + $0xc8] sm:$0xff]  ;;  %v579_v47 = vrot.slane %v576_v38, 1  ;;  %v1892_v49 = vld [vmem:[%s2398_s3 + $0xc0] sm:$0xff]  ;;  %v1907_v55 = vld [vmem:[%s2398_s3 + $0x130] sm:$0xff]  ;;  %s330_s16 = sadd.s32 %s1948_s12, %s2121_s17 }
  0x1c   : > { %633 = vmatpush.bf16.msra.mxu2 %v1887_v13  ;;  %v476_v41 = vshll.u32 %v466_v31, 16  ;;  %v474_v52 = vor.u32 %v473_v40, %v469_v39  ;;  %v1864_v54 = vld [vmem:[%s2158_s11] sm:$0xff]  ;;  %v1925_v56 = vld [vmem:[%s2398_s3 + $0x1b0] sm:$0xff]  ;;  %v1906_v62 = vld [vmem:[%s2398_s3 + $0x128] sm:$0xff]  ;;  %s1406_s30 = sshll.u32 %s330_s16, 2 }
  0x1d   : > { %532 = vmatpush.bf16.msra.mxu1 %v1878_v14  ;;  %v580_v57 = vsel %vm577_vm0, %v578_v46, %v579_v47  ;;  %v1891_v58 = vld [vmem:[%s2235_s7] sm:$0xff]  ;;  %v1916_v59 = vld [vmem:[%s2398_s3 + $0x170] sm:$0xff]  ;;  %v1924_v63 = vld [vmem:[%s2398_s3 + $0x1a8] sm:$0xff]  ;;  %s2276_s15 = scalar_lea.vmem %s2397_s2, %s1406_s30 }
  0x1e   : > { %726 = vmatpush.bf16.msra.mxu3 %v1896_v15  ;;  %v478_v53 = vrot.slane %v476_v41, 1  ;;  %v1934_v60 = vld [vmem:[%s2398_s3 + $0x1f0] sm:$0xff]  ;;  %v1915_v0 = vld [vmem:[%s2398_s3 + $0x168] sm:$0xff]  ;;  %v1905_v2 = vld [vmem:[%s2398_s3 + $0x120] sm:$0xff] }
  0x1f   : > { %423 = vmatpush.bf16.msra.mxu0 %v1868_v16  ;;  %v1933_v1 = vld [vmem:[%s2398_s3 + $0x1e8] sm:$0xff]  ;;  %v1923_v3 = vld [vmem:[%s2398_s3 + $0x1a0] sm:$0xff]  ;;  %v1904_v8 = vld [vmem:[%s2398_s3 + $0x118] sm:$0xff] }
  0x20   : > { %634 = vmatpush.bf16.msra.mxu2 %v1886_v17  ;;  %v479_v61 = vsel %vm467_vm1, %v474_v52, %v478_v53  ;;  %v745_v4 = vld [vmem:[%s2235_s7 + $0x8] sm:$0x1]  ;;  %v1914_v5 = vld [vmem:[%s2398_s3 + $0x160] sm:$0xff]  ;;  %v1922_v9 = vld [vmem:[%s2398_s3 + $0x198] sm:$0xff] }
  0x21   : > { %533 = vmatpush.bf16.msra.mxu1 %v1877_v18  ;;  %v1932_v6 = vld [vmem:[%s2398_s3 + $0x1e0] sm:$0xff]  ;;  %v1047_v7 = vld [vmem:[%s2276_s15 + $0x8] sm:$0x1]  ;;  %v768_v11 = vunpack.c.l.b16 %v745_v4  ;;  %v1913_v12 = vld [vmem:[%s2398_s3 + $0x158] sm:$0xff] }
  0x22   : > { %727 = vmatpush.bf16.msra.mxu3 %v1895_v19  ;;  %v1900_v10 = vld [vmem:[%s2235_s7] sm:$0xff]  ;;  %v1931_v13 = vld [vmem:[%s2398_s3 + $0x1d8] sm:$0xff]  ;;  %v1070_v15 = vunpack.c.l.b16 %v1047_v7  ;;  %v854_v16 = vld [vmem:[%s2235_s7 + $0x8] sm:$0x1] }
  0x23   : > { %424 = vmatpush.bf16.msra.mxu0 %v1867_v20  ;;  %v1927_v14 = vld [vmem:[%s2276_s15] sm:$0xff]  ;;  %v1903_v17 = vld [vmem:[%s2398_s3 + $0x110] sm:$0xff]  ;;  %v770_v19 = vpack.c.b16 %v768_v11, %v768_v11  ;;  %v774_v20 = vshll.u32 %v1900_v10, 16  ;;  %v1902_v28 = vld [vmem:[%s2398_s3 + $0x108] sm:$0xff]  ;;  %v772_v30 = vshrl.u32 %v1900_v10, 16 }
  0x24   : > { %635 = vmatpush.bf16.msra.mxu2 %v1885_v22  ;;  %v1921_v18 = vld [vmem:[%s2398_s3 + $0x190] sm:$0xff]  ;;  %v1672_v23 = vld [vmem:[%s2235_s7] sm:$0xe]  ;;  %v1909_v24 = vld [vmem:[%s2235_s7] sm:$0xf0]  ;;  %v1076_v27 = vshll.u32 %v1927_v14, 16 }
  0x25   : > { %534 = vmatpush.bf16.msra.mxu1 %v1876_v25  ;;  %v1912_v21 = vld [vmem:[%s2398_s3 + $0x150] sm:$0xff]  ;;  %v877_v25 = vunpack.c.l.b16 %v854_v16  ;;  %v1920_v29 = vld [vmem:[%s2398_s3 + $0x188] sm:$0xff]  ;;  %v776_v31 = vrot.slane %v774_v20, 1  ;;  %v779_v32 = vshll.u32 %v770_v19, 16  ;;  %v1074_v37 = vshrl.u32 %v1927_v14, 16  ;;  %v1901_v40 = vld [vmem:[%s2398_s3 + $0x100] sm:$0xff] }
  0x26   : > { %728 = vmatpush.bf16.msra.mxu3 %v1894_v26  ;;  %v1930_v22 = vld [vmem:[%s2398_s3 + $0x1d0] sm:$0xff]  ;;  %v1072_v26 = vpack.c.b16 %v1070_v15, %v1070_v15  ;;  %v1078_v38 = vrot.slane %v1076_v27, 1  ;;  %v1919_v41 = vld [vmem:[%s2398_s3 + $0x180] sm:$0xff] }
  0x27   : > { %425 = vmatpush.bf16.msra.mxu0 %v1866_v33  ;;  %v1673_v33 = vor.u32 %v1909_v24, %v1672_v23  ;;  %v1928_v46 = vld [vmem:[%s2398_s3 + $0x1c0] sm:$0xff] }
  0x28   : > { %636 = vmatpush.bf16.msra.mxu2 %v1884_v34  ;;  %v1911_v34 = vld [vmem:[%s2398_s3 + $0x148] sm:$0xff]  ;;  %v1081_v39 = vshll.u32 %v1072_v26, 16 }
  0x29   : > { %535 = vmatpush.bf16.msra.mxu1 %v1875_v35  ;;  %v1929_v35 = vld [vmem:[%s2398_s3 + $0x1c8] sm:$0xff]  ;;  %v880_v47 = vrot.slane %v1673_v33, 1 }
  0x2a   : > { %729 = vmatpush.bf16.msra.mxu3 %v1893_v36  ;;  %v879_v36 = vpack.c.b16 %v877_v25, %v877_v25 }
  0x2b   : > { %426 = vmatpush.bf16.msra.mxu0 %v1865_v42  ;;  %v777_v42 = vor.u32 %v776_v31, %v772_v30 }
  0x2c   : > { %637 = vmatpush.bf16.msra.mxu2 %v1883_v43  ;;  %v781_v43 = vrot.slane %v779_v32, 1  ;;  %v1989_v32 = vld [vmem:[%s2399_s4] ss:$0 sm:$0xff] }
  0x2d   : > { %536 = vmatpush.bf16.msra.mxu1 %v1874_v48  ;;  %v881_v48 = vrot.slane %v879_v36, 1 }
  0x2e   : > { %730 = vmatpush.bf16.msra.mxu3 %v1892_v49  ;;  %427 = vmatmul.bf16.vlgmr.msra.gmra.mxu0 %v1864_v54  ;;  %v1079_v49 = vor.u32 %v1078_v38, %v1074_v37  ;;  %v782_v52 = vsel %vm467_vm1, %v777_v42, %v781_v43 }
  0x2f   : > { %832 = vmatpush.bf16.msrb.mxu0 %v1908_v44  ;;  %638 = vmatmul.bf16.vlgmr.msra.gmra.mxu2 %v580_v57  ;;  %v1944_v44 = vld [vmem:[%s2398_s3 + $0x238] sm:$0xff]  ;;  %v882_v53 = vsel %vm577_vm0, %v880_v47, %v881_v48  ;;  %v1941_v57 = vld [vmem:[%s2398_s3 + $0x220] sm:$0xff] }
  0x30   : > { %1025 = vmatpush.bf16.msrb.mxu2 %v1926_v45  ;;  %537 = vmatmul.bf16.vlgmr.msra.gmra.mxu1 %v479_v61  ;;  %v1910_v45 = vld [vmem:[%s2398_s3 + $0x140] sm:$0xff] }
  0x31   : > { %932 = vmatpush.bf16.msrb.mxu1 %v1917_v50  ;;  %731 = vmatmul.bf16.vlgmr.msra.gmra.mxu3 %v1891_v58  ;;  %v1083_v50 = vrot.slane %v1081_v39, 1  ;;  %v1940_v58 = vld [vmem:[%s2398_s3 + $0x218] sm:$0xff] }
  0x32   : > { %1134 = vmatpush.bf16.msrb.mxu3 %v1935_v51  ;;  %v1918_v51 = vld [vmem:[%s2276_s15] sm:$0xff] }
  0x33   : > { %833 = vmatpush.bf16.msrb.mxu0 %v1907_v55  ;;  %v1084_v54 = vsel %vm467_vm1, %v1079_v49, %v1083_v50  ;;  %v1943_v55 = vld [vmem:[%s2398_s3 + $0x230] sm:$0xff] }
  0x34   : > { %1026 = vmatpush.bf16.msrb.mxu2 %v1925_v56  ;;  %v1942_v56 = vld [vmem:[%s2398_s3 + $0x228] sm:$0xff] }
  0x35   : > { %933 = vmatpush.bf16.msrb.mxu1 %v1916_v59  ;;  %v1156_v59 = vld [vmem:[%s2276_s15 + $0x8] sm:$0x1] }
  0x36   : > { %1135 = vmatpush.bf16.msrb.mxu3 %v1934_v60  ;;  %v1939_v60 = vld [vmem:[%s2398_s3 + $0x210] sm:$0xff]  ;;  %v1179_v61 = vunpack.c.l.b16 %v1156_v59 }
  0x37   : > { %834 = vmatpush.bf16.msrb.mxu0 %v1906_v62  ;;  %v1828_v62 = vld [vmem:[%s2276_s15] sm:$0xe] }
  0x38   : > { %1027 = vmatpush.bf16.msrb.mxu2 %v1924_v63  ;;  %v1936_v63 = vld [vmem:[%s2276_s15] sm:$0xf0]  ;;  %s1407_s15 = sshll.u32 %s2419_s18, 1 }
  0x39   : > { %934 = vmatpush.bf16.msrb.mxu1 %v1915_v0  ;;  %v1938_v0 = vld [vmem:[%s2398_s3 + $0x208] sm:$0xff]  ;;  %s340_s28 = sadd.s32 %s1408_s27, %s1407_s15 }
  0x3a   : > { %1136 = vmatpush.bf16.msrb.mxu3 %v1933_v1  ;;  %v1829_v1 = vor.u32 %v1936_v63, %v1828_v62  ;;  %s1409_s29 = sshll.u32 %s340_s28, 3 }
  0x3b   : > { %835 = vmatpush.bf16.msrb.mxu0 %v1905_v2  ;;  %v1181_v2 = vpack.c.b16 %v1179_v61, %v1179_v61  ;;  %s342_s18 = scalar_lea.vmem %s2400_s5, %s1409_s29 }
  0x3c   : > { %1028 = vmatpush.bf16.msrb.mxu2 %v1923_v3  ;;  %v1937_v3 = vld [vmem:[%s2398_s3 + $0x200] sm:$0xff]  ;;  %v1182_v4 = vrot.slane %v1829_v1, 1 }
  0x3d   : > { %935 = vmatpush.bf16.msrb.mxu1 %v1914_v5  ;;  %v1183_v5 = vrot.slane %v1181_v2, 1 }
  0x3e   : > { %1137 = vmatpush.bf16.msrb.mxu3 %v1932_v6 }
  0x3f   : > { %836 = vmatpush.bf16.msrb.mxu0 %v1904_v8  ;;  %v1184_v6 = vsel %vm577_vm0, %v1182_v4, %v1183_v5 }
  0x40   : > { %1029 = vmatpush.bf16.msrb.mxu2 %v1922_v9 }
  0x41   : > { %936 = vmatpush.bf16.msrb.mxu1 %v1913_v12 }
  0x42   : > { %1138 = vmatpush.bf16.msrb.mxu3 %v1931_v13 }
  0x43   : > { %837 = vmatpush.bf16.msrb.mxu0 %v1903_v17 }
  0x44   : > { %1030 = vmatpush.bf16.msrb.mxu2 %v1921_v18 }
  0x45   : > { %937 = vmatpush.bf16.msrb.mxu1 %v1912_v21 }
  0x46   : > { %1139 = vmatpush.bf16.msrb.mxu3 %v1930_v22 }
  0x47   : > { %838 = vmatpush.bf16.msrb.mxu0 %v1902_v28 }
  0x48   : > { %1031 = vmatpush.bf16.msrb.mxu2 %v1920_v29 }
  0x49   : > { %938 = vmatpush.bf16.msrb.mxu1 %v1911_v34 }
  0x4a   : > { %1140 = vmatpush.bf16.msrb.mxu3 %v1929_v35 }
  0x4b   : > { %839 = vmatpush.bf16.msrb.mxu0 %v1901_v40 }
  0x4c   : > { %1032 = vmatpush.bf16.msrb.mxu2 %v1919_v41 }
  0x4d   : > { %939 = vmatpush.bf16.msrb.mxu1 %v1910_v45 }
  0x4e   : > { %1141 = vmatpush.bf16.msrb.mxu3 %v1928_v46  ;;  %840 = vmatmul.bf16.vlgmr.msrb.gmra.mxu0 %v782_v52 }
  0x4f   : > { %1234 = vmatpush.bf16.msra.mxu0 %v1944_v44  ;;  %1033 = vmatmul.bf16.vlgmr.msrb.gmra.mxu2 %v1918_v51 }
  0x50   : > { %940 = vmatmul.bf16.vlgmr.msrb.gmra.mxu1 %v882_v53 }
  0x51   : > { %1142 = vmatmul.bf16.vlgmr.msrb.gmra.mxu3 %v1084_v54 }
  0x53   : > { %1235 = vmatpush.bf16.msra.mxu0 %v1943_v55 }
  0x57   : > { %1236 = vmatpush.bf16.msra.mxu0 %v1942_v56 }
  0x5b   : > { %1237 = vmatpush.bf16.msra.mxu0 %v1941_v57 }
  0x5f   : > { %1238 = vmatpush.bf16.msra.mxu0 %v1940_v58 }
  0x63   : > { %1239 = vmatpush.bf16.msra.mxu0 %v1939_v60 }
  0x67   : > { %1240 = vmatpush.bf16.msra.mxu0 %v1938_v0 }
  0x6b   : > { %1241 = vmatpush.bf16.msra.mxu0 %v1937_v3 }
  0x6e   : > { %1242 = vmatmul.bf16.vlgmr.msra.gmra.mxu0 %v1184_v6 }
  0xab   : > { %v428_v7 = vpop.f32.mrf.mxu0 }
  0xad   : > { %v538_v8 = vpop.f32.mrf.mxu1 }
  0xae   : > { %v543_v12 = vadd.f32 %v538_v8, %v428_v7 }
  0xb2   : > { %v639_v9 = vpop.f32.mrf.mxu2 }
  0xb3   : > { %v430_v10 = vpop.f32.mrf.mxu0  ;;  %v644_v14 = vadd.f32 %v639_v9, %v543_v12 }
  0xb4   : > { %v732_v11 = vpop.f32.mrf.mxu3 }
  0xb5   : > { %v540_v13 = vpop.f32.mrf.mxu1  ;;  %v737_v17 = vadd.f32 %v732_v11, %v644_v14 }
  0xb6   : > { %v544_v19 = vadd.f32 %v540_v13, %v430_v10 }
  0xba   : > { %v641_v15 = vpop.f32.mrf.mxu2 }
  0xbb   : > { %v645_v23 = vadd.f32 %v641_v15, %v544_v19 }
  0xbc   : > { %v734_v18 = vpop.f32.mrf.mxu3 }
  0xbd   : > { %v738_v27 = vadd.f32 %v734_v18, %v645_v23 }
  0xcb   : > { %v841_v16 = vpop.f32.mrf.mxu0 }
  0xcc   : > { %v846_v20 = vadd.f32 %v841_v16, %v737_v17 }
  0xcd   : > { %v941_v21 = vpop.f32.mrf.mxu1 }
  0xce   : > { %v946_v24 = vadd.f32 %v941_v21, %v846_v20 }
  0xd2   : > { %v1034_v22 = vpop.f32.mrf.mxu2 }
  0xd3   : > { %v843_v25 = vpop.f32.mrf.mxu0  ;;  %v1039_v28 = vadd.f32 %v1034_v22, %v946_v24 }
  0xd4   : > { %v1143_v26 = vpop.f32.mrf.mxu3  ;;  %v847_v29 = vadd.f32 %v843_v25, %v738_v27 }
  0xd5   : > { %v943_v30 = vpop.f32.mrf.mxu1  ;;  %v1148_v31 = vadd.f32 %v1143_v26, %v1039_v28 }
  0xd6   : > { %v947_v35 = vadd.f32 %v943_v30, %v847_v29 }
  0xda   : > { %v1036_v33 = vpop.f32.mrf.mxu2 }
  0xdb   : > { %v1040_v37 = vadd.f32 %v1036_v33, %v947_v35 }
  0xdc   : > { %v1145_v39 = vpop.f32.mrf.mxu3 }
  0xdd   : > { %v1149_v40 = vadd.f32 %v1145_v39, %v1040_v37 }
  0xeb   : > { %v1243_v34 = vpop.f32.mrf.mxu0 }
  0xec   : > { %v1248_v36 = vadd.f32 %v1243_v34, %v1148_v31 }
  0xee   : > { %v1258_v38 = vadd.f32 %v1989_v32, %v1248_v36 }
  0xf0   : > { %1260 = vst [vmem:[%s342_s18] sm:$0xff] %v1258_v38 }
  0xf3   : > { %v1245_v41 = vpop.f32.mrf.mxu0 }
  0xf4   : > { %v1249_v42 = vadd.f32 %v1245_v41, %v1149_v40 }
  0xf6   : > { %v1259_v43 = vadd.f32 %v1989_v32, %v1249_v42 }
  0xf8   : > { %1261 = vst [vmem:[%s342_s18 + $0x8] sm:$0xff] %v1259_v43 }
  0xf9 PF: > { %s15_s22 = sadd.s32 1, %s2028_s22   ;;  %s2402_s18 = smov %s2020_s20 }
  0xfa   : > { %p12_p10 = scmp.ge.s32.totalorder %s15_s22, 34   ;;  %s2403_s19 = smov %s2024_s21 }
  0xfb   : > { %s2404_s20 = smov %s2407_s23  ;;  %s2405_s21 = smov %s2411_s24 }
  0xfc   :  { %14 = sbr.rel (!%p12_p10) target bundleno = 3 (0x3), region = 84 }

</bundles_post_ra>
